<compile_context>
chip_gen: v5e
topology: v5e:2x2
jax: 0.10.0
libtpu: 0.0.40
codegen_flags: <defaults>
</compile_context>

<pallas_src>
from functools import partial

import numpy as np
import jax
import jax.numpy as jnp
from jax.experimental import pallas as pl
from jax.experimental.pallas import tpu as pltpu

EPS = 1e-5
COMPUTE_DTYPE = jnp.bfloat16          # MXU operand / inter-layer activation dtype

_VMEM_SPEC = pl.BlockSpec(memory_space=pltpu.MemorySpace.VMEM)


# ---------------------------------------------------------------------------
# Pallas kernels
# ---------------------------------------------------------------------------

def _block_kernel(*refs, n_in, pool):
    """Fused conv_block, fully VMEM resident, batch folded into rows.

    Ref order (inputs):
      x slabs (n_in, each (N*H, W*Cin_i) bf16)
      U, D    ((NH, NH) bf16 row-shift matrices with image-boundary zeroing)
      B1      (n_in banded weights, each (3, W*Cin_i, W*Cout) bf16)
      B2      ((3, W*Cout, W*Cout) bf16)
      S, St   ((W*Cout, Cout) / (Cout, W*Cout) f32 channel sum / broadcast)
      g1, b1, g2, b2   ((1, Cout) f32 BatchNorm affine params)
      [PE, PO, QE, QO] (bf16 pooling selection matrices, pool only)
    Outputs: act ((NH, W*Cout) bf16) [, pooled ((N*H/2, W/2*Cout) bf16)]
    """
    it = iter(refs)
    xs = [next(it) for _ in range(n_in)]
    u_ref, d_ref = next(it), next(it)
    b1 = [next(it) for _ in range(n_in)]
    b2 = next(it)
    s_ref, st_ref = next(it), next(it)
    g1, be1, g2, be2 = next(it), next(it), next(it), next(it)
    if pool:
        pe, po, qe, qo = next(it), next(it), next(it), next(it)
    act_ref = next(it)
    if pool:
        pool_ref = next(it)

    U = u_ref[...]
    D = d_ref[...]

    def conv3x3(x_list, b_list):
        acc = None
        for x, b in zip(x_list, b_list):
            # Row halo via 0/1 shift matmuls (exact in bf16 after f32 accum).
            xu = jnp.dot(U, x, preferred_element_type=jnp.float32).astype(jnp.bfloat16)
            xd = jnp.dot(D, x, preferred_element_type=jnp.float32).astype(jnp.bfloat16)
            y = (jnp.dot(xu, b[0], preferred_element_type=jnp.float32) +
                 jnp.dot(x,  b[1], preferred_element_type=jnp.float32) +
                 jnp.dot(xd, b[2], preferred_element_type=jnp.float32))
            acc = y if acc is None else acc + y
        return acc

    def bn_relu(y, g_ref, b_ref):
        # Training-mode BatchNorm with centered (two-pass) variance, all f32.
        nh, wc = y.shape
        c = s_ref.shape[1]
        inv_m = 1.0 / float(nh * (wc // c))          # count = N*H*W per channel
        rsum = jnp.sum(y, axis=0, keepdims=True)                         # (1, WC)
        mean_c = jnp.dot(rsum, s_ref[...],
                         preferred_element_type=jnp.float32) * inv_m     # (1, C)
        mean_row = jnp.dot(mean_c, st_ref[...],
                           preferred_element_type=jnp.float32)           # (1, WC)
        d = y - mean_row
        var_c = jnp.dot(jnp.sum(d * d, axis=0, keepdims=True), s_ref[...],
                        preferred_element_type=jnp.float32) * inv_m      # (1, C)
        scale_c = g_ref[...] * jax.lax.rsqrt(var_c + EPS)
        shift_c = b_ref[...] - mean_c * scale_c
        scale_row = jnp.dot(scale_c, st_ref[...], preferred_element_type=jnp.float32)
        shift_row = jnp.dot(shift_c, st_ref[...], preferred_element_type=jnp.float32)
        return jnp.maximum(y * scale_row + shift_row, 0.0)

    x_vals = [r[...] for r in xs]
    a1 = bn_relu(conv3x3(x_vals, b1), g1, be1).astype(jnp.bfloat16)
    a2 = bn_relu(conv3x3([a1], [b2]), g2, be2)
    a2_bf = a2.astype(act_ref.dtype)
    act_ref[...] = a2_bf

    if pool:
        # MaxPool2d(2,2): row-pair max via bf16 selection matmuls, then col-pair.
        rows = jnp.maximum(
            jnp.dot(pe[...], a2_bf, preferred_element_type=jnp.float32),
            jnp.dot(po[...], a2_bf, preferred_element_type=jnp.float32),
        ).astype(jnp.bfloat16)
        pooled = jnp.maximum(
            jnp.dot(rows, qe[...], preferred_element_type=jnp.float32),
            jnp.dot(rows, qo[...], preferred_element_type=jnp.float32))
        pool_ref[...] = pooled.astype(pool_ref.dtype)


def _matmul_bias_kernel(x_ref, m_ref, b_ref, o_ref):
    """Whole-batch lane-packed matmul + bias (ConvTranspose2d(2,2) and 1x1)."""
    y = jnp.dot(x_ref[...], m_ref[...], preferred_element_type=jnp.float32)
    o_ref[...] = (y + b_ref[...]).astype(o_ref.dtype)


# ---------------------------------------------------------------------------
# Structural 0/1 matrices (built host-side at trace time; tiny constants)
# ---------------------------------------------------------------------------

def _shift_mats(n, h):
    nh = n * h
    u = np.zeros((nh, nh), np.float32)
    d = np.zeros((nh, nh), np.float32)
    for r in range(nh):
        if r % h != 0:
            u[r, r - 1] = 1.0       # row above (zero at image top = padding)
        if r % h != h - 1:
            d[r, r + 1] = 1.0       # row below (zero at image bottom)
    return jnp.asarray(u, COMPUTE_DTYPE), jnp.asarray(d, COMPUTE_DTYPE)


def _chan_sum_mats(W, c):
    s = np.zeros((W * c, c), np.float32)
    s[np.arange(W * c), np.arange(W * c) % c] = 1.0
    return jnp.asarray(s, jnp.float32), jnp.asarray(s.T, jnp.float32)


def _pool_row_mats(n, h):
    hp = h // 2
    pe = np.zeros((n * hp, n * h), np.float32)
    po = np.zeros((n * hp, n * h), np.float32)
    for b in range(n):
        for r in range(hp):
            pe[b * hp + r, b * h + 2 * r] = 1.0
            po[b * hp + r, b * h + 2 * r + 1] = 1.0
    return jnp.asarray(pe, COMPUTE_DTYPE), jnp.asarray(po, COMPUTE_DTYPE)


def _pool_col_mats(W, c):
    wp = W // 2
    qe = np.zeros((W * c, wp * c), np.float32)
    qo = np.zeros((W * c, wp * c), np.float32)
    eye = np.eye(c, dtype=np.float32)
    for j in range(wp):
        qe[(2 * j) * c:(2 * j + 1) * c, j * c:(j + 1) * c] = eye
        qo[(2 * j + 1) * c:(2 * j + 2) * c, j * c:(j + 1) * c] = eye
    return jnp.asarray(qe, COMPUTE_DTYPE), jnp.asarray(qo, COMPUTE_DTYPE)


# ---------------------------------------------------------------------------
# Layer wrappers
# ---------------------------------------------------------------------------

def conv_block_apply(xs, block_p, *, n, h, pool=False):
    """conv_block on lane-packed (N*H, W*Cin) slabs; multiple xs == channel concat."""
    p1, p2 = block_p["conv1"], block_p["conv2"]
    W, cout = p2["W"], p2["cout"]
    wc = W * cout
    nh = n * h
    U, D = _shift_mats(n, h)
    S, St = _chan_sum_mats(W, cout)
    ins = list(xs) + [U, D] + list(p1["B"]) + [
        p2["B"][0], S, St, p1["gamma"], p1["beta"], p2["gamma"], p2["beta"]]
    if pool:
        PE, PO = _pool_row_mats(n, h)
        QE, QO = _pool_col_mats(W, cout)
        ins += [PE, PO, QE, QO]
        out_shape = (jax.ShapeDtypeStruct((nh, wc), COMPUTE_DTYPE),
                     jax.ShapeDtypeStruct((n * (h // 2), (W // 2) * cout),
                                          COMPUTE_DTYPE))
        out_specs = (_VMEM_SPEC, _VMEM_SPEC)
    else:
        out_shape = jax.ShapeDtypeStruct((nh, wc), COMPUTE_DTYPE)
        out_specs = _VMEM_SPEC

    return pl.pallas_call(
        partial(_block_kernel, n_in=len(xs), pool=pool),
        in_specs=[_VMEM_SPEC] * len(ins),
        out_specs=out_specs,
        out_shape=out_shape,
    )(*ins)


def upconv2x2(x, p, *, n, h):
    """ConvTranspose2d(kernel_size=2, stride=2) on a lane-packed slab."""
    W, cout = p["W"], p["cout"]
    out = pl.pallas_call(
        _matmul_bias_kernel,
        in_specs=[_VMEM_SPEC] * 3,
        out_specs=_VMEM_SPEC,
        out_shape=jax.ShapeDtypeStruct((n * h, 4 * W * cout), COMPUTE_DTYPE),
    )(x, p["M"], p["b"])
    # packed column order is (dy, 2w+dx, c) -> row interleave is a free reshape
    return out.reshape(n, h, 2, 2 * W * cout).reshape(n * 2 * h, 2 * W * cout)


def conv1x1(x, p, *, n, h):
    """Final Conv2d(kernel_size=1) with bias (no BN)."""
    W, cout = p["W"], p["cout"]
    y = pl.pallas_call(
        _matmul_bias_kernel,
        in_specs=[_VMEM_SPEC] * 3,
        out_specs=_VMEM_SPEC,
        out_shape=jax.ShapeDtypeStruct((n * h, W * cout), jnp.float32),
    )(x, p["M"], p["b"])
    return y.reshape(n, h, W, cout)


# ---------------------------------------------------------------------------
# Parameter construction (deterministic, synthetic).  Structured matmul
# matrices (banded conv, packed transposed-conv, block-diag 1x1) are built
# once here -> zero runtime cost.
# ---------------------------------------------------------------------------

def _banded_conv_mat(w9, W):
    # w9: (3, 3, cin, cout).  B[dy, w'*cin+ci, w*cout+co] = w9[dy, w'-w+1, ci, co]
    _, _, cin, cout = w9.shape
    B = np.zeros((3, W * cin, W * cout), np.float32)
    for dy in range(3):
        for w in range(W):
            for dx in range(3):
                wp = w + dx - 1
                if 0 <= wp < W:
                    B[dy, wp * cin:(wp + 1) * cin, w * cout:(w + 1) * cout] = w9[dy, dx]
    return jnp.asarray(B, COMPUTE_DTYPE)


def _conv_layer_params(rng, cins, cout, W):
    fan_in = 9 * sum(cins)
    Bs = [_banded_conv_mat(
        rng.standard_normal((3, 3, cin, cout)).astype(np.float32) / np.sqrt(fan_in), W)
        for cin in cins]
    # Conv bias omitted: it cancels exactly under training-mode BatchNorm.
    return {"B": Bs,
            "gamma": jnp.ones((1, cout), jnp.float32),
            "beta": jnp.zeros((1, cout), jnp.float32),
            "W": W, "cout": cout}


def _upconv_params(rng, cin, cout, W):
    kt = rng.standard_normal((cin, 2, 2, cout)).astype(np.float32) / np.sqrt(4 * cin)
    b = rng.standard_normal((cout,)).astype(np.float32) * 0.01
    M = np.zeros((W * cin, 4 * W * cout), np.float32)
    for w in range(W):
        for dy in range(2):
            for dx in range(2):
                c0 = dy * (2 * W * cout) + (2 * w + dx) * cout
                M[w * cin:(w + 1) * cin, c0:c0 + cout] = kt[:, dy, dx, :]
    return {"M": jnp.asarray(M, COMPUTE_DTYPE),
            "b": jnp.asarray(np.tile(b, 4 * W)[None, :], jnp.float32),
            "W": W, "cout": cout}


def _final_params(rng, cin, cout, W):
    w1 = rng.standard_normal((cin, cout)).astype(np.float32) / np.sqrt(cin)
    b = rng.standard_normal((cout,)).astype(np.float32) * 0.01
    M = np.zeros((W * cin, W * cout), np.float32)
    for w in range(W):
        M[w * cin:(w + 1) * cin, w * cout:(w + 1) * cout] = w1
    return {"M": jnp.asarray(M, COMPUTE_DTYPE),
            "b": jnp.asarray(np.tile(b, W)[None, :], jnp.float32),
            "W": W, "cout": cout}


def init_params(seed=0, in_channels=1, out_channels=3, depth=2, init_filters=8,
                spatial=16):
    rng = np.random.default_rng(seed)
    p = {"encoder": [], "upconv": [], "decoder": []}
    cin, f = in_channels, init_filters
    for k in range(depth):
        s = spatial >> k
        p["encoder"].append({
            "conv1": _conv_layer_params(rng, [cin], f, s),
            "conv2": _conv_layer_params(rng, [f], f, s),
        })
        cin, f = f, f * 2
    sb = spatial >> depth
    p["bottleneck"] = {
        "conv1": _conv_layer_params(rng, [cin], f, sb),
        "conv2": _conv_layer_params(rng, [f], f, sb),
    }
    ch = f
    for i in range(depth):
        cout = ch // 2
        s_in = spatial >> (depth - i)
        s_out = 2 * s_in
        p["upconv"].append(_upconv_params(rng, ch, cout, s_in))
        p["decoder"].append({
            # decoder conv1 consumes [upsampled, skip] (== torch.cat order)
            "conv1": _conv_layer_params(rng, [cout, cout], cout, s_out),
            "conv2": _conv_layer_params(rng, [cout], cout, s_out),
        })
        ch = cout
    p["final"] = _final_params(rng, ch, out_channels, spatial)
    return p


# ---------------------------------------------------------------------------
# Full forward (mirrors unet.forward)
# ---------------------------------------------------------------------------

def unet_forward(params, x_nchw):
    n, c, H, W = x_nchw.shape
    # NCHW -> lane-packed rows (N*H, W*C) in bf16 (batch folded into matmul M)
    x = jnp.transpose(x_nchw, (0, 2, 3, 1)).reshape(n * H, W * c).astype(COMPUTE_DTYPE)

    h = H
    skips = []
    for enc_p in params["encoder"]:
        act, x = conv_block_apply([x], enc_p, n=n, h=h, pool=True)
        skips.append(act)
        h //= 2

    x = conv_block_apply([x], params["bottleneck"], n=n, h=h)

    for i, dec_p in enumerate(params["decoder"]):
        up = upconv2x2(x, params["upconv"][i], n=n, h=h)
        h *= 2
        x = conv_block_apply([up, skips[-i - 1]], dec_p, n=n, h=h)

    y = conv1x1(x, params["final"], n=n, h=h)     # (N, H, W, out) f32
    return jnp.transpose(y, (0, 3, 1, 2))          # NHWC -> NCHW


# ---------------------------------------------------------------------------

if __name__ == "__main__":
    key = jax.random.PRNGKey(0)
    x = jax.random.normal(key, (2, 1, 16, 16), jnp.float32)   # NCHW like PyTorch

    params = init_params(seed=0, in_channels=1, out_channels=3, depth=2,
                         init_filters=8, spatial=16)

    fwd = jax.jit(partial(unet_forward, params))
    y = fwd(x)
    jax.block_until_ready(y)

    assert y.shape == (2, 3, 16, 16), y.shape
    assert bool(jnp.all(jnp.isfinite(y)))
    print("KERNEL_OK")
</pallas_src>

<mosaic_0001>
module attributes {stable_mosaic.version = 11 : i64} {
  func.func @_block_kernel(%arg0: memref<32x16xbf16, #tpu.memory_space<vmem>>, %arg1: memref<32x32xbf16, #tpu.memory_space<vmem>>, %arg2: memref<32x32xbf16, #tpu.memory_space<vmem>>, %arg3: memref<3x16x128xbf16, #tpu.memory_space<vmem>>, %arg4: memref<3x128x128xbf16, #tpu.memory_space<vmem>>, %arg5: memref<128x8xf32, #tpu.memory_space<vmem>>, %arg6: memref<8x128xf32, #tpu.memory_space<vmem>>, %arg7: memref<1x8xf32, #tpu.memory_space<vmem>>, %arg8: memref<1x8xf32, #tpu.memory_space<vmem>>, %arg9: memref<1x8xf32, #tpu.memory_space<vmem>>, %arg10: memref<1x8xf32, #tpu.memory_space<vmem>>, %arg11: memref<16x32xbf16, #tpu.memory_space<vmem>>, %arg12: memref<16x32xbf16, #tpu.memory_space<vmem>>, %arg13: memref<128x64xbf16, #tpu.memory_space<vmem>>, %arg14: memref<128x64xbf16, #tpu.memory_space<vmem>>, %arg15: memref<32x128xbf16, #tpu.memory_space<vmem>>, %arg16: memref<16x64xbf16, #tpu.memory_space<vmem>>) attributes {dimension_semantics = [], scalar_prefetch = 0 : i64, scratch_operands = 0 : i64, tpu.core_type = #tpu.core_type<tc>} {
    %c0 = arith.constant 0 : index
    %c0_0 = arith.constant 0 : index
    %0 = vector.load %arg1[%c0, %c0_0] : memref<32x32xbf16, #tpu.memory_space<vmem>>, vector<32x32xbf16>
    %c0_1 = arith.constant 0 : index
    %c0_2 = arith.constant 0 : index
    %1 = vector.load %arg2[%c0_1, %c0_2] : memref<32x32xbf16, #tpu.memory_space<vmem>>, vector<32x32xbf16>
    %c0_3 = arith.constant 0 : index
    %c0_4 = arith.constant 0 : index
    %2 = vector.load %arg0[%c0_3, %c0_4] : memref<32x16xbf16, #tpu.memory_space<vmem>>, vector<32x16xbf16>
    %cst = arith.constant dense<0.000000e+00> : vector<32x16xf32>
    %3 = tpu.matmul %0, %2, %cst {dimension_numbers = #tpu.dot_dimension_numbers<[1], [0], [0], [1], [0, 0, 1, 1], [], []>} : vector<32x32xbf16>, vector<32x16xbf16>, vector<32x16xf32> -> vector<32x16xf32>
    %4 = arith.truncf %3 : vector<32x16xf32> to vector<32x16xbf16>
    %cst_5 = arith.constant dense<0.000000e+00> : vector<32x16xf32>
    %5 = tpu.matmul %1, %2, %cst_5 {dimension_numbers = #tpu.dot_dimension_numbers<[1], [0], [0], [1], [0, 0, 1, 1], [], []>} : vector<32x32xbf16>, vector<32x16xbf16>, vector<32x16xf32> -> vector<32x16xf32>
    %6 = arith.truncf %5 : vector<32x16xf32> to vector<32x16xbf16>
    %c0_6 = arith.constant 0 : index
    %c0_7 = arith.constant 0 : index
    %c0_8 = arith.constant 0 : index
    %7 = vector.load %arg3[%c0_6, %c0_7, %c0_8] : memref<3x16x128xbf16, #tpu.memory_space<vmem>>, vector<1x16x128xbf16>
    %8 = vector.shape_cast %7 : vector<1x16x128xbf16> to vector<16x128xbf16>
    %cst_9 = arith.constant dense<0.000000e+00> : vector<32x128xf32>
    %9 = tpu.matmul %4, %8, %cst_9 {dimension_numbers = #tpu.dot_dimension_numbers<[1], [0], [0], [1], [0, 0, 1, 1], [], []>} : vector<32x16xbf16>, vector<16x128xbf16>, vector<32x128xf32> -> vector<32x128xf32>
    %c1 = arith.constant 1 : index
    %c0_10 = arith.constant 0 : index
    %c0_11 = arith.constant 0 : index
    %10 = vector.load %arg3[%c1, %c0_10, %c0_11] : memref<3x16x128xbf16, #tpu.memory_space<vmem>>, vector<1x16x128xbf16>
    %11 = vector.shape_cast %10 : vector<1x16x128xbf16> to vector<16x128xbf16>
    %cst_12 = arith.constant dense<0.000000e+00> : vector<32x128xf32>
    %12 = tpu.matmul %2, %11, %cst_12 {dimension_numbers = #tpu.dot_dimension_numbers<[1], [0], [0], [1], [0, 0, 1, 1], [], []>} : vector<32x16xbf16>, vector<16x128xbf16>, vector<32x128xf32> -> vector<32x128xf32>
    %13 = arith.addf %9, %12 : vector<32x128xf32>
    %c2 = arith.constant 2 : index
    %c0_13 = arith.constant 0 : index
    %c0_14 = arith.constant 0 : index
    %14 = vector.load %arg3[%c2, %c0_13, %c0_14] : memref<3x16x128xbf16, #tpu.memory_space<vmem>>, vector<1x16x128xbf16>
    %15 = vector.shape_cast %14 : vector<1x16x128xbf16> to vector<16x128xbf16>
    %cst_15 = arith.constant dense<0.000000e+00> : vector<32x128xf32>
    %16 = tpu.matmul %6, %15, %cst_15 {dimension_numbers = #tpu.dot_dimension_numbers<[1], [0], [0], [1], [0, 0, 1, 1], [], []>} : vector<32x16xbf16>, vector<16x128xbf16>, vector<32x128xf32> -> vector<32x128xf32>
    %17 = arith.addf %13, %16 : vector<32x128xf32>
    %cst_16 = arith.constant dense<0.000000e+00> : vector<128xf32>
    %18 = vector.multi_reduction <add>, %17, %cst_16 [0] : vector<32x128xf32> to vector<128xf32>
    %19 = vector.shape_cast %18 : vector<128xf32> to vector<1x128xf32>
    %c0_17 = arith.constant 0 : index
    %c0_18 = arith.constant 0 : index
    %20 = vector.load %arg5[%c0_17, %c0_18] : memref<128x8xf32, #tpu.memory_space<vmem>>, vector<128x8xf32>
    %cst_19 = arith.constant dense<0.000000e+00> : vector<1x8xf32>
    %21 = tpu.matmul %19, %20, %cst_19 {dimension_numbers = #tpu.dot_dimension_numbers<[1], [0], [0], [1], [0, 0, 1, 1], [], []>} : vector<1x128xf32>, vector<128x8xf32>, vector<1x8xf32> -> vector<1x8xf32>
    %cst_20 = arith.constant 0.001953125 : f32
    %22 = vector.broadcast %cst_20 : f32 to vector<1x8xf32>
    %23 = arith.mulf %21, %22 : vector<1x8xf32>
    %c0_21 = arith.constant 0 : index
    %c0_22 = arith.constant 0 : index
    %24 = vector.load %arg6[%c0_21, %c0_22] : memref<8x128xf32, #tpu.memory_space<vmem>>, vector<8x128xf32>
    %cst_23 = arith.constant dense<0.000000e+00> : vector<1x128xf32>
    %25 = tpu.matmul %23, %24, %cst_23 {dimension_numbers = #tpu.dot_dimension_numbers<[1], [0], [0], [1], [0, 0, 1, 1], [], []>} : vector<1x8xf32>, vector<8x128xf32>, vector<1x128xf32> -> vector<1x128xf32>
    %26 = vector.broadcast %25 : vector<1x128xf32> to vector<32x128xf32>
    %27 = arith.subf %17, %26 : vector<32x128xf32>
    %28 = arith.mulf %27, %27 : vector<32x128xf32>
    %cst_24 = arith.constant dense<0.000000e+00> : vector<128xf32>
    %29 = vector.multi_reduction <add>, %28, %cst_24 [0] : vector<32x128xf32> to vector<128xf32>
    %30 = vector.shape_cast %29 : vector<128xf32> to vector<1x128xf32>
    %c0_25 = arith.constant 0 : index
    %c0_26 = arith.constant 0 : index
    %31 = vector.load %arg5[%c0_25, %c0_26] : memref<128x8xf32, #tpu.memory_space<vmem>>, vector<128x8xf32>
    %cst_27 = arith.constant dense<0.000000e+00> : vector<1x8xf32>
    %32 = tpu.matmul %30, %31, %cst_27 {dimension_numbers = #tpu.dot_dimension_numbers<[1], [0], [0], [1], [0, 0, 1, 1], [], []>} : vector<1x128xf32>, vector<128x8xf32>, vector<1x8xf32> -> vector<1x8xf32>
    %cst_28 = arith.constant 0.001953125 : f32
    %33 = vector.broadcast %cst_28 : f32 to vector<1x8xf32>
    %34 = arith.mulf %32, %33 : vector<1x8xf32>
    %c0_29 = arith.constant 0 : index
    %c0_30 = arith.constant 0 : index
    %35 = vector.load %arg7[%c0_29, %c0_30] : memref<1x8xf32, #tpu.memory_space<vmem>>, vector<1x8xf32>
    %cst_31 = arith.constant 9.99999974E-6 : f32
    %36 = vector.broadcast %cst_31 : f32 to vector<1x8xf32>
    %37 = arith.addf %34, %36 : vector<1x8xf32>
    %38 = math.rsqrt %37 : vector<1x8xf32>
    %39 = arith.mulf %35, %38 : vector<1x8xf32>
    %c0_32 = arith.constant 0 : index
    %c0_33 = arith.constant 0 : index
    %40 = vector.load %arg8[%c0_32, %c0_33] : memref<1x8xf32, #tpu.memory_space<vmem>>, vector<1x8xf32>
    %41 = arith.mulf %23, %39 : vector<1x8xf32>
    %42 = arith.subf %40, %41 : vector<1x8xf32>
    %c0_34 = arith.constant 0 : index
    %c0_35 = arith.constant 0 : index
    %43 = vector.load %arg6[%c0_34, %c0_35] : memref<8x128xf32, #tpu.memory_space<vmem>>, vector<8x128xf32>
    %cst_36 = arith.constant dense<0.000000e+00> : vector<1x128xf32>
    %44 = tpu.matmul %39, %43, %cst_36 {dimension_numbers = #tpu.dot_dimension_numbers<[1], [0], [0], [1], [0, 0, 1, 1], [], []>} : vector<1x8xf32>, vector<8x128xf32>, vector<1x128xf32> -> vector<1x128xf32>
    %c0_37 = arith.constant 0 : index
    %c0_38 = arith.constant 0 : index
    %45 = vector.load %arg6[%c0_37, %c0_38] : memref<8x128xf32, #tpu.memory_space<vmem>>, vector<8x128xf32>
    %cst_39 = arith.constant dense<0.000000e+00> : vector<1x128xf32>
    %46 = tpu.matmul %42, %45, %cst_39 {dimension_numbers = #tpu.dot_dimension_numbers<[1], [0], [0], [1], [0, 0, 1, 1], [], []>} : vector<1x8xf32>, vector<8x128xf32>, vector<1x128xf32> -> vector<1x128xf32>
    %47 = vector.broadcast %44 : vector<1x128xf32> to vector<32x128xf32>
    %48 = arith.mulf %17, %47 : vector<32x128xf32>
    %49 = vector.broadcast %46 : vector<1x128xf32> to vector<32x128xf32>
    %50 = arith.addf %48, %49 : vector<32x128xf32>
    %cst_40 = arith.constant 0.000000e+00 : f32
    %51 = vector.broadcast %cst_40 : f32 to vector<32x128xf32>
    %52 = arith.maximumf %50, %51 : vector<32x128xf32>
    %53 = arith.truncf %52 : vector<32x128xf32> to vector<32x128xbf16>
    %cst_41 = arith.constant dense<0.000000e+00> : vector<32x128xf32>
    %54 = tpu.matmul %0, %53, %cst_41 {dimension_numbers = #tpu.dot_dimension_numbers<[1], [0], [0], [1], [0, 0, 1, 1], [], []>} : vector<32x32xbf16>, vector<32x128xbf16>, vector<32x128xf32> -> vector<32x128xf32>
    %55 = arith.truncf %54 : vector<32x128xf32> to vector<32x128xbf16>
    %cst_42 = arith.constant dense<0.000000e+00> : vector<32x128xf32>
    %56 = tpu.matmul %1, %53, %cst_42 {dimension_numbers = #tpu.dot_dimension_numbers<[1], [0], [0], [1], [0, 0, 1, 1], [], []>} : vector<32x32xbf16>, vector<32x128xbf16>, vector<32x128xf32> -> vector<32x128xf32>
    %57 = arith.truncf %56 : vector<32x128xf32> to vector<32x128xbf16>
    %c0_43 = arith.constant 0 : index
    %c0_44 = arith.constant 0 : index
    %c0_45 = arith.constant 0 : index
    %58 = vector.load %arg4[%c0_43, %c0_44, %c0_45] : memref<3x128x128xbf16, #tpu.memory_space<vmem>>, vector<1x128x128xbf16>
    %59 = vector.shape_cast %58 : vector<1x128x128xbf16> to vector<128x128xbf16>
    %cst_46 = arith.constant dense<0.000000e+00> : vector<32x128xf32>
    %60 = tpu.matmul %55, %59, %cst_46 {dimension_numbers = #tpu.dot_dimension_numbers<[1], [0], [0], [1], [0, 0, 1, 1], [], []>} : vector<32x128xbf16>, vector<128x128xbf16>, vector<32x128xf32> -> vector<32x128xf32>
    %c1_47 = arith.constant 1 : index
    %c0_48 = arith.constant 0 : index
    %c0_49 = arith.constant 0 : index
    %61 = vector.load %arg4[%c1_47, %c0_48, %c0_49] : memref<3x128x128xbf16, #tpu.memory_space<vmem>>, vector<1x128x128xbf16>
    %62 = vector.shape_cast %61 : vector<1x128x128xbf16> to vector<128x128xbf16>
    %cst_50 = arith.constant dense<0.000000e+00> : vector<32x128xf32>
    %63 = tpu.matmul %53, %62, %cst_50 {dimension_numbers = #tpu.dot_dimension_numbers<[1], [0], [0], [1], [0, 0, 1, 1], [], []>} : vector<32x128xbf16>, vector<128x128xbf16>, vector<32x128xf32> -> vector<32x128xf32>
    %64 = arith.addf %60, %63 : vector<32x128xf32>
    %c2_51 = arith.constant 2 : index
    %c0_52 = arith.constant 0 : index
    %c0_53 = arith.constant 0 : index
    %65 = vector.load %arg4[%c2_51, %c0_52, %c0_53] : memref<3x128x128xbf16, #tpu.memory_space<vmem>>, vector<1x128x128xbf16>
    %66 = vector.shape_cast %65 : vector<1x128x128xbf16> to vector<128x128xbf16>
    %cst_54 = arith.constant dense<0.000000e+00> : vector<32x128xf32>
    %67 = tpu.matmul %57, %66, %cst_54 {dimension_numbers = #tpu.dot_dimension_numbers<[1], [0], [0], [1], [0, 0, 1, 1], [], []>} : vector<32x128xbf16>, vector<128x128xbf16>, vector<32x128xf32> -> vector<32x128xf32>
    %68 = arith.addf %64, %67 : vector<32x128xf32>
    %cst_55 = arith.constant dense<0.000000e+00> : vector<128xf32>
    %69 = vector.multi_reduction <add>, %68, %cst_55 [0] : vector<32x128xf32> to vector<128xf32>
    %70 = vector.shape_cast %69 : vector<128xf32> to vector<1x128xf32>
    %c0_56 = arith.constant 0 : index
    %c0_57 = arith.constant 0 : index
    %71 = vector.load %arg5[%c0_56, %c0_57] : memref<128x8xf32, #tpu.memory_space<vmem>>, vector<128x8xf32>
    %cst_58 = arith.constant dense<0.000000e+00> : vector<1x8xf32>
    %72 = tpu.matmul %70, %71, %cst_58 {dimension_numbers = #tpu.dot_dimension_numbers<[1], [0], [0], [1], [0, 0, 1, 1], [], []>} : vector<1x128xf32>, vector<128x8xf32>, vector<1x8xf32> -> vector<1x8xf32>
    %cst_59 = arith.constant 0.001953125 : f32
    %73 = vector.broadcast %cst_59 : f32 to vector<1x8xf32>
    %74 = arith.mulf %72, %73 : vector<1x8xf32>
    %c0_60 = arith.constant 0 : index
    %c0_61 = arith.constant 0 : index
    %75 = vector.load %arg6[%c0_60, %c0_61] : memref<8x128xf32, #tpu.memory_space<vmem>>, vector<8x128xf32>
    %cst_62 = arith.constant dense<0.000000e+00> : vector<1x128xf32>
    %76 = tpu.matmul %74, %75, %cst_62 {dimension_numbers = #tpu.dot_dimension_numbers<[1], [0], [0], [1], [0, 0, 1, 1], [], []>} : vector<1x8xf32>, vector<8x128xf32>, vector<1x128xf32> -> vector<1x128xf32>
    %77 = vector.broadcast %76 : vector<1x128xf32> to vector<32x128xf32>
    %78 = arith.subf %68, %77 : vector<32x128xf32>
    %79 = arith.mulf %78, %78 : vector<32x128xf32>
    %cst_63 = arith.constant dense<0.000000e+00> : vector<128xf32>
    %80 = vector.multi_reduction <add>, %79, %cst_63 [0] : vector<32x128xf32> to vector<128xf32>
    %81 = vector.shape_cast %80 : vector<128xf32> to vector<1x128xf32>
    %c0_64 = arith.constant 0 : index
    %c0_65 = arith.constant 0 : index
    %82 = vector.load %arg5[%c0_64, %c0_65] : memref<128x8xf32, #tpu.memory_space<vmem>>, vector<128x8xf32>
    %cst_66 = arith.constant dense<0.000000e+00> : vector<1x8xf32>
    %83 = tpu.matmul %81, %82, %cst_66 {dimension_numbers = #tpu.dot_dimension_numbers<[1], [0], [0], [1], [0, 0, 1, 1], [], []>} : vector<1x128xf32>, vector<128x8xf32>, vector<1x8xf32> -> vector<1x8xf32>
    %cst_67 = arith.constant 0.001953125 : f32
    %84 = vector.broadcast %cst_67 : f32 to vector<1x8xf32>
    %85 = arith.mulf %83, %84 : vector<1x8xf32>
    %c0_68 = arith.constant 0 : index
    %c0_69 = arith.constant 0 : index
    %86 = vector.load %arg9[%c0_68, %c0_69] : memref<1x8xf32, #tpu.memory_space<vmem>>, vector<1x8xf32>
    %cst_70 = arith.constant 9.99999974E-6 : f32
    %87 = vector.broadcast %cst_70 : f32 to vector<1x8xf32>
    %88 = arith.addf %85, %87 : vector<1x8xf32>
    %89 = math.rsqrt %88 : vector<1x8xf32>
    %90 = arith.mulf %86, %89 : vector<1x8xf32>
    %c0_71 = arith.constant 0 : index
    %c0_72 = arith.constant 0 : index
    %91 = vector.load %arg10[%c0_71, %c0_72] : memref<1x8xf32, #tpu.memory_space<vmem>>, vector<1x8xf32>
    %92 = arith.mulf %74, %90 : vector<1x8xf32>
    %93 = arith.subf %91, %92 : vector<1x8xf32>
    %c0_73 = arith.constant 0 : index
    %c0_74 = arith.constant 0 : index
    %94 = vector.load %arg6[%c0_73, %c0_74] : memref<8x128xf32, #tpu.memory_space<vmem>>, vector<8x128xf32>
    %cst_75 = arith.constant dense<0.000000e+00> : vector<1x128xf32>
    %95 = tpu.matmul %90, %94, %cst_75 {dimension_numbers = #tpu.dot_dimension_numbers<[1], [0], [0], [1], [0, 0, 1, 1], [], []>} : vector<1x8xf32>, vector<8x128xf32>, vector<1x128xf32> -> vector<1x128xf32>
    %c0_76 = arith.constant 0 : index
    %c0_77 = arith.constant 0 : index
    %96 = vector.load %arg6[%c0_76, %c0_77] : memref<8x128xf32, #tpu.memory_space<vmem>>, vector<8x128xf32>
    %cst_78 = arith.constant dense<0.000000e+00> : vector<1x128xf32>
    %97 = tpu.matmul %93, %96, %cst_78 {dimension_numbers = #tpu.dot_dimension_numbers<[1], [0], [0], [1], [0, 0, 1, 1], [], []>} : vector<1x8xf32>, vector<8x128xf32>, vector<1x128xf32> -> vector<1x128xf32>
    %98 = vector.broadcast %95 : vector<1x128xf32> to vector<32x128xf32>
    %99 = arith.mulf %68, %98 : vector<32x128xf32>
    %100 = vector.broadcast %97 : vector<1x128xf32> to vector<32x128xf32>
    %101 = arith.addf %99, %100 : vector<32x128xf32>
    %cst_79 = arith.constant 0.000000e+00 : f32
    %102 = vector.broadcast %cst_79 : f32 to vector<32x128xf32>
    %103 = arith.maximumf %101, %102 : vector<32x128xf32>
    %104 = arith.truncf %103 : vector<32x128xf32> to vector<32x128xbf16>
    %c0_80 = arith.constant 0 : index
    %c0_81 = arith.constant 0 : index
    %105 = vector.load %arg15[%c0_80, %c0_81] : memref<32x128xbf16, #tpu.memory_space<vmem>>, vector<32x128xbf16>
    tpu.vector_store %arg15[%c0_80, %c0_81], %104 {strides = array<i32>} : memref<32x128xbf16, #tpu.memory_space<vmem>>, vector<32x128xbf16>,
    %c0_82 = arith.constant 0 : index
    %c0_83 = arith.constant 0 : index
    %106 = vector.load %arg11[%c0_82, %c0_83] : memref<16x32xbf16, #tpu.memory_space<vmem>>, vector<16x32xbf16>
    %cst_84 = arith.constant dense<0.000000e+00> : vector<16x128xf32>
    %107 = tpu.matmul %106, %104, %cst_84 {dimension_numbers = #tpu.dot_dimension_numbers<[1], [0], [0], [1], [0, 0, 1, 1], [], []>} : vector<16x32xbf16>, vector<32x128xbf16>, vector<16x128xf32> -> vector<16x128xf32>
    %c0_85 = arith.constant 0 : index
    %c0_86 = arith.constant 0 : index
    %108 = vector.load %arg12[%c0_85, %c0_86] : memref<16x32xbf16, #tpu.memory_space<vmem>>, vector<16x32xbf16>
    %cst_87 = arith.constant dense<0.000000e+00> : vector<16x128xf32>
    %109 = tpu.matmul %108, %104, %cst_87 {dimension_numbers = #tpu.dot_dimension_numbers<[1], [0], [0], [1], [0, 0, 1, 1], [], []>} : vector<16x32xbf16>, vector<32x128xbf16>, vector<16x128xf32> -> vector<16x128xf32>
    %110 = arith.maximumf %107, %109 : vector<16x128xf32>
    %111 = arith.truncf %110 : vector<16x128xf32> to vector<16x128xbf16>
    %c0_88 = arith.constant 0 : index
    %c0_89 = arith.constant 0 : index
    %112 = vector.load %arg13[%c0_88, %c0_89] : memref<128x64xbf16, #tpu.memory_space<vmem>>, vector<128x64xbf16>
    %cst_90 = arith.constant dense<0.000000e+00> : vector<16x64xf32>
    %113 = tpu.matmul %111, %112, %cst_90 {dimension_numbers = #tpu.dot_dimension_numbers<[1], [0], [0], [1], [0, 0, 1, 1], [], []>} : vector<16x128xbf16>, vector<128x64xbf16>, vector<16x64xf32> -> vector<16x64xf32>
    %c0_91 = arith.constant 0 : index
    %c0_92 = arith.constant 0 : index
    %114 = vector.load %arg14[%c0_91, %c0_92] : memref<128x64xbf16, #tpu.memory_space<vmem>>, vector<128x64xbf16>
    %cst_93 = arith.constant dense<0.000000e+00> : vector<16x64xf32>
    %115 = tpu.matmul %111, %114, %cst_93 {dimension_numbers = #tpu.dot_dimension_numbers<[1], [0], [0], [1], [0, 0, 1, 1], [], []>} : vector<16x128xbf16>, vector<128x64xbf16>, vector<16x64xf32> -> vector<16x64xf32>
    %116 = arith.maximumf %113, %115 : vector<16x64xf32>
    %117 = arith.truncf %116 : vector<16x64xf32> to vector<16x64xbf16>
    %c0_94 = arith.constant 0 : index
    %c0_95 = arith.constant 0 : index
    %118 = vector.load %arg16[%c0_94, %c0_95] : memref<16x64xbf16, #tpu.memory_space<vmem>>, vector<16x64xbf16>
    tpu.vector_store %arg16[%c0_94, %c0_95], %117 {strides = array<i32>} : memref<16x64xbf16, #tpu.memory_space<vmem>>, vector<16x64xbf16>,
    return
  }
}

module attributes {stable_mosaic.version = 11 : i64} {
  func.func @_matmul_bias_kernel(%arg0: memref<8x128xbf16, #tpu.memory_space<vmem>>, %arg1: memref<128x256xbf16, #tpu.memory_space<vmem>>, %arg2: memref<1x256xf32, #tpu.memory_space<vmem>>, %arg3: memref<8x256xbf16, #tpu.memory_space<vmem>>) attributes {dimension_semantics = [], scalar_prefetch = 0 : i64, scratch_operands = 0 : i64, tpu.core_type = #tpu.core_type<tc>} {
    %c0 = arith.constant 0 : index
    %c0_0 = arith.constant 0 : index
    %0 = vector.load %arg0[%c0, %c0_0] : memref<8x128xbf16, #tpu.memory_space<vmem>>, vector<8x128xbf16>
    %c0_1 = arith.constant 0 : index
    %c0_2 = arith.constant 0 : index
    %1 = vector.load %arg1[%c0_1, %c0_2] : memref<128x256xbf16, #tpu.memory_space<vmem>>, vector<128x256xbf16>
    %cst = arith.constant dense<0.000000e+00> : vector<8x256xf32>
    %2 = tpu.matmul %0, %1, %cst {dimension_numbers = #tpu.dot_dimension_numbers<[1], [0], [0], [1], [0, 0, 1, 1], [], []>} : vector<8x128xbf16>, vector<128x256xbf16>, vector<8x256xf32> -> vector<8x256xf32>
    %c0_3 = arith.constant 0 : index
    %c0_4 = arith.constant 0 : index
    %3 = vector.load %arg2[%c0_3, %c0_4] : memref<1x256xf32, #tpu.memory_space<vmem>>, vector<1x256xf32>
    %4 = vector.broadcast %3 : vector<1x256xf32> to vector<8x256xf32>
    %5 = arith.addf %2, %4 : vector<8x256xf32>
    %6 = arith.truncf %5 : vector<8x256xf32> to vector<8x256xbf16>
    %c0_5 = arith.constant 0 : index
    %c0_6 = arith.constant 0 : index
    %7 = vector.load %arg3[%c0_5, %c0_6] : memref<8x256xbf16, #tpu.memory_space<vmem>>, vector<8x256xbf16>
    tpu.vector_store %arg3[%c0_5, %c0_6], %6 {strides = array<i32>} : memref<8x256xbf16, #tpu.memory_space<vmem>>, vector<8x256xbf16>,
    return
  }
}

module attributes {stable_mosaic.version = 11 : i64} {
  func.func @_block_kernel(%arg0: memref<8x64xbf16, #tpu.memory_space<vmem>>, %arg1: memref<8x8xbf16, #tpu.memory_space<vmem>>, %arg2: memref<8x8xbf16, #tpu.memory_space<vmem>>, %arg3: memref<3x64x128xbf16, #tpu.memory_space<vmem>>, %arg4: memref<3x128x128xbf16, #tpu.memory_space<vmem>>, %arg5: memref<128x32xf32, #tpu.memory_space<vmem>>, %arg6: memref<32x128xf32, #tpu.memory_space<vmem>>, %arg7: memref<1x32xf32, #tpu.memory_space<vmem>>, %arg8: memref<1x32xf32, #tpu.memory_space<vmem>>, %arg9: memref<1x32xf32, #tpu.memory_space<vmem>>, %arg10: memref<1x32xf32, #tpu.memory_space<vmem>>, %arg11: memref<8x128xbf16, #tpu.memory_space<vmem>>) attributes {dimension_semantics = [], scalar_prefetch = 0 : i64, scratch_operands = 0 : i64, tpu.core_type = #tpu.core_type<tc>} {
    %c0 = arith.constant 0 : index
    %c0_0 = arith.constant 0 : index
    %0 = vector.load %arg1[%c0, %c0_0] : memref<8x8xbf16, #tpu.memory_space<vmem>>, vector<8x8xbf16>
    %c0_1 = arith.constant 0 : index
    %c0_2 = arith.constant 0 : index
    %1 = vector.load %arg2[%c0_1, %c0_2] : memref<8x8xbf16, #tpu.memory_space<vmem>>, vector<8x8xbf16>
    %c0_3 = arith.constant 0 : index
    %c0_4 = arith.constant 0 : index
    %2 = vector.load %arg0[%c0_3, %c0_4] : memref<8x64xbf16, #tpu.memory_space<vmem>>, vector<8x64xbf16>
    %cst = arith.constant dense<0.000000e+00> : vector<8x64xf32>
    %3 = tpu.matmul %0, %2, %cst {dimension_numbers = #tpu.dot_dimension_numbers<[1], [0], [0], [1], [0, 0, 1, 1], [], []>} : vector<8x8xbf16>, vector<8x64xbf16>, vector<8x64xf32> -> vector<8x64xf32>
    %4 = arith.truncf %3 : vector<8x64xf32> to vector<8x64xbf16>
    %cst_5 = arith.constant dense<0.000000e+00> : vector<8x64xf32>
    %5 = tpu.matmul %1, %2, %cst_5 {dimension_numbers = #tpu.dot_dimension_numbers<[1], [0], [0], [1], [0, 0, 1, 1], [], []>} : vector<8x8xbf16>, vector<8x64xbf16>, vector<8x64xf32> -> vector<8x64xf32>
    %6 = arith.truncf %5 : vector<8x64xf32> to vector<8x64xbf16>
    %c0_6 = arith.constant 0 : index
    %c0_7 = arith.constant 0 : index
    %c0_8 = arith.constant 0 : index
    %7 = vector.load %arg3[%c0_6, %c0_7, %c0_8] : memref<3x64x128xbf16, #tpu.memory_space<vmem>>, vector<1x64x128xbf16>
    %8 = vector.shape_cast %7 : vector<1x64x128xbf16> to vector<64x128xbf16>
    %cst_9 = arith.constant dense<0.000000e+00> : vector<8x128xf32>
    %9 = tpu.matmul %4, %8, %cst_9 {dimension_numbers = #tpu.dot_dimension_numbers<[1], [0], [0], [1], [0, 0, 1, 1], [], []>} : vector<8x64xbf16>, vector<64x128xbf16>, vector<8x128xf32> -> vector<8x128xf32>
    %c1 = arith.constant 1 : index
    %c0_10 = arith.constant 0 : index
    %c0_11 = arith.constant 0 : index
    %10 = vector.load %arg3[%c1, %c0_10, %c0_11] : memref<3x64x128xbf16, #tpu.memory_space<vmem>>, vector<1x64x128xbf16>
    %11 = vector.shape_cast %10 : vector<1x64x128xbf16> to vector<64x128xbf16>
    %cst_12 = arith.constant dense<0.000000e+00> : vector<8x128xf32>
    %12 = tpu.matmul %2, %11, %cst_12 {dimension_numbers = #tpu.dot_dimension_numbers<[1], [0], [0], [1], [0, 0, 1, 1], [], []>} : vector<8x64xbf16>, vector<64x128xbf16>, vector<8x128xf32> -> vector<8x128xf32>
    %13 = arith.addf %9, %12 : vector<8x128xf32>
    %c2 = arith.constant 2 : index
    %c0_13 = arith.constant 0 : index
    %c0_14 = arith.constant 0 : index
    %14 = vector.load %arg3[%c2, %c0_13, %c0_14] : memref<3x64x128xbf16, #tpu.memory_space<vmem>>, vector<1x64x128xbf16>
    %15 = vector.shape_cast %14 : vector<1x64x128xbf16> to vector<64x128xbf16>
    %cst_15 = arith.constant dense<0.000000e+00> : vector<8x128xf32>
    %16 = tpu.matmul %6, %15, %cst_15 {dimension_numbers = #tpu.dot_dimension_numbers<[1], [0], [0], [1], [0, 0, 1, 1], [], []>} : vector<8x64xbf16>, vector<64x128xbf16>, vector<8x128xf32> -> vector<8x128xf32>
    %17 = arith.addf %13, %16 : vector<8x128xf32>
    %cst_16 = arith.constant dense<0.000000e+00> : vector<128xf32>
    %18 = vector.multi_reduction <add>, %17, %cst_16 [0] : vector<8x128xf32> to vector<128xf32>
    %19 = vector.shape_cast %18 : vector<128xf32> to vector<1x128xf32>
    %c0_17 = arith.constant 0 : index
    %c0_18 = arith.constant 0 : index
    %20 = vector.load %arg5[%c0_17, %c0_18] : memref<128x32xf32, #tpu.memory_space<vmem>>, vector<128x32xf32>
    %cst_19 = arith.constant dense<0.000000e+00> : vector<1x32xf32>
    %21 = tpu.matmul %19, %20, %cst_19 {dimension_numbers = #tpu.dot_dimension_numbers<[1], [0], [0], [1], [0, 0, 1, 1], [], []>} : vector<1x128xf32>, vector<128x32xf32>, vector<1x32xf32> -> vector<1x32xf32>
    %cst_20 = arith.constant 3.125000e-02 : f32
    %22 = vector.broadcast %cst_20 : f32 to vector<1x32xf32>
    %23 = arith.mulf %21, %22 : vector<1x32xf32>
    %c0_21 = arith.constant 0 : index
    %c0_22 = arith.constant 0 : index
    %24 = vector.load %arg6[%c0_21, %c0_22] : memref<32x128xf32, #tpu.memory_space<vmem>>, vector<32x128xf32>
    %cst_23 = arith.constant dense<0.000000e+00> : vector<1x128xf32>
    %25 = tpu.matmul %23, %24, %cst_23 {dimension_numbers = #tpu.dot_dimension_numbers<[1], [0], [0], [1], [0, 0, 1, 1], [], []>} : vector<1x32xf32>, vector<32x128xf32>, vector<1x128xf32> -> vector<1x128xf32>
    %26 = vector.broadcast %25 : vector<1x128xf32> to vector<8x128xf32>
    %27 = arith.subf %17, %26 : vector<8x128xf32>
    %28 = arith.mulf %27, %27 : vector<8x128xf32>
    %cst_24 = arith.constant dense<0.000000e+00> : vector<128xf32>
    %29 = vector.multi_reduction <add>, %28, %cst_24 [0] : vector<8x128xf32> to vector<128xf32>
    %30 = vector.shape_cast %29 : vector<128xf32> to vector<1x128xf32>
    %c0_25 = arith.constant 0 : index
    %c0_26 = arith.constant 0 : index
    %31 = vector.load %arg5[%c0_25, %c0_26] : memref<128x32xf32, #tpu.memory_space<vmem>>, vector<128x32xf32>
    %cst_27 = arith.constant dense<0.000000e+00> : vector<1x32xf32>
    %32 = tpu.matmul %30, %31, %cst_27 {dimension_numbers = #tpu.dot_dimension_numbers<[1], [0], [0], [1], [0, 0, 1, 1], [], []>} : vector<1x128xf32>, vector<128x32xf32>, vector<1x32xf32> -> vector<1x32xf32>
    %cst_28 = arith.constant 3.125000e-02 : f32
    %33 = vector.broadcast %cst_28 : f32 to vector<1x32xf32>
    %34 = arith.mulf %32, %33 : vector<1x32xf32>
    %c0_29 = arith.constant 0 : index
    %c0_30 = arith.constant 0 : index
    %35 = vector.load %arg7[%c0_29, %c0_30] : memref<1x32xf32, #tpu.memory_space<vmem>>, vector<1x32xf32>
    %cst_31 = arith.constant 9.99999974E-6 : f32
    %36 = vector.broadcast %cst_31 : f32 to vector<1x32xf32>
    %37 = arith.addf %34, %36 : vector<1x32xf32>
    %38 = math.rsqrt %37 : vector<1x32xf32>
    %39 = arith.mulf %35, %38 : vector<1x32xf32>
    %c0_32 = arith.constant 0 : index
    %c0_33 = arith.constant 0 : index
    %40 = vector.load %arg8[%c0_32, %c0_33] : memref<1x32xf32, #tpu.memory_space<vmem>>, vector<1x32xf32>
    %41 = arith.mulf %23, %39 : vector<1x32xf32>
    %42 = arith.subf %40, %41 : vector<1x32xf32>
    %c0_34 = arith.constant 0 : index
    %c0_35 = arith.constant 0 : index
    %43 = vector.load %arg6[%c0_34, %c0_35] : memref<32x128xf32, #tpu.memory_space<vmem>>, vector<32x128xf32>
    %cst_36 = arith.constant dense<0.000000e+00> : vector<1x128xf32>
    %44 = tpu.matmul %39, %43, %cst_36 {dimension_numbers = #tpu.dot_dimension_numbers<[1], [0], [0], [1], [0, 0, 1, 1], [], []>} : vector<1x32xf32>, vector<32x128xf32>, vector<1x128xf32> -> vector<1x128xf32>
    %c0_37 = arith.constant 0 : index
    %c0_38 = arith.constant 0 : index
    %45 = vector.load %arg6[%c0_37, %c0_38] : memref<32x128xf32, #tpu.memory_space<vmem>>, vector<32x128xf32>
    %cst_39 = arith.constant dense<0.000000e+00> : vector<1x128xf32>
    %46 = tpu.matmul %42, %45, %cst_39 {dimension_numbers = #tpu.dot_dimension_numbers<[1], [0], [0], [1], [0, 0, 1, 1], [], []>} : vector<1x32xf32>, vector<32x128xf32>, vector<1x128xf32> -> vector<1x128xf32>
    %47 = vector.broadcast %44 : vector<1x128xf32> to vector<8x128xf32>
    %48 = arith.mulf %17, %47 : vector<8x128xf32>
    %49 = vector.broadcast %46 : vector<1x128xf32> to vector<8x128xf32>
    %50 = arith.addf %48, %49 : vector<8x128xf32>
    %cst_40 = arith.constant 0.000000e+00 : f32
    %51 = vector.broadcast %cst_40 : f32 to vector<8x128xf32>
    %52 = arith.maximumf %50, %51 : vector<8x128xf32>
    %53 = arith.truncf %52 : vector<8x128xf32> to vector<8x128xbf16>
    %cst_41 = arith.constant dense<0.000000e+00> : vector<8x128xf32>
    %54 = tpu.matmul %0, %53, %cst_41 {dimension_numbers = #tpu.dot_dimension_numbers<[1], [0], [0], [1], [0, 0, 1, 1], [], []>} : vector<8x8xbf16>, vector<8x128xbf16>, vector<8x128xf32> -> vector<8x128xf32>
    %55 = arith.truncf %54 : vector<8x128xf32> to vector<8x128xbf16>
    %cst_42 = arith.constant dense<0.000000e+00> : vector<8x128xf32>
    %56 = tpu.matmul %1, %53, %cst_42 {dimension_numbers = #tpu.dot_dimension_numbers<[1], [0], [0], [1], [0, 0, 1, 1], [], []>} : vector<8x8xbf16>, vector<8x128xbf16>, vector<8x128xf32> -> vector<8x128xf32>
    %57 = arith.truncf %56 : vector<8x128xf32> to vector<8x128xbf16>
    %c0_43 = arith.constant 0 : index
    %c0_44 = arith.constant 0 : index
    %c0_45 = arith.constant 0 : index
    %58 = vector.load %arg4[%c0_43, %c0_44, %c0_45] : memref<3x128x128xbf16, #tpu.memory_space<vmem>>, vector<1x128x128xbf16>
    %59 = vector.shape_cast %58 : vector<1x128x128xbf16> to vector<128x128xbf16>
    %cst_46 = arith.constant dense<0.000000e+00> : vector<8x128xf32>
    %60 = tpu.matmul %55, %59, %cst_46 {dimension_numbers = #tpu.dot_dimension_numbers<[1], [0], [0], [1], [0, 0, 1, 1], [], []>} : vector<8x128xbf16>, vector<128x128xbf16>, vector<8x128xf32> -> vector<8x128xf32>
    %c1_47 = arith.constant 1 : index
    %c0_48 = arith.constant 0 : index
    %c0_49 = arith.constant 0 : index
    %61 = vector.load %arg4[%c1_47, %c0_48, %c0_49] : memref<3x128x128xbf16, #tpu.memory_space<vmem>>, vector<1x128x128xbf16>
    %62 = vector.shape_cast %61 : vector<1x128x128xbf16> to vector<128x128xbf16>
    %cst_50 = arith.constant dense<0.000000e+00> : vector<8x128xf32>
    %63 = tpu.matmul %53, %62, %cst_50 {dimension_numbers = #tpu.dot_dimension_numbers<[1], [0], [0], [1], [0, 0, 1, 1], [], []>} : vector<8x128xbf16>, vector<128x128xbf16>, vector<8x128xf32> -> vector<8x128xf32>
    %64 = arith.addf %60, %63 : vector<8x128xf32>
    %c2_51 = arith.constant 2 : index
    %c0_52 = arith.constant 0 : index
    %c0_53 = arith.constant 0 : index
    %65 = vector.load %arg4[%c2_51, %c0_52, %c0_53] : memref<3x128x128xbf16, #tpu.memory_space<vmem>>, vector<1x128x128xbf16>
    %66 = vector.shape_cast %65 : vector<1x128x128xbf16> to vector<128x128xbf16>
    %cst_54 = arith.constant dense<0.000000e+00> : vector<8x128xf32>
    %67 = tpu.matmul %57, %66, %cst_54 {dimension_numbers = #tpu.dot_dimension_numbers<[1], [0], [0], [1], [0, 0, 1, 1], [], []>} : vector<8x128xbf16>, vector<128x128xbf16>, vector<8x128xf32> -> vector<8x128xf32>
    %68 = arith.addf %64, %67 : vector<8x128xf32>
    %cst_55 = arith.constant dense<0.000000e+00> : vector<128xf32>
    %69 = vector.multi_reduction <add>, %68, %cst_55 [0] : vector<8x128xf32> to vector<128xf32>
    %70 = vector.shape_cast %69 : vector<128xf32> to vector<1x128xf32>
    %c0_56 = arith.constant 0 : index
    %c0_57 = arith.constant 0 : index
    %71 = vector.load %arg5[%c0_56, %c0_57] : memref<128x32xf32, #tpu.memory_space<vmem>>, vector<128x32xf32>
    %cst_58 = arith.constant dense<0.000000e+00> : vector<1x32xf32>
    %72 = tpu.matmul %70, %71, %cst_58 {dimension_numbers = #tpu.dot_dimension_numbers<[1], [0], [0], [1], [0, 0, 1, 1], [], []>} : vector<1x128xf32>, vector<128x32xf32>, vector<1x32xf32> -> vector<1x32xf32>
    %cst_59 = arith.constant 3.125000e-02 : f32
    %73 = vector.broadcast %cst_59 : f32 to vector<1x32xf32>
    %74 = arith.mulf %72, %73 : vector<1x32xf32>
    %c0_60 = arith.constant 0 : index
    %c0_61 = arith.constant 0 : index
    %75 = vector.load %arg6[%c0_60, %c0_61] : memref<32x128xf32, #tpu.memory_space<vmem>>, vector<32x128xf32>
    %cst_62 = arith.constant dense<0.000000e+00> : vector<1x128xf32>
    %76 = tpu.matmul %74, %75, %cst_62 {dimension_numbers = #tpu.dot_dimension_numbers<[1], [0], [0], [1], [0, 0, 1, 1], [], []>} : vector<1x32xf32>, vector<32x128xf32>, vector<1x128xf32> -> vector<1x128xf32>
    %77 = vector.broadcast %76 : vector<1x128xf32> to vector<8x128xf32>
    %78 = arith.subf %68, %77 : vector<8x128xf32>
    %79 = arith.mulf %78, %78 : vector<8x128xf32>
    %cst_63 = arith.constant dense<0.000000e+00> : vector<128xf32>
    %80 = vector.multi_reduction <add>, %79, %cst_63 [0] : vector<8x128xf32> to vector<128xf32>
    %81 = vector.shape_cast %80 : vector<128xf32> to vector<1x128xf32>
    %c0_64 = arith.constant 0 : index
    %c0_65 = arith.constant 0 : index
    %82 = vector.load %arg5[%c0_64, %c0_65] : memref<128x32xf32, #tpu.memory_space<vmem>>, vector<128x32xf32>
    %cst_66 = arith.constant dense<0.000000e+00> : vector<1x32xf32>
    %83 = tpu.matmul %81, %82, %cst_66 {dimension_numbers = #tpu.dot_dimension_numbers<[1], [0], [0], [1], [0, 0, 1, 1], [], []>} : vector<1x128xf32>, vector<128x32xf32>, vector<1x32xf32> -> vector<1x32xf32>
    %cst_67 = arith.constant 3.125000e-02 : f32
    %84 = vector.broadcast %cst_67 : f32 to vector<1x32xf32>
    %85 = arith.mulf %83, %84 : vector<1x32xf32>
    %c0_68 = arith.constant 0 : index
    %c0_69 = arith.constant 0 : index
    %86 = vector.load %arg9[%c0_68, %c0_69] : memref<1x32xf32, #tpu.memory_space<vmem>>, vector<1x32xf32>
    %cst_70 = arith.constant 9.99999974E-6 : f32
    %87 = vector.broadcast %cst_70 : f32 to vector<1x32xf32>
    %88 = arith.addf %85, %87 : vector<1x32xf32>
    %89 = math.rsqrt %88 : vector<1x32xf32>
    %90 = arith.mulf %86, %89 : vector<1x32xf32>
    %c0_71 = arith.constant 0 : index
    %c0_72 = arith.constant 0 : index
    %91 = vector.load %arg10[%c0_71, %c0_72] : memref<1x32xf32, #tpu.memory_space<vmem>>, vector<1x32xf32>
    %92 = arith.mulf %74, %90 : vector<1x32xf32>
    %93 = arith.subf %91, %92 : vector<1x32xf32>
    %c0_73 = arith.constant 0 : index
    %c0_74 = arith.constant 0 : index
    %94 = vector.load %arg6[%c0_73, %c0_74] : memref<32x128xf32, #tpu.memory_space<vmem>>, vector<32x128xf32>
    %cst_75 = arith.constant dense<0.000000e+00> : vector<1x128xf32>
    %95 = tpu.matmul %90, %94, %cst_75 {dimension_numbers = #tpu.dot_dimension_numbers<[1], [0], [0], [1], [0, 0, 1, 1], [], []>} : vector<1x32xf32>, vector<32x128xf32>, vector<1x128xf32> -> vector<1x128xf32>
    %c0_76 = arith.constant 0 : index
    %c0_77 = arith.constant 0 : index
    %96 = vector.load %arg6[%c0_76, %c0_77] : memref<32x128xf32, #tpu.memory_space<vmem>>, vector<32x128xf32>
    %cst_78 = arith.constant dense<0.000000e+00> : vector<1x128xf32>
    %97 = tpu.matmul %93, %96, %cst_78 {dimension_numbers = #tpu.dot_dimension_numbers<[1], [0], [0], [1], [0, 0, 1, 1], [], []>} : vector<1x32xf32>, vector<32x128xf32>, vector<1x128xf32> -> vector<1x128xf32>
    %98 = vector.broadcast %95 : vector<1x128xf32> to vector<8x128xf32>
    %99 = arith.mulf %68, %98 : vector<8x128xf32>
    %100 = vector.broadcast %97 : vector<1x128xf32> to vector<8x128xf32>
    %101 = arith.addf %99, %100 : vector<8x128xf32>
    %cst_79 = arith.constant 0.000000e+00 : f32
    %102 = vector.broadcast %cst_79 : f32 to vector<8x128xf32>
    %103 = arith.maximumf %101, %102 : vector<8x128xf32>
    %104 = arith.truncf %103 : vector<8x128xf32> to vector<8x128xbf16>
    %c0_80 = arith.constant 0 : index
    %c0_81 = arith.constant 0 : index
    %105 = vector.load %arg11[%c0_80, %c0_81] : memref<8x128xbf16, #tpu.memory_space<vmem>>, vector<8x128xbf16>
    tpu.vector_store %arg11[%c0_80, %c0_81], %104 {strides = array<i32>} : memref<8x128xbf16, #tpu.memory_space<vmem>>, vector<8x128xbf16>,
    return
  }
}

module attributes {stable_mosaic.version = 11 : i64} {
  func.func @_block_kernel(%arg0: memref<16x64xbf16, #tpu.memory_space<vmem>>, %arg1: memref<16x16xbf16, #tpu.memory_space<vmem>>, %arg2: memref<16x16xbf16, #tpu.memory_space<vmem>>, %arg3: memref<3x64x128xbf16, #tpu.memory_space<vmem>>, %arg4: memref<3x128x128xbf16, #tpu.memory_space<vmem>>, %arg5: memref<128x16xf32, #tpu.memory_space<vmem>>, %arg6: memref<16x128xf32, #tpu.memory_space<vmem>>, %arg7: memref<1x16xf32, #tpu.memory_space<vmem>>, %arg8: memref<1x16xf32, #tpu.memory_space<vmem>>, %arg9: memref<1x16xf32, #tpu.memory_space<vmem>>, %arg10: memref<1x16xf32, #tpu.memory_space<vmem>>, %arg11: memref<8x16xbf16, #tpu.memory_space<vmem>>, %arg12: memref<8x16xbf16, #tpu.memory_space<vmem>>, %arg13: memref<128x64xbf16, #tpu.memory_space<vmem>>, %arg14: memref<128x64xbf16, #tpu.memory_space<vmem>>, %arg15: memref<16x128xbf16, #tpu.memory_space<vmem>>, %arg16: memref<8x64xbf16, #tpu.memory_space<vmem>>) attributes {dimension_semantics = [], scalar_prefetch = 0 : i64, scratch_operands = 0 : i64, tpu.core_type = #tpu.core_type<tc>} {
    %c0 = arith.constant 0 : index
    %c0_0 = arith.constant 0 : index
    %0 = vector.load %arg1[%c0, %c0_0] : memref<16x16xbf16, #tpu.memory_space<vmem>>, vector<16x16xbf16>
    %c0_1 = arith.constant 0 : index
    %c0_2 = arith.constant 0 : index
    %1 = vector.load %arg2[%c0_1, %c0_2] : memref<16x16xbf16, #tpu.memory_space<vmem>>, vector<16x16xbf16>
    %c0_3 = arith.constant 0 : index
    %c0_4 = arith.constant 0 : index
    %2 = vector.load %arg0[%c0_3, %c0_4] : memref<16x64xbf16, #tpu.memory_space<vmem>>, vector<16x64xbf16>
    %cst = arith.constant dense<0.000000e+00> : vector<16x64xf32>
    %3 = tpu.matmul %0, %2, %cst {dimension_numbers = #tpu.dot_dimension_numbers<[1], [0], [0], [1], [0, 0, 1, 1], [], []>} : vector<16x16xbf16>, vector<16x64xbf16>, vector<16x64xf32> -> vector<16x64xf32>
    %4 = arith.truncf %3 : vector<16x64xf32> to vector<16x64xbf16>
    %cst_5 = arith.constant dense<0.000000e+00> : vector<16x64xf32>
    %5 = tpu.matmul %1, %2, %cst_5 {dimension_numbers = #tpu.dot_dimension_numbers<[1], [0], [0], [1], [0, 0, 1, 1], [], []>} : vector<16x16xbf16>, vector<16x64xbf16>, vector<16x64xf32> -> vector<16x64xf32>
    %6 = arith.truncf %5 : vector<16x64xf32> to vector<16x64xbf16>
    %c0_6 = arith.constant 0 : index
    %c0_7 = arith.constant 0 : index
    %c0_8 = arith.constant 0 : index
    %7 = vector.load %arg3[%c0_6, %c0_7, %c0_8] : memref<3x64x128xbf16, #tpu.memory_space<vmem>>, vector<1x64x128xbf16>
    %8 = vector.shape_cast %7 : vector<1x64x128xbf16> to vector<64x128xbf16>
    %cst_9 = arith.constant dense<0.000000e+00> : vector<16x128xf32>
    %9 = tpu.matmul %4, %8, %cst_9 {dimension_numbers = #tpu.dot_dimension_numbers<[1], [0], [0], [1], [0, 0, 1, 1], [], []>} : vector<16x64xbf16>, vector<64x128xbf16>, vector<16x128xf32> -> vector<16x128xf32>
    %c1 = arith.constant 1 : index
    %c0_10 = arith.constant 0 : index
    %c0_11 = arith.constant 0 : index
    %10 = vector.load %arg3[%c1, %c0_10, %c0_11] : memref<3x64x128xbf16, #tpu.memory_space<vmem>>, vector<1x64x128xbf16>
    %11 = vector.shape_cast %10 : vector<1x64x128xbf16> to vector<64x128xbf16>
    %cst_12 = arith.constant dense<0.000000e+00> : vector<16x128xf32>
    %12 = tpu.matmul %2, %11, %cst_12 {dimension_numbers = #tpu.dot_dimension_numbers<[1], [0], [0], [1], [0, 0, 1, 1], [], []>} : vector<16x64xbf16>, vector<64x128xbf16>, vector<16x128xf32> -> vector<16x128xf32>
    %13 = arith.addf %9, %12 : vector<16x128xf32>
    %c2 = arith.constant 2 : index
    %c0_13 = arith.constant 0 : index
    %c0_14 = arith.constant 0 : index
    %14 = vector.load %arg3[%c2, %c0_13, %c0_14] : memref<3x64x128xbf16, #tpu.memory_space<vmem>>, vector<1x64x128xbf16>
    %15 = vector.shape_cast %14 : vector<1x64x128xbf16> to vector<64x128xbf16>
    %cst_15 = arith.constant dense<0.000000e+00> : vector<16x128xf32>
    %16 = tpu.matmul %6, %15, %cst_15 {dimension_numbers = #tpu.dot_dimension_numbers<[1], [0], [0], [1], [0, 0, 1, 1], [], []>} : vector<16x64xbf16>, vector<64x128xbf16>, vector<16x128xf32> -> vector<16x128xf32>
    %17 = arith.addf %13, %16 : vector<16x128xf32>
    %cst_16 = arith.constant dense<0.000000e+00> : vector<128xf32>
    %18 = vector.multi_reduction <add>, %17, %cst_16 [0] : vector<16x128xf32> to vector<128xf32>
    %19 = vector.shape_cast %18 : vector<128xf32> to vector<1x128xf32>
    %c0_17 = arith.constant 0 : index
    %c0_18 = arith.constant 0 : index
    %20 = vector.load %arg5[%c0_17, %c0_18] : memref<128x16xf32, #tpu.memory_space<vmem>>, vector<128x16xf32>
    %cst_19 = arith.constant dense<0.000000e+00> : vector<1x16xf32>
    %21 = tpu.matmul %19, %20, %cst_19 {dimension_numbers = #tpu.dot_dimension_numbers<[1], [0], [0], [1], [0, 0, 1, 1], [], []>} : vector<1x128xf32>, vector<128x16xf32>, vector<1x16xf32> -> vector<1x16xf32>
    %cst_20 = arith.constant 7.812500e-03 : f32
    %22 = vector.broadcast %cst_20 : f32 to vector<1x16xf32>
    %23 = arith.mulf %21, %22 : vector<1x16xf32>
    %c0_21 = arith.constant 0 : index
    %c0_22 = arith.constant 0 : index
    %24 = vector.load %arg6[%c0_21, %c0_22] : memref<16x128xf32, #tpu.memory_space<vmem>>, vector<16x128xf32>
    %cst_23 = arith.constant dense<0.000000e+00> : vector<1x128xf32>
    %25 = tpu.matmul %23, %24, %cst_23 {dimension_numbers = #tpu.dot_dimension_numbers<[1], [0], [0], [1], [0, 0, 1, 1], [], []>} : vector<1x16xf32>, vector<16x128xf32>, vector<1x128xf32> -> vector<1x128xf32>
    %26 = vector.broadcast %25 : vector<1x128xf32> to vector<16x128xf32>
    %27 = arith.subf %17, %26 : vector<16x128xf32>
    %28 = arith.mulf %27, %27 : vector<16x128xf32>
    %cst_24 = arith.constant dense<0.000000e+00> : vector<128xf32>
    %29 = vector.multi_reduction <add>, %28, %cst_24 [0] : vector<16x128xf32> to vector<128xf32>
    %30 = vector.shape_cast %29 : vector<128xf32> to vector<1x128xf32>
    %c0_25 = arith.constant 0 : index
    %c0_26 = arith.constant 0 : index
    %31 = vector.load %arg5[%c0_25, %c0_26] : memref<128x16xf32, #tpu.memory_space<vmem>>, vector<128x16xf32>
    %cst_27 = arith.constant dense<0.000000e+00> : vector<1x16xf32>
    %32 = tpu.matmul %30, %31, %cst_27 {dimension_numbers = #tpu.dot_dimension_numbers<[1], [0], [0], [1], [0, 0, 1, 1], [], []>} : vector<1x128xf32>, vector<128x16xf32>, vector<1x16xf32> -> vector<1x16xf32>
    %cst_28 = arith.constant 7.812500e-03 : f32
    %33 = vector.broadcast %cst_28 : f32 to vector<1x16xf32>
    %34 = arith.mulf %32, %33 : vector<1x16xf32>
    %c0_29 = arith.constant 0 : index
    %c0_30 = arith.constant 0 : index
    %35 = vector.load %arg7[%c0_29, %c0_30] : memref<1x16xf32, #tpu.memory_space<vmem>>, vector<1x16xf32>
    %cst_31 = arith.constant 9.99999974E-6 : f32
    %36 = vector.broadcast %cst_31 : f32 to vector<1x16xf32>
    %37 = arith.addf %34, %36 : vector<1x16xf32>
    %38 = math.rsqrt %37 : vector<1x16xf32>
    %39 = arith.mulf %35, %38 : vector<1x16xf32>
    %c0_32 = arith.constant 0 : index
    %c0_33 = arith.constant 0 : index
    %40 = vector.load %arg8[%c0_32, %c0_33] : memref<1x16xf32, #tpu.memory_space<vmem>>, vector<1x16xf32>
    %41 = arith.mulf %23, %39 : vector<1x16xf32>
    %42 = arith.subf %40, %41 : vector<1x16xf32>
    %c0_34 = arith.constant 0 : index
    %c0_35 = arith.constant 0 : index
    %43 = vector.load %arg6[%c0_34, %c0_35] : memref<16x128xf32, #tpu.memory_space<vmem>>, vector<16x128xf32>
    %cst_36 = arith.constant dense<0.000000e+00> : vector<1x128xf32>
    %44 = tpu.matmul %39, %43, %cst_36 {dimension_numbers = #tpu.dot_dimension_numbers<[1], [0], [0], [1], [0, 0, 1, 1], [], []>} : vector<1x16xf32>, vector<16x128xf32>, vector<1x128xf32> -> vector<1x128xf32>
    %c0_37 = arith.constant 0 : index
    %c0_38 = arith.constant 0 : index
    %45 = vector.load %arg6[%c0_37, %c0_38] : memref<16x128xf32, #tpu.memory_space<vmem>>, vector<16x128xf32>
    %cst_39 = arith.constant dense<0.000000e+00> : vector<1x128xf32>
    %46 = tpu.matmul %42, %45, %cst_39 {dimension_numbers = #tpu.dot_dimension_numbers<[1], [0], [0], [1], [0, 0, 1, 1], [], []>} : vector<1x16xf32>, vector<16x128xf32>, vector<1x128xf32> -> vector<1x128xf32>
    %47 = vector.broadcast %44 : vector<1x128xf32> to vector<16x128xf32>
    %48 = arith.mulf %17, %47 : vector<16x128xf32>
    %49 = vector.broadcast %46 : vector<1x128xf32> to vector<16x128xf32>
    %50 = arith.addf %48, %49 : vector<16x128xf32>
    %cst_40 = arith.constant 0.000000e+00 : f32
    %51 = vector.broadcast %cst_40 : f32 to vector<16x128xf32>
    %52 = arith.maximumf %50, %51 : vector<16x128xf32>
    %53 = arith.truncf %52 : vector<16x128xf32> to vector<16x128xbf16>
    %cst_41 = arith.constant dense<0.000000e+00> : vector<16x128xf32>
    %54 = tpu.matmul %0, %53, %cst_41 {dimension_numbers = #tpu.dot_dimension_numbers<[1], [0], [0], [1], [0, 0, 1, 1], [], []>} : vector<16x16xbf16>, vector<16x128xbf16>, vector<16x128xf32> -> vector<16x128xf32>
    %55 = arith.truncf %54 : vector<16x128xf32> to vector<16x128xbf16>
    %cst_42 = arith.constant dense<0.000000e+00> : vector<16x128xf32>
    %56 = tpu.matmul %1, %53, %cst_42 {dimension_numbers = #tpu.dot_dimension_numbers<[1], [0], [0], [1], [0, 0, 1, 1], [], []>} : vector<16x16xbf16>, vector<16x128xbf16>, vector<16x128xf32> -> vector<16x128xf32>
    %57 = arith.truncf %56 : vector<16x128xf32> to vector<16x128xbf16>
    %c0_43 = arith.constant 0 : index
    %c0_44 = arith.constant 0 : index
    %c0_45 = arith.constant 0 : index
    %58 = vector.load %arg4[%c0_43, %c0_44, %c0_45] : memref<3x128x128xbf16, #tpu.memory_space<vmem>>, vector<1x128x128xbf16>
    %59 = vector.shape_cast %58 : vector<1x128x128xbf16> to vector<128x128xbf16>
    %cst_46 = arith.constant dense<0.000000e+00> : vector<16x128xf32>
    %60 = tpu.matmul %55, %59, %cst_46 {dimension_numbers = #tpu.dot_dimension_numbers<[1], [0], [0], [1], [0, 0, 1, 1], [], []>} : vector<16x128xbf16>, vector<128x128xbf16>, vector<16x128xf32> -> vector<16x128xf32>
    %c1_47 = arith.constant 1 : index
    %c0_48 = arith.constant 0 : index
    %c0_49 = arith.constant 0 : index
    %61 = vector.load %arg4[%c1_47, %c0_48, %c0_49] : memref<3x128x128xbf16, #tpu.memory_space<vmem>>, vector<1x128x128xbf16>
    %62 = vector.shape_cast %61 : vector<1x128x128xbf16> to vector<128x128xbf16>
    %cst_50 = arith.constant dense<0.000000e+00> : vector<16x128xf32>
    %63 = tpu.matmul %53, %62, %cst_50 {dimension_numbers = #tpu.dot_dimension_numbers<[1], [0], [0], [1], [0, 0, 1, 1], [], []>} : vector<16x128xbf16>, vector<128x128xbf16>, vector<16x128xf32> -> vector<16x128xf32>
    %64 = arith.addf %60, %63 : vector<16x128xf32>
    %c2_51 = arith.constant 2 : index
    %c0_52 = arith.constant 0 : index
    %c0_53 = arith.constant 0 : index
    %65 = vector.load %arg4[%c2_51, %c0_52, %c0_53] : memref<3x128x128xbf16, #tpu.memory_space<vmem>>, vector<1x128x128xbf16>
    %66 = vector.shape_cast %65 : vector<1x128x128xbf16> to vector<128x128xbf16>
    %cst_54 = arith.constant dense<0.000000e+00> : vector<16x128xf32>
    %67 = tpu.matmul %57, %66, %cst_54 {dimension_numbers = #tpu.dot_dimension_numbers<[1], [0], [0], [1], [0, 0, 1, 1], [], []>} : vector<16x128xbf16>, vector<128x128xbf16>, vector<16x128xf32> -> vector<16x128xf32>
    %68 = arith.addf %64, %67 : vector<16x128xf32>
    %cst_55 = arith.constant dense<0.000000e+00> : vector<128xf32>
    %69 = vector.multi_reduction <add>, %68, %cst_55 [0] : vector<16x128xf32> to vector<128xf32>
    %70 = vector.shape_cast %69 : vector<128xf32> to vector<1x128xf32>
    %c0_56 = arith.constant 0 : index
    %c0_57 = arith.constant 0 : index
    %71 = vector.load %arg5[%c0_56, %c0_57] : memref<128x16xf32, #tpu.memory_space<vmem>>, vector<128x16xf32>
    %cst_58 = arith.constant dense<0.000000e+00> : vector<1x16xf32>
    %72 = tpu.matmul %70, %71, %cst_58 {dimension_numbers = #tpu.dot_dimension_numbers<[1], [0], [0], [1], [0, 0, 1, 1], [], []>} : vector<1x128xf32>, vector<128x16xf32>, vector<1x16xf32> -> vector<1x16xf32>
    %cst_59 = arith.constant 7.812500e-03 : f32
    %73 = vector.broadcast %cst_59 : f32 to vector<1x16xf32>
    %74 = arith.mulf %72, %73 : vector<1x16xf32>
    %c0_60 = arith.constant 0 : index
    %c0_61 = arith.constant 0 : index
    %75 = vector.load %arg6[%c0_60, %c0_61] : memref<16x128xf32, #tpu.memory_space<vmem>>, vector<16x128xf32>
    %cst_62 = arith.constant dense<0.000000e+00> : vector<1x128xf32>
    %76 = tpu.matmul %74, %75, %cst_62 {dimension_numbers = #tpu.dot_dimension_numbers<[1], [0], [0], [1], [0, 0, 1, 1], [], []>} : vector<1x16xf32>, vector<16x128xf32>, vector<1x128xf32> -> vector<1x128xf32>
    %77 = vector.broadcast %76 : vector<1x128xf32> to vector<16x128xf32>
    %78 = arith.subf %68, %77 : vector<16x128xf32>
    %79 = arith.mulf %78, %78 : vector<16x128xf32>
    %cst_63 = arith.constant dense<0.000000e+00> : vector<128xf32>
    %80 = vector.multi_reduction <add>, %79, %cst_63 [0] : vector<16x128xf32> to vector<128xf32>
    %81 = vector.shape_cast %80 : vector<128xf32> to vector<1x128xf32>
    %c0_64 = arith.constant 0 : index
    %c0_65 = arith.constant 0 : index
    %82 = vector.load %arg5[%c0_64, %c0_65] : memref<128x16xf32, #tpu.memory_space<vmem>>, vector<128x16xf32>
    %cst_66 = arith.constant dense<0.000000e+00> : vector<1x16xf32>
    %83 = tpu.matmul %81, %82, %cst_66 {dimension_numbers = #tpu.dot_dimension_numbers<[1], [0], [0], [1], [0, 0, 1, 1], [], []>} : vector<1x128xf32>, vector<128x16xf32>, vector<1x16xf32> -> vector<1x16xf32>
    %cst_67 = arith.constant 7.812500e-03 : f32
    %84 = vector.broadcast %cst_67 : f32 to vector<1x16xf32>
    %85 = arith.mulf %83, %84 : vector<1x16xf32>
    %c0_68 = arith.constant 0 : index
    %c0_69 = arith.constant 0 : index
    %86 = vector.load %arg9[%c0_68, %c0_69] : memref<1x16xf32, #tpu.memory_space<vmem>>, vector<1x16xf32>
    %cst_70 = arith.constant 9.99999974E-6 : f32
    %87 = vector.broadcast %cst_70 : f32 to vector<1x16xf32>
    %88 = arith.addf %85, %87 : vector<1x16xf32>
    %89 = math.rsqrt %88 : vector<1x16xf32>
    %90 = arith.mulf %86, %89 : vector<1x16xf32>
    %c0_71 = arith.constant 0 : index
    %c0_72 = arith.constant 0 : index
    %91 = vector.load %arg10[%c0_71, %c0_72] : memref<1x16xf32, #tpu.memory_space<vmem>>, vector<1x16xf32>
    %92 = arith.mulf %74, %90 : vector<1x16xf32>
    %93 = arith.subf %91, %92 : vector<1x16xf32>
    %c0_73 = arith.constant 0 : index
    %c0_74 = arith.constant 0 : index
    %94 = vector.load %arg6[%c0_73, %c0_74] : memref<16x128xf32, #tpu.memory_space<vmem>>, vector<16x128xf32>
    %cst_75 = arith.constant dense<0.000000e+00> : vector<1x128xf32>
    %95 = tpu.matmul %90, %94, %cst_75 {dimension_numbers = #tpu.dot_dimension_numbers<[1], [0], [0], [1], [0, 0, 1, 1], [], []>} : vector<1x16xf32>, vector<16x128xf32>, vector<1x128xf32> -> vector<1x128xf32>
    %c0_76 = arith.constant 0 : index
    %c0_77 = arith.constant 0 : index
    %96 = vector.load %arg6[%c0_76, %c0_77] : memref<16x128xf32, #tpu.memory_space<vmem>>, vector<16x128xf32>
    %cst_78 = arith.constant dense<0.000000e+00> : vector<1x128xf32>
    %97 = tpu.matmul %93, %96, %cst_78 {dimension_numbers = #tpu.dot_dimension_numbers<[1], [0], [0], [1], [0, 0, 1, 1], [], []>} : vector<1x16xf32>, vector<16x128xf32>, vector<1x128xf32> -> vector<1x128xf32>
    %98 = vector.broadcast %95 : vector<1x128xf32> to vector<16x128xf32>
    %99 = arith.mulf %68, %98 : vector<16x128xf32>
    %100 = vector.broadcast %97 : vector<1x128xf32> to vector<16x128xf32>
    %101 = arith.addf %99, %100 : vector<16x128xf32>
    %cst_79 = arith.constant 0.000000e+00 : f32
    %102 = vector.broadcast %cst_79 : f32 to vector<16x128xf32>
    %103 = arith.maximumf %101, %102 : vector<16x128xf32>
    %104 = arith.truncf %103 : vector<16x128xf32> to vector<16x128xbf16>
    %c0_80 = arith.constant 0 : index
    %c0_81 = arith.constant 0 : index
    %105 = vector.load %arg15[%c0_80, %c0_81] : memref<16x128xbf16, #tpu.memory_space<vmem>>, vector<16x128xbf16>
    tpu.vector_store %arg15[%c0_80, %c0_81], %104 {strides = array<i32>} : memref<16x128xbf16, #tpu.memory_space<vmem>>, vector<16x128xbf16>,
    %c0_82 = arith.constant 0 : index
    %c0_83 = arith.constant 0 : index
    %106 = vector.load %arg11[%c0_82, %c0_83] : memref<8x16xbf16, #tpu.memory_space<vmem>>, vector<8x16xbf16>
    %cst_84 = arith.constant dense<0.000000e+00> : vector<8x128xf32>
    %107 = tpu.matmul %106, %104, %cst_84 {dimension_numbers = #tpu.dot_dimension_numbers<[1], [0], [0], [1], [0, 0, 1, 1], [], []>} : vector<8x16xbf16>, vector<16x128xbf16>, vector<8x128xf32> -> vector<8x128xf32>
    %c0_85 = arith.constant 0 : index
    %c0_86 = arith.constant 0 : index
    %108 = vector.load %arg12[%c0_85, %c0_86] : memref<8x16xbf16, #tpu.memory_space<vmem>>, vector<8x16xbf16>
    %cst_87 = arith.constant dense<0.000000e+00> : vector<8x128xf32>
    %109 = tpu.matmul %108, %104, %cst_87 {dimension_numbers = #tpu.dot_dimension_numbers<[1], [0], [0], [1], [0, 0, 1, 1], [], []>} : vector<8x16xbf16>, vector<16x128xbf16>, vector<8x128xf32> -> vector<8x128xf32>
    %110 = arith.maximumf %107, %109 : vector<8x128xf32>
    %111 = arith.truncf %110 : vector<8x128xf32> to vector<8x128xbf16>
    %c0_88 = arith.constant 0 : index
    %c0_89 = arith.constant 0 : index
    %112 = vector.load %arg13[%c0_88, %c0_89] : memref<128x64xbf16, #tpu.memory_space<vmem>>, vector<128x64xbf16>
    %cst_90 = arith.constant dense<0.000000e+00> : vector<8x64xf32>
    %113 = tpu.matmul %111, %112, %cst_90 {dimension_numbers = #tpu.dot_dimension_numbers<[1], [0], [0], [1], [0, 0, 1, 1], [], []>} : vector<8x128xbf16>, vector<128x64xbf16>, vector<8x64xf32> -> vector<8x64xf32>
    %c0_91 = arith.constant 0 : index
    %c0_92 = arith.constant 0 : index
    %114 = vector.load %arg14[%c0_91, %c0_92] : memref<128x64xbf16, #tpu.memory_space<vmem>>, vector<128x64xbf16>
    %cst_93 = arith.constant dense<0.000000e+00> : vector<8x64xf32>
    %115 = tpu.matmul %111, %114, %cst_93 {dimension_numbers = #tpu.dot_dimension_numbers<[1], [0], [0], [1], [0, 0, 1, 1], [], []>} : vector<8x128xbf16>, vector<128x64xbf16>, vector<8x64xf32> -> vector<8x64xf32>
    %116 = arith.maximumf %113, %115 : vector<8x64xf32>
    %117 = arith.truncf %116 : vector<8x64xf32> to vector<8x64xbf16>
    %c0_94 = arith.constant 0 : index
    %c0_95 = arith.constant 0 : index
    %118 = vector.load %arg16[%c0_94, %c0_95] : memref<8x64xbf16, #tpu.memory_space<vmem>>, vector<8x64xbf16>
    tpu.vector_store %arg16[%c0_94, %c0_95], %117 {strides = array<i32>} : memref<8x64xbf16, #tpu.memory_space<vmem>>, vector<8x64xbf16>,
    return
  }
}

module attributes {stable_mosaic.version = 11 : i64} {
  func.func @_block_kernel(%arg0: memref<16x128xbf16, #tpu.memory_space<vmem>>, %arg1: memref<16x128xbf16, #tpu.memory_space<vmem>>, %arg2: memref<16x16xbf16, #tpu.memory_space<vmem>>, %arg3: memref<16x16xbf16, #tpu.memory_space<vmem>>, %arg4: memref<3x128x128xbf16, #tpu.memory_space<vmem>>, %arg5: memref<3x128x128xbf16, #tpu.memory_space<vmem>>, %arg6: memref<3x128x128xbf16, #tpu.memory_space<vmem>>, %arg7: memref<128x16xf32, #tpu.memory_space<vmem>>, %arg8: memref<16x128xf32, #tpu.memory_space<vmem>>, %arg9: memref<1x16xf32, #tpu.memory_space<vmem>>, %arg10: memref<1x16xf32, #tpu.memory_space<vmem>>, %arg11: memref<1x16xf32, #tpu.memory_space<vmem>>, %arg12: memref<1x16xf32, #tpu.memory_space<vmem>>, %arg13: memref<16x128xbf16, #tpu.memory_space<vmem>>) attributes {dimension_semantics = [], scalar_prefetch = 0 : i64, scratch_operands = 0 : i64, tpu.core_type = #tpu.core_type<tc>} {
    %c0 = arith.constant 0 : index
    %c0_0 = arith.constant 0 : index
    %0 = vector.load %arg2[%c0, %c0_0] : memref<16x16xbf16, #tpu.memory_space<vmem>>, vector<16x16xbf16>
    %c0_1 = arith.constant 0 : index
    %c0_2 = arith.constant 0 : index
    %1 = vector.load %arg3[%c0_1, %c0_2] : memref<16x16xbf16, #tpu.memory_space<vmem>>, vector<16x16xbf16>
    %c0_3 = arith.constant 0 : index
    %c0_4 = arith.constant 0 : index
    %2 = vector.load %arg0[%c0_3, %c0_4] : memref<16x128xbf16, #tpu.memory_space<vmem>>, vector<16x128xbf16>
    %c0_5 = arith.constant 0 : index
    %c0_6 = arith.constant 0 : index
    %3 = vector.load %arg1[%c0_5, %c0_6] : memref<16x128xbf16, #tpu.memory_space<vmem>>, vector<16x128xbf16>
    %cst = arith.constant dense<0.000000e+00> : vector<16x128xf32>
    %4 = tpu.matmul %0, %2, %cst {dimension_numbers = #tpu.dot_dimension_numbers<[1], [0], [0], [1], [0, 0, 1, 1], [], []>} : vector<16x16xbf16>, vector<16x128xbf16>, vector<16x128xf32> -> vector<16x128xf32>
    %5 = arith.truncf %4 : vector<16x128xf32> to vector<16x128xbf16>
    %cst_7 = arith.constant dense<0.000000e+00> : vector<16x128xf32>
    %6 = tpu.matmul %1, %2, %cst_7 {dimension_numbers = #tpu.dot_dimension_numbers<[1], [0], [0], [1], [0, 0, 1, 1], [], []>} : vector<16x16xbf16>, vector<16x128xbf16>, vector<16x128xf32> -> vector<16x128xf32>
    %7 = arith.truncf %6 : vector<16x128xf32> to vector<16x128xbf16>
    %c0_8 = arith.constant 0 : index
    %c0_9 = arith.constant 0 : index
    %c0_10 = arith.constant 0 : index
    %8 = vector.load %arg4[%c0_8, %c0_9, %c0_10] : memref<3x128x128xbf16, #tpu.memory_space<vmem>>, vector<1x128x128xbf16>
    %9 = vector.shape_cast %8 : vector<1x128x128xbf16> to vector<128x128xbf16>
    %cst_11 = arith.constant dense<0.000000e+00> : vector<16x128xf32>
    %10 = tpu.matmul %5, %9, %cst_11 {dimension_numbers = #tpu.dot_dimension_numbers<[1], [0], [0], [1], [0, 0, 1, 1], [], []>} : vector<16x128xbf16>, vector<128x128xbf16>, vector<16x128xf32> -> vector<16x128xf32>
    %c1 = arith.constant 1 : index
    %c0_12 = arith.constant 0 : index
    %c0_13 = arith.constant 0 : index
    %11 = vector.load %arg4[%c1, %c0_12, %c0_13] : memref<3x128x128xbf16, #tpu.memory_space<vmem>>, vector<1x128x128xbf16>
    %12 = vector.shape_cast %11 : vector<1x128x128xbf16> to vector<128x128xbf16>
    %cst_14 = arith.constant dense<0.000000e+00> : vector<16x128xf32>
    %13 = tpu.matmul %2, %12, %cst_14 {dimension_numbers = #tpu.dot_dimension_numbers<[1], [0], [0], [1], [0, 0, 1, 1], [], []>} : vector<16x128xbf16>, vector<128x128xbf16>, vector<16x128xf32> -> vector<16x128xf32>
    %14 = arith.addf %10, %13 : vector<16x128xf32>
    %c2 = arith.constant 2 : index
    %c0_15 = arith.constant 0 : index
    %c0_16 = arith.constant 0 : index
    %15 = vector.load %arg4[%c2, %c0_15, %c0_16] : memref<3x128x128xbf16, #tpu.memory_space<vmem>>, vector<1x128x128xbf16>
    %16 = vector.shape_cast %15 : vector<1x128x128xbf16> to vector<128x128xbf16>
    %cst_17 = arith.constant dense<0.000000e+00> : vector<16x128xf32>
    %17 = tpu.matmul %7, %16, %cst_17 {dimension_numbers = #tpu.dot_dimension_numbers<[1], [0], [0], [1], [0, 0, 1, 1], [], []>} : vector<16x128xbf16>, vector<128x128xbf16>, vector<16x128xf32> -> vector<16x128xf32>
    %18 = arith.addf %14, %17 : vector<16x128xf32>
    %cst_18 = arith.constant dense<0.000000e+00> : vector<16x128xf32>
    %19 = tpu.matmul %0, %3, %cst_18 {dimension_numbers = #tpu.dot_dimension_numbers<[1], [0], [0], [1], [0, 0, 1, 1], [], []>} : vector<16x16xbf16>, vector<16x128xbf16>, vector<16x128xf32> -> vector<16x128xf32>
    %20 = arith.truncf %19 : vector<16x128xf32> to vector<16x128xbf16>
    %cst_19 = arith.constant dense<0.000000e+00> : vector<16x128xf32>
    %21 = tpu.matmul %1, %3, %cst_19 {dimension_numbers = #tpu.dot_dimension_numbers<[1], [0], [0], [1], [0, 0, 1, 1], [], []>} : vector<16x16xbf16>, vector<16x128xbf16>, vector<16x128xf32> -> vector<16x128xf32>
    %22 = arith.truncf %21 : vector<16x128xf32> to vector<16x128xbf16>
    %c0_20 = arith.constant 0 : index
    %c0_21 = arith.constant 0 : index
    %c0_22 = arith.constant 0 : index
    %23 = vector.load %arg5[%c0_20, %c0_21, %c0_22] : memref<3x128x128xbf16, #tpu.memory_space<vmem>>, vector<1x128x128xbf16>
    %24 = vector.shape_cast %23 : vector<1x128x128xbf16> to vector<128x128xbf16>
    %cst_23 = arith.constant dense<0.000000e+00> : vector<16x128xf32>
    %25 = tpu.matmul %20, %24, %cst_23 {dimension_numbers = #tpu.dot_dimension_numbers<[1], [0], [0], [1], [0, 0, 1, 1], [], []>} : vector<16x128xbf16>, vector<128x128xbf16>, vector<16x128xf32> -> vector<16x128xf32>
    %c1_24 = arith.constant 1 : index
    %c0_25 = arith.constant 0 : index
    %c0_26 = arith.constant 0 : index
    %26 = vector.load %arg5[%c1_24, %c0_25, %c0_26] : memref<3x128x128xbf16, #tpu.memory_space<vmem>>, vector<1x128x128xbf16>
    %27 = vector.shape_cast %26 : vector<1x128x128xbf16> to vector<128x128xbf16>
    %cst_27 = arith.constant dense<0.000000e+00> : vector<16x128xf32>
    %28 = tpu.matmul %3, %27, %cst_27 {dimension_numbers = #tpu.dot_dimension_numbers<[1], [0], [0], [1], [0, 0, 1, 1], [], []>} : vector<16x128xbf16>, vector<128x128xbf16>, vector<16x128xf32> -> vector<16x128xf32>
    %29 = arith.addf %25, %28 : vector<16x128xf32>
    %c2_28 = arith.constant 2 : index
    %c0_29 = arith.constant 0 : index
    %c0_30 = arith.constant 0 : index
    %30 = vector.load %arg5[%c2_28, %c0_29, %c0_30] : memref<3x128x128xbf16, #tpu.memory_space<vmem>>, vector<1x128x128xbf16>
    %31 = vector.shape_cast %30 : vector<1x128x128xbf16> to vector<128x128xbf16>
    %cst_31 = arith.constant dense<0.000000e+00> : vector<16x128xf32>
    %32 = tpu.matmul %22, %31, %cst_31 {dimension_numbers = #tpu.dot_dimension_numbers<[1], [0], [0], [1], [0, 0, 1, 1], [], []>} : vector<16x128xbf16>, vector<128x128xbf16>, vector<16x128xf32> -> vector<16x128xf32>
    %33 = arith.addf %29, %32 : vector<16x128xf32>
    %34 = arith.addf %18, %33 : vector<16x128xf32>
    %cst_32 = arith.constant dense<0.000000e+00> : vector<128xf32>
    %35 = vector.multi_reduction <add>, %34, %cst_32 [0] : vector<16x128xf32> to vector<128xf32>
    %36 = vector.shape_cast %35 : vector<128xf32> to vector<1x128xf32>
    %c0_33 = arith.constant 0 : index
    %c0_34 = arith.constant 0 : index
    %37 = vector.load %arg7[%c0_33, %c0_34] : memref<128x16xf32, #tpu.memory_space<vmem>>, vector<128x16xf32>
    %cst_35 = arith.constant dense<0.000000e+00> : vector<1x16xf32>
    %38 = tpu.matmul %36, %37, %cst_35 {dimension_numbers = #tpu.dot_dimension_numbers<[1], [0], [0], [1], [0, 0, 1, 1], [], []>} : vector<1x128xf32>, vector<128x16xf32>, vector<1x16xf32> -> vector<1x16xf32>
    %cst_36 = arith.constant 7.812500e-03 : f32
    %39 = vector.broadcast %cst_36 : f32 to vector<1x16xf32>
    %40 = arith.mulf %38, %39 : vector<1x16xf32>
    %c0_37 = arith.constant 0 : index
    %c0_38 = arith.constant 0 : index
    %41 = vector.load %arg8[%c0_37, %c0_38] : memref<16x128xf32, #tpu.memory_space<vmem>>, vector<16x128xf32>
    %cst_39 = arith.constant dense<0.000000e+00> : vector<1x128xf32>
    %42 = tpu.matmul %40, %41, %cst_39 {dimension_numbers = #tpu.dot_dimension_numbers<[1], [0], [0], [1], [0, 0, 1, 1], [], []>} : vector<1x16xf32>, vector<16x128xf32>, vector<1x128xf32> -> vector<1x128xf32>
    %43 = vector.broadcast %42 : vector<1x128xf32> to vector<16x128xf32>
    %44 = arith.subf %34, %43 : vector<16x128xf32>
    %45 = arith.mulf %44, %44 : vector<16x128xf32>
    %cst_40 = arith.constant dense<0.000000e+00> : vector<128xf32>
    %46 = vector.multi_reduction <add>, %45, %cst_40 [0] : vector<16x128xf32> to vector<128xf32>
    %47 = vector.shape_cast %46 : vector<128xf32> to vector<1x128xf32>
    %c0_41 = arith.constant 0 : index
    %c0_42 = arith.constant 0 : index
    %48 = vector.load %arg7[%c0_41, %c0_42] : memref<128x16xf32, #tpu.memory_space<vmem>>, vector<128x16xf32>
    %cst_43 = arith.constant dense<0.000000e+00> : vector<1x16xf32>
    %49 = tpu.matmul %47, %48, %cst_43 {dimension_numbers = #tpu.dot_dimension_numbers<[1], [0], [0], [1], [0, 0, 1, 1], [], []>} : vector<1x128xf32>, vector<128x16xf32>, vector<1x16xf32> -> vector<1x16xf32>
    %cst_44 = arith.constant 7.812500e-03 : f32
    %50 = vector.broadcast %cst_44 : f32 to vector<1x16xf32>
    %51 = arith.mulf %49, %50 : vector<1x16xf32>
    %c0_45 = arith.constant 0 : index
    %c0_46 = arith.constant 0 : index
    %52 = vector.load %arg9[%c0_45, %c0_46] : memref<1x16xf32, #tpu.memory_space<vmem>>, vector<1x16xf32>
    %cst_47 = arith.constant 9.99999974E-6 : f32
    %53 = vector.broadcast %cst_47 : f32 to vector<1x16xf32>
    %54 = arith.addf %51, %53 : vector<1x16xf32>
    %55 = math.rsqrt %54 : vector<1x16xf32>
    %56 = arith.mulf %52, %55 : vector<1x16xf32>
    %c0_48 = arith.constant 0 : index
    %c0_49 = arith.constant 0 : index
    %57 = vector.load %arg10[%c0_48, %c0_49] : memref<1x16xf32, #tpu.memory_space<vmem>>, vector<1x16xf32>
    %58 = arith.mulf %40, %56 : vector<1x16xf32>
    %59 = arith.subf %57, %58 : vector<1x16xf32>
    %c0_50 = arith.constant 0 : index
    %c0_51 = arith.constant 0 : index
    %60 = vector.load %arg8[%c0_50, %c0_51] : memref<16x128xf32, #tpu.memory_space<vmem>>, vector<16x128xf32>
    %cst_52 = arith.constant dense<0.000000e+00> : vector<1x128xf32>
    %61 = tpu.matmul %56, %60, %cst_52 {dimension_numbers = #tpu.dot_dimension_numbers<[1], [0], [0], [1], [0, 0, 1, 1], [], []>} : vector<1x16xf32>, vector<16x128xf32>, vector<1x128xf32> -> vector<1x128xf32>
    %c0_53 = arith.constant 0 : index
    %c0_54 = arith.constant 0 : index
    %62 = vector.load %arg8[%c0_53, %c0_54] : memref<16x128xf32, #tpu.memory_space<vmem>>, vector<16x128xf32>
    %cst_55 = arith.constant dense<0.000000e+00> : vector<1x128xf32>
    %63 = tpu.matmul %59, %62, %cst_55 {dimension_numbers = #tpu.dot_dimension_numbers<[1], [0], [0], [1], [0, 0, 1, 1], [], []>} : vector<1x16xf32>, vector<16x128xf32>, vector<1x128xf32> -> vector<1x128xf32>
    %64 = vector.broadcast %61 : vector<1x128xf32> to vector<16x128xf32>
    %65 = arith.mulf %34, %64 : vector<16x128xf32>
    %66 = vector.broadcast %63 : vector<1x128xf32> to vector<16x128xf32>
    %67 = arith.addf %65, %66 : vector<16x128xf32>
    %cst_56 = arith.constant 0.000000e+00 : f32
    %68 = vector.broadcast %cst_56 : f32 to vector<16x128xf32>
    %69 = arith.maximumf %67, %68 : vector<16x128xf32>
    %70 = arith.truncf %69 : vector<16x128xf32> to vector<16x128xbf16>
    %cst_57 = arith.constant dense<0.000000e+00> : vector<16x128xf32>
    %71 = tpu.matmul %0, %70, %cst_57 {dimension_numbers = #tpu.dot_dimension_numbers<[1], [0], [0], [1], [0, 0, 1, 1], [], []>} : vector<16x16xbf16>, vector<16x128xbf16>, vector<16x128xf32> -> vector<16x128xf32>
    %72 = arith.truncf %71 : vector<16x128xf32> to vector<16x128xbf16>
    %cst_58 = arith.constant dense<0.000000e+00> : vector<16x128xf32>
    %73 = tpu.matmul %1, %70, %cst_58 {dimension_numbers = #tpu.dot_dimension_numbers<[1], [0], [0], [1], [0, 0, 1, 1], [], []>} : vector<16x16xbf16>, vector<16x128xbf16>, vector<16x128xf32> -> vector<16x128xf32>
    %74 = arith.truncf %73 : vector<16x128xf32> to vector<16x128xbf16>
    %c0_59 = arith.constant 0 : index
    %c0_60 = arith.constant 0 : index
    %c0_61 = arith.constant 0 : index
    %75 = vector.load %arg6[%c0_59, %c0_60, %c0_61] : memref<3x128x128xbf16, #tpu.memory_space<vmem>>, vector<1x128x128xbf16>
    %76 = vector.shape_cast %75 : vector<1x128x128xbf16> to vector<128x128xbf16>
    %cst_62 = arith.constant dense<0.000000e+00> : vector<16x128xf32>
    %77 = tpu.matmul %72, %76, %cst_62 {dimension_numbers = #tpu.dot_dimension_numbers<[1], [0], [0], [1], [0, 0, 1, 1], [], []>} : vector<16x128xbf16>, vector<128x128xbf16>, vector<16x128xf32> -> vector<16x128xf32>
    %c1_63 = arith.constant 1 : index
    %c0_64 = arith.constant 0 : index
    %c0_65 = arith.constant 0 : index
    %78 = vector.load %arg6[%c1_63, %c0_64, %c0_65] : memref<3x128x128xbf16, #tpu.memory_space<vmem>>, vector<1x128x128xbf16>
    %79 = vector.shape_cast %78 : vector<1x128x128xbf16> to vector<128x128xbf16>
    %cst_66 = arith.constant dense<0.000000e+00> : vector<16x128xf32>
    %80 = tpu.matmul %70, %79, %cst_66 {dimension_numbers = #tpu.dot_dimension_numbers<[1], [0], [0], [1], [0, 0, 1, 1], [], []>} : vector<16x128xbf16>, vector<128x128xbf16>, vector<16x128xf32> -> vector<16x128xf32>
    %81 = arith.addf %77, %80 : vector<16x128xf32>
    %c2_67 = arith.constant 2 : index
    %c0_68 = arith.constant 0 : index
    %c0_69 = arith.constant 0 : index
    %82 = vector.load %arg6[%c2_67, %c0_68, %c0_69] : memref<3x128x128xbf16, #tpu.memory_space<vmem>>, vector<1x128x128xbf16>
    %83 = vector.shape_cast %82 : vector<1x128x128xbf16> to vector<128x128xbf16>
    %cst_70 = arith.constant dense<0.000000e+00> : vector<16x128xf32>
    %84 = tpu.matmul %74, %83, %cst_70 {dimension_numbers = #tpu.dot_dimension_numbers<[1], [0], [0], [1], [0, 0, 1, 1], [], []>} : vector<16x128xbf16>, vector<128x128xbf16>, vector<16x128xf32> -> vector<16x128xf32>
    %85 = arith.addf %81, %84 : vector<16x128xf32>
    %cst_71 = arith.constant dense<0.000000e+00> : vector<128xf32>
    %86 = vector.multi_reduction <add>, %85, %cst_71 [0] : vector<16x128xf32> to vector<128xf32>
    %87 = vector.shape_cast %86 : vector<128xf32> to vector<1x128xf32>
    %c0_72 = arith.constant 0 : index
    %c0_73 = arith.constant 0 : index
    %88 = vector.load %arg7[%c0_72, %c0_73] : memref<128x16xf32, #tpu.memory_space<vmem>>, vector<128x16xf32>
    %cst_74 = arith.constant dense<0.000000e+00> : vector<1x16xf32>
    %89 = tpu.matmul %87, %88, %cst_74 {dimension_numbers = #tpu.dot_dimension_numbers<[1], [0], [0], [1], [0, 0, 1, 1], [], []>} : vector<1x128xf32>, vector<128x16xf32>, vector<1x16xf32> -> vector<1x16xf32>
    %cst_75 = arith.constant 7.812500e-03 : f32
    %90 = vector.broadcast %cst_75 : f32 to vector<1x16xf32>
    %91 = arith.mulf %89, %90 : vector<1x16xf32>
    %c0_76 = arith.constant 0 : index
    %c0_77 = arith.constant 0 : index
    %92 = vector.load %arg8[%c0_76, %c0_77] : memref<16x128xf32, #tpu.memory_space<vmem>>, vector<16x128xf32>
    %cst_78 = arith.constant dense<0.000000e+00> : vector<1x128xf32>
    %93 = tpu.matmul %91, %92, %cst_78 {dimension_numbers = #tpu.dot_dimension_numbers<[1], [0], [0], [1], [0, 0, 1, 1], [], []>} : vector<1x16xf32>, vector<16x128xf32>, vector<1x128xf32> -> vector<1x128xf32>
    %94 = vector.broadcast %93 : vector<1x128xf32> to vector<16x128xf32>
    %95 = arith.subf %85, %94 : vector<16x128xf32>
    %96 = arith.mulf %95, %95 : vector<16x128xf32>
    %cst_79 = arith.constant dense<0.000000e+00> : vector<128xf32>
    %97 = vector.multi_reduction <add>, %96, %cst_79 [0] : vector<16x128xf32> to vector<128xf32>
    %98 = vector.shape_cast %97 : vector<128xf32> to vector<1x128xf32>
    %c0_80 = arith.constant 0 : index
    %c0_81 = arith.constant 0 : index
    %99 = vector.load %arg7[%c0_80, %c0_81] : memref<128x16xf32, #tpu.memory_space<vmem>>, vector<128x16xf32>
    %cst_82 = arith.constant dense<0.000000e+00> : vector<1x16xf32>
    %100 = tpu.matmul %98, %99, %cst_82 {dimension_numbers = #tpu.dot_dimension_numbers<[1], [0], [0], [1], [0, 0, 1, 1], [], []>} : vector<1x128xf32>, vector<128x16xf32>, vector<1x16xf32> -> vector<1x16xf32>
    %cst_83 = arith.constant 7.812500e-03 : f32
    %101 = vector.broadcast %cst_83 : f32 to vector<1x16xf32>
    %102 = arith.mulf %100, %101 : vector<1x16xf32>
    %c0_84 = arith.constant 0 : index
    %c0_85 = arith.constant 0 : index
    %103 = vector.load %arg11[%c0_84, %c0_85] : memref<1x16xf32, #tpu.memory_space<vmem>>, vector<1x16xf32>
    %cst_86 = arith.constant 9.99999974E-6 : f32
    %104 = vector.broadcast %cst_86 : f32 to vector<1x16xf32>
    %105 = arith.addf %102, %104 : vector<1x16xf32>
    %106 = math.rsqrt %105 : vector<1x16xf32>
    %107 = arith.mulf %103, %106 : vector<1x16xf32>
    %c0_87 = arith.constant 0 : index
    %c0_88 = arith.constant 0 : index
    %108 = vector.load %arg12[%c0_87, %c0_88] : memref<1x16xf32, #tpu.memory_space<vmem>>, vector<1x16xf32>
    %109 = arith.mulf %91, %107 : vector<1x16xf32>
    %110 = arith.subf %108, %109 : vector<1x16xf32>
    %c0_89 = arith.constant 0 : index
    %c0_90 = arith.constant 0 : index
    %111 = vector.load %arg8[%c0_89, %c0_90] : memref<16x128xf32, #tpu.memory_space<vmem>>, vector<16x128xf32>
    %cst_91 = arith.constant dense<0.000000e+00> : vector<1x128xf32>
    %112 = tpu.matmul %107, %111, %cst_91 {dimension_numbers = #tpu.dot_dimension_numbers<[1], [0], [0], [1], [0, 0, 1, 1], [], []>} : vector<1x16xf32>, vector<16x128xf32>, vector<1x128xf32> -> vector<1x128xf32>
    %c0_92 = arith.constant 0 : index
    %c0_93 = arith.constant 0 : index
    %113 = vector.load %arg8[%c0_92, %c0_93] : memref<16x128xf32, #tpu.memory_space<vmem>>, vector<16x128xf32>
    %cst_94 = arith.constant dense<0.000000e+00> : vector<1x128xf32>
    %114 = tpu.matmul %110, %113, %cst_94 {dimension_numbers = #tpu.dot_dimension_numbers<[1], [0], [0], [1], [0, 0, 1, 1], [], []>} : vector<1x16xf32>, vector<16x128xf32>, vector<1x128xf32> -> vector<1x128xf32>
    %115 = vector.broadcast %112 : vector<1x128xf32> to vector<16x128xf32>
    %116 = arith.mulf %85, %115 : vector<16x128xf32>
    %117 = vector.broadcast %114 : vector<1x128xf32> to vector<16x128xf32>
    %118 = arith.addf %116, %117 : vector<16x128xf32>
    %cst_95 = arith.constant 0.000000e+00 : f32
    %119 = vector.broadcast %cst_95 : f32 to vector<16x128xf32>
    %120 = arith.maximumf %118, %119 : vector<16x128xf32>
    %121 = arith.truncf %120 : vector<16x128xf32> to vector<16x128xbf16>
    %c0_96 = arith.constant 0 : index
    %c0_97 = arith.constant 0 : index
    %122 = vector.load %arg13[%c0_96, %c0_97] : memref<16x128xbf16, #tpu.memory_space<vmem>>, vector<16x128xbf16>
    tpu.vector_store %arg13[%c0_96, %c0_97], %121 {strides = array<i32>} : memref<16x128xbf16, #tpu.memory_space<vmem>>, vector<16x128xbf16>,
    return
  }
}

module attributes {stable_mosaic.version = 11 : i64} {
  func.func @_matmul_bias_kernel(%arg0: memref<16x128xbf16, #tpu.memory_space<vmem>>, %arg1: memref<128x256xbf16, #tpu.memory_space<vmem>>, %arg2: memref<1x256xf32, #tpu.memory_space<vmem>>, %arg3: memref<16x256xbf16, #tpu.memory_space<vmem>>) attributes {dimension_semantics = [], scalar_prefetch = 0 : i64, scratch_operands = 0 : i64, tpu.core_type = #tpu.core_type<tc>} {
    %c0 = arith.constant 0 : index
    %c0_0 = arith.constant 0 : index
    %0 = vector.load %arg0[%c0, %c0_0] : memref<16x128xbf16, #tpu.memory_space<vmem>>, vector<16x128xbf16>
    %c0_1 = arith.constant 0 : index
    %c0_2 = arith.constant 0 : index
    %1 = vector.load %arg1[%c0_1, %c0_2] : memref<128x256xbf16, #tpu.memory_space<vmem>>, vector<128x256xbf16>
    %cst = arith.constant dense<0.000000e+00> : vector<16x256xf32>
    %2 = tpu.matmul %0, %1, %cst {dimension_numbers = #tpu.dot_dimension_numbers<[1], [0], [0], [1], [0, 0, 1, 1], [], []>} : vector<16x128xbf16>, vector<128x256xbf16>, vector<16x256xf32> -> vector<16x256xf32>
    %c0_3 = arith.constant 0 : index
    %c0_4 = arith.constant 0 : index
    %3 = vector.load %arg2[%c0_3, %c0_4] : memref<1x256xf32, #tpu.memory_space<vmem>>, vector<1x256xf32>
    %4 = vector.broadcast %3 : vector<1x256xf32> to vector<16x256xf32>
    %5 = arith.addf %2, %4 : vector<16x256xf32>
    %6 = arith.truncf %5 : vector<16x256xf32> to vector<16x256xbf16>
    %c0_5 = arith.constant 0 : index
    %c0_6 = arith.constant 0 : index
    %7 = vector.load %arg3[%c0_5, %c0_6] : memref<16x256xbf16, #tpu.memory_space<vmem>>, vector<16x256xbf16>
    tpu.vector_store %arg3[%c0_5, %c0_6], %6 {strides = array<i32>} : memref<16x256xbf16, #tpu.memory_space<vmem>>, vector<16x256xbf16>,
    return
  }
}

module attributes {stable_mosaic.version = 11 : i64} {
  func.func @_matmul_bias_kernel(%arg0: memref<32x128xbf16, #tpu.memory_space<vmem>>, %arg1: memref<128x48xbf16, #tpu.memory_space<vmem>>, %arg2: memref<1x48xf32, #tpu.memory_space<vmem>>, %arg3: memref<32x48xf32, #tpu.memory_space<vmem>>) attributes {dimension_semantics = [], scalar_prefetch = 0 : i64, scratch_operands = 0 : i64, tpu.core_type = #tpu.core_type<tc>} {
    %c0 = arith.constant 0 : index
    %c0_0 = arith.constant 0 : index
    %0 = vector.load %arg0[%c0, %c0_0] : memref<32x128xbf16, #tpu.memory_space<vmem>>, vector<32x128xbf16>
    %c0_1 = arith.constant 0 : index
    %c0_2 = arith.constant 0 : index
    %1 = vector.load %arg1[%c0_1, %c0_2] : memref<128x48xbf16, #tpu.memory_space<vmem>>, vector<128x48xbf16>
    %cst = arith.constant dense<0.000000e+00> : vector<32x48xf32>
    %2 = tpu.matmul %0, %1, %cst {dimension_numbers = #tpu.dot_dimension_numbers<[1], [0], [0], [1], [0, 0, 1, 1], [], []>} : vector<32x128xbf16>, vector<128x48xbf16>, vector<32x48xf32> -> vector<32x48xf32>
    %c0_3 = arith.constant 0 : index
    %c0_4 = arith.constant 0 : index
    %3 = vector.load %arg2[%c0_3, %c0_4] : memref<1x48xf32, #tpu.memory_space<vmem>>, vector<1x48xf32>
    %4 = vector.broadcast %3 : vector<1x48xf32> to vector<32x48xf32>
    %5 = arith.addf %2, %4 : vector<32x48xf32>
    %c0_5 = arith.constant 0 : index
    %c0_6 = arith.constant 0 : index
    %6 = vector.load %arg3[%c0_5, %c0_6] : memref<32x48xf32, #tpu.memory_space<vmem>>, vector<32x48xf32>
    tpu.vector_store %arg3[%c0_5, %c0_6], %5 {strides = array<i32>} : memref<32x48xf32, #tpu.memory_space<vmem>>, vector<32x48xf32>,
    return
  }
}

module attributes {stable_mosaic.version = 11 : i64} {
  func.func @_block_kernel(%arg0: memref<32x128xbf16, #tpu.memory_space<vmem>>, %arg1: memref<32x128xbf16, #tpu.memory_space<vmem>>, %arg2: memref<32x32xbf16, #tpu.memory_space<vmem>>, %arg3: memref<32x32xbf16, #tpu.memory_space<vmem>>, %arg4: memref<3x128x128xbf16, #tpu.memory_space<vmem>>, %arg5: memref<3x128x128xbf16, #tpu.memory_space<vmem>>, %arg6: memref<3x128x128xbf16, #tpu.memory_space<vmem>>, %arg7: memref<128x8xf32, #tpu.memory_space<vmem>>, %arg8: memref<8x128xf32, #tpu.memory_space<vmem>>, %arg9: memref<1x8xf32, #tpu.memory_space<vmem>>, %arg10: memref<1x8xf32, #tpu.memory_space<vmem>>, %arg11: memref<1x8xf32, #tpu.memory_space<vmem>>, %arg12: memref<1x8xf32, #tpu.memory_space<vmem>>, %arg13: memref<32x128xbf16, #tpu.memory_space<vmem>>) attributes {dimension_semantics = [], scalar_prefetch = 0 : i64, scratch_operands = 0 : i64, tpu.core_type = #tpu.core_type<tc>} {
    %c0 = arith.constant 0 : index
    %c0_0 = arith.constant 0 : index
    %0 = vector.load %arg2[%c0, %c0_0] : memref<32x32xbf16, #tpu.memory_space<vmem>>, vector<32x32xbf16>
    %c0_1 = arith.constant 0 : index
    %c0_2 = arith.constant 0 : index
    %1 = vector.load %arg3[%c0_1, %c0_2] : memref<32x32xbf16, #tpu.memory_space<vmem>>, vector<32x32xbf16>
    %c0_3 = arith.constant 0 : index
    %c0_4 = arith.constant 0 : index
    %2 = vector.load %arg0[%c0_3, %c0_4] : memref<32x128xbf16, #tpu.memory_space<vmem>>, vector<32x128xbf16>
    %c0_5 = arith.constant 0 : index
    %c0_6 = arith.constant 0 : index
    %3 = vector.load %arg1[%c0_5, %c0_6] : memref<32x128xbf16, #tpu.memory_space<vmem>>, vector<32x128xbf16>
    %cst = arith.constant dense<0.000000e+00> : vector<32x128xf32>
    %4 = tpu.matmul %0, %2, %cst {dimension_numbers = #tpu.dot_dimension_numbers<[1], [0], [0], [1], [0, 0, 1, 1], [], []>} : vector<32x32xbf16>, vector<32x128xbf16>, vector<32x128xf32> -> vector<32x128xf32>
    %5 = arith.truncf %4 : vector<32x128xf32> to vector<32x128xbf16>
    %cst_7 = arith.constant dense<0.000000e+00> : vector<32x128xf32>
    %6 = tpu.matmul %1, %2, %cst_7 {dimension_numbers = #tpu.dot_dimension_numbers<[1], [0], [0], [1], [0, 0, 1, 1], [], []>} : vector<32x32xbf16>, vector<32x128xbf16>, vector<32x128xf32> -> vector<32x128xf32>
    %7 = arith.truncf %6 : vector<32x128xf32> to vector<32x128xbf16>
    %c0_8 = arith.constant 0 : index
    %c0_9 = arith.constant 0 : index
    %c0_10 = arith.constant 0 : index
    %8 = vector.load %arg4[%c0_8, %c0_9, %c0_10] : memref<3x128x128xbf16, #tpu.memory_space<vmem>>, vector<1x128x128xbf16>
    %9 = vector.shape_cast %8 : vector<1x128x128xbf16> to vector<128x128xbf16>
    %cst_11 = arith.constant dense<0.000000e+00> : vector<32x128xf32>
    %10 = tpu.matmul %5, %9, %cst_11 {dimension_numbers = #tpu.dot_dimension_numbers<[1], [0], [0], [1], [0, 0, 1, 1], [], []>} : vector<32x128xbf16>, vector<128x128xbf16>, vector<32x128xf32> -> vector<32x128xf32>
    %c1 = arith.constant 1 : index
    %c0_12 = arith.constant 0 : index
    %c0_13 = arith.constant 0 : index
    %11 = vector.load %arg4[%c1, %c0_12, %c0_13] : memref<3x128x128xbf16, #tpu.memory_space<vmem>>, vector<1x128x128xbf16>
    %12 = vector.shape_cast %11 : vector<1x128x128xbf16> to vector<128x128xbf16>
    %cst_14 = arith.constant dense<0.000000e+00> : vector<32x128xf32>
    %13 = tpu.matmul %2, %12, %cst_14 {dimension_numbers = #tpu.dot_dimension_numbers<[1], [0], [0], [1], [0, 0, 1, 1], [], []>} : vector<32x128xbf16>, vector<128x128xbf16>, vector<32x128xf32> -> vector<32x128xf32>
    %14 = arith.addf %10, %13 : vector<32x128xf32>
    %c2 = arith.constant 2 : index
    %c0_15 = arith.constant 0 : index
    %c0_16 = arith.constant 0 : index
    %15 = vector.load %arg4[%c2, %c0_15, %c0_16] : memref<3x128x128xbf16, #tpu.memory_space<vmem>>, vector<1x128x128xbf16>
    %16 = vector.shape_cast %15 : vector<1x128x128xbf16> to vector<128x128xbf16>
    %cst_17 = arith.constant dense<0.000000e+00> : vector<32x128xf32>
    %17 = tpu.matmul %7, %16, %cst_17 {dimension_numbers = #tpu.dot_dimension_numbers<[1], [0], [0], [1], [0, 0, 1, 1], [], []>} : vector<32x128xbf16>, vector<128x128xbf16>, vector<32x128xf32> -> vector<32x128xf32>
    %18 = arith.addf %14, %17 : vector<32x128xf32>
    %cst_18 = arith.constant dense<0.000000e+00> : vector<32x128xf32>
    %19 = tpu.matmul %0, %3, %cst_18 {dimension_numbers = #tpu.dot_dimension_numbers<[1], [0], [0], [1], [0, 0, 1, 1], [], []>} : vector<32x32xbf16>, vector<32x128xbf16>, vector<32x128xf32> -> vector<32x128xf32>
    %20 = arith.truncf %19 : vector<32x128xf32> to vector<32x128xbf16>
    %cst_19 = arith.constant dense<0.000000e+00> : vector<32x128xf32>
    %21 = tpu.matmul %1, %3, %cst_19 {dimension_numbers = #tpu.dot_dimension_numbers<[1], [0], [0], [1], [0, 0, 1, 1], [], []>} : vector<32x32xbf16>, vector<32x128xbf16>, vector<32x128xf32> -> vector<32x128xf32>
    %22 = arith.truncf %21 : vector<32x128xf32> to vector<32x128xbf16>
    %c0_20 = arith.constant 0 : index
    %c0_21 = arith.constant 0 : index
    %c0_22 = arith.constant 0 : index
    %23 = vector.load %arg5[%c0_20, %c0_21, %c0_22] : memref<3x128x128xbf16, #tpu.memory_space<vmem>>, vector<1x128x128xbf16>
    %24 = vector.shape_cast %23 : vector<1x128x128xbf16> to vector<128x128xbf16>
    %cst_23 = arith.constant dense<0.000000e+00> : vector<32x128xf32>
    %25 = tpu.matmul %20, %24, %cst_23 {dimension_numbers = #tpu.dot_dimension_numbers<[1], [0], [0], [1], [0, 0, 1, 1], [], []>} : vector<32x128xbf16>, vector<128x128xbf16>, vector<32x128xf32> -> vector<32x128xf32>
    %c1_24 = arith.constant 1 : index
    %c0_25 = arith.constant 0 : index
    %c0_26 = arith.constant 0 : index
    %26 = vector.load %arg5[%c1_24, %c0_25, %c0_26] : memref<3x128x128xbf16, #tpu.memory_space<vmem>>, vector<1x128x128xbf16>
    %27 = vector.shape_cast %26 : vector<1x128x128xbf16> to vector<128x128xbf16>
    %cst_27 = arith.constant dense<0.000000e+00> : vector<32x128xf32>
    %28 = tpu.matmul %3, %27, %cst_27 {dimension_numbers = #tpu.dot_dimension_numbers<[1], [0], [0], [1], [0, 0, 1, 1], [], []>} : vector<32x128xbf16>, vector<128x128xbf16>, vector<32x128xf32> -> vector<32x128xf32>
    %29 = arith.addf %25, %28 : vector<32x128xf32>
    %c2_28 = arith.constant 2 : index
    %c0_29 = arith.constant 0 : index
    %c0_30 = arith.constant 0 : index
    %30 = vector.load %arg5[%c2_28, %c0_29, %c0_30] : memref<3x128x128xbf16, #tpu.memory_space<vmem>>, vector<1x128x128xbf16>
    %31 = vector.shape_cast %30 : vector<1x128x128xbf16> to vector<128x128xbf16>
    %cst_31 = arith.constant dense<0.000000e+00> : vector<32x128xf32>
    %32 = tpu.matmul %22, %31, %cst_31 {dimension_numbers = #tpu.dot_dimension_numbers<[1], [0], [0], [1], [0, 0, 1, 1], [], []>} : vector<32x128xbf16>, vector<128x128xbf16>, vector<32x128xf32> -> vector<32x128xf32>
    %33 = arith.addf %29, %32 : vector<32x128xf32>
    %34 = arith.addf %18, %33 : vector<32x128xf32>
    %cst_32 = arith.constant dense<0.000000e+00> : vector<128xf32>
    %35 = vector.multi_reduction <add>, %34, %cst_32 [0] : vector<32x128xf32> to vector<128xf32>
    %36 = vector.shape_cast %35 : vector<128xf32> to vector<1x128xf32>
    %c0_33 = arith.constant 0 : index
    %c0_34 = arith.constant 0 : index
    %37 = vector.load %arg7[%c0_33, %c0_34] : memref<128x8xf32, #tpu.memory_space<vmem>>, vector<128x8xf32>
    %cst_35 = arith.constant dense<0.000000e+00> : vector<1x8xf32>
    %38 = tpu.matmul %36, %37, %cst_35 {dimension_numbers = #tpu.dot_dimension_numbers<[1], [0], [0], [1], [0, 0, 1, 1], [], []>} : vector<1x128xf32>, vector<128x8xf32>, vector<1x8xf32> -> vector<1x8xf32>
    %cst_36 = arith.constant 0.001953125 : f32
    %39 = vector.broadcast %cst_36 : f32 to vector<1x8xf32>
    %40 = arith.mulf %38, %39 : vector<1x8xf32>
    %c0_37 = arith.constant 0 : index
    %c0_38 = arith.constant 0 : index
    %41 = vector.load %arg8[%c0_37, %c0_38] : memref<8x128xf32, #tpu.memory_space<vmem>>, vector<8x128xf32>
    %cst_39 = arith.constant dense<0.000000e+00> : vector<1x128xf32>
    %42 = tpu.matmul %40, %41, %cst_39 {dimension_numbers = #tpu.dot_dimension_numbers<[1], [0], [0], [1], [0, 0, 1, 1], [], []>} : vector<1x8xf32>, vector<8x128xf32>, vector<1x128xf32> -> vector<1x128xf32>
    %43 = vector.broadcast %42 : vector<1x128xf32> to vector<32x128xf32>
    %44 = arith.subf %34, %43 : vector<32x128xf32>
    %45 = arith.mulf %44, %44 : vector<32x128xf32>
    %cst_40 = arith.constant dense<0.000000e+00> : vector<128xf32>
    %46 = vector.multi_reduction <add>, %45, %cst_40 [0] : vector<32x128xf32> to vector<128xf32>
    %47 = vector.shape_cast %46 : vector<128xf32> to vector<1x128xf32>
    %c0_41 = arith.constant 0 : index
    %c0_42 = arith.constant 0 : index
    %48 = vector.load %arg7[%c0_41, %c0_42] : memref<128x8xf32, #tpu.memory_space<vmem>>, vector<128x8xf32>
    %cst_43 = arith.constant dense<0.000000e+00> : vector<1x8xf32>
    %49 = tpu.matmul %47, %48, %cst_43 {dimension_numbers = #tpu.dot_dimension_numbers<[1], [0], [0], [1], [0, 0, 1, 1], [], []>} : vector<1x128xf32>, vector<128x8xf32>, vector<1x8xf32> -> vector<1x8xf32>
    %cst_44 = arith.constant 0.001953125 : f32
    %50 = vector.broadcast %cst_44 : f32 to vector<1x8xf32>
    %51 = arith.mulf %49, %50 : vector<1x8xf32>
    %c0_45 = arith.constant 0 : index
    %c0_46 = arith.constant 0 : index
    %52 = vector.load %arg9[%c0_45, %c0_46] : memref<1x8xf32, #tpu.memory_space<vmem>>, vector<1x8xf32>
    %cst_47 = arith.constant 9.99999974E-6 : f32
    %53 = vector.broadcast %cst_47 : f32 to vector<1x8xf32>
    %54 = arith.addf %51, %53 : vector<1x8xf32>
    %55 = math.rsqrt %54 : vector<1x8xf32>
    %56 = arith.mulf %52, %55 : vector<1x8xf32>
    %c0_48 = arith.constant 0 : index
    %c0_49 = arith.constant 0 : index
    %57 = vector.load %arg10[%c0_48, %c0_49] : memref<1x8xf32, #tpu.memory_space<vmem>>, vector<1x8xf32>
    %58 = arith.mulf %40, %56 : vector<1x8xf32>
    %59 = arith.subf %57, %58 : vector<1x8xf32>
    %c0_50 = arith.constant 0 : index
    %c0_51 = arith.constant 0 : index
    %60 = vector.load %arg8[%c0_50, %c0_51] : memref<8x128xf32, #tpu.memory_space<vmem>>, vector<8x128xf32>
    %cst_52 = arith.constant dense<0.000000e+00> : vector<1x128xf32>
    %61 = tpu.matmul %56, %60, %cst_52 {dimension_numbers = #tpu.dot_dimension_numbers<[1], [0], [0], [1], [0, 0, 1, 1], [], []>} : vector<1x8xf32>, vector<8x128xf32>, vector<1x128xf32> -> vector<1x128xf32>
    %c0_53 = arith.constant 0 : index
    %c0_54 = arith.constant 0 : index
    %62 = vector.load %arg8[%c0_53, %c0_54] : memref<8x128xf32, #tpu.memory_space<vmem>>, vector<8x128xf32>
    %cst_55 = arith.constant dense<0.000000e+00> : vector<1x128xf32>
    %63 = tpu.matmul %59, %62, %cst_55 {dimension_numbers = #tpu.dot_dimension_numbers<[1], [0], [0], [1], [0, 0, 1, 1], [], []>} : vector<1x8xf32>, vector<8x128xf32>, vector<1x128xf32> -> vector<1x128xf32>
    %64 = vector.broadcast %61 : vector<1x128xf32> to vector<32x128xf32>
    %65 = arith.mulf %34, %64 : vector<32x128xf32>
    %66 = vector.broadcast %63 : vector<1x128xf32> to vector<32x128xf32>
    %67 = arith.addf %65, %66 : vector<32x128xf32>
    %cst_56 = arith.constant 0.000000e+00 : f32
    %68 = vector.broadcast %cst_56 : f32 to vector<32x128xf32>
    %69 = arith.maximumf %67, %68 : vector<32x128xf32>
    %70 = arith.truncf %69 : vector<32x128xf32> to vector<32x128xbf16>
    %cst_57 = arith.constant dense<0.000000e+00> : vector<32x128xf32>
    %71 = tpu.matmul %0, %70, %cst_57 {dimension_numbers = #tpu.dot_dimension_numbers<[1], [0], [0], [1], [0, 0, 1, 1], [], []>} : vector<32x32xbf16>, vector<32x128xbf16>, vector<32x128xf32> -> vector<32x128xf32>
    %72 = arith.truncf %71 : vector<32x128xf32> to vector<32x128xbf16>
    %cst_58 = arith.constant dense<0.000000e+00> : vector<32x128xf32>
    %73 = tpu.matmul %1, %70, %cst_58 {dimension_numbers = #tpu.dot_dimension_numbers<[1], [0], [0], [1], [0, 0, 1, 1], [], []>} : vector<32x32xbf16>, vector<32x128xbf16>, vector<32x128xf32> -> vector<32x128xf32>
    %74 = arith.truncf %73 : vector<32x128xf32> to vector<32x128xbf16>
    %c0_59 = arith.constant 0 : index
    %c0_60 = arith.constant 0 : index
    %c0_61 = arith.constant 0 : index
    %75 = vector.load %arg6[%c0_59, %c0_60, %c0_61] : memref<3x128x128xbf16, #tpu.memory_space<vmem>>, vector<1x128x128xbf16>
    %76 = vector.shape_cast %75 : vector<1x128x128xbf16> to vector<128x128xbf16>
    %cst_62 = arith.constant dense<0.000000e+00> : vector<32x128xf32>
    %77 = tpu.matmul %72, %76, %cst_62 {dimension_numbers = #tpu.dot_dimension_numbers<[1], [0], [0], [1], [0, 0, 1, 1], [], []>} : vector<32x128xbf16>, vector<128x128xbf16>, vector<32x128xf32> -> vector<32x128xf32>
    %c1_63 = arith.constant 1 : index
    %c0_64 = arith.constant 0 : index
    %c0_65 = arith.constant 0 : index
    %78 = vector.load %arg6[%c1_63, %c0_64, %c0_65] : memref<3x128x128xbf16, #tpu.memory_space<vmem>>, vector<1x128x128xbf16>
    %79 = vector.shape_cast %78 : vector<1x128x128xbf16> to vector<128x128xbf16>
    %cst_66 = arith.constant dense<0.000000e+00> : vector<32x128xf32>
    %80 = tpu.matmul %70, %79, %cst_66 {dimension_numbers = #tpu.dot_dimension_numbers<[1], [0], [0], [1], [0, 0, 1, 1], [], []>} : vector<32x128xbf16>, vector<128x128xbf16>, vector<32x128xf32> -> vector<32x128xf32>
    %81 = arith.addf %77, %80 : vector<32x128xf32>
    %c2_67 = arith.constant 2 : index
    %c0_68 = arith.constant 0 : index
    %c0_69 = arith.constant 0 : index
    %82 = vector.load %arg6[%c2_67, %c0_68, %c0_69] : memref<3x128x128xbf16, #tpu.memory_space<vmem>>, vector<1x128x128xbf16>
    %83 = vector.shape_cast %82 : vector<1x128x128xbf16> to vector<128x128xbf16>
    %cst_70 = arith.constant dense<0.000000e+00> : vector<32x128xf32>
    %84 = tpu.matmul %74, %83, %cst_70 {dimension_numbers = #tpu.dot_dimension_numbers<[1], [0], [0], [1], [0, 0, 1, 1], [], []>} : vector<32x128xbf16>, vector<128x128xbf16>, vector<32x128xf32> -> vector<32x128xf32>
    %85 = arith.addf %81, %84 : vector<32x128xf32>
    %cst_71 = arith.constant dense<0.000000e+00> : vector<128xf32>
    %86 = vector.multi_reduction <add>, %85, %cst_71 [0] : vector<32x128xf32> to vector<128xf32>
    %87 = vector.shape_cast %86 : vector<128xf32> to vector<1x128xf32>
    %c0_72 = arith.constant 0 : index
    %c0_73 = arith.constant 0 : index
    %88 = vector.load %arg7[%c0_72, %c0_73] : memref<128x8xf32, #tpu.memory_space<vmem>>, vector<128x8xf32>
    %cst_74 = arith.constant dense<0.000000e+00> : vector<1x8xf32>
    %89 = tpu.matmul %87, %88, %cst_74 {dimension_numbers = #tpu.dot_dimension_numbers<[1], [0], [0], [1], [0, 0, 1, 1], [], []>} : vector<1x128xf32>, vector<128x8xf32>, vector<1x8xf32> -> vector<1x8xf32>
    %cst_75 = arith.constant 0.001953125 : f32
    %90 = vector.broadcast %cst_75 : f32 to vector<1x8xf32>
    %91 = arith.mulf %89, %90 : vector<1x8xf32>
    %c0_76 = arith.constant 0 : index
    %c0_77 = arith.constant 0 : index
    %92 = vector.load %arg8[%c0_76, %c0_77] : memref<8x128xf32, #tpu.memory_space<vmem>>, vector<8x128xf32>
    %cst_78 = arith.constant dense<0.000000e+00> : vector<1x128xf32>
    %93 = tpu.matmul %91, %92, %cst_78 {dimension_numbers = #tpu.dot_dimension_numbers<[1], [0], [0], [1], [0, 0, 1, 1], [], []>} : vector<1x8xf32>, vector<8x128xf32>, vector<1x128xf32> -> vector<1x128xf32>
    %94 = vector.broadcast %93 : vector<1x128xf32> to vector<32x128xf32>
    %95 = arith.subf %85, %94 : vector<32x128xf32>
    %96 = arith.mulf %95, %95 : vector<32x128xf32>
    %cst_79 = arith.constant dense<0.000000e+00> : vector<128xf32>
    %97 = vector.multi_reduction <add>, %96, %cst_79 [0] : vector<32x128xf32> to vector<128xf32>
    %98 = vector.shape_cast %97 : vector<128xf32> to vector<1x128xf32>
    %c0_80 = arith.constant 0 : index
    %c0_81 = arith.constant 0 : index
    %99 = vector.load %arg7[%c0_80, %c0_81] : memref<128x8xf32, #tpu.memory_space<vmem>>, vector<128x8xf32>
    %cst_82 = arith.constant dense<0.000000e+00> : vector<1x8xf32>
    %100 = tpu.matmul %98, %99, %cst_82 {dimension_numbers = #tpu.dot_dimension_numbers<[1], [0], [0], [1], [0, 0, 1, 1], [], []>} : vector<1x128xf32>, vector<128x8xf32>, vector<1x8xf32> -> vector<1x8xf32>
    %cst_83 = arith.constant 0.001953125 : f32
    %101 = vector.broadcast %cst_83 : f32 to vector<1x8xf32>
    %102 = arith.mulf %100, %101 : vector<1x8xf32>
    %c0_84 = arith.constant 0 : index
    %c0_85 = arith.constant 0 : index
    %103 = vector.load %arg11[%c0_84, %c0_85] : memref<1x8xf32, #tpu.memory_space<vmem>>, vector<1x8xf32>
    %cst_86 = arith.constant 9.99999974E-6 : f32
    %104 = vector.broadcast %cst_86 : f32 to vector<1x8xf32>
    %105 = arith.addf %102, %104 : vector<1x8xf32>
    %106 = math.rsqrt %105 : vector<1x8xf32>
    %107 = arith.mulf %103, %106 : vector<1x8xf32>
    %c0_87 = arith.constant 0 : index
    %c0_88 = arith.constant 0 : index
    %108 = vector.load %arg12[%c0_87, %c0_88] : memref<1x8xf32, #tpu.memory_space<vmem>>, vector<1x8xf32>
    %109 = arith.mulf %91, %107 : vector<1x8xf32>
    %110 = arith.subf %108, %109 : vector<1x8xf32>
    %c0_89 = arith.constant 0 : index
    %c0_90 = arith.constant 0 : index
    %111 = vector.load %arg8[%c0_89, %c0_90] : memref<8x128xf32, #tpu.memory_space<vmem>>, vector<8x128xf32>
    %cst_91 = arith.constant dense<0.000000e+00> : vector<1x128xf32>
    %112 = tpu.matmul %107, %111, %cst_91 {dimension_numbers = #tpu.dot_dimension_numbers<[1], [0], [0], [1], [0, 0, 1, 1], [], []>} : vector<1x8xf32>, vector<8x128xf32>, vector<1x128xf32> -> vector<1x128xf32>
    %c0_92 = arith.constant 0 : index
    %c0_93 = arith.constant 0 : index
    %113 = vector.load %arg8[%c0_92, %c0_93] : memref<8x128xf32, #tpu.memory_space<vmem>>, vector<8x128xf32>
    %cst_94 = arith.constant dense<0.000000e+00> : vector<1x128xf32>
    %114 = tpu.matmul %110, %113, %cst_94 {dimension_numbers = #tpu.dot_dimension_numbers<[1], [0], [0], [1], [0, 0, 1, 1], [], []>} : vector<1x8xf32>, vector<8x128xf32>, vector<1x128xf32> -> vector<1x128xf32>
    %115 = vector.broadcast %112 : vector<1x128xf32> to vector<32x128xf32>
    %116 = arith.mulf %85, %115 : vector<32x128xf32>
    %117 = vector.broadcast %114 : vector<1x128xf32> to vector<32x128xf32>
    %118 = arith.addf %116, %117 : vector<32x128xf32>
    %cst_95 = arith.constant 0.000000e+00 : f32
    %119 = vector.broadcast %cst_95 : f32 to vector<32x128xf32>
    %120 = arith.maximumf %118, %119 : vector<32x128xf32>
    %121 = arith.truncf %120 : vector<32x128xf32> to vector<32x128xbf16>
    %c0_96 = arith.constant 0 : index
    %c0_97 = arith.constant 0 : index
    %122 = vector.load %arg13[%c0_96, %c0_97] : memref<32x128xbf16, #tpu.memory_space<vmem>>, vector<32x128xbf16>
    tpu.vector_store %arg13[%c0_96, %c0_97], %121 {strides = array<i32>} : memref<32x128xbf16, #tpu.memory_space<vmem>>, vector<32x128xbf16>,
    return
  }
}

</mosaic_0001>

<bundles_post_ra>
// kernel: unet_forward.11
= control target key start
LH: loop header
LB: loop body
LE: loop exit
PB: predicated region body
PF: predicated region fallthrough
CT: control target
= control target key end

     0   :  { %8 = vsyncpa [#allocation3], 0  ;;  %s353_s0 = inlined_call_operand.vmem [shape: bf16[8,128], index: 0, kind: input, shape index: {}]   ;;  %s354_s1 = inlined_call_operand.hbm [shape: bf16[128,256], index: 1, kind: input, shape index: {}]   ;;  %s355_s2 = inlined_call_operand.hbm [shape: f32[1,256], index: 2, kind: input, shape index: {}]   ;;  %s356_s3 = inlined_call_operand.vmem [shape: bf16[8,256], index: 3, kind: output, shape index: {}]  }
   0x1   :  { %s16_s14 = sshll.u32 %s354_s1, 4  ;;  %s17_s14 = int_to_ptr.hbm [resolvable:$true] %s16_s14 }
   0x2   :  { %9 = vsyncpa [#allocation5], 0  ;;  %s317_s15 = smov [#allocation2]   ;;  %s30_s19 = sshll.u32 %s355_s2, 4  ;;  %s31_s19 = int_to_ptr.hbm [resolvable:$true] %s30_s19 }
   0x3   :  { %s18_s16 = sshll.u32 %s317_s15, 4  ;;  %s318_s20 = smov 128   ;;  %s19_s16 = int_to_ptr.vmem [resolvable:$true] %s18_s16 }
   0x4   :  { %s319_s21 = smov 8   ;;  %s320_s22 = smov [#allocation4]  }
   0x5   :  { %24 = dma.hbm_to_vmem [thread:$0]  %s17_s14, 2048, %s19_s16, [#allocation3], %s318_s20, %s318_s20, %s319_s21  }
   0x6   :  { %s32_s23 = sshll.u32 %s320_s22, 4  ;;  %s33_s23 = int_to_ptr.vmem [resolvable:$true] %s32_s23 }
   0x7   :  { %35 = dma.hbm_to_vmem [thread:$0]  %s31_s19, 32, %s33_s23, [#allocation5]  }
   0x8   :  { %313 = dma.done.wait [#allocation3], 2048  }
   0x9   :  { %314 = vsyncadd [#allocation3], 4294965248 }
   0xa   :  { %315 = dma.done.wait [#allocation5], 32  }
   0xb   :  { %316 = vsyncadd [#allocation5], 4294967264  ;;  %v239_v0 = vld [vmem:[#allocation2 + $0x70] sm:$0xf]  ;;  %v260_v1 = vld [vmem:[#allocation2 + $0x74] sm:$0xf0] }
   0xc   :  { %v259_v2 = vld [vmem:[#allocation2 + $0x74] sm:$0xf]  ;;  %v240_v3 = vor.u32 %v260_v1, %v239_v0  ;;  %v241_v4 = vld [vmem:[#allocation2 + $0x78] sm:$0xf0]  ;;  %v231_v5 = vld [vmem:[#allocation2 + $0x60] sm:$0xf] }
   0xd   :  { %v258_v6 = vld [vmem:[#allocation2 + $0x64] sm:$0xf0]  ;;  %v244_v7 = vor.u32 %v259_v2, %v241_v4  ;;  %v257_v8 = vld [vmem:[#allocation2 + $0x64] sm:$0xf]  ;;  %v233_v9 = vld [vmem:[#allocation2 + $0x68] sm:$0xf0] }
   0xe   :  { %147 = vmatpush.bf16.msra.mxu0 %v240_v3  ;;  %v232_v10 = vor.u32 %v258_v6, %v231_v5  ;;  %v236_v11 = vor.u32 %v257_v8, %v233_v9  ;;  %v223_v12 = vld [vmem:[#allocation2 + $0x50] sm:$0xf]  ;;  %v256_v13 = vld [vmem:[#allocation2 + $0x54] sm:$0xf0]  ;;  %v255_v14 = vld [vmem:[#allocation2 + $0x54] sm:$0xf] }
   0xf   :  { %160 = vmatpush.bf16.msra.mxu1 %v244_v7  ;;  %v225_v15 = vld [vmem:[#allocation2 + $0x58] sm:$0xf0]  ;;  %v224_v16 = vor.u32 %v256_v13, %v223_v12  ;;  %v215_v18 = vld [vmem:[#allocation2 + $0x40] sm:$0xf]  ;;  %v254_v19 = vld [vmem:[#allocation2 + $0x44] sm:$0xf0] }
  0x10   :  { %v228_v17 = vor.u32 %v255_v14, %v225_v15  ;;  %v253_v20 = vld [vmem:[#allocation2 + $0x44] sm:$0xf]  ;;  %v217_v21 = vld [vmem:[#allocation2 + $0x48] sm:$0xf0]  ;;  %v216_v22 = vor.u32 %v254_v19, %v215_v18  ;;  %v207_v24 = vld [vmem:[#allocation2 + $0x30] sm:$0xf] }
  0x11   :  { %v220_v23 = vor.u32 %v253_v20, %v217_v21  ;;  %v252_v25 = vld [vmem:[#allocation2 + $0x34] sm:$0xf0]  ;;  %v251_v26 = vld [vmem:[#allocation2 + $0x34] sm:$0xf]  ;;  %v209_v27 = vld [vmem:[#allocation2 + $0x38] sm:$0xf0] }
  0x12   :  { %148 = vmatpush.bf16.msra.mxu0 %v232_v10  ;;  %v208_v28 = vor.u32 %v252_v25, %v207_v24  ;;  %v212_v29 = vor.u32 %v251_v26, %v209_v27  ;;  %v199_v30 = vld [vmem:[#allocation2 + $0x20] sm:$0xf]  ;;  %v250_v31 = vld [vmem:[#allocation2 + $0x24] sm:$0xf0]  ;;  %v249_v32 = vld [vmem:[#allocation2 + $0x24] sm:$0xf] }
  0x13   :  { %161 = vmatpush.bf16.msra.mxu1 %v236_v11  ;;  %v201_v33 = vld [vmem:[#allocation2 + $0x28] sm:$0xf0]  ;;  %v200_v34 = vor.u32 %v250_v31, %v199_v30  ;;  %v191_v36 = vld [vmem:[#allocation2 + $0x10] sm:$0xf]  ;;  %v248_v37 = vld [vmem:[#allocation2 + $0x14] sm:$0xf0] }
  0x14   :  { %v204_v35 = vor.u32 %v249_v32, %v201_v33  ;;  %v247_v38 = vld [vmem:[#allocation2 + $0x14] sm:$0xf]  ;;  %v193_v39 = vld [vmem:[#allocation2 + $0x18] sm:$0xf0]  ;;  %v192_v40 = vor.u32 %v248_v37, %v191_v36  ;;  %v183_v42 = vld [vmem:[#allocation2] sm:$0xf] }
  0x15   :  { %v196_v41 = vor.u32 %v247_v38, %v193_v39  ;;  %v246_v43 = vld [vmem:[#allocation2 + $0x4] sm:$0xf0]  ;;  %v245_v44 = vld [vmem:[#allocation2 + $0x4] sm:$0xf]  ;;  %v185_v45 = vld [vmem:[#allocation2 + $0x8] sm:$0xf0] }
  0x16   :  { %149 = vmatpush.bf16.msra.mxu0 %v224_v16  ;;  %v184_v46 = vor.u32 %v246_v43, %v183_v42  ;;  %v188_v47 = vor.u32 %v245_v44, %v185_v45  ;;  %v44_v48 = vld [vmem:[%s353_s0] sm:$0xf] }
  0x17   :  { %162 = vmatpush.bf16.msra.mxu1 %v228_v17  ;;  %v61_v49 = vld [vmem:[#allocation4] sm:$0x3] }
  0x18   :  { %v63_v50 = vperm.slane %v61_v49, 0  ;;  %v64_v51 = vperm.slane %v61_v49, 1 }
  0x1a   :  { %150 = vmatpush.bf16.msra.mxu0 %v216_v22 }
  0x1b   :  { %163 = vmatpush.bf16.msra.mxu1 %v220_v23 }
  0x1e   :  { %151 = vmatpush.bf16.msra.mxu0 %v208_v28 }
  0x1f   :  { %164 = vmatpush.bf16.msra.mxu1 %v212_v29 }
  0x22   :  { %152 = vmatpush.bf16.msra.mxu0 %v200_v34 }
  0x23   :  { %165 = vmatpush.bf16.msra.mxu1 %v204_v35 }
  0x26   :  { %153 = vmatpush.bf16.msra.mxu0 %v192_v40 }
  0x27   :  { %166 = vmatpush.bf16.msra.mxu1 %v196_v41 }
  0x2a   :  { %154 = vmatpush.bf16.msra.mxu0 %v184_v46 }
  0x2b   :  { %167 = vmatpush.bf16.msra.mxu1 %v188_v47 }
  0x2d   :  { %155 = vmatmul.bf16.vlgmr.msra.gmra.mxu0 %v44_v48 }
  0x2e   :  { %168 = vmatmul.bf16.vlgmr.msra.gmra.mxu1 %v44_v48 }
  0xaa   :  { %v156_v52 = vpop.f32.mrf.mxu0 }
  0xab   :  { %v157_v53 = vadd.f32 %v156_v52, %v63_v50  ;;  %v169_v54 = vpop.f32.mrf.mxu1 }
  0xac   :  { %v170_v55 = vadd.f32 %v169_v54, %v64_v51 }
  0xae   :  { %v173_v56 = vpack.c.bf16 %v170_v55, %v157_v53 }
  0xb0   :  { %174 = vst [vmem:[%s356_s3] sm:$0xff] %v173_v56 }
  0xb2   :  { %v158_v57 = vpop.f32.mrf.mxu0 }
  0xb3   :  { %v171_v58 = vpop.f32.mrf.mxu1 }
  0xb4   :  { %179 = vsyncpa [#allocation3], 1 }
  0xb5   :  { %180 = vsyncpa [#allocation5], 1 }

// kernel: unet_forward.10
= control target key start
LH: loop header
LB: loop body
LE: loop exit
PB: predicated region body
PF: predicated region fallthrough
CT: control target
= control target key end

     0   :  { %16 = vsyncpa [#allocation3], 0  ;;  %s1531_s0 = inlined_call_operand.vmem [shape: bf16[8,64], index: 0, kind: input, shape index: {}]   ;;  %s1532_s1 = inlined_call_operand.hbm [shape: bf16[8,8], index: 1, kind: input, shape index: {}]   ;;  %s1533_s2 = inlined_call_operand.hbm [shape: bf16[8,8], index: 2, kind: input, shape index: {}]   ;;  %s1534_s3 = inlined_call_operand.hbm [shape: bf16[3,64,128], index: 3, kind: input, shape index: {}]   ;;  %s1535_s4 = inlined_call_operand.hbm [shape: bf16[3,128,128], index: 4, kind: input, shape index: {}]   ;;  %s1536_s5 = inlined_call_operand.hbm [shape: f32[128,32], index: 5, kind: input, shape index: {}]   ;;  %s1537_s6 = inlined_call_operand.hbm [shape: f32[32,128], index: 6, kind: input, shape index: {}]   ;;  %s1538_s7 = inlined_call_operand.vmem [shape: f32[1,32], index: 7, kind: input, shape index: {}, may-alias: {7,9}]   ;;  %s1539_s8 = inlined_call_operand.vmem [shape: f32[1,32], index: 8, kind: input, shape index: {}, may-alias: {8,10}]   ;;  %s1540_s9 = inlined_call_operand.vmem [shape: f32[1,32], index: 9, kind: input, shape index: {}, may-alias: {7,9}]   ;;  %s1541_s10 = inlined_call_operand.vmem [shape: f32[1,32], index: 10, kind: input, shape index: {}, may-alias: {8,10}]   ;;  %s1542_s11 = inlined_call_operand.vmem [shape: bf16[8,128], index: 11, kind: output, shape index: {}]  }
   0x1   :  { %17 = vsyncpa [#allocation5], 0 }
   0x2   :  { %18 = vsyncpa [#allocation8], 0  ;;  %s38_s19 = sshll.u32 %s1533_s2, 4  ;;  %s39_s19 = int_to_ptr.hbm [resolvable:$true] %s38_s19 }
   0x3   :  { %19 = vsyncpa [#allocation11], 0  ;;  %s1268_s20 = smov [#allocation4]   ;;  %s61_s24 = sshll.u32 %s1535_s4, 4  ;;  %s62_s24 = int_to_ptr.hbm [resolvable:$true] %s61_s24 }
   0x4   :  { %s40_s21 = sshll.u32 %s1268_s20, 4  ;;  %s1269_s25 = smov [#allocation7]   ;;  %s41_s21 = int_to_ptr.vmem [resolvable:$true] %s40_s21 }
   0x5   :  { %43 = dma.hbm_to_vmem [thread:$0]  %s39_s19, 64, %s41_s21, [#allocation5]  }
   0x6   :  { %s63_s26 = sshll.u32 %s1269_s25, 4  ;;  %s27_s29 = sshll.u32 %s1532_s1, 4  ;;  %s64_s26 = int_to_ptr.vmem [resolvable:$true] %s63_s26  ;;  %s28_s29 = int_to_ptr.hbm [resolvable:$true] %s27_s29 }
   0x7   :  { %s1270_s2 = smov 64   ;;  %s1271_s30 = smov 4  }
   0x8   :  { %69 = dma.hbm_to_vmem [thread:$0]  %s62_s24, 3072, %s64_s26, [#allocation8], %s1270_s2, %s1270_s2, %s1271_s30  }
   0x9   :  { %s48_s14 = sshll.u32 %s1534_s3, 4  ;;  %s1272_s15 = smov [#allocation2]   ;;  %s49_s14 = int_to_ptr.hbm [resolvable:$true] %s48_s14 }
   0xa   :  { %s29_s16 = sshll.u32 %s1272_s15, 4  ;;  %s1273_s4 = smov [#allocation6]   ;;  %s30_s16 = int_to_ptr.vmem [resolvable:$true] %s29_s16 }
   0xb   :  { %32 = dma.hbm_to_vmem [thread:$0]  %s28_s29, 64, %s30_s16, [#allocation3]  }
   0xc   :  { %s50_s17 = sshll.u32 %s1273_s4, 4  ;;  %s74_s1 = sshll.u32 %s1536_s5, 4  ;;  %s51_s17 = int_to_ptr.vmem [resolvable:$true] %s50_s17  ;;  %s75_s1 = int_to_ptr.hbm [resolvable:$true] %s74_s1 }
   0xd   :  { %56 = dma.hbm_to_vmem [thread:$0]  %s49_s14, 1536, %s51_s17, [#allocation5], %s1270_s2, %s1270_s2, %s1271_s30  }
   0xe   :  { %s1274_s20 = smov [#allocation9]   ;;  %s87_s3 = sshll.u32 %s1537_s6, 4  ;;  %s88_s3 = int_to_ptr.hbm [resolvable:$true] %s87_s3 }
   0xf   :  { %s76_s21 = sshll.u32 %s1274_s20, 4  ;;  %s1275_s24 = smov 128   ;;  %s77_s21 = int_to_ptr.vmem [resolvable:$true] %s76_s21 }
  0x10   :  { %s1276_s25 = smov 8   ;;  %s1277_s26 = smov [#allocation10]  }
  0x11   :  { %82 = dma.hbm_to_vmem [thread:$0]  %s75_s1, 2048, %s77_s21, [#allocation8], %s1275_s24, %s1275_s24, %s1276_s25  }
  0x12   :  { %s89_s27 = sshll.u32 %s1277_s26, 4  ;;  %s90_s27 = int_to_ptr.vmem [resolvable:$true] %s89_s27 }
  0x13   :  { %95 = dma.hbm_to_vmem [thread:$0]  %s88_s3, 512, %s90_s27, [#allocation11], %s1275_s24, %s1275_s24, %s1276_s25  }
  0x14   :  { %1260 = dma.done.wait [#allocation3], 64  }
  0x15   :  { %1261 = vsyncadd [#allocation3], 4294967232 }
  0x16   :  { %1262 = dma.done.wait [#allocation5], 1600  }
  0x17   :  { %1263 = vsyncadd [#allocation5], 4294965696 }
  0x18   :  { %1264 = dma.done.wait [#allocation8], 5120  }
  0x19   :  { %1265 = vsyncadd [#allocation8], 4294962176 }
  0x1a   :  { %1266 = dma.done.wait [#allocation11], 512  }
  0x1b   :  { %1267 = vsyncadd [#allocation11], 4294966784  ;;  %vm136_vm0 = vcmask 1043456   ;;  %v131_v0 = vld [vmem:[%s1531_s0] sm:$0xf]  ;;  %vm132_vm1 = vcmask 64512  }
  0x1c   :  { %v138_v1 = vsel %vm136_vm0, %v131_v0, 0  ;;  %v1360_v2 = vld [vmem:[#allocation2] sm:$0xf]  ;;  %v1362_v4 = vld [vmem:[#allocation4] sm:$0xf]  ;;  %v1072_v7 = vld [vmem:[#allocation6 + $0x30] sm:$0xff] }
  0x1d   :  { %v1073_v3 = vld [vmem:[#allocation6 + $0x38] sm:$0xff]  ;;  %147 = vmatpush.bf16.msra.mxu3 %v138_v1  ;;  %164 = vmatpush.bf16.msra.mxu1 %v138_v1  ;;  %v1068_v8 = vld [vmem:[#allocation6 + $0x10] sm:$0xff]  ;;  %v1071_v10 = vld [vmem:[#allocation6 + $0x28] sm:$0xff]  ;;  %vm212_vm2 = vcmask 523264   ;;  %vm365_vm3 = vcmask 261120  }
  0x1e   :  { %v1069_v5 = vld [vmem:[#allocation6 + $0x18] sm:$0xff]  ;;  %219 = vmatpush.bf16.msra.mxu2 %v1073_v3  ;;  %v1076_v9 = vld [vmem:[#allocation6 + $0x50] sm:$0xff]  ;;  %v1067_v11 = vld [vmem:[#allocation6 + $0x8] sm:$0xff] }
  0x1f   :  { %v1077_v6 = vld [vmem:[#allocation6 + $0x58] sm:$0xff]  ;;  %v1075_v12 = vld [vmem:[#allocation6 + $0x48] sm:$0xff]  ;;  %v1070_v13 = vld [vmem:[#allocation6 + $0x20] sm:$0xff] }
  0x20   :  { %308 = vmatpush.bf16.msra.mxu0 %v1077_v6  ;;  %909 = vmatmul.msk.bf16.vlgmr.msra.gmra.mxu3 %vm132_vm1, %v1360_v2  ;;  %v1066_v14 = vld [vmem:[#allocation6] sm:$0xff]  ;;  %v1369_v16 = vld [vmem:[#allocation9 + $0x78] sm:$0xff]  ;;  %v1371_v17 = vld [vmem:[#allocation9 + $0x70] sm:$0xff] }
  0x21   :  { %259 = vmatpush.bf16.msrb.mxu3 %v1069_v5  ;;  %910 = vmatmul.msk.bf16.vlgmr.msra.gmra.mxu1 %vm132_vm1, %v1362_v4  ;;  %v1074_v15 = vld [vmem:[#allocation6 + $0x40] sm:$0xff]  ;;  %v1375_v18 = vld [vmem:[#allocation9 + $0x68] sm:$0xff]  ;;  %v1387_v28 = vld [vmem:[#allocation9 + $0x58] sm:$0xff] }
  0x22   :  { %220 = vmatpush.bf16.msra.mxu2 %v1072_v7  ;;  %340 = vmatpush.msrb.mxu1 %v1369_v16  ;;  %v1380_v19 = vld [vmem:[#allocation9 + $0x60] sm:$0xff]  ;;  %v1389_v29 = vld [vmem:[#allocation9 + $0x50] sm:$0xff]  ;;  %v1393_v30 = vld [vmem:[#allocation9 + $0x48] sm:$0xff] }
  0x23   :  { %v1399_v31 = vld [vmem:[#allocation9 + $0x40] sm:$0xff]  ;;  %v1403_v32 = vld [vmem:[#allocation9 + $0x38] sm:$0xff]  ;;  %v1407_v33 = vld [vmem:[#allocation9 + $0x30] sm:$0xff] }
  0x24   :  { %309 = vmatpush.bf16.msra.mxu0 %v1076_v9  ;;  %341 = vmatpush.msrb.mxu1 %v1371_v17  ;;  %v1409_v34 = vld [vmem:[#allocation9 + $0x28] sm:$0xff]  ;;  %v1415_v35 = vld [vmem:[#allocation9 + $0x20] sm:$0xff]  ;;  %v1418_v36 = vld [vmem:[#allocation9 + $0x18] sm:$0xff] }
  0x25   :  { %260 = vmatpush.bf16.msrb.mxu3 %v1068_v8  ;;  %v1421_v37 = vld [vmem:[#allocation9 + $0x10] sm:$0xff]  ;;  %v1425_v38 = vld [vmem:[#allocation9 + $0x8] sm:$0xff]  ;;  %v1429_v39 = vld [vmem:[#allocation9] sm:$0xff] }
  0x26   :  { %221 = vmatpush.bf16.msra.mxu2 %v1071_v10  ;;  %342 = vmatpush.msrb.mxu1 %v1375_v18  ;;  %v1435_v40 = vld [vmem:[#allocation10 + $0x18] sm:$0xff]  ;;  %v1437_v41 = vld [vmem:[#allocation10 + $0x10] sm:$0xff]  ;;  %v1461_v54 = vld [vmem:[#allocation10 + $0x8] sm:$0xff] }
  0x27   :  { %v1464_v55 = vld [vmem:[#allocation10] sm:$0xff] }
  0x28   :  { %310 = vmatpush.bf16.msra.mxu0 %v1075_v12  ;;  %343 = vmatpush.msrb.mxu1 %v1380_v19 }
  0x29   :  { %261 = vmatpush.bf16.msrb.mxu3 %v1067_v11 }
  0x2a   :  { %222 = vmatpush.bf16.msra.mxu2 %v1070_v13  ;;  %344 = vmatpush.msrb.mxu1 %v1387_v28 }
  0x2c   :  { %311 = vmatpush.bf16.msra.mxu0 %v1074_v15  ;;  %345 = vmatpush.msrb.mxu1 %v1389_v29 }
  0x2d   :  { %927 = vmatmul.msk.bf16.vlgmr.msra.gmra.mxu2 %vm212_vm2, %v131_v0  ;;  %262 = vmatpush.bf16.msrb.mxu3 %v1066_v14  ;;  %v419_v14 = vld [vmem:[%s1538_s7] sm:$0x1] }
  0x2e   :  { %346 = vmatpush.msrb.mxu1 %v1393_v30  ;;  %381 = vmatpush.msrb.mxu2 %v1435_v40 }
  0x30   :  { %347 = vmatpush.msrb.mxu1 %v1399_v31  ;;  %382 = vmatpush.msrb.mxu2 %v1437_v41 }
  0x31   :  { %398 = vmatpush.msra.mxu3 %v1369_v16 }
  0x32   :  { %348 = vmatpush.msrb.mxu1 %v1403_v32  ;;  %383 = vmatpush.msrb.mxu2 %v1461_v54 }
  0x33   :  { %399 = vmatpush.msra.mxu3 %v1371_v17 }
  0x34   :  { %349 = vmatpush.msrb.mxu1 %v1407_v33  ;;  %384 = vmatpush.msrb.mxu2 %v1464_v55 }
  0x35   :  { %400 = vmatpush.msra.mxu3 %v1375_v18 }
  0x36   :  { %350 = vmatpush.msrb.mxu1 %v1409_v34  ;;  %450 = vmatpush.msra.mxu2 %v1435_v40 }
  0x37   :  { %401 = vmatpush.msra.mxu3 %v1380_v19 }
  0x38   :  { %351 = vmatpush.msrb.mxu1 %v1415_v35  ;;  %451 = vmatpush.msra.mxu2 %v1437_v41 }
  0x39   :  { %402 = vmatpush.msra.mxu3 %v1387_v28 }
  0x3a   :  { %352 = vmatpush.msrb.mxu1 %v1418_v36  ;;  %452 = vmatpush.msra.mxu2 %v1461_v54 }
  0x3b   :  { %403 = vmatpush.msra.mxu3 %v1389_v29 }
  0x3c   :  { %353 = vmatpush.msrb.mxu1 %v1421_v37  ;;  %453 = vmatpush.msra.mxu2 %v1464_v55 }
  0x3d   :  { %404 = vmatpush.msra.mxu3 %v1393_v30 }
  0x3e   :  { %354 = vmatpush.msrb.mxu1 %v1425_v38 }
  0x3f   :  { %405 = vmatpush.msra.mxu3 %v1399_v31 }
  0x40   :  { %355 = vmatpush.msrb.mxu1 %v1429_v39 }
  0x41   :  { %406 = vmatpush.msra.mxu3 %v1403_v32 }
  0x43   :  { %407 = vmatpush.msra.mxu3 %v1407_v33 }
  0x45   :  { %408 = vmatpush.msra.mxu3 %v1409_v34 }
  0x47   :  { %409 = vmatpush.msra.mxu3 %v1415_v35 }
  0x49   :  { %410 = vmatpush.msra.mxu3 %v1418_v36 }
  0x4b   :  { %411 = vmatpush.msra.mxu3 %v1421_v37 }
  0x4d   :  { %412 = vmatpush.msra.mxu3 %v1425_v38 }
  0x4f   :  { %413 = vmatpush.msra.mxu3 %v1429_v39 }
  0x9e   :  { %v166_v20 = vpop.f32.mrf.mxu1 }
  0x9f   :  { %v170_v21 = vpack.c.bf16 %v166_v20, %v166_v20 }
  0xa1   :  { %961 = vmatmul.msk.bf16.vlgmr.msra.gmra.mxu0 %vm212_vm2, %v170_v21  ;;  %v1093_v21 = vld [vmem:[#allocation7 + $0x78] sm:$0xff] }
  0xa3   :  { %v149_v22 = vpop.f32.mrf.mxu3 }
  0xa4   :  { %v153_v23 = vpack.c.bf16 %v149_v22, %v149_v22 }
  0xa6   :  { %v168_v24 = vpop.f32.mrf.mxu1  ;;  %944 = vmatmul.msk.bf16.vlgmr.msrb.gmra.mxu3 %vm212_vm2, %v153_v23  ;;  %v1092_v23 = vld [vmem:[#allocation7 + $0x70] sm:$0xff] }
  0xa7   :  { %758 = vmatpush.msrb.mxu3 %v1369_v16 }
  0xa9   :  { %759 = vmatpush.msrb.mxu3 %v1371_v17 }
  0xab   :  { %v151_v25 = vpop.f32.mrf.mxu3  ;;  %760 = vmatpush.msrb.mxu3 %v1375_v18 }
  0xac   :  { %v432_v25 = vld [vmem:[%s1539_s8] sm:$0x1] }
  0xad   :  { %761 = vmatpush.msrb.mxu3 %v1380_v19 }
  0xaf   :  { %762 = vmatpush.msrb.mxu3 %v1387_v28 }
  0xb0   :  { %v224_v26 = vpop.f32.mrf.mxu2 }
  0xb1   :  { %763 = vmatpush.msrb.mxu3 %v1389_v29 }
  0xb3   :  { %764 = vmatpush.msrb.mxu3 %v1393_v30 }
  0xb5   :  { %765 = vmatpush.msrb.mxu3 %v1399_v31 }
  0xb7   :  { %766 = vmatpush.msrb.mxu3 %v1403_v32 }
  0xb8   :  { %v226_v27 = vpop.f32.mrf.mxu2 }
  0xb9   :  { %767 = vmatpush.msrb.mxu3 %v1407_v33 }
  0xbb   :  { %768 = vmatpush.msrb.mxu3 %v1409_v34 }
  0xbd   :  { %769 = vmatpush.msrb.mxu3 %v1415_v35 }
  0xbf   :  { %770 = vmatpush.msrb.mxu3 %v1418_v36 }
  0xc1   :  { %771 = vmatpush.msrb.mxu3 %v1421_v37 }
  0xc3   :  { %772 = vmatpush.msrb.mxu3 %v1425_v38 }
  0xc5   :  { %773 = vmatpush.msrb.mxu3 %v1429_v39 }
 0x11e   :  { %v313_v42 = vpop.f32.mrf.mxu0 }
 0x126   :  { %v315_v43 = vpop.f32.mrf.mxu0 }
 0x127   :  { %v1089_v43 = vld [vmem:[#allocation7 + $0x58] sm:$0xff] }
 0x129   :  { %v264_v44 = vpop.f32.mrf.mxu3 }
 0x12a   :  { %v265_v45 = vadd.f32 %v264_v44, %v224_v26  ;;  %v1091_v26 = vld [vmem:[#allocation7 + $0x68] sm:$0xff]  ;;  %v1088_v44 = vld [vmem:[#allocation7 + $0x50] sm:$0xff] }
 0x12c   :  { %v1450_v46 = vadd.f32 %v313_v42, %v265_v45  ;;  %v1090_v42 = vld [vmem:[#allocation7 + $0x60] sm:$0xff]  ;;  %v1087_v45 = vld [vmem:[#allocation7 + $0x48] sm:$0xff] }
 0x12e   :  { %v318_v47 = vrot.slane %v1450_v46, 4 }
 0x130   :  { %v319_v48 = vadd.f32 %v318_v47, %v1450_v46  ;;  %v1086_v47 = vld [vmem:[#allocation7 + $0x40] sm:$0xff] }
 0x131   :  { %v266_v49 = vpop.f32.mrf.mxu3 }
 0x132   :  { %v320_v50 = vrot.slane %v319_v48, 2 }
 0x134   :  { %v321_v51 = vadd.f32 %v320_v50, %v319_v48 }
 0x136   :  { %v322_v52 = vrot.slane %v321_v51, 1 }
 0x138   :  { %v323_v53 = vadd.f32 %v322_v52, %v321_v51 }
 0x13a   :  { %356 = vmatmul.f32.vlgmr.msrb.gmra.mxu1 %v323_v53 }
 0x1b7   :  { %v357_v56 = vpop.f32.mrf.mxu1 }
 0x1b8   :  { %v360_v57 = vmul.f32 0.03125, %v357_v56 }
 0x1ba   :  { %962 = vmatmul.msk.f32.vlgmr.msrb.gmra.mxu2 %vm365_vm3, %v360_v57 }
 0x1bb   :  { %473 = vmatpush.msrb.mxu2 %v1435_v40 }
 0x1bd   :  { %474 = vmatpush.msrb.mxu2 %v1437_v41 }
 0x1bf   :  { %475 = vmatpush.msrb.mxu2 %v1461_v54 }
 0x1c1   :  { %476 = vmatpush.msrb.mxu2 %v1464_v55 }
 0x23d   :  { %v386_v58 = vpop.f32.mrf.mxu2 }
 0x23e   :  { %v389_v59 = vperm.slane %v386_v58, 0  ;;  %v1085_v58 = vld [vmem:[#allocation7 + $0x38] sm:$0xff] }
 0x240   :  { %v390_v60 = vsub.f32 %v1450_v46, %v389_v59  ;;  %v1101_v59 = vld [vmem:[#allocation7 + $0xb8] sm:$0xff] }
 0x242   :  { %v391_v61 = vmul.f32 %v390_v60, %v390_v60 }
 0x244   :  { %v392_v62 = vrot.slane %v391_v61, 4 }
 0x246   :  { %v393_v63 = vadd.f32 %v392_v62, %v391_v61  ;;  %v1084_v61 = vld [vmem:[#allocation7 + $0x30] sm:$0xff] }
 0x247   :  { %v1100_v62 = vld [vmem:[#allocation7 + $0xb0] sm:$0xff] }
 0x248   :  { %v394_v0 = vrot.slane %v393_v63, 2 }
 0x24a   :  { %v395_v1 = vadd.f32 %v394_v0, %v393_v63  ;;  %v1099_v63 = vld [vmem:[#allocation7 + $0xa8] sm:$0xff]  ;;  %v1082_v0 = vld [vmem:[#allocation7 + $0x20] sm:$0xff] }
 0x24c   :  { %v396_v3 = vrot.slane %v395_v1, 1 }
 0x24e   :  { %v397_v5 = vadd.f32 %v396_v3, %v395_v1  ;;  %v1098_v1 = vld [vmem:[#allocation7 + $0xa0] sm:$0xff]  ;;  %v1081_v3 = vld [vmem:[#allocation7 + $0x18] sm:$0xff] }
 0x250   :  { %414 = vmatmul.f32.vlgmr.msra.gmra.mxu3 %v397_v5  ;;  %v1097_v5 = vld [vmem:[#allocation7 + $0x98] sm:$0xff] }
 0x251   :  { %863 = vmatpush.msra.mxu3 %v1435_v40 }
 0x253   :  { %864 = vmatpush.msra.mxu3 %v1437_v41 }
 0x255   :  { %865 = vmatpush.msra.mxu3 %v1461_v54 }
 0x257   :  { %866 = vmatpush.msra.mxu3 %v1464_v55 }
 0x2d3   :  { %v415_v6 = vpop.f32.mrf.mxu3 }
 0x2d4   :  { %v418_v7 = vmul.f32 0.03125, %v415_v6  ;;  %v1080_v6 = vld [vmem:[#allocation7 + $0x10] sm:$0xff] }
 0x2d6   :  { %v420_v8 = vadd.f32 1e-05, %v418_v7  ;;  %v1096_v7 = vld [vmem:[#allocation7 + $0x90] sm:$0xff] }
 0x2d8   :  { %1112 = vrsqrt.f32 %v420_v8  ;;  %vm427_vm5 = vweird.f32 %v420_v8 }
 0x2de   :  { %v1113_v9 = vpop.eup %1112 }
 0x2df   :  { %v422_v10 = vmul.f32 %v1113_v9, %v420_v8  ;;  %vm428_vm4 = vweird.f32 %v1113_v9  ;;  %v1078_v8 = vld [vmem:[#allocation7] sm:$0xff] }
 0x2e0   :  { %vm429_vm6 = vmor %vm427_vm5, %vm428_vm4 }
 0x2e1   :  { %v423_v11 = vmul.f32 %v1113_v9, %v422_v10 }
 0x2e3   :  { %v424_v12 = vmul.f32 0.5, %v423_v11 }
 0x2e5   :  { %v425_v13 = vsub.f32 1.5, %v424_v12 }
 0x2e7   :  { %v426_v15 = vmul.f32 %v1113_v9, %v425_v13 }
 0x2e9   :  { %v430_v20 = vsel %vm429_vm6, %v1113_v9, %v426_v15  ;;  %v1094_v9 = vld [vmem:[#allocation7 + $0x80] sm:$0xff] }
 0x2ea   :  { %v431_v22 = vmul.f32 %v430_v20, %v419_v14 }
 0x2ec   :  { %963 = vmatmul.msk.f32.vlgmr.msra.gmra.mxu2 %vm365_vm3, %v431_v22  ;;  %v433_v24 = vmul.f32 %v431_v22, %v360_v57 }
 0x2ed   :  { %599 = vmatpush.bf16.msra.mxu2 %v1093_v21 }
 0x2ee   :  { %v434_v27 = vsub.f32 %v432_v25, %v433_v24 }
 0x2f1   :  { %600 = vmatpush.bf16.msra.mxu2 %v1092_v23 }
 0x2f4   :  { %964 = vmatmul.msk.f32.vlgmr.msrb.gmra.mxu2 %vm365_vm3, %v434_v27 }
 0x2f5   :  { %601 = vmatpush.bf16.msra.mxu2 %v1091_v26 }
 0x2f9   :  { %602 = vmatpush.bf16.msra.mxu2 %v1090_v42 }
 0x2fd   :  { %603 = vmatpush.bf16.msra.mxu2 %v1089_v43 }
 0x301   :  { %604 = vmatpush.bf16.msra.mxu2 %v1088_v44 }
 0x305   :  { %605 = vmatpush.bf16.msra.mxu2 %v1087_v45 }
 0x309   :  { %606 = vmatpush.bf16.msra.mxu2 %v1086_v47 }
 0x30d   :  { %794 = vmatpush.msrb.mxu2 %v1435_v40 }
 0x30f   :  { %795 = vmatpush.msrb.mxu2 %v1437_v41 }
 0x311   :  { %796 = vmatpush.msrb.mxu2 %v1461_v54 }
 0x313   :  { %797 = vmatpush.msrb.mxu2 %v1464_v55 }
 0x36f   :  { %v455_v48 = vpop.f32.mrf.mxu2 }
 0x370   :  { %v481_v49 = vperm.slane %v455_v48, 0 }
 0x372   :  { %v482_v51 = vmul.f32 %v481_v49, %v1450_v46  ;;  %v1083_v46 = vld [vmem:[#allocation7 + $0x28] sm:$0xff]  ;;  %v832_v49 = vld [vmem:[%s1540_s9] sm:$0x1] }
 0x377   :  { %v478_v50 = vpop.f32.mrf.mxu2 }
 0x378   :  { %v483_v52 = vperm.slane %v478_v50, 0 }
 0x37a   :  { %v484_v53 = vadd.f32 %v483_v52, %v482_v51 }
 0x37c   :  { %v485_v56 = vmax.f32 %v484_v53, 0.0  ;;  %v845_v53 = vld [vmem:[%s1541_s10] sm:$0x1] }
 0x37e   :  { %v486_v57 = vpack.c.bf16 %v485_v56, %v485_v56 }
 0x380   :  { %607 = vmatmul.bf16.vlgmr.msra.gmra.mxu2 %v486_v57  ;;  %v488_v60 = vsel %vm136_vm0, %v486_v57, 0 }
 0x381   :  { %497 = vmatpush.bf16.msrb.mxu0 %v488_v60  ;;  %511 = vmatpush.bf16.msra.mxu1 %v488_v60 }
 0x384   :  { %965 = vmatmul.msk.bf16.vlgmr.msrb.gmra.mxu0 %vm132_vm1, %v1360_v2  ;;  %966 = vmatmul.msk.bf16.vlgmr.msra.gmra.mxu1 %vm132_vm1, %v1362_v4  ;;  %v1079_v2 = vld [vmem:[#allocation7 + $0x8] sm:$0xff] }
 0x385   :  { %660 = vmatpush.bf16.msra.mxu0 %v1085_v58  ;;  %738 = vmatpush.bf16.msrb.mxu1 %v1101_v59  ;;  %v1095_v4 = vld [vmem:[#allocation7 + $0x88] sm:$0xff] }
 0x389   :  { %661 = vmatpush.bf16.msra.mxu0 %v1084_v61  ;;  %739 = vmatpush.bf16.msrb.mxu1 %v1100_v62 }
 0x38d   :  { %662 = vmatpush.bf16.msra.mxu0 %v1083_v46  ;;  %740 = vmatpush.bf16.msrb.mxu1 %v1099_v63 }
 0x391   :  { %663 = vmatpush.bf16.msra.mxu0 %v1082_v0  ;;  %741 = vmatpush.bf16.msrb.mxu1 %v1098_v1 }
 0x395   :  { %664 = vmatpush.bf16.msra.mxu0 %v1081_v3  ;;  %742 = vmatpush.bf16.msrb.mxu1 %v1097_v5 }
 0x399   :  { %665 = vmatpush.bf16.msra.mxu0 %v1080_v6  ;;  %743 = vmatpush.bf16.msrb.mxu1 %v1096_v7 }
 0x39d   :  { %666 = vmatpush.bf16.msra.mxu0 %v1079_v2  ;;  %744 = vmatpush.bf16.msrb.mxu1 %v1095_v4 }
 0x3a1   :  { %667 = vmatpush.bf16.msra.mxu0 %v1078_v8  ;;  %745 = vmatpush.bf16.msrb.mxu1 %v1094_v9 }
 0x3a5   :  { %811 = vmatpush.msrb.mxu0 %v1369_v16  ;;  %886 = vmatpush.msra.mxu1 %v1435_v40 }
 0x3a7   :  { %812 = vmatpush.msrb.mxu0 %v1371_v17  ;;  %887 = vmatpush.msra.mxu1 %v1437_v41 }
 0x3a9   :  { %813 = vmatpush.msrb.mxu0 %v1375_v18  ;;  %888 = vmatpush.msra.mxu1 %v1461_v54 }
 0x3ab   :  { %814 = vmatpush.msrb.mxu0 %v1380_v19  ;;  %889 = vmatpush.msra.mxu1 %v1464_v55 }
 0x3ad   :  { %815 = vmatpush.msrb.mxu0 %v1387_v28 }
 0x3af   :  { %816 = vmatpush.msrb.mxu0 %v1389_v29 }
 0x3b1   :  { %817 = vmatpush.msrb.mxu0 %v1393_v30 }
 0x3b3   :  { %818 = vmatpush.msrb.mxu0 %v1399_v31 }
 0x3b5   :  { %819 = vmatpush.msrb.mxu0 %v1403_v32 }
 0x3b7   :  { %820 = vmatpush.msrb.mxu0 %v1407_v33 }
 0x3b9   :  { %821 = vmatpush.msrb.mxu0 %v1409_v34 }
 0x3bb   :  { %822 = vmatpush.msrb.mxu0 %v1415_v35 }
 0x3bd   :  { %823 = vmatpush.msrb.mxu0 %v1418_v36 }
 0x3bf   :  { %824 = vmatpush.msrb.mxu0 %v1421_v37 }
 0x3c1   :  { %825 = vmatpush.msrb.mxu0 %v1425_v38 }
 0x3c3   :  { %826 = vmatpush.msrb.mxu0 %v1429_v39 }
 0x401   :  { %v499_v16 = vpop.f32.mrf.mxu0  ;;  %v513_v17 = vpop.f32.mrf.mxu1 }
 0x402   :  { %v503_v18 = vpack.c.bf16 %v499_v16, %v499_v16  ;;  %v517_v19 = vpack.c.bf16 %v513_v17, %v513_v17 }
 0x403   :  { %v608_v28 = vpop.f32.mrf.mxu2 }
 0x404   :  { %668 = vmatmul.bf16.vlgmr.msra.gmra.mxu0 %v503_v18  ;;  %746 = vmatmul.bf16.vlgmr.msrb.gmra.mxu1 %v517_v19 }
 0x409   :  { %v501_v29 = vpop.f32.mrf.mxu0  ;;  %v515_v30 = vpop.f32.mrf.mxu1 }
 0x40b   :  { %v610_v31 = vpop.f32.mrf.mxu2 }
 0x481   :  { %v669_v32 = vpop.f32.mrf.mxu0  ;;  %v747_v33 = vpop.f32.mrf.mxu1 }
 0x482   :  { %v670_v34 = vadd.f32 %v669_v32, %v608_v28 }
 0x484   :  { %v751_v35 = vadd.f32 %v747_v33, %v670_v34 }
 0x486   :  { %v752_v36 = vrot.slane %v751_v35, 4 }
 0x488   :  { %v753_v37 = vadd.f32 %v752_v36, %v751_v35 }
 0x489   :  { %v671_v40 = vpop.f32.mrf.mxu0  ;;  %v749_v38 = vpop.f32.mrf.mxu1 }
 0x48a   :  { %v754_v41 = vrot.slane %v753_v37, 2 }
 0x48c   :  { %v755_v39 = vadd.f32 %v754_v41, %v753_v37 }
 0x48e   :  { %v756_v54 = vrot.slane %v755_v39, 1 }
 0x490   :  { %v757_v55 = vadd.f32 %v756_v54, %v755_v39 }
 0x492   :  { %774 = vmatmul.f32.vlgmr.msrb.gmra.mxu3 %v757_v55 }
 0x515   :  { %v775_v10 = vpop.f32.mrf.mxu3 }
 0x516   :  { %v778_v11 = vmul.f32 0.03125, %v775_v10 }
 0x518   :  { %1063 = vmatmul.msk.f32.vlgmr.msrb.gmra.mxu2 %vm365_vm3, %v778_v11 }
 0x59b   :  { %v799_v12 = vpop.f32.mrf.mxu2 }
 0x59c   :  { %v802_v13 = vperm.slane %v799_v12, 0 }
 0x59e   :  { %v803_v14 = vsub.f32 %v751_v35, %v802_v13 }
 0x5a0   :  { %v804_v15 = vmul.f32 %v803_v14, %v803_v14 }
 0x5a2   :  { %v805_v20 = vrot.slane %v804_v15, 4 }
 0x5a4   :  { %v806_v21 = vadd.f32 %v805_v20, %v804_v15 }
 0x5a6   :  { %v807_v22 = vrot.slane %v806_v21, 2 }
 0x5a8   :  { %v808_v23 = vadd.f32 %v807_v22, %v806_v21 }
 0x5aa   :  { %v809_v24 = vrot.slane %v808_v23, 1 }
 0x5ac   :  { %v810_v25 = vadd.f32 %v809_v24, %v808_v23 }
 0x5ae   :  { %827 = vmatmul.f32.vlgmr.msrb.gmra.mxu0 %v810_v25 }
 0x62b   :  { %v828_v26 = vpop.f32.mrf.mxu0 }
 0x62c   :  { %v831_v27 = vmul.f32 0.03125, %v828_v26 }
 0x62e   :  { %v833_v42 = vadd.f32 1e-05, %v831_v27 }
 0x630   :  { %1114 = vrsqrt.f32 %v833_v42  ;;  %vm840_vm8 = vweird.f32 %v833_v42 }
 0x636   :  { %v1115_v43 = vpop.eup %1114 }
 0x637   :  { %v835_v44 = vmul.f32 %v1115_v43, %v833_v42  ;;  %vm841_vm7 = vweird.f32 %v1115_v43 }
 0x638   :  { %vm842_vm9 = vmor %vm840_vm8, %vm841_vm7 }
 0x639   :  { %v836_v45 = vmul.f32 %v1115_v43, %v835_v44 }
 0x63b   :  { %v837_v47 = vmul.f32 0.5, %v836_v45 }
 0x63d   :  { %v838_v48 = vsub.f32 1.5, %v837_v47 }
 0x63f   :  { %v839_v50 = vmul.f32 %v1115_v43, %v838_v48 }
 0x641   :  { %v843_v51 = vsel %vm842_vm9, %v1115_v43, %v839_v50 }
 0x642   :  { %v844_v52 = vmul.f32 %v843_v51, %v832_v49 }
 0x644   :  { %v846_v56 = vmul.f32 %v844_v52, %v778_v11  ;;  %1064 = vmatmul.msk.f32.vlgmr.msra.gmra.mxu3 %vm365_vm3, %v844_v52 }
 0x646   :  { %v847_v57 = vsub.f32 %v845_v53, %v846_v56 }
 0x648   :  { %1065 = vmatmul.msk.f32.vlgmr.msra.gmra.mxu1 %vm365_vm3, %v847_v57 }
 0x6c5   :  { %v891_v58 = vpop.f32.mrf.mxu1 }
 0x6c6   :  { %v896_v61 = vperm.slane %v891_v58, 0 }
 0x6c7   :  { %v868_v59 = vpop.f32.mrf.mxu3 }
 0x6c8   :  { %v894_v60 = vperm.slane %v868_v59, 0 }
 0x6ca   :  { %v895_v62 = vmul.f32 %v894_v60, %v751_v35 }
 0x6cc   :  { %v897_v46 = vadd.f32 %v896_v61, %v895_v62 }
 0x6ce   :  { %v898_v63 = vmax.f32 %v897_v46, 0.0 }
 0x6d0   :  { %v899_v0 = vpack.c.bf16 %v898_v63, %v898_v63 }
 0x6d2   :  { %900 = vst [vmem:[%s1542_s11] sm:$0xf] %v899_v0 }
 0x6d3   :  { %905 = vsyncpa [#allocation3], 1 }
 0x6d4   :  { %906 = vsyncpa [#allocation5], 1 }
 0x6d5   :  { %907 = vsyncpa [#allocation8], 1 }
 0x6d6   :  { %908 = vsyncpa [#allocation11], 1 }

// kernel: unet_forward.8
= control target key start
LH: loop header
LB: loop body
LE: loop exit
PB: predicated region body
PF: predicated region fallthrough
CT: control target
= control target key end

     0   :  { %s2194_s0 = inlined_call_operand.vmem [shape: bf16[32,16], index: 0, kind: input, shape index: {}]   ;;  %s2195_s1 = inlined_call_operand.hbm [shape: bf16[32,32], index: 1, kind: input, shape index: {}]   ;;  %s2196_s2 = inlined_call_operand.hbm [shape: bf16[32,32], index: 2, kind: input, shape index: {}]   ;;  %s2197_s3 = inlined_call_operand.hbm [shape: bf16[3,16,128], index: 3, kind: input, shape index: {}]   ;;  %s2198_s4 = inlined_call_operand.hbm [shape: bf16[3,128,128], index: 4, kind: input, shape index: {}]   ;;  %s2199_s5 = inlined_call_operand.hbm [shape: f32[128,8], index: 5, kind: input, shape index: {}]   ;;  %s2200_s6 = inlined_call_operand.vmem [shape: f32[8,128], index: 6, kind: input, shape index: {}]   ;;  %s2201_s7 = inlined_call_operand.vmem [shape: f32[1,8], index: 7, kind: input, shape index: {}, may-alias: {7,9}]   ;;  %s2202_s8 = inlined_call_operand.vmem [shape: f32[1,8], index: 8, kind: input, shape index: {}, may-alias: {8,10}]   ;;  %s2203_s9 = inlined_call_operand.vmem [shape: f32[1,8], index: 9, kind: input, shape index: {}, may-alias: {7,9}]   ;;  %s2204_s10 = inlined_call_operand.vmem [shape: f32[1,8], index: 10, kind: input, shape index: {}, may-alias: {8,10}]   ;;  %s2205_s11 = inlined_call_operand.hbm [shape: bf16[16,32], index: 11, kind: input, shape index: {}]   ;;  %s2206_s12 = inlined_call_operand.hbm [shape: bf16[16,32], index: 12, kind: input, shape index: {}]   ;;  %s2207_s13 = inlined_call_operand.hbm [shape: bf16[128,64], index: 13, kind: input, shape index: {}]   ;;  %s2208_s14 = inlined_call_operand.hbm [shape: bf16[128,64], index: 14, kind: input, shape index: {}]   ;;  %s2209_s15 = inlined_call_operand.vmem [shape: bf16[32,128], index: 15, kind: output, shape index: {0}]   ;;  %s2210_s16 = inlined_call_operand.vmem [shape: bf16[16,64], index: 16, kind: output, shape index: {1}]  }
   0x1   :  { %2212 = sst [smem:[#allocation21_spill]] %s2194_s0 }
   0x2   :  { %22 = vsyncpa [#allocation3], 0 }
   0x3   :  { %23 = vsyncpa [#allocation5], 0 }
   0x4   :  { %24 = vsyncpa [#allocation8], 0 }
   0x5   :  { %25 = vsyncpa [#allocation11], 0 }
   0x6   :  { %26 = vsyncpa [#allocation14], 0  ;;  %s46_s23 = sshll.u32 %s2196_s2, 4  ;;  %s1830_s24 = smov [#allocation4]   ;;  %s47_s23 = int_to_ptr.hbm [resolvable:$true] %s46_s23 }
   0x7   :  { %s48_s25 = sshll.u32 %s1830_s24, 4  ;;  %s72_s28 = sshll.u32 %s2198_s4, 4  ;;  %s49_s25 = int_to_ptr.vmem [resolvable:$true] %s48_s25  ;;  %s73_s28 = int_to_ptr.hbm [resolvable:$true] %s72_s28 }
   0x8   :  { %s1831_s29 = smov 64   ;;  %s1832_s30 = smov 4  }
   0x9   :  { %54 = dma.hbm_to_vmem [thread:$0]  %s47_s23, 256, %s49_s25, [#allocation5], %s1831_s29, %s1831_s29, %s1832_s30  }
   0xa   :  { %s1833_s0 = smov [#allocation7]   ;;  %s108_s2 = sshll.u32 %s2205_s11, 4  ;;  %s109_s2 = int_to_ptr.hbm [resolvable:$true] %s108_s2 }
   0xb   :  { %s74_s17 = sshll.u32 %s1833_s0, 4  ;;  %s134_s21 = sshll.u32 %s2207_s13, 4  ;;  %s75_s17 = int_to_ptr.vmem [resolvable:$true] %s74_s17  ;;  %s135_s21 = int_to_ptr.hbm [resolvable:$true] %s134_s21 }
   0xc   :  { %80 = dma.hbm_to_vmem [thread:$0]  %s73_s28, 3072, %s75_s17, [#allocation8], %s1831_s29, %s1831_s29, %s1832_s30  }
   0xd   :  { %s1834_s22 = smov [#allocation10]   ;;  %s1835_s23 = smov [#allocation13]  }
   0xe   :  { %s110_s24 = sshll.u32 %s1834_s22, 4  ;;  %s136_s11 = sshll.u32 %s1835_s23, 4  ;;  %s111_s24 = int_to_ptr.vmem [resolvable:$true] %s110_s24  ;;  %s137_s11 = int_to_ptr.vmem [resolvable:$true] %s136_s11 }
   0xf   :  { %116 = dma.hbm_to_vmem [thread:$0]  %s109_s2, 128, %s111_s24, [#allocation11], %s1831_s29, %s1831_s29, %s1832_s30  }
  0x10   :  { %s33_s27 = sshll.u32 %s2195_s1, 4  ;;  %s59_s0 = sshll.u32 %s2197_s3, 4  ;;  %s34_s27 = int_to_ptr.hbm [resolvable:$true] %s33_s27  ;;  %s60_s0 = int_to_ptr.hbm [resolvable:$true] %s59_s0 }
  0x11   :  { %142 = dma.hbm_to_vmem [thread:$0]  %s135_s21, 1024, %s137_s11, [#allocation14], %s1831_s29, %s1831_s29, %s1832_s30  }
  0x12   :  { %s1836_s17 = smov [#allocation2]   ;;  %s1837_s19 = smov [#allocation6]  }
  0x13   :  { %s35_s18 = sshll.u32 %s1836_s17, 4  ;;  %s61_s1 = sshll.u32 %s1837_s19, 4  ;;  %s36_s18 = int_to_ptr.vmem [resolvable:$true] %s35_s18  ;;  %s62_s1 = int_to_ptr.vmem [resolvable:$true] %s61_s1 }
  0x14   :  { %41 = dma.hbm_to_vmem [thread:$0]  %s34_s27, 256, %s36_s18, [#allocation3], %s1831_s29, %s1831_s29, %s1832_s30  }
  0x15   :  { %s85_s20 = sshll.u32 %s2199_s5, 4  ;;  %s1838_s3 = smov [#allocation9]   ;;  %s86_s20 = int_to_ptr.hbm [resolvable:$true] %s85_s20 }
  0x16   :  { %67 = dma.hbm_to_vmem [thread:$0]  %s60_s0, 384, %s62_s1, [#allocation5], %s1831_s29, %s1831_s29, %s1832_s30  }
  0x17   :  { %s87_s21 = sshll.u32 %s1838_s3, 4  ;;  %s121_s23 = sshll.u32 %s2206_s12, 4  ;;  %s88_s21 = int_to_ptr.vmem [resolvable:$true] %s87_s21  ;;  %s122_s23 = int_to_ptr.hbm [resolvable:$true] %s121_s23 }
  0x18   :  { %s1839_s11 = smov 128   ;;  %s1840_s25 = smov 8  }
  0x19   :  { %93 = dma.hbm_to_vmem [thread:$0]  %s86_s20, 2048, %s88_s21, [#allocation8], %s1839_s11, %s1839_s11, %s1840_s25  }
  0x1a   :  { %s1841_s26 = smov [#allocation12]   ;;  %s147_s28 = sshll.u32 %s2208_s14, 4  ;;  %s148_s28 = int_to_ptr.hbm [resolvable:$true] %s147_s28 }
  0x1b   :  { %s123_s27 = sshll.u32 %s1841_s26, 4  ;;  %s1842_s0 = smov [#allocation15]   ;;  %s124_s27 = int_to_ptr.vmem [resolvable:$true] %s123_s27 }
  0x1c   :  { %129 = dma.hbm_to_vmem [thread:$0]  %s122_s23, 128, %s124_s27, [#allocation11], %s1831_s29, %s1831_s29, %s1832_s30  }
  0x1d   :  { %s149_s17 = sshll.u32 %s1842_s0, 4  ;;  %s150_s17 = int_to_ptr.vmem [resolvable:$true] %s149_s17 }
  0x1e   :  { %155 = dma.hbm_to_vmem [thread:$0]  %s148_s28, 1024, %s150_s17, [#allocation14], %s1831_s29, %s1831_s29, %s1832_s30  }
  0x1f   :  { %1820 = dma.done.wait [#allocation3], 256  }
  0x20   :  { %1821 = vsyncadd [#allocation3], 4294967040 }
  0x21   :  { %1822 = dma.done.wait [#allocation5], 640  }
  0x22   :  { %1823 = vsyncadd [#allocation5], 4294966656 }
  0x23   :  { %1824 = dma.done.wait [#allocation8], 5120  }
  0x24   :  { %1825 = vsyncadd [#allocation8], 4294962176 }
  0x25   :  { %1826 = dma.done.wait [#allocation11], 256  }
  0x26   :  { %1827 = vsyncadd [#allocation11], 4294967040 }
  0x27   :  { %1828 = dma.done.wait [#allocation14], 2048  }
  0x28   :  { %1829 = vsyncadd [#allocation14], 4294965248  ;;  %s2213_s18 = sld [smem:[#allocation21_spill]]  ;;  %v1531_v2 = vld [vmem:[#allocation6 + $0x8] sm:$0xff]  ;;  %v1530_v3 = vld [vmem:[#allocation6] sm:$0xff]  ;;  %vm303_vm0 = vcmask 130048  }
  0x29   :  { %v1532_v4 = vld [vmem:[#allocation6 + $0x10] sm:$0xff]  ;;  %1586 = vmatpush.bf16.msra.mxu3 %v1531_v2  ;;  %317 = vmatpush.bf16.msra.mxu2 %v1531_v2  ;;  %v1985_v5 = vld [vmem:[#allocation2] sm:$0xff]  ;;  %vm227_vm1 = vcmask 261120   ;;  %v1995_v7 = vld [vmem:[#allocation2 + $0x8] sm:$0xff]  ;;  %vm445_vm2 = vcmask 64512   ;;  %vm1282_vm9 = vcmask 519168  }
  0x2a   :  { %v1987_v6 = vld [vmem:[#allocation4] sm:$0xff]  ;;  %v1997_v8 = vld [vmem:[#allocation4 + $0x8] sm:$0xff]  ;;  %v2011_v22 = vld [vmem:[#allocation9 + $0x70] sm:$0xff] }
  0x2b   :  { %v2007_v21 = vld [vmem:[#allocation9 + $0x78] sm:$0xff]  ;;  %v2015_v25 = vld [vmem:[#allocation9 + $0x68] sm:$0xff]  ;;  %v2019_v26 = vld [vmem:[#allocation9 + $0x60] sm:$0xff] }
  0x2c   :  { %v2023_v27 = vld [vmem:[#allocation9 + $0x58] sm:$0xff]  ;;  %v2027_v28 = vld [vmem:[#allocation9 + $0x50] sm:$0xff]  ;;  %v2031_v29 = vld [vmem:[#allocation9 + $0x48] sm:$0xff] }
  0x2d   :  { %348 = vmatpush.bf16.msrb.mxu3 %v1530_v3  ;;  %382 = vmatpush.bf16.msrb.mxu2 %v1532_v4  ;;  %v2035_v32 = vld [vmem:[#allocation9 + $0x40] sm:$0xff]  ;;  %v2039_v33 = vld [vmem:[#allocation9 + $0x38] sm:$0xff]  ;;  %v2043_v34 = vld [vmem:[#allocation9 + $0x30] sm:$0xff] }
  0x2e   :  { %v1529_v0 = vld [vmem:[%s2213_s18 + $0x8] sm:$0xff]  ;;  %v1528_v1 = vld [vmem:[%s2213_s18] sm:$0xff]  ;;  %v2051_v38 = vld [vmem:[#allocation9 + $0x20] sm:$0xff] }
  0x2f   :  { %240 = vmatpush.bf16.msra.mxu0 %v1529_v0  ;;  %277 = vmatpush.bf16.msra.mxu1 %v1529_v0  ;;  %v2047_v35 = vld [vmem:[#allocation9 + $0x28] sm:$0xff]  ;;  %v2055_v39 = vld [vmem:[#allocation9 + $0x18] sm:$0xff]  ;;  %v2059_v40 = vld [vmem:[#allocation9 + $0x10] sm:$0xff] }
  0x30   :  { %1331 = vmatmul.msk.bf16.vlgmr.msra.gmra.mxu3 %vm303_vm0, %v1529_v0  ;;  %1330 = vmatmul.msk.bf16.vlgmr.msra.gmra.mxu2 %vm303_vm0, %v1528_v1  ;;  %v2061_v41 = vld [vmem:[#allocation9 + $0x8] sm:$0xff]  ;;  %v2065_v42 = vld [vmem:[#allocation9] sm:$0xff] }
  0x31   :  { %423 = vmatpush.msra.mxu3 %v2007_v21  ;;  %v2074_v45 = vld [vmem:[%s2200_s6] sm:$0xff] }
  0x33   :  { %241 = vmatpush.bf16.msra.mxu0 %v1528_v1  ;;  %278 = vmatpush.bf16.msra.mxu1 %v1528_v1 }
  0x34   :  { %424 = vmatpush.msra.mxu3 %v2011_v22 }
  0x36   :  { %1314 = vmatmul.msk.bf16.vlgmr.msra.gmra.mxu0 %vm227_vm1, %v1985_v5  ;;  %1324 = vmatmul.msk.bf16.vlgmr.msra.gmra.mxu1 %vm227_vm1, %v1987_v6 }
  0x37   :  { %487 = vmatpush.msrb.mxu1 %v2007_v21  ;;  %425 = vmatpush.msra.mxu3 %v2015_v25 }
  0x38   :  { %464 = vmatpush.msrb.mxu0 %v2074_v45 }
  0x39   :  { %488 = vmatpush.msrb.mxu1 %v2011_v22  ;;  %426 = vmatpush.msra.mxu3 %v2019_v26 }
  0x3a   :  { %565 = vmatpush.msra.mxu0 %v2074_v45 }
  0x3b   :  { %489 = vmatpush.msrb.mxu1 %v2015_v25  ;;  %427 = vmatpush.msra.mxu3 %v2023_v27 }
  0x3d   :  { %490 = vmatpush.msrb.mxu1 %v2019_v26  ;;  %428 = vmatpush.msra.mxu3 %v2027_v28 }
  0x3f   :  { %491 = vmatpush.msrb.mxu1 %v2023_v27  ;;  %429 = vmatpush.msra.mxu3 %v2031_v29 }
  0x41   :  { %492 = vmatpush.msrb.mxu1 %v2027_v28  ;;  %430 = vmatpush.msra.mxu3 %v2035_v32 }
  0x43   :  { %493 = vmatpush.msrb.mxu1 %v2031_v29  ;;  %431 = vmatpush.msra.mxu3 %v2039_v33 }
  0x45   :  { %494 = vmatpush.msrb.mxu1 %v2035_v32  ;;  %432 = vmatpush.msra.mxu3 %v2043_v34 }
  0x46   :  { %1315 = vmatmul.msk.bf16.gmra.mxu0 %vm227_vm1, %v1995_v7  ;;  %1325 = vmatmul.msk.bf16.gmra.mxu1 %vm227_vm1, %v1997_v8 }
  0x47   :  { %495 = vmatpush.msrb.mxu1 %v2039_v33  ;;  %433 = vmatpush.msra.mxu3 %v2047_v35 }
  0x49   :  { %496 = vmatpush.msrb.mxu1 %v2043_v34  ;;  %434 = vmatpush.msra.mxu3 %v2051_v38 }
  0x4b   :  { %497 = vmatpush.msrb.mxu1 %v2047_v35  ;;  %435 = vmatpush.msra.mxu3 %v2055_v39 }
  0x4d   :  { %498 = vmatpush.msrb.mxu1 %v2051_v38  ;;  %436 = vmatpush.msra.mxu3 %v2059_v40 }
  0x4f   :  { %499 = vmatpush.msrb.mxu1 %v2055_v39  ;;  %437 = vmatpush.msra.mxu3 %v2061_v41 }
  0x51   :  { %500 = vmatpush.msrb.mxu1 %v2059_v40  ;;  %438 = vmatpush.msra.mxu3 %v2065_v42 }
  0x53   :  { %501 = vmatpush.msrb.mxu1 %v2061_v41 }
  0x55   :  { %502 = vmatpush.msrb.mxu1 %v2065_v42 }
  0x57   :  { %542 = vmatpush.msra.mxu1 %v2074_v45 }
  0xb3   :  { %v243_v9 = vpop.f32.mrf.mxu0  ;;  %v280_v10 = vpop.f32.mrf.mxu1 }
  0xb4   :  { %v324_v23 = vpop.f32.mrf.mxu3  ;;  %v319_v24 = vpop.f32.mrf.mxu2 }
  0xbb   :  { %v245_v11 = vpop.f32.mrf.mxu0  ;;  %v282_v12 = vpop.f32.mrf.mxu1 }
  0xbc   :  { %v253_v13 = vpack.c.bf16 %v245_v11, %v243_v9  ;;  %v290_v14 = vpack.c.bf16 %v282_v12, %v280_v10  ;;  %v326_v30 = vpop.f32.mrf.mxu3  ;;  %v321_v31 = vpop.f32.mrf.mxu2 }
  0xbe   :  { %1336 = vmatmul.msk.bf16.vlgmr.msrb.gmra.mxu3 %vm303_vm0, %v253_v13  ;;  %1342 = vmatmul.msk.bf16.vlgmr.msrb.gmra.mxu2 %vm303_vm0, %v290_v14 }
  0xc3   :  { %v248_v15 = vpop.f32.mrf.mxu0  ;;  %v285_v16 = vpop.f32.mrf.mxu1 }
  0xcb   :  { %v250_v17 = vpop.f32.mrf.mxu0  ;;  %v287_v18 = vpop.f32.mrf.mxu1 }
  0xcc   :  { %v254_v19 = vpack.c.bf16 %v250_v17, %v248_v15  ;;  %v291_v20 = vpack.c.bf16 %v287_v18, %v285_v16 }
  0xce   :  { %1337 = vmatmul.msk.bf16.gmra.mxu3 %vm303_vm0, %v254_v19  ;;  %1343 = vmatmul.msk.bf16.gmra.mxu2 %vm303_vm0, %v291_v20 }
 0x141   :  { %v350_v36 = vpop.f32.mrf.mxu3  ;;  %v384_v37 = vpop.f32.mrf.mxu2 }
 0x142   :  { %v351_v49 = vadd.f32 %v350_v36, %v319_v24 }
 0x144   :  { %v2081_v52 = vadd.f32 %v384_v37, %v351_v49 }
 0x149   :  { %v352_v43 = vpop.f32.mrf.mxu3  ;;  %v386_v44 = vpop.f32.mrf.mxu2 }
 0x14a   :  { %v353_v48 = vadd.f32 %v352_v43, %v321_v31 }
 0x14c   :  { %v2079_v51 = vadd.f32 %v386_v44, %v353_v48  ;;  %v1548_v44 = vld [vmem:[#allocation7 + $0x78] sm:$0xff] }
 0x14d   :  { %709 = vmatpush.bf16.msra.mxu2 %v1548_v44 }
 0x14e   :  { %v398_v55 = vadd.f32 %v2079_v51, %v2081_v52 }
 0x151   :  { %v355_v46 = vpop.f32.mrf.mxu3  ;;  %v389_v47 = vpop.f32.mrf.mxu2 }
 0x152   :  { %v356_v50 = vadd.f32 %v355_v46, %v324_v23  ;;  %v1547_v46 = vld [vmem:[#allocation7 + $0x70] sm:$0xff] }
 0x153   :  { %710 = vmatpush.bf16.msra.mxu2 %v1547_v46 }
 0x154   :  { %v2083_v53 = vadd.f32 %v389_v47, %v356_v50  ;;  %v1546_v50 = vld [vmem:[#allocation7 + $0x68] sm:$0xff] }
 0x156   :  { %v399_v58 = vadd.f32 %v398_v55, %v2083_v53 }
 0x157   :  { %711 = vmatpush.bf16.msra.mxu2 %v1546_v50  ;;  %v1554_v50 = vld [vmem:[#allocation7 + $0xa8] sm:$0xff] }
 0x159   :  { %v357_v54 = vpop.f32.mrf.mxu3  ;;  %v391_v57 = vpop.f32.mrf.mxu2 }
 0x15a   :  { %v358_v56 = vadd.f32 %v357_v54, %v326_v30  ;;  %v1545_v54 = vld [vmem:[#allocation7 + $0x60] sm:$0xff] }
 0x15b   :  { %712 = vmatpush.bf16.msra.mxu2 %v1545_v54  ;;  %v1553_v54 = vld [vmem:[#allocation7 + $0xa0] sm:$0xff] }
 0x15c   :  { %v2088_v59 = vadd.f32 %v391_v57, %v358_v56  ;;  %v1544_v56 = vld [vmem:[#allocation7 + $0x58] sm:$0xff] }
 0x15e   :  { %v400_v60 = vadd.f32 %v399_v58, %v2088_v59 }
 0x15f   :  { %713 = vmatpush.bf16.msra.mxu2 %v1544_v56  ;;  %v1550_v56 = vld [vmem:[#allocation7 + $0x88] sm:$0xff] }
 0x160   :  { %v401_v61 = vrot.slane %v400_v60, 4 }
 0x162   :  { %v402_v62 = vadd.f32 %v401_v61, %v400_v60 }
 0x164   :  { %v403_v63 = vrot.slane %v402_v62, 2 }
 0x166   :  { %v404_v0 = vadd.f32 %v403_v63, %v402_v62  ;;  %v508_v62 = vld [vmem:[%s2201_s7] sm:$0x1] }
 0x168   :  { %v405_v1 = vrot.slane %v404_v0, 1 }
 0x16a   :  { %v406_v2 = vadd.f32 %v405_v1, %v404_v0 }
 0x16c   :  { %439 = vmatmul.f32.vlgmr.msra.gmra.mxu3 %v406_v2  ;;  %v521_v2 = vld [vmem:[%s2202_s8] sm:$0x1] }
 0x1ef   :  { %v440_v3 = vpop.f32.mrf.mxu3 }
 0x1f0   :  { %v443_v4 = vmul.f32 0.001953125, %v440_v3 }
 0x1f2   :  { %1344 = vmatmul.msk.f32.vlgmr.msrb.gmra.mxu0 %vm445_vm2, %v443_v4 }
 0x26f   :  { %v466_v9 = vpop.f32.mrf.mxu0 }
 0x270   :  { %v469_v10 = vperm.slane %v466_v9, 0 }
 0x272   :  { %v470_v11 = vsub.f32 %v2081_v52, %v469_v10  ;;  %v471_v12 = vsub.f32 %v2079_v51, %v469_v10  ;;  %v472_v13 = vsub.f32 %v2083_v53, %v469_v10  ;;  %v473_v14 = vsub.f32 %v2088_v59, %v469_v10  ;;  %v1543_v10 = vld [vmem:[#allocation7 + $0x50] sm:$0xff] }
 0x273   :  { %714 = vmatpush.bf16.msra.mxu2 %v1543_v10 }
 0x274   :  { %v474_v15 = vmul.f32 %v470_v11, %v470_v11  ;;  %v475_v16 = vmul.f32 %v471_v12, %v471_v12  ;;  %v476_v17 = vmul.f32 %v472_v13, %v472_v13  ;;  %v477_v19 = vmul.f32 %v473_v14, %v473_v14  ;;  %v1542_v11 = vld [vmem:[#allocation7 + $0x48] sm:$0xff]  ;;  %v1541_v12 = vld [vmem:[#allocation7 + $0x40] sm:$0xff] }
 0x276   :  { %v478_v18 = vadd.f32 %v475_v16, %v474_v15 }
 0x277   :  { %715 = vmatpush.bf16.msra.mxu2 %v1542_v11 }
 0x278   :  { %v479_v20 = vadd.f32 %v478_v18, %v476_v17  ;;  %v1540_v17 = vld [vmem:[#allocation7 + $0x38] sm:$0xff] }
 0x279   :  { %776 = vmatpush.bf16.msrb.mxu0 %v1540_v17 }
 0x27a   :  { %v480_v23 = vadd.f32 %v479_v20, %v477_v19 }
 0x27b   :  { %716 = vmatpush.bf16.msra.mxu2 %v1541_v12 }
 0x27c   :  { %v481_v24 = vrot.slane %v480_v23, 4 }
 0x27e   :  { %v482_v30 = vadd.f32 %v481_v24, %v480_v23  ;;  %v1539_v23 = vld [vmem:[#allocation7 + $0x30] sm:$0xff] }
 0x27f   :  { %1032 = vmatpush.msrb.mxu2 %v2074_v45  ;;  %777 = vmatpush.bf16.msrb.mxu0 %v1539_v23 }
 0x280   :  { %v483_v31 = vrot.slane %v482_v30, 2 }
 0x282   :  { %v484_v36 = vadd.f32 %v483_v31, %v482_v30 }
 0x284   :  { %v485_v37 = vrot.slane %v484_v36, 1 }
 0x286   :  { %v486_v43 = vadd.f32 %v485_v37, %v484_v36 }
 0x288   :  { %503 = vmatmul.f32.vlgmr.msrb.gmra.mxu1 %v486_v43 }
 0x305   :  { %v504_v47 = vpop.f32.mrf.mxu1 }
 0x306   :  { %v507_v48 = vmul.f32 0.001953125, %v504_v47 }
 0x308   :  { %v509_v49 = vadd.f32 1e-05, %v507_v48 }
 0x30a   :  { %1600 = vrsqrt.f32 %v509_v49  ;;  %vm516_vm4 = vweird.f32 %v509_v49 }
 0x310   :  { %v1601_v55 = vpop.eup %1600 }
 0x311   :  { %v511_v57 = vmul.f32 %v1601_v55, %v509_v49  ;;  %vm517_vm3 = vweird.f32 %v1601_v55  ;;  %v1536_v49 = vld [vmem:[#allocation7 + $0x18] sm:$0xff] }
 0x312   :  { %vm518_vm5 = vmor %vm516_vm4, %vm517_vm3 }
 0x313   :  { %v512_v58 = vmul.f32 %v1601_v55, %v511_v57  ;;  %v1549_v57 = vld [vmem:[#allocation7 + $0x80] sm:$0xff] }
 0x315   :  { %v513_v60 = vmul.f32 0.5, %v512_v58 }
 0x317   :  { %v514_v61 = vsub.f32 1.5, %v513_v60 }
 0x319   :  { %v515_v63 = vmul.f32 %v1601_v55, %v514_v61 }
 0x31b   :  { %v519_v0 = vsel %vm518_vm5, %v1601_v55, %v515_v63  ;;  %v1533_v55 = vld [vmem:[#allocation7] sm:$0xff] }
 0x31c   :  { %v520_v1 = vmul.f32 %v519_v0, %v508_v62 }
 0x31e   :  { %v522_v3 = vmul.f32 %v520_v1, %v443_v4  ;;  %1345 = vmatmul.msk.f32.vlgmr.msra.gmra.mxu1 %vm445_vm2, %v520_v1 }
 0x320   :  { %v523_v9 = vsub.f32 %v521_v2, %v522_v3 }
 0x322   :  { %1346 = vmatmul.msk.f32.vlgmr.msra.gmra.mxu0 %vm445_vm2, %v523_v9 }
 0x39b   :  { %v544_v13 = vpop.f32.mrf.mxu1 }
 0x39c   :  { %v570_v14 = vperm.slane %v544_v13, 0 }
 0x39e   :  { %v571_v15 = vmul.f32 %v570_v14, %v2081_v52  ;;  %v572_v4 = vmul.f32 %v570_v14, %v2079_v51  ;;  %v573_v18 = vmul.f32 %v570_v14, %v2083_v53  ;;  %v574_v19 = vmul.f32 %v570_v14, %v2088_v59  ;;  %v1538_v52 = vld [vmem:[#allocation7 + $0x28] sm:$0xff]  ;;  %v1556_v51 = vld [vmem:[#allocation7 + $0xb8] sm:$0xff]  ;;  %v1537_v53 = vld [vmem:[#allocation7 + $0x20] sm:$0xff] }
 0x39f   :  { %v567_v16 = vpop.f32.mrf.mxu0  ;;  %778 = vmatpush.bf16.msrb.mxu0 %v1538_v52  ;;  %v1555_v59 = vld [vmem:[#allocation7 + $0xb0] sm:$0xff] }
 0x3a0   :  { %v575_v20 = vperm.slane %v567_v16, 0 }
 0x3a2   :  { %v576_v24 = vadd.f32 %v575_v20, %v571_v15  ;;  %v577_v30 = vadd.f32 %v575_v20, %v572_v4  ;;  %v578_v31 = vadd.f32 %v575_v20, %v573_v18  ;;  %v579_v36 = vadd.f32 %v575_v20, %v574_v19 }
 0x3a3   :  { %779 = vmatpush.bf16.msrb.mxu0 %v1537_v53 }
 0x3a4   :  { %v580_v37 = vmax.f32 %v576_v24, 0.0  ;;  %v581_v43 = vmax.f32 %v577_v30, 0.0  ;;  %v582_v44 = vmax.f32 %v578_v31, 0.0  ;;  %v583_v46 = vmax.f32 %v579_v36, 0.0 }
 0x3a6   :  { %v585_v47 = vpack.c.bf16 %v583_v46, %v582_v44  ;;  %v584_v48 = vpack.c.bf16 %v581_v43, %v580_v37 }
 0x3a7   :  { %780 = vmatpush.bf16.msrb.mxu0 %v1536_v49 }
 0x3a8   :  { %592 = vmatpush.bf16.msrb.mxu1 %v585_v47  ;;  %613 = vmatpush.bf16.msrb.mxu3 %v585_v47 }
 0x3a9   :  { %717 = vmatmul.bf16.vlgmr.msra.gmra.mxu2 %v584_v48 }
 0x3ac   :  { %593 = vmatpush.bf16.msrb.mxu1 %v584_v48  ;;  %614 = vmatpush.bf16.msrb.mxu3 %v584_v48 }
 0x3af   :  { %1347 = vmatmul.msk.bf16.vlgmr.msrb.gmra.mxu1 %vm227_vm1, %v1985_v5  ;;  %1349 = vmatmul.msk.bf16.vlgmr.msrb.gmra.mxu3 %vm227_vm1, %v1987_v6  ;;  %v1535_v5 = vld [vmem:[#allocation7 + $0x10] sm:$0xff]  ;;  %v1552_v6 = vld [vmem:[#allocation7 + $0x98] sm:$0xff] }
 0x3b0   :  { %860 = vmatpush.bf16.msra.mxu1 %v1556_v51  ;;  %892 = vmatpush.msra.mxu3 %v2007_v21 }
 0x3b1   :  { %781 = vmatpush.bf16.msrb.mxu0 %v1535_v5 }
 0x3b2   :  { %893 = vmatpush.msra.mxu3 %v2011_v22 }
 0x3b4   :  { %861 = vmatpush.bf16.msra.mxu1 %v1555_v59  ;;  %894 = vmatpush.msra.mxu3 %v2015_v25 }
 0x3b6   :  { %895 = vmatpush.msra.mxu3 %v2019_v26 }
 0x3b8   :  { %862 = vmatpush.bf16.msra.mxu1 %v1554_v50  ;;  %896 = vmatpush.msra.mxu3 %v2023_v27 }
 0x3b9   :  { %722 = vmatmul.bf16.gmra.mxu2 %v585_v47 }
 0x3ba   :  { %897 = vmatpush.msra.mxu3 %v2027_v28 }
 0x3bc   :  { %863 = vmatpush.bf16.msra.mxu1 %v1553_v54  ;;  %898 = vmatpush.msra.mxu3 %v2031_v29 }
 0x3be   :  { %899 = vmatpush.msra.mxu3 %v2035_v32 }
 0x3bf   :  { %1348 = vmatmul.msk.bf16.gmra.mxu1 %vm227_vm1, %v1995_v7  ;;  %1350 = vmatmul.msk.bf16.gmra.mxu3 %vm227_vm1, %v1997_v8  ;;  %v1534_v7 = vld [vmem:[#allocation7 + $0x8] sm:$0xff]  ;;  %v1551_v8 = vld [vmem:[#allocation7 + $0x90] sm:$0xff] }
 0x3c0   :  { %900 = vmatpush.msra.mxu3 %v2039_v33  ;;  %864 = vmatpush.bf16.msra.mxu1 %v1552_v6 }
 0x3c1   :  { %782 = vmatpush.bf16.msrb.mxu0 %v1534_v7 }
 0x3c2   :  { %901 = vmatpush.msra.mxu3 %v2043_v34 }
 0x3c4   :  { %902 = vmatpush.msra.mxu3 %v2047_v35  ;;  %865 = vmatpush.bf16.msra.mxu1 %v1551_v8 }
 0x3c5   :  { %783 = vmatpush.bf16.msrb.mxu0 %v1533_v55 }
 0x3c6   :  { %903 = vmatpush.msra.mxu3 %v2051_v38 }
 0x3c8   :  { %904 = vmatpush.msra.mxu3 %v2055_v39  ;;  %866 = vmatpush.bf16.msra.mxu1 %v1550_v56 }
 0x3c9   :  { %954 = vmatpush.msra.mxu0 %v2007_v21 }
 0x3ca   :  { %905 = vmatpush.msra.mxu3 %v2059_v40 }
 0x3cb   :  { %955 = vmatpush.msra.mxu0 %v2011_v22 }
 0x3cc   :  { %906 = vmatpush.msra.mxu3 %v2061_v41  ;;  %867 = vmatpush.bf16.msra.mxu1 %v1549_v57 }
 0x3cd   :  { %956 = vmatpush.msra.mxu0 %v2015_v25 }
 0x3ce   :  { %907 = vmatpush.msra.mxu3 %v2065_v42 }
 0x3cf   :  { %957 = vmatpush.msra.mxu0 %v2019_v26 }
 0x3d0   :  { %931 = vmatpush.msrb.mxu3 %v2074_v45 }
 0x3d1   :  { %958 = vmatpush.msra.mxu0 %v2023_v27 }
 0x3d3   :  { %959 = vmatpush.msra.mxu0 %v2027_v28 }
 0x3d5   :  { %960 = vmatpush.msra.mxu0 %v2031_v29 }
 0x3d7   :  { %961 = vmatpush.msra.mxu0 %v2035_v32 }
 0x3d9   :  { %962 = vmatpush.msra.mxu0 %v2039_v33 }
 0x3db   :  { %963 = vmatpush.msra.mxu0 %v2043_v34 }
 0x3dd   :  { %964 = vmatpush.msra.mxu0 %v2047_v35 }
 0x3df   :  { %965 = vmatpush.msra.mxu0 %v2051_v38 }
 0x3e1   :  { %966 = vmatpush.msra.mxu0 %v2055_v39 }
 0x3e3   :  { %967 = vmatpush.msra.mxu0 %v2059_v40 }
 0x3e5   :  { %968 = vmatpush.msra.mxu0 %v2061_v41 }
 0x3e7   :  { %969 = vmatpush.msra.mxu0 %v2065_v42 }
 0x42c   :  { %v595_v21 = vpop.f32.mrf.mxu1  ;;  %v718_v39 = vpop.f32.mrf.mxu2 }
 0x432   :  { %v616_v22 = vpop.f32.mrf.mxu3 }
 0x434   :  { %v597_v25 = vpop.f32.mrf.mxu1  ;;  %v720_v41 = vpop.f32.mrf.mxu2 }
 0x435   :  { %v605_v26 = vpack.c.bf16 %v597_v25, %v595_v21 }
 0x437   :  { %784 = vmatmul.bf16.vlgmr.msrb.gmra.mxu0 %v605_v26 }
 0x43a   :  { %v618_v27 = vpop.f32.mrf.mxu3 }
 0x43b   :  { %v626_v28 = vpack.c.bf16 %v618_v27, %v616_v22 }
 0x43c   :  { %v600_v29 = vpop.f32.mrf.mxu1  ;;  %v723_v62 = vpop.f32.mrf.mxu2 }
 0x43d   :  { %868 = vmatmul.bf16.vlgmr.msra.gmra.mxu1 %v626_v28 }
 0x442   :  { %v621_v32 = vpop.f32.mrf.mxu3 }
 0x444   :  { %v602_v33 = vpop.f32.mrf.mxu1  ;;  %v725_v12 = vpop.f32.mrf.mxu2 }
 0x445   :  { %v606_v34 = vpack.c.bf16 %v602_v33, %v600_v29  ;;  %v975_v29 = vld [vmem:[%s2203_s9] sm:$0x1] }
 0x447   :  { %789 = vmatmul.bf16.gmra.mxu0 %v606_v34 }
 0x44a   :  { %v623_v35 = vpop.f32.mrf.mxu3 }
 0x44b   :  { %v627_v38 = vpack.c.bf16 %v623_v35, %v621_v32  ;;  %v988_v35 = vld [vmem:[%s2204_s10] sm:$0x1] }
 0x44d   :  { %873 = vmatmul.bf16.gmra.mxu1 %v627_v38 }
 0x4b4   :  { %v785_v40 = vpop.f32.mrf.mxu0 }
 0x4b5   :  { %v786_v1 = vadd.f32 %v785_v40, %v718_v39  ;;  %v1566_v40 = vld [vmem:[#allocation13 + $0x38] sm:$0xff] }
 0x4b6   :  { %1186 = vmatpush.bf16.msrb.mxu1 %v1566_v40 }
 0x4ba   :  { %v869_v58 = vpop.f32.mrf.mxu1 }
 0x4bb   :  { %v2152_v10 = vadd.f32 %v869_v58, %v786_v1  ;;  %v1574_v58 = vld [vmem:[#allocation15 + $0x38] sm:$0xff] }
 0x4bc   :  { %v787_v60 = vpop.f32.mrf.mxu0  ;;  %1264 = vmatpush.bf16.msra.mxu2 %v1574_v58 }
 0x4bd   :  { %v788_v0 = vadd.f32 %v787_v60, %v720_v41  ;;  %v1565_v41 = vld [vmem:[#allocation13 + $0x30] sm:$0xff] }
 0x4be   :  { %v1573_v60 = vld [vmem:[#allocation15 + $0x30] sm:$0xff]  ;;  %1187 = vmatpush.bf16.msrb.mxu1 %v1565_v41 }
 0x4c0   :  { %1265 = vmatpush.bf16.msra.mxu2 %v1573_v60 }
 0x4c2   :  { %v871_v61 = vpop.f32.mrf.mxu1 }
 0x4c3   :  { %v2150_v2 = vadd.f32 %v871_v61, %v788_v0  ;;  %v1564_v61 = vld [vmem:[#allocation13 + $0x28] sm:$0xff] }
 0x4c4   :  { %v790_v42 = vpop.f32.mrf.mxu0  ;;  %1188 = vmatpush.bf16.msrb.mxu1 %v1564_v61 }
 0x4c5   :  { %v791_v3 = vadd.f32 %v790_v42, %v723_v62  ;;  %v883_v13 = vadd.f32 %v2150_v2, %v2152_v10  ;;  %v1572_v42 = vld [vmem:[#allocation15 + $0x28] sm:$0xff] }
 0x4c6   :  { %1266 = vmatpush.bf16.msra.mxu2 %v1572_v42 }
 0x4ca   :  { %v874_v63 = vpop.f32.mrf.mxu1 }
 0x4cb   :  { %v2154_v11 = vadd.f32 %v874_v63, %v791_v3 }
 0x4cc   :  { %v792_v9 = vpop.f32.mrf.mxu0 }
 0x4cd   :  { %v793_v14 = vadd.f32 %v792_v9, %v725_v12  ;;  %v884_v16 = vadd.f32 %v883_v13, %v2154_v11 }
 0x4d2   :  { %v876_v15 = vpop.f32.mrf.mxu1 }
 0x4d3   :  { %v2159_v17 = vadd.f32 %v876_v15, %v793_v14 }
 0x4d5   :  { %v885_v4 = vadd.f32 %v884_v16, %v2159_v17 }
 0x4d7   :  { %v886_v18 = vrot.slane %v885_v4, 4 }
 0x4d9   :  { %v887_v19 = vadd.f32 %v886_v18, %v885_v4 }
 0x4db   :  { %v888_v20 = vrot.slane %v887_v19, 2 }
 0x4dd   :  { %v889_v23 = vadd.f32 %v888_v20, %v887_v19 }
 0x4df   :  { %v890_v24 = vrot.slane %v889_v23, 1 }
 0x4e1   :  { %v891_v30 = vadd.f32 %v890_v24, %v889_v23 }
 0x4e3   :  { %908 = vmatmul.f32.vlgmr.msra.gmra.mxu3 %v891_v30 }
 0x4e4   :  { %1009 = vmatpush.msra.mxu3 %v2074_v45 }
 0x566   :  { %v909_v31 = vpop.f32.mrf.mxu3 }
 0x567   :  { %v912_v36 = vmul.f32 0.001953125, %v909_v31 }
 0x569   :  { %1447 = vmatmul.msk.f32.vlgmr.msrb.gmra.mxu3 %vm445_vm2, %v912_v36 }
 0x5ec   :  { %v933_v37 = vpop.f32.mrf.mxu3 }
 0x5ed   :  { %v936_v43 = vperm.slane %v933_v37, 0 }
 0x5ef   :  { %v937_v44 = vsub.f32 %v2152_v10, %v936_v43  ;;  %v938_v46 = vsub.f32 %v2150_v2, %v936_v43  ;;  %v939_v52 = vsub.f32 %v2154_v11, %v936_v43  ;;  %v940_v47 = vsub.f32 %v2159_v17, %v936_v43 }
 0x5f1   :  { %v941_v48 = vmul.f32 %v937_v44, %v937_v44  ;;  %v942_v51 = vmul.f32 %v938_v46, %v938_v46  ;;  %v943_v53 = vmul.f32 %v939_v52, %v939_v52  ;;  %v944_v49 = vmul.f32 %v940_v47, %v940_v47  ;;  %v1557_v52 = vld [vmem:[#allocation10] sm:$0xff]  ;;  %v1558_v47 = vld [vmem:[#allocation12] sm:$0xff] }
 0x5f3   :  { %v945_v59 = vadd.f32 %v942_v51, %v941_v48  ;;  %v1563_v48 = vld [vmem:[#allocation13 + $0x20] sm:$0xff] }
 0x5f4   :  { %v1571_v51 = vld [vmem:[#allocation15 + $0x20] sm:$0xff]  ;;  %1189 = vmatpush.bf16.msrb.mxu1 %v1563_v48 }
 0x5f5   :  { %v946_v45 = vadd.f32 %v945_v59, %v943_v53  ;;  %1267 = vmatpush.bf16.msra.mxu2 %v1571_v51  ;;  %v1562_v53 = vld [vmem:[#allocation13 + $0x18] sm:$0xff] }
 0x5f6   :  { %v1570_v59 = vld [vmem:[#allocation15 + $0x18] sm:$0xff] }
 0x5f7   :  { %v947_v50 = vadd.f32 %v946_v45, %v944_v49  ;;  %v1561_v49 = vld [vmem:[#allocation13 + $0x10] sm:$0xff] }
 0x5f8   :  { %1190 = vmatpush.bf16.msrb.mxu1 %v1562_v53  ;;  %v1569_v45 = vld [vmem:[#allocation15 + $0x10] sm:$0xff] }
 0x5f9   :  { %v948_v54 = vrot.slane %v947_v50, 4  ;;  %1268 = vmatpush.bf16.msra.mxu2 %v1570_v59 }
 0x5fb   :  { %v949_v5 = vadd.f32 %v948_v54, %v947_v50  ;;  %v1560_v50 = vld [vmem:[#allocation13 + $0x8] sm:$0xff] }
 0x5fc   :  { %1191 = vmatpush.bf16.msrb.mxu1 %v1561_v49  ;;  %v1568_v54 = vld [vmem:[#allocation15 + $0x8] sm:$0xff] }
 0x5fd   :  { %v950_v6 = vrot.slane %v949_v5, 2  ;;  %1269 = vmatpush.bf16.msra.mxu2 %v1569_v45 }
 0x5ff   :  { %v951_v7 = vadd.f32 %v950_v6, %v949_v5  ;;  %v1559_v5 = vld [vmem:[#allocation13] sm:$0xff] }
 0x600   :  { %1192 = vmatpush.bf16.msrb.mxu1 %v1560_v50  ;;  %v1567_v6 = vld [vmem:[#allocation15] sm:$0xff] }
 0x601   :  { %v952_v8 = vrot.slane %v951_v7, 1  ;;  %1270 = vmatpush.bf16.msra.mxu2 %v1568_v54 }
 0x603   :  { %v953_v55 = vadd.f32 %v952_v8, %v951_v7 }
 0x604   :  { %1193 = vmatpush.bf16.msrb.mxu1 %v1559_v5 }
 0x605   :  { %970 = vmatmul.f32.vlgmr.msra.gmra.mxu0 %v953_v55  ;;  %1271 = vmatpush.bf16.msra.mxu2 %v1567_v6 }
 0x682   :  { %v971_v56 = vpop.f32.mrf.mxu0 }
 0x683   :  { %v974_v57 = vmul.f32 0.001953125, %v971_v56 }
 0x685   :  { %v976_v21 = vadd.f32 1e-05, %v974_v57 }
 0x687   :  { %1602 = vrsqrt.f32 %v976_v21  ;;  %vm983_vm7 = vweird.f32 %v976_v21 }
 0x68d   :  { %v1603_v22 = vpop.eup %1602 }
 0x68e   :  { %v978_v25 = vmul.f32 %v1603_v22, %v976_v21  ;;  %vm984_vm6 = vweird.f32 %v1603_v22 }
 0x68f   :  { %vm985_vm8 = vmor %vm983_vm7, %vm984_vm6 }
 0x690   :  { %v979_v26 = vmul.f32 %v1603_v22, %v978_v25 }
 0x692   :  { %v980_v27 = vmul.f32 0.5, %v979_v26 }
 0x694   :  { %v981_v28 = vsub.f32 1.5, %v980_v27 }
 0x696   :  { %v982_v32 = vmul.f32 %v1603_v22, %v981_v28 }
 0x698   :  { %v986_v33 = vsel %vm985_vm8, %v1603_v22, %v982_v32 }
 0x699   :  { %v987_v34 = vmul.f32 %v986_v33, %v975_v29 }
 0x69b   :  { %v989_v38 = vmul.f32 %v987_v34, %v912_v36  ;;  %1448 = vmatmul.msk.f32.vlgmr.msra.gmra.mxu3 %vm445_vm2, %v987_v34 }
 0x69d   :  { %v990_v39 = vsub.f32 %v988_v35, %v989_v38 }
 0x69f   :  { %1449 = vmatmul.msk.f32.vlgmr.msrb.gmra.mxu2 %vm445_vm2, %v990_v39 }
 0x71e   :  { %v1011_v62 = vpop.f32.mrf.mxu3 }
 0x71f   :  { %v1037_v63 = vperm.slane %v1011_v62, 0 }
 0x721   :  { %v1038_v0 = vmul.f32 %v1037_v63, %v2152_v10  ;;  %v1039_v3 = vmul.f32 %v1037_v63, %v2150_v2  ;;  %v1040_v9 = vmul.f32 %v1037_v63, %v2154_v11  ;;  %v1041_v12 = vmul.f32 %v1037_v63, %v2159_v17 }
 0x722   :  { %v1034_v1 = vpop.f32.mrf.mxu2 }
 0x723   :  { %v1042_v13 = vperm.slane %v1034_v1, 0 }
 0x725   :  { %v1043_v14 = vadd.f32 %v1042_v13, %v1038_v0  ;;  %v1044_v15 = vadd.f32 %v1042_v13, %v1039_v3  ;;  %v1045_v16 = vadd.f32 %v1042_v13, %v1040_v9  ;;  %v1046_v4 = vadd.f32 %v1042_v13, %v1041_v12 }
 0x727   :  { %v1049_v18 = vmax.f32 %v1045_v16, 0.0  ;;  %v1050_v19 = vmax.f32 %v1046_v4, 0.0  ;;  %v1047_v20 = vmax.f32 %v1043_v14, 0.0  ;;  %v1048_v23 = vmax.f32 %v1044_v15, 0.0 }
 0x729   :  { %v1583_v24 = vpack.c.bf16 %v1050_v19, %v1049_v18  ;;  %v1053_v30 = vpack.c.bf16 %v1049_v18, %v1049_v18  ;;  %v1054_v31 = vpack.c.bf16 %v1050_v19, %v1050_v19  ;;  %v1051_v10 = vpack.c.bf16 %v1047_v20, %v1047_v20 }
 0x72a   :  { %v1052_v36 = vpack.c.bf16 %v1048_v23, %v1048_v23  ;;  %v1578_v37 = vpack.c.bf16 %v1048_v23, %v1047_v20 }
 0x72b   :  { %1585 = vst [vmem:[%s2209_s15 + $0x8] sm:$0xff] %v1583_v24   ;;  %v1072_v2 = vunpack.c.l.b16 %v1053_v30  ;;  %v1073_v11 = vunpack.c.l.b16 %v1054_v31  ;;  %v1070_v43 = vunpack.c.l.b16 %v1051_v10 }
 0x72c   :  { %1579 = vst [vmem:[%s2209_s15] sm:$0xff] %v1578_v37   ;;  %v1071_v44 = vunpack.c.l.b16 %v1052_v36 }
 0x72d   :  { %v1075_v17 = vpack.c.b16 %v1073_v11, %v1072_v2 }
 0x72e   :  { %v1074_v46 = vpack.c.b16 %v1071_v44, %v1070_v43 }
 0x72f   :  { %1087 = vmatpush.bf16.msrb.mxu3 %v1075_v17  ;;  %1111 = vmatpush.bf16.msrb.mxu0 %v1075_v17 }
 0x733   :  { %1088 = vmatpush.bf16.msrb.mxu3 %v1074_v46  ;;  %1112 = vmatpush.bf16.msrb.mxu0 %v1074_v46 }
 0x736   :  { %1454 = vmatmul.msk.bf16.vlgmr.msrb.gmra.mxu3 %vm227_vm1, %v1557_v52  ;;  %1459 = vmatmul.msk.bf16.vlgmr.msrb.gmra.mxu0 %vm227_vm1, %v1558_v47 }
 0x7b3   :  { %v1114_v7 = vpop.f32.mrf.mxu0 }
 0x7b9   :  { %v1090_v8 = vpop.f32.mrf.mxu3 }
 0x7ba   :  { %v1119_v57 = vmax.f32 %v1090_v8, %v1114_v7 }
 0x7bb   :  { %v1116_v55 = vpop.f32.mrf.mxu0 }
 0x7c1   :  { %v1092_v56 = vpop.f32.mrf.mxu3 }
 0x7c2   :  { %v1120_v21 = vmax.f32 %v1092_v56, %v1116_v55 }
 0x7c4   :  { %v1121_v22 = vpack.c.bf16 %v1120_v21, %v1119_v57 }
 0x7c6   :  { %1194 = vmatmul.bf16.vlgmr.msrb.gmra.mxu1 %v1121_v22  ;;  %1272 = vmatmul.bf16.vlgmr.msra.gmra.mxu2 %v1121_v22 }
 0x843   :  { %v1195_v25 = vpop.f32.mrf.mxu1 }
 0x849   :  { %v1273_v26 = vpop.f32.mrf.mxu2 }
 0x84a   :  { %v1278_v27 = vmax.f32 %v1195_v25, %v1273_v26 }
 0x84b   :  { %v1197_v29 = vpop.f32.mrf.mxu1 }
 0x84c   :  { %v1280_v28 = vpack.c.bf16 %v1278_v27, %v1278_v27 }
 0x84e   :  { %1283 = vst.msk [vmem:[%s2210_s16] sm:$0xf] %vm1282_vm9, %v1280_v28 }
 0x851   :  { %v1275_v32 = vpop.f32.mrf.mxu2 }
 0x852   :  { %v1279_v33 = vmax.f32 %v1197_v29, %v1275_v32 }
 0x854   :  { %v1281_v34 = vpack.c.bf16 %v1279_v33, %v1279_v33 }
 0x856   :  { %1284 = vst.msk [vmem:[%s2210_s16 + $0x4] sm:$0xf] %vm1282_vm9, %v1281_v34 }
 0x857   :  { %1293 = vsyncpa [#allocation3], 1 }
 0x858   :  { %1294 = vsyncpa [#allocation5], 1 }
 0x859   :  { %1295 = vsyncpa [#allocation8], 1 }
 0x85a   :  { %1296 = vsyncpa [#allocation11], 1 }
 0x85b   :  { %1297 = vsyncpa [#allocation14], 1 }

// kernel: unet_forward.9
= control target key start
LH: loop header
LB: loop body
LE: loop exit
PB: predicated region body
PF: predicated region fallthrough
CT: control target
= control target key end

     0   :  { %s2113_s0 = inlined_call_operand.vmem [shape: bf16[16,64], index: 0, kind: input, shape index: {}]   ;;  %s2114_s1 = inlined_call_operand.hbm [shape: bf16[16,16], index: 1, kind: input, shape index: {}]   ;;  %s2115_s2 = inlined_call_operand.hbm [shape: bf16[16,16], index: 2, kind: input, shape index: {}]   ;;  %s2116_s3 = inlined_call_operand.hbm [shape: bf16[3,64,128], index: 3, kind: input, shape index: {}]   ;;  %s2117_s4 = inlined_call_operand.hbm [shape: bf16[3,128,128], index: 4, kind: input, shape index: {}]   ;;  %s2118_s5 = inlined_call_operand.hbm [shape: f32[128,16], index: 5, kind: input, shape index: {}]   ;;  %s2119_s6 = inlined_call_operand.hbm [shape: f32[16,128], index: 6, kind: input, shape index: {}]   ;;  %s2120_s7 = inlined_call_operand.vmem [shape: f32[1,16], index: 7, kind: input, shape index: {}, may-alias: {7,9}]   ;;  %s2121_s8 = inlined_call_operand.vmem [shape: f32[1,16], index: 8, kind: input, shape index: {}, may-alias: {8,10}]   ;;  %s2122_s9 = inlined_call_operand.vmem [shape: f32[1,16], index: 9, kind: input, shape index: {}, may-alias: {7,9}]   ;;  %s2123_s10 = inlined_call_operand.vmem [shape: f32[1,16], index: 10, kind: input, shape index: {}, may-alias: {8,10}]   ;;  %s2124_s11 = inlined_call_operand.hbm [shape: bf16[8,16], index: 11, kind: input, shape index: {}]   ;;  %s2125_s12 = inlined_call_operand.hbm [shape: bf16[8,16], index: 12, kind: input, shape index: {}]   ;;  %s2126_s13 = inlined_call_operand.hbm [shape: bf16[128,64], index: 13, kind: input, shape index: {}]   ;;  %s2127_s14 = inlined_call_operand.hbm [shape: bf16[128,64], index: 14, kind: input, shape index: {}]   ;;  %s2128_s15 = inlined_call_operand.vmem [shape: bf16[16,128], index: 15, kind: output, shape index: {0}]   ;;  %s2129_s16 = inlined_call_operand.vmem [shape: bf16[8,64], index: 16, kind: output, shape index: {1}]  }
   0x1   :  { %2130 = sst [smem:[#allocation24_spill]] %s2113_s0 }
   0x2   :  { %22 = vsyncpa [#allocation3], 0 }
   0x3   :  { %23 = vsyncpa [#allocation5], 0 }
   0x4   :  { %24 = vsyncpa [#allocation8], 0 }
   0x5   :  { %25 = vsyncpa [#allocation11], 0 }
   0x6   :  { %26 = vsyncpa [#allocation14], 0 }
   0x7   :  { %27 = vsyncpa [#allocation17], 0  ;;  %s47_s23 = sshll.u32 %s2115_s2, 4  ;;  %s1794_s24 = smov [#allocation4]   ;;  %s48_s23 = int_to_ptr.hbm [resolvable:$true] %s47_s23 }
   0x8   :  { %s49_s25 = sshll.u32 %s1794_s24, 4  ;;  %s73_s28 = sshll.u32 %s2117_s4, 4  ;;  %s50_s25 = int_to_ptr.vmem [resolvable:$true] %s49_s25  ;;  %s74_s28 = int_to_ptr.hbm [resolvable:$true] %s73_s28 }
   0x9   :  { %s1795_s29 = smov 64   ;;  %s1796_s30 = smov 4  }
   0xa   :  { %55 = dma.hbm_to_vmem [thread:$0]  %s48_s23, 128, %s50_s25, [#allocation5], %s1795_s29, %s1795_s29, %s1796_s30  }
   0xb   :  { %s1797_s0 = smov [#allocation7]   ;;  %s99_s19 = sshll.u32 %s2119_s6, 4  ;;  %s100_s19 = int_to_ptr.hbm [resolvable:$true] %s99_s19 }
   0xc   :  { %s75_s17 = sshll.u32 %s1797_s0, 4  ;;  %s1798_s4 = smov [#allocation10]   ;;  %s76_s17 = int_to_ptr.vmem [resolvable:$true] %s75_s17 }
   0xd   :  { %81 = dma.hbm_to_vmem [thread:$0]  %s74_s28, 3072, %s76_s17, [#allocation8], %s1795_s29, %s1795_s29, %s1796_s30  }
   0xe   :  { %s101_s20 = sshll.u32 %s1798_s4, 4  ;;  %s132_s23 = sshll.u32 %s2125_s12, 4  ;;  %s102_s20 = int_to_ptr.vmem [resolvable:$true] %s101_s20  ;;  %s133_s23 = int_to_ptr.hbm [resolvable:$true] %s132_s23 }
   0xf   :  { %s1799_s24 = smov 128   ;;  %s1800_s25 = smov 8  }
  0x10   :  { %107 = dma.hbm_to_vmem [thread:$0]  %s100_s19, 256, %s102_s20, [#allocation11], %s1799_s24, %s1799_s24, %s1800_s25  }
  0x11   :  { %s1801_s26 = smov [#allocation13]   ;;  %s34_s6 = sshll.u32 %s2114_s1, 4  ;;  %s35_s6 = int_to_ptr.hbm [resolvable:$true] %s34_s6 }
  0x12   :  { %s134_s27 = sshll.u32 %s1801_s26, 4  ;;  %s60_s12 = sshll.u32 %s2116_s3, 4  ;;  %s135_s27 = int_to_ptr.vmem [resolvable:$true] %s134_s27  ;;  %s61_s12 = int_to_ptr.hbm [resolvable:$true] %s60_s12 }
  0x13   :  { %137 = dma.hbm_to_vmem [thread:$0]  %s133_s23, 64, %s135_s27, [#allocation14]  }
  0x14   :  { %s1802_s18 = smov [#allocation2]   ;;  %s1803_s19 = smov [#allocation6]  }
  0x15   :  { %s36_s4 = sshll.u32 %s1802_s18, 4  ;;  %s62_s20 = sshll.u32 %s1803_s19, 4  ;;  %s37_s4 = int_to_ptr.vmem [resolvable:$true] %s36_s4  ;;  %s63_s20 = int_to_ptr.vmem [resolvable:$true] %s62_s20 }
  0x16   :  { %42 = dma.hbm_to_vmem [thread:$0]  %s35_s6, 128, %s37_s4, [#allocation3], %s1795_s29, %s1795_s29, %s1796_s30  }
  0x17   :  { %s86_s1 = sshll.u32 %s2118_s5, 4  ;;  %s121_s26 = sshll.u32 %s2124_s11, 4  ;;  %s87_s1 = int_to_ptr.hbm [resolvable:$true] %s86_s1  ;;  %s122_s26 = int_to_ptr.hbm [resolvable:$true] %s121_s26 }
  0x18   :  { %68 = dma.hbm_to_vmem [thread:$0]  %s61_s12, 1536, %s63_s20, [#allocation5], %s1795_s29, %s1795_s29, %s1796_s30  }
  0x19   :  { %s1804_s27 = smov [#allocation9]   ;;  %s1805_s0 = smov [#allocation12]  }
  0x1a   :  { %s88_s28 = sshll.u32 %s1804_s27, 4  ;;  %s123_s5 = sshll.u32 %s1805_s0, 4  ;;  %s89_s28 = int_to_ptr.vmem [resolvable:$true] %s88_s28  ;;  %s124_s5 = int_to_ptr.vmem [resolvable:$true] %s123_s5 }
  0x1b   :  { %94 = dma.hbm_to_vmem [thread:$0]  %s87_s1, 2048, %s89_s28, [#allocation8], %s1799_s24, %s1799_s24, %s1800_s25  }
  0x1c   :  { %s142_s2 = sshll.u32 %s2126_s13, 4  ;;  %s155_s11 = sshll.u32 %s2127_s14, 4  ;;  %s143_s2 = int_to_ptr.hbm [resolvable:$true] %s142_s2  ;;  %s156_s11 = int_to_ptr.hbm [resolvable:$true] %s155_s11 }
  0x1d   :  { %126 = dma.hbm_to_vmem [thread:$0]  %s122_s26, 64, %s124_s5, [#allocation11]  }
  0x1e   :  { %s1806_s4 = smov [#allocation15]   ;;  %s1807_s24 = smov [#allocation16]  }
  0x1f   :  { %s144_s19 = sshll.u32 %s1806_s4, 4  ;;  %s157_s25 = sshll.u32 %s1807_s24, 4  ;;  %s145_s19 = int_to_ptr.vmem [resolvable:$true] %s144_s19  ;;  %s158_s25 = int_to_ptr.vmem [resolvable:$true] %s157_s25 }
  0x20   :  { %150 = dma.hbm_to_vmem [thread:$0]  %s143_s2, 1024, %s145_s19, [#allocation14], %s1795_s29, %s1795_s29, %s1796_s30  }
  0x21   :  { %163 = dma.hbm_to_vmem [thread:$0]  %s156_s11, 1024, %s158_s25, [#allocation17], %s1795_s29, %s1795_s29, %s1796_s30  }
  0x22   :  { %1782 = dma.done.wait [#allocation3], 128  }
  0x23   :  { %1783 = vsyncadd [#allocation3], 4294967168 }
  0x24   :  { %1784 = dma.done.wait [#allocation5], 1664  }
  0x25   :  { %1785 = vsyncadd [#allocation5], 4294965632 }
  0x26   :  { %1786 = dma.done.wait [#allocation8], 5120  }
  0x27   :  { %1787 = vsyncadd [#allocation8], 4294962176 }
  0x28   :  { %1788 = dma.done.wait [#allocation11], 320  }
  0x29   :  { %1789 = vsyncadd [#allocation11], 4294966976 }
  0x2a   :  { %1790 = dma.done.wait [#allocation14], 1088  }
  0x2b   :  { %1791 = vsyncadd [#allocation14], 4294966208 }
  0x2c   :  { %1792 = dma.done.wait [#allocation17], 1024  }
  0x2d   :  { %1793 = vsyncadd [#allocation17], 4294966272  ;;  %s2131_s20 = sld [smem:[#allocation24_spill]]  ;;  %v1950_v1 = vld [vmem:[#allocation2] sm:$0xff]  ;;  %v1952_v2 = vld [vmem:[#allocation4] sm:$0xff]  ;;  %vm222_vm0 = vcmask 130048  }
  0x2e   :  { %v1474_v3 = vld [vmem:[#allocation6 + $0x38] sm:$0xff]  ;;  %v1473_v5 = vld [vmem:[#allocation6 + $0x30] sm:$0xff]  ;;  %v1472_v6 = vld [vmem:[#allocation6 + $0x28] sm:$0xff]  ;;  %vm305_vm1 = vcmask 523264   ;;  %vm1213_vm8 = vcmask 519168  }
  0x2f   :  { %v1478_v4 = vld [vmem:[#allocation6 + $0x58] sm:$0xff]  ;;  %313 = vmatpush.bf16.msra.mxu3 %v1474_v3  ;;  %v1471_v7 = vld [vmem:[#allocation6 + $0x20] sm:$0xff]  ;;  %v1469_v9 = vld [vmem:[#allocation6 + $0x10] sm:$0xff] }
  0x30   :  { %v1470_v8 = vld [vmem:[#allocation6 + $0x18] sm:$0xff]  ;;  %v1477_v10 = vld [vmem:[#allocation6 + $0x50] sm:$0xff]  ;;  %v1468_v11 = vld [vmem:[#allocation6 + $0x8] sm:$0xff] }
  0x31   :  { %v1476_v12 = vld [vmem:[#allocation6 + $0x48] sm:$0xff]  ;;  %v1467_v13 = vld [vmem:[#allocation6] sm:$0xff]  ;;  %v1961_v21 = vld [vmem:[#allocation9 + $0x78] sm:$0xff] }
  0x32   :  { %v1475_v14 = vld [vmem:[#allocation6 + $0x40] sm:$0xff]  ;;  %v1963_v22 = vld [vmem:[#allocation9 + $0x70] sm:$0xff]  ;;  %v1969_v23 = vld [vmem:[#allocation9 + $0x68] sm:$0xff] }
  0x33   :  { %v1466_v0 = vld [vmem:[%s2131_s20] sm:$0xff]  ;;  %314 = vmatpush.bf16.msra.mxu3 %v1473_v5  ;;  %v1973_v24 = vld [vmem:[#allocation9 + $0x60] sm:$0xff]  ;;  %v1977_v25 = vld [vmem:[#allocation9 + $0x58] sm:$0xff] }
  0x34   :  { %233 = vmatpush.bf16.msra.mxu0 %v1466_v0  ;;  %256 = vmatpush.bf16.msra.mxu1 %v1466_v0  ;;  %v1979_v26 = vld [vmem:[#allocation9 + $0x50] sm:$0xff]  ;;  %v1985_v27 = vld [vmem:[#allocation9 + $0x48] sm:$0xff]  ;;  %v1989_v28 = vld [vmem:[#allocation9 + $0x40] sm:$0xff] }
  0x35   :  { %v1993_v29 = vld [vmem:[#allocation9 + $0x38] sm:$0xff]  ;;  %v1997_v30 = vld [vmem:[#allocation9 + $0x30] sm:$0xff]  ;;  %v2001_v32 = vld [vmem:[#allocation9 + $0x28] sm:$0xff] }
  0x36   :  { %v2003_v33 = vld [vmem:[#allocation9 + $0x20] sm:$0xff]  ;;  %v2007_v34 = vld [vmem:[#allocation9 + $0x18] sm:$0xff]  ;;  %v2011_v35 = vld [vmem:[#allocation9 + $0x10] sm:$0xff] }
  0x37   :  { %1237 = vmatmul.msk.bf16.vlgmr.msra.gmra.mxu0 %vm222_vm0, %v1950_v1  ;;  %1242 = vmatmul.msk.bf16.vlgmr.msra.gmra.mxu1 %vm222_vm0, %v1952_v2  ;;  %v2015_v36 = vld [vmem:[#allocation9 + $0x8] sm:$0xff]  ;;  %v2019_v37 = vld [vmem:[#allocation9] sm:$0xff] }
  0x38   :  { %404 = vmatpush.bf16.msrb.mxu0 %v1478_v4  ;;  %315 = vmatpush.bf16.msra.mxu3 %v1472_v6  ;;  %v2047_v54 = vld [vmem:[#allocation10 + $0x8] sm:$0xff]  ;;  %v2051_v55 = vld [vmem:[#allocation10] sm:$0xff] }
  0x39   :  { %439 = vmatpush.msrb.mxu1 %v1961_v21  ;;  %479 = vmatpush.msra.mxu2 %v2047_v54 }
  0x3b   :  { %440 = vmatpush.msrb.mxu1 %v1963_v22  ;;  %480 = vmatpush.msra.mxu2 %v2051_v55 }
  0x3c   :  { %316 = vmatpush.bf16.msra.mxu3 %v1471_v7  ;;  %405 = vmatpush.bf16.msrb.mxu0 %v1477_v10  ;;  %v1493_v10 = vld [vmem:[#allocation7 + $0x70] sm:$0xff] }
  0x3d   :  { %441 = vmatpush.msrb.mxu1 %v1969_v23  ;;  %574 = vmatpush.msrb.mxu2 %v2047_v54 }
  0x3f   :  { %1259 = vmatmul.msk.bf16.vlgmr.msra.gmra.mxu3 %vm305_vm1, %v1466_v0  ;;  %442 = vmatpush.msrb.mxu1 %v1973_v24 }
  0x40   :  { %354 = vmatpush.bf16.msrb.mxu3 %v1470_v8  ;;  %406 = vmatpush.bf16.msrb.mxu0 %v1476_v12 }
  0x41   :  { %443 = vmatpush.msrb.mxu1 %v1977_v25  ;;  %575 = vmatpush.msrb.mxu2 %v2051_v55 }
  0x43   :  { %444 = vmatpush.msrb.mxu1 %v1979_v26 }
  0x44   :  { %355 = vmatpush.bf16.msrb.mxu3 %v1469_v9  ;;  %407 = vmatpush.bf16.msrb.mxu0 %v1475_v14  ;;  %v1494_v9 = vld [vmem:[#allocation7 + $0x78] sm:$0xff]  ;;  %v1492_v14 = vld [vmem:[#allocation7 + $0x68] sm:$0xff] }
  0x45   :  { %445 = vmatpush.msrb.mxu1 %v1985_v27 }
  0x47   :  { %446 = vmatpush.msrb.mxu1 %v1989_v28 }
  0x48   :  { %356 = vmatpush.bf16.msrb.mxu3 %v1468_v11  ;;  %551 = vmatpush.msra.mxu0 %v2047_v54 }
  0x49   :  { %447 = vmatpush.msrb.mxu1 %v1993_v29 }
  0x4a   :  { %552 = vmatpush.msra.mxu0 %v2051_v55 }
  0x4b   :  { %448 = vmatpush.msrb.mxu1 %v1997_v30 }
  0x4c   :  { %357 = vmatpush.bf16.msrb.mxu3 %v1467_v13 }
  0x4d   :  { %449 = vmatpush.msrb.mxu1 %v2001_v32 }
  0x4f   :  { %450 = vmatpush.msrb.mxu1 %v2003_v33 }
  0x50   :  { %497 = vmatpush.msra.mxu3 %v1961_v21 }
  0x51   :  { %451 = vmatpush.msrb.mxu1 %v2007_v34 }
  0x52   :  { %498 = vmatpush.msra.mxu3 %v1963_v22 }
  0x53   :  { %452 = vmatpush.msrb.mxu1 %v2011_v35 }
  0x54   :  { %499 = vmatpush.msra.mxu3 %v1969_v23 }
  0x55   :  { %453 = vmatpush.msrb.mxu1 %v2015_v36 }
  0x56   :  { %500 = vmatpush.msra.mxu3 %v1973_v24 }
  0x57   :  { %454 = vmatpush.msrb.mxu1 %v2019_v37 }
  0x58   :  { %501 = vmatpush.msra.mxu3 %v1977_v25 }
  0x5a   :  { %502 = vmatpush.msra.mxu3 %v1979_v26 }
  0x5c   :  { %503 = vmatpush.msra.mxu3 %v1985_v27 }
  0x5e   :  { %504 = vmatpush.msra.mxu3 %v1989_v28 }
  0x60   :  { %505 = vmatpush.msra.mxu3 %v1993_v29 }
  0x62   :  { %506 = vmatpush.msra.mxu3 %v1997_v30 }
  0x64   :  { %507 = vmatpush.msra.mxu3 %v2001_v32 }
  0x66   :  { %508 = vmatpush.msra.mxu3 %v2003_v33 }
  0x68   :  { %509 = vmatpush.msra.mxu3 %v2007_v34 }
  0x6a   :  { %510 = vmatpush.msra.mxu3 %v2011_v35 }
  0x6c   :  { %511 = vmatpush.msra.mxu3 %v2015_v36 }
  0x6e   :  { %512 = vmatpush.msra.mxu3 %v2019_v37 }
  0xb4   :  { %v235_v15 = vpop.f32.mrf.mxu0  ;;  %v258_v16 = vpop.f32.mrf.mxu1 }
  0xbc   :  { %v237_v17 = vpop.f32.mrf.mxu0  ;;  %v260_v18 = vpop.f32.mrf.mxu1 }
  0xbd   :  { %v240_v19 = vpack.c.bf16 %v237_v17, %v235_v15  ;;  %v263_v20 = vpack.c.bf16 %v260_v18, %v258_v16 }
  0xbf   :  { %1276 = vmatmul.msk.bf16.vlgmr.msrb.gmra.mxu3 %vm305_vm1, %v240_v19  ;;  %1293 = vmatmul.msk.bf16.vlgmr.msrb.gmra.mxu0 %vm305_vm1, %v263_v20  ;;  %v518_v20 = vld [vmem:[%s2120_s7] sm:$0x1] }
  0xc0   :  { %864 = vmatpush.msrb.mxu3 %v1961_v21 }
  0xc2   :  { %v318_v31 = vpop.f32.mrf.mxu3  ;;  %865 = vmatpush.msrb.mxu3 %v1963_v22 }
  0xc4   :  { %866 = vmatpush.msrb.mxu3 %v1969_v23 }
  0xc6   :  { %867 = vmatpush.msrb.mxu3 %v1973_v24 }
  0xc8   :  { %868 = vmatpush.msrb.mxu3 %v1977_v25 }
  0xca   :  { %v320_v38 = vpop.f32.mrf.mxu3  ;;  %869 = vmatpush.msrb.mxu3 %v1979_v26 }
  0xcc   :  { %870 = vmatpush.msrb.mxu3 %v1985_v27 }
  0xce   :  { %871 = vmatpush.msrb.mxu3 %v1989_v28 }
  0xd0   :  { %872 = vmatpush.msrb.mxu3 %v1993_v29 }
  0xd2   :  { %873 = vmatpush.msrb.mxu3 %v1997_v30 }
  0xd4   :  { %874 = vmatpush.msrb.mxu3 %v2001_v32 }
  0xd6   :  { %875 = vmatpush.msrb.mxu3 %v2003_v33 }
  0xd8   :  { %876 = vmatpush.msrb.mxu3 %v2007_v34 }
  0xda   :  { %877 = vmatpush.msrb.mxu3 %v2011_v35 }
  0xdc   :  { %878 = vmatpush.msrb.mxu3 %v2015_v36 }
  0xde   :  { %879 = vmatpush.msrb.mxu3 %v2019_v37 }
 0x13c   :  { %v409_v39 = vpop.f32.mrf.mxu0 }
 0x142   :  { %v359_v40 = vpop.f32.mrf.mxu3 }
 0x143   :  { %v360_v41 = vadd.f32 %v359_v40, %v318_v31  ;;  %v531_v40 = vld [vmem:[%s2121_s8] sm:$0x1] }
 0x144   :  { %v411_v44 = vpop.f32.mrf.mxu0 }
 0x145   :  { %v2033_v45 = vadd.f32 %v409_v39, %v360_v41 }
 0x14a   :  { %v361_v42 = vpop.f32.mrf.mxu3 }
 0x14b   :  { %v362_v43 = vadd.f32 %v361_v42, %v320_v38 }
 0x14d   :  { %v2035_v46 = vadd.f32 %v411_v44, %v362_v43  ;;  %v1491_v43 = vld [vmem:[#allocation7 + $0x60] sm:$0xff]  ;;  %v1490_v44 = vld [vmem:[#allocation7 + $0x58] sm:$0xff] }
 0x14f   :  { %v416_v47 = vadd.f32 %v2035_v46, %v2033_v45 }
 0x151   :  { %v417_v48 = vrot.slane %v416_v47, 4 }
 0x153   :  { %v418_v49 = vadd.f32 %v417_v48, %v416_v47  ;;  %v1489_v47 = vld [vmem:[#allocation7 + $0x50] sm:$0xff]  ;;  %v1488_v48 = vld [vmem:[#allocation7 + $0x48] sm:$0xff] }
 0x155   :  { %v419_v50 = vrot.slane %v418_v49, 2 }
 0x157   :  { %v420_v51 = vadd.f32 %v419_v50, %v418_v49  ;;  %v1487_v49 = vld [vmem:[#allocation7 + $0x40] sm:$0xff] }
 0x159   :  { %v421_v52 = vrot.slane %v420_v51, 1 }
 0x15b   :  { %v422_v53 = vadd.f32 %v421_v52, %v420_v51 }
 0x15d   :  { %455 = vmatmul.f32.vlgmr.msrb.gmra.mxu1 %v422_v53 }
 0x1da   :  { %v456_v56 = vpop.f32.mrf.mxu1 }
 0x1db   :  { %v459_v57 = vmul.f32 0.0078125, %v456_v56 }
 0x1dd   :  { %1294 = vmatmul.msk.f32.vlgmr.msra.gmra.mxu2 %vm222_vm0, %v459_v57 }
 0x1de   :  { %700 = vmatpush.bf16.msra.mxu2 %v1494_v9  ;;  %v1497_v9 = vld [vmem:[#allocation7 + $0x90] sm:$0xff] }
 0x1e2   :  { %701 = vmatpush.bf16.msra.mxu2 %v1493_v10  ;;  %v1496_v10 = vld [vmem:[#allocation7 + $0x88] sm:$0xff] }
 0x1e6   :  { %702 = vmatpush.bf16.msra.mxu2 %v1492_v14 }
 0x1ea   :  { %703 = vmatpush.bf16.msra.mxu2 %v1491_v43 }
 0x1ee   :  { %704 = vmatpush.bf16.msra.mxu2 %v1490_v44 }
 0x1f2   :  { %705 = vmatpush.bf16.msra.mxu2 %v1489_v47 }
 0x1f6   :  { %706 = vmatpush.bf16.msra.mxu2 %v1488_v48 }
 0x1fa   :  { %707 = vmatpush.bf16.msra.mxu2 %v1487_v49 }
 0x260   :  { %v482_v58 = vpop.f32.mrf.mxu2 }
 0x261   :  { %v485_v59 = vperm.slane %v482_v58, 0 }
 0x263   :  { %v486_v60 = vsub.f32 %v2033_v45, %v485_v59  ;;  %v487_v61 = vsub.f32 %v2035_v46, %v485_v59 }
 0x265   :  { %v488_v62 = vmul.f32 %v486_v60, %v486_v60  ;;  %v489_v63 = vmul.f32 %v487_v61, %v487_v61 }
 0x267   :  { %v490_v0 = vadd.f32 %v489_v63, %v488_v62  ;;  %v1486_v62 = vld [vmem:[#allocation7 + $0x38] sm:$0xff] }
 0x269   :  { %v491_v3 = vrot.slane %v490_v0, 4 }
 0x26b   :  { %v492_v4 = vadd.f32 %v491_v3, %v490_v0  ;;  %v1502_v0 = vld [vmem:[#allocation7 + $0xb8] sm:$0xff]  ;;  %v1485_v3 = vld [vmem:[#allocation7 + $0x30] sm:$0xff] }
 0x26d   :  { %v493_v5 = vrot.slane %v492_v4, 2 }
 0x26f   :  { %v494_v6 = vadd.f32 %v493_v5, %v492_v4  ;;  %v1501_v4 = vld [vmem:[#allocation7 + $0xb0] sm:$0xff]  ;;  %v1483_v5 = vld [vmem:[#allocation7 + $0x20] sm:$0xff] }
 0x271   :  { %v495_v7 = vrot.slane %v494_v6, 1 }
 0x273   :  { %v496_v8 = vadd.f32 %v495_v7, %v494_v6  ;;  %v1499_v6 = vld [vmem:[#allocation7 + $0xa0] sm:$0xff]  ;;  %v1482_v7 = vld [vmem:[#allocation7 + $0x18] sm:$0xff] }
 0x275   :  { %513 = vmatmul.f32.vlgmr.msra.gmra.mxu3 %v496_v8  ;;  %v1498_v8 = vld [vmem:[#allocation7 + $0x98] sm:$0xff] }
 0x2f8   :  { %v514_v11 = vpop.f32.mrf.mxu3 }
 0x2f9   :  { %v517_v12 = vmul.f32 0.0078125, %v514_v11  ;;  %v1479_v11 = vld [vmem:[#allocation7] sm:$0xff] }
 0x2fb   :  { %v519_v13 = vadd.f32 1e-05, %v517_v12  ;;  %v1495_v12 = vld [vmem:[#allocation7 + $0x80] sm:$0xff] }
 0x2fd   :  { %1538 = vrsqrt.f32 %v519_v13  ;;  %vm526_vm3 = vweird.f32 %v519_v13 }
 0x303   :  { %v1539_v15 = vpop.eup %1538 }
 0x304   :  { %v521_v16 = vmul.f32 %v1539_v15, %v519_v13  ;;  %vm527_vm2 = vweird.f32 %v1539_v15 }
 0x305   :  { %vm528_vm4 = vmor %vm526_vm3, %vm527_vm2 }
 0x306   :  { %v522_v17 = vmul.f32 %v1539_v15, %v521_v16 }
 0x308   :  { %v523_v18 = vmul.f32 0.5, %v522_v17 }
 0x30a   :  { %v524_v19 = vsub.f32 1.5, %v523_v18 }
 0x30c   :  { %v525_v31 = vmul.f32 %v1539_v15, %v524_v19 }
 0x30e   :  { %v529_v38 = vsel %vm528_vm4, %v1539_v15, %v525_v31 }
 0x30f   :  { %v530_v39 = vmul.f32 %v529_v38, %v518_v20 }
 0x311   :  { %1295 = vmatmul.msk.f32.vlgmr.msra.gmra.mxu0 %vm222_vm0, %v530_v39  ;;  %v532_v41 = vmul.f32 %v530_v39, %v459_v57 }
 0x313   :  { %v533_v42 = vsub.f32 %v531_v40, %v532_v41 }
 0x315   :  { %1296 = vmatmul.msk.f32.vlgmr.msrb.gmra.mxu2 %vm222_vm0, %v533_v42 }
 0x316   :  { %902 = vmatpush.msrb.mxu2 %v2047_v54 }
 0x318   :  { %903 = vmatpush.msrb.mxu2 %v2051_v55 }
 0x38e   :  { %v554_v50 = vpop.f32.mrf.mxu0 }
 0x38f   :  { %v580_v51 = vperm.slane %v554_v50, 0 }
 0x391   :  { %v581_v53 = vmul.f32 %v580_v51, %v2033_v45  ;;  %v582_v56 = vmul.f32 %v580_v51, %v2035_v46  ;;  %v1484_v45 = vld [vmem:[#allocation7 + $0x28] sm:$0xff] }
 0x392   :  { %v1500_v46 = vld [vmem:[#allocation7 + $0xa8] sm:$0xff] }
 0x398   :  { %v577_v52 = vpop.f32.mrf.mxu2 }
 0x399   :  { %v583_v57 = vperm.slane %v577_v52, 0 }
 0x39b   :  { %v584_v58 = vadd.f32 %v583_v57, %v581_v53  ;;  %v585_v59 = vadd.f32 %v583_v57, %v582_v56 }
 0x39d   :  { %v586_v60 = vmax.f32 %v584_v58, 0.0  ;;  %v587_v61 = vmax.f32 %v585_v59, 0.0 }
 0x39f   :  { %v588_v63 = vpack.c.bf16 %v587_v61, %v586_v60  ;;  %v941_v61 = vld [vmem:[%s2122_s9] sm:$0x1] }
 0x3a1   :  { %596 = vmatpush.bf16.msrb.mxu0 %v588_v63  ;;  %611 = vmatpush.bf16.msra.mxu1 %v588_v63 }
 0x3a2   :  { %708 = vmatmul.bf16.vlgmr.msra.gmra.mxu2 %v588_v63 }
 0x3a3   :  { %974 = vmatpush.msra.mxu2 %v2047_v54 }
 0x3a4   :  { %1297 = vmatmul.msk.bf16.vlgmr.msrb.gmra.mxu0 %vm222_vm0, %v1950_v1  ;;  %1298 = vmatmul.msk.bf16.vlgmr.msra.gmra.mxu1 %vm222_vm0, %v1952_v2  ;;  %v1481_v1 = vld [vmem:[#allocation7 + $0x10] sm:$0xff]  ;;  %v1480_v2 = vld [vmem:[#allocation7 + $0x8] sm:$0xff] }
 0x3a5   :  { %762 = vmatpush.bf16.msra.mxu0 %v1486_v62  ;;  %841 = vmatpush.bf16.msrb.mxu1 %v1502_v0 }
 0x3a6   :  { %975 = vmatpush.msra.mxu2 %v2051_v55 }
 0x3a9   :  { %763 = vmatpush.bf16.msra.mxu0 %v1485_v3  ;;  %842 = vmatpush.bf16.msrb.mxu1 %v1501_v4  ;;  %v954_v3 = vld [vmem:[%s2123_s10] sm:$0x1] }
 0x3ad   :  { %764 = vmatpush.bf16.msra.mxu0 %v1484_v45  ;;  %843 = vmatpush.bf16.msrb.mxu1 %v1500_v46  ;;  %v1510_v46 = vld [vmem:[#allocation15 + $0x38] sm:$0xff] }
 0x3b1   :  { %765 = vmatpush.bf16.msra.mxu0 %v1483_v5  ;;  %844 = vmatpush.bf16.msrb.mxu1 %v1499_v6  ;;  %v1509_v5 = vld [vmem:[#allocation15 + $0x30] sm:$0xff]  ;;  %v1508_v6 = vld [vmem:[#allocation15 + $0x28] sm:$0xff] }
 0x3b5   :  { %766 = vmatpush.bf16.msra.mxu0 %v1482_v7  ;;  %845 = vmatpush.bf16.msrb.mxu1 %v1498_v8  ;;  %v1507_v7 = vld [vmem:[#allocation15 + $0x20] sm:$0xff] }
 0x3b9   :  { %767 = vmatpush.bf16.msra.mxu0 %v1481_v1  ;;  %846 = vmatpush.bf16.msrb.mxu1 %v1497_v9  ;;  %v1506_v9 = vld [vmem:[#allocation15 + $0x18] sm:$0xff] }
 0x3bd   :  { %768 = vmatpush.bf16.msra.mxu0 %v1480_v2  ;;  %847 = vmatpush.bf16.msrb.mxu1 %v1496_v10 }
 0x3c1   :  { %769 = vmatpush.bf16.msra.mxu0 %v1479_v11  ;;  %848 = vmatpush.bf16.msrb.mxu1 %v1495_v12 }
 0x3c5   :  { %920 = vmatpush.msrb.mxu0 %v1961_v21  ;;  %1121 = vmatpush.bf16.msra.mxu1 %v1510_v46 }
 0x3c7   :  { %921 = vmatpush.msrb.mxu0 %v1963_v22 }
 0x3c9   :  { %922 = vmatpush.msrb.mxu0 %v1969_v23  ;;  %1122 = vmatpush.bf16.msra.mxu1 %v1509_v5 }
 0x3cb   :  { %923 = vmatpush.msrb.mxu0 %v1973_v24 }
 0x3cd   :  { %924 = vmatpush.msrb.mxu0 %v1977_v25  ;;  %1123 = vmatpush.bf16.msra.mxu1 %v1508_v6 }
 0x3cf   :  { %925 = vmatpush.msrb.mxu0 %v1979_v26 }
 0x3d1   :  { %926 = vmatpush.msrb.mxu0 %v1985_v27  ;;  %1124 = vmatpush.bf16.msra.mxu1 %v1507_v7 }
 0x3d3   :  { %927 = vmatpush.msrb.mxu0 %v1989_v28 }
 0x3d5   :  { %928 = vmatpush.msrb.mxu0 %v1993_v29  ;;  %1125 = vmatpush.bf16.msra.mxu1 %v1506_v9 }
 0x3d7   :  { %929 = vmatpush.msrb.mxu0 %v1997_v30 }
 0x3d9   :  { %930 = vmatpush.msrb.mxu0 %v2001_v32 }
 0x3db   :  { %931 = vmatpush.msrb.mxu0 %v2003_v33 }
 0x3dd   :  { %932 = vmatpush.msrb.mxu0 %v2007_v34 }
 0x3df   :  { %933 = vmatpush.msrb.mxu0 %v2011_v35 }
 0x3e1   :  { %934 = vmatpush.msrb.mxu0 %v2015_v36 }
 0x3e3   :  { %935 = vmatpush.msrb.mxu0 %v2019_v37 }
 0x421   :  { %v598_v21 = vpop.f32.mrf.mxu0  ;;  %v613_v22 = vpop.f32.mrf.mxu1 }
 0x425   :  { %v709_v27 = vpop.f32.mrf.mxu2 }
 0x429   :  { %v600_v23 = vpop.f32.mrf.mxu0  ;;  %v615_v24 = vpop.f32.mrf.mxu1 }
 0x42a   :  { %v603_v25 = vpack.c.bf16 %v600_v23, %v598_v21  ;;  %v618_v26 = vpack.c.bf16 %v615_v24, %v613_v22  ;;  %v1505_v21 = vld [vmem:[#allocation15 + $0x10] sm:$0xff] }
 0x42b   :  { %1126 = vmatpush.bf16.msra.mxu1 %v1505_v21 }
 0x42c   :  { %770 = vmatmul.bf16.vlgmr.msra.gmra.mxu0 %v603_v25  ;;  %849 = vmatmul.bf16.vlgmr.msrb.gmra.mxu1 %v618_v26  ;;  %v1504_v26 = vld [vmem:[#allocation15 + $0x8] sm:$0xff] }
 0x42d   :  { %997 = vmatpush.msra.mxu0 %v2047_v54  ;;  %v711_v32 = vpop.f32.mrf.mxu2 }
 0x42f   :  { %998 = vmatpush.msra.mxu0 %v2051_v55  ;;  %1127 = vmatpush.bf16.msra.mxu1 %v1504_v26 }
 0x4a9   :  { %v771_v28 = vpop.f32.mrf.mxu0  ;;  %v850_v29 = vpop.f32.mrf.mxu1 }
 0x4aa   :  { %v772_v30 = vadd.f32 %v771_v28, %v709_v27 }
 0x4ac   :  { %v855_v36 = vadd.f32 %v850_v29, %v772_v30 }
 0x4b1   :  { %v773_v33 = vpop.f32.mrf.mxu0  ;;  %v852_v35 = vpop.f32.mrf.mxu1 }
 0x4b2   :  { %v774_v34 = vadd.f32 %v773_v33, %v711_v32  ;;  %v1518_v33 = vld [vmem:[#allocation16 + $0x38] sm:$0xff] }
 0x4b4   :  { %v856_v13 = vadd.f32 %v852_v35, %v774_v34  ;;  %v1015_v35 = vld [vmem:[#allocation12] sm:$0xf] }
 0x4b6   :  { %v857_v14 = vadd.f32 %v856_v13, %v855_v36 }
 0x4b8   :  { %v858_v37 = vrot.slane %v857_v14, 4 }
 0x4ba   :  { %v859_v15 = vadd.f32 %v858_v37, %v857_v14  ;;  %v1516_v14 = vld [vmem:[#allocation16 + $0x28] sm:$0xff]  ;;  %v1515_v37 = vld [vmem:[#allocation16 + $0x20] sm:$0xff] }
 0x4bc   :  { %v860_v16 = vrot.slane %v859_v15, 2 }
 0x4be   :  { %v861_v17 = vadd.f32 %v860_v16, %v859_v15  ;;  %v1514_v15 = vld [vmem:[#allocation16 + $0x18] sm:$0xff]  ;;  %v1513_v16 = vld [vmem:[#allocation16 + $0x10] sm:$0xff] }
 0x4c0   :  { %v862_v18 = vrot.slane %v861_v17, 1 }
 0x4c2   :  { %v863_v19 = vadd.f32 %v862_v18, %v861_v17  ;;  %v1512_v17 = vld [vmem:[#allocation16 + $0x8] sm:$0xff]  ;;  %v1503_v18 = vld [vmem:[#allocation15] sm:$0xff] }
 0x4c3   :  { %1128 = vmatpush.bf16.msra.mxu1 %v1503_v18 }
 0x4c4   :  { %880 = vmatmul.f32.vlgmr.msrb.gmra.mxu3 %v863_v19  ;;  %v1511_v19 = vld [vmem:[#allocation16] sm:$0xff] }
 0x547   :  { %v881_v54 = vpop.f32.mrf.mxu3 }
 0x548   :  { %v884_v55 = vmul.f32 0.0078125, %v881_v54 }
 0x54a   :  { %1395 = vmatmul.msk.f32.vlgmr.msrb.gmra.mxu2 %vm222_vm0, %v884_v55 }
 0x5cd   :  { %v905_v20 = vpop.f32.mrf.mxu2 }
 0x5ce   :  { %v908_v31 = vperm.slane %v905_v20, 0 }
 0x5d0   :  { %v909_v38 = vsub.f32 %v855_v36, %v908_v31  ;;  %v910_v39 = vsub.f32 %v856_v13, %v908_v31 }
 0x5d2   :  { %v911_v40 = vmul.f32 %v909_v38, %v909_v38  ;;  %v912_v41 = vmul.f32 %v910_v39, %v910_v39 }
 0x5d4   :  { %v913_v42 = vadd.f32 %v912_v41, %v911_v40 }
 0x5d6   :  { %v914_v43 = vrot.slane %v913_v42, 4 }
 0x5d8   :  { %v915_v44 = vadd.f32 %v914_v43, %v913_v42 }
 0x5da   :  { %v916_v47 = vrot.slane %v915_v44, 2 }
 0x5dc   :  { %v917_v48 = vadd.f32 %v916_v47, %v915_v44 }
 0x5de   :  { %v918_v49 = vrot.slane %v917_v48, 1 }
 0x5e0   :  { %v919_v50 = vadd.f32 %v918_v49, %v917_v48 }
 0x5e2   :  { %936 = vmatmul.f32.vlgmr.msrb.gmra.mxu0 %v919_v50 }
 0x65f   :  { %v937_v51 = vpop.f32.mrf.mxu0 }
 0x660   :  { %v940_v52 = vmul.f32 0.0078125, %v937_v51 }
 0x662   :  { %v942_v53 = vadd.f32 1e-05, %v940_v52 }
 0x664   :  { %1540 = vrsqrt.f32 %v942_v53  ;;  %vm949_vm6 = vweird.f32 %v942_v53 }
 0x66a   :  { %v1541_v56 = vpop.eup %1540 }
 0x66b   :  { %v944_v57 = vmul.f32 %v1541_v56, %v942_v53  ;;  %vm950_vm5 = vweird.f32 %v1541_v56 }
 0x66c   :  { %vm951_vm7 = vmor %vm949_vm6, %vm950_vm5 }
 0x66d   :  { %v945_v58 = vmul.f32 %v1541_v56, %v944_v57 }
 0x66f   :  { %v946_v59 = vmul.f32 0.5, %v945_v58 }
 0x671   :  { %v947_v60 = vsub.f32 1.5, %v946_v59 }
 0x673   :  { %v948_v62 = vmul.f32 %v1541_v56, %v947_v60 }
 0x675   :  { %v952_v63 = vsel %vm951_vm7, %v1541_v56, %v948_v62 }
 0x676   :  { %v953_v0 = vmul.f32 %v952_v63, %v941_v61 }
 0x678   :  { %v955_v4 = vmul.f32 %v953_v0, %v884_v55  ;;  %1396 = vmatmul.msk.f32.vlgmr.msra.gmra.mxu2 %vm222_vm0, %v953_v0 }
 0x67a   :  { %v956_v45 = vsub.f32 %v954_v3, %v955_v4 }
 0x67c   :  { %1397 = vmatmul.msk.f32.vlgmr.msra.gmra.mxu0 %vm222_vm0, %v956_v45 }
 0x6f9   :  { %v1000_v8 = vpop.f32.mrf.mxu0 }
 0x6fa   :  { %v1006_v10 = vperm.slane %v1000_v8, 0 }
 0x6fb   :  { %v977_v1 = vpop.f32.mrf.mxu2 }
 0x6fc   :  { %v1003_v2 = vperm.slane %v977_v1, 0 }
 0x6fe   :  { %v1004_v11 = vmul.f32 %v1003_v2, %v855_v36  ;;  %v1005_v12 = vmul.f32 %v1003_v2, %v856_v13  ;;  %v1038_v36 = vld [vmem:[#allocation13] sm:$0xf]  ;;  %v1517_v13 = vld [vmem:[#allocation16 + $0x30] sm:$0xff] }
 0x700   :  { %v1007_v22 = vadd.f32 %v1006_v10, %v1004_v11  ;;  %v1008_v23 = vadd.f32 %v1006_v10, %v1005_v12 }
 0x702   :  { %v1009_v24 = vmax.f32 %v1007_v22, 0.0  ;;  %v1010_v25 = vmax.f32 %v1008_v23, 0.0 }
 0x704   :  { %v1011_v27 = vpack.c.bf16 %v1009_v24, %v1009_v24  ;;  %v1012_v28 = vpack.c.bf16 %v1010_v25, %v1010_v25  ;;  %v1522_v29 = vpack.c.bf16 %v1010_v25, %v1009_v24 }
 0x706   :  { %1523 = vst [vmem:[%s2128_s15] sm:$0xff] %v1522_v29   ;;  %v1018_v30 = vunpack.c.l.b16 %v1011_v27  ;;  %v1019_v32 = vunpack.c.l.b16 %v1012_v28 }
 0x708   :  { %v1020_v34 = vpack.c.b16 %v1019_v32, %v1018_v30 }
 0x70a   :  { %1032 = vmatpush.bf16.msrb.mxu2 %v1020_v34  ;;  %1049 = vmatpush.bf16.msra.mxu3 %v1020_v34 }
 0x70d   :  { %1398 = vmatmul.msk.bf16.vlgmr.msrb.gmra.mxu2 %vm222_vm0, %v1015_v35  ;;  %1399 = vmatmul.msk.bf16.vlgmr.msra.gmra.mxu3 %vm222_vm0, %v1038_v36 }
 0x70e   :  { %1198 = vmatpush.bf16.msra.mxu2 %v1518_v33 }
 0x712   :  { %1199 = vmatpush.bf16.msra.mxu2 %v1517_v13 }
 0x716   :  { %1200 = vmatpush.bf16.msra.mxu2 %v1516_v14 }
 0x71a   :  { %1201 = vmatpush.bf16.msra.mxu2 %v1515_v37 }
 0x71e   :  { %1202 = vmatpush.bf16.msra.mxu2 %v1514_v15 }
 0x722   :  { %1203 = vmatpush.bf16.msra.mxu2 %v1513_v16 }
 0x726   :  { %1204 = vmatpush.bf16.msra.mxu2 %v1512_v17 }
 0x72a   :  { %1205 = vmatpush.bf16.msra.mxu2 %v1511_v19 }
 0x790   :  { %v1034_v54 = vpop.f32.mrf.mxu2  ;;  %v1051_v55 = vpop.f32.mrf.mxu3 }
 0x791   :  { %v1055_v20 = vmax.f32 %v1034_v54, %v1051_v55 }
 0x793   :  { %v1056_v31 = vpack.c.bf16 %v1055_v20, %v1055_v20 }
 0x795   :  { %1129 = vmatmul.bf16.vlgmr.msra.gmra.mxu1 %v1056_v31  ;;  %1206 = vmatmul.bf16.vlgmr.msra.gmra.mxu2 %v1056_v31 }
 0x798   :  { %v1036_v38 = vpop.f32.mrf.mxu2  ;;  %v1053_v39 = vpop.f32.mrf.mxu3 }
 0x812   :  { %v1130_v40 = vpop.f32.mrf.mxu1 }
 0x818   :  { %v1207_v41 = vpop.f32.mrf.mxu2 }
 0x819   :  { %v1211_v42 = vmax.f32 %v1130_v40, %v1207_v41 }
 0x81a   :  { %v1132_v43 = vpop.f32.mrf.mxu1 }
 0x81b   :  { %v1212_v44 = vpack.c.bf16 %v1211_v42, %v1211_v42 }
 0x81d   :  { %1214 = vst.msk [vmem:[%s2129_s16] sm:$0xf] %vm1213_vm8, %v1212_v44 }
 0x820   :  { %v1209_v47 = vpop.f32.mrf.mxu2 }
 0x821   :  { %1223 = vsyncpa [#allocation3], 1 }
 0x822   :  { %1224 = vsyncpa [#allocation5], 1 }
 0x823   :  { %1225 = vsyncpa [#allocation8], 1 }
 0x824   :  { %1226 = vsyncpa [#allocation11], 1 }
 0x825   :  { %1227 = vsyncpa [#allocation14], 1 }
 0x826   :  { %1228 = vsyncpa [#allocation17], 1 }

// kernel: unet_forward.13
= control target key start
LH: loop header
LB: loop body
LE: loop exit
PB: predicated region body
PF: predicated region fallthrough
CT: control target
= control target key end

     0   :  { %8 = vsyncpa [#allocation3], 0  ;;  %s372_s0 = inlined_call_operand.vmem [shape: bf16[16,128], index: 0, kind: input, shape index: {}]   ;;  %s373_s1 = inlined_call_operand.hbm [shape: bf16[128,256], index: 1, kind: input, shape index: {}]   ;;  %s374_s2 = inlined_call_operand.hbm [shape: f32[1,256], index: 2, kind: input, shape index: {}]   ;;  %s375_s3 = inlined_call_operand.vmem [shape: bf16[16,256], index: 3, kind: output, shape index: {}]  }
   0x1   :  { %s16_s14 = sshll.u32 %s373_s1, 4  ;;  %s17_s14 = int_to_ptr.hbm [resolvable:$true] %s16_s14 }
   0x2   :  { %9 = vsyncpa [#allocation5], 0  ;;  %s333_s15 = smov [#allocation2]   ;;  %s30_s19 = sshll.u32 %s374_s2, 4  ;;  %s31_s19 = int_to_ptr.hbm [resolvable:$true] %s30_s19 }
   0x3   :  { %s18_s16 = sshll.u32 %s333_s15, 4  ;;  %s334_s20 = smov 128   ;;  %s19_s16 = int_to_ptr.vmem [resolvable:$true] %s18_s16 }
   0x4   :  { %s335_s21 = smov 8   ;;  %s336_s22 = smov [#allocation4]  }
   0x5   :  { %24 = dma.hbm_to_vmem [thread:$0]  %s17_s14, 2048, %s19_s16, [#allocation3], %s334_s20, %s334_s20, %s335_s21  }
   0x6   :  { %s32_s23 = sshll.u32 %s336_s22, 4  ;;  %s33_s23 = int_to_ptr.vmem [resolvable:$true] %s32_s23 }
   0x7   :  { %35 = dma.hbm_to_vmem [thread:$0]  %s31_s19, 32, %s33_s23, [#allocation5]  }
   0x8   :  { %329 = dma.done.wait [#allocation3], 2048  }
   0x9   :  { %330 = vsyncadd [#allocation3], 4294965248 }
   0xa   :  { %331 = dma.done.wait [#allocation5], 32  }
   0xb   :  { %332 = vsyncadd [#allocation5], 4294967264  ;;  %v254_v0 = vld [vmem:[#allocation2 + $0x70] sm:$0xf]  ;;  %v276_v1 = vld [vmem:[#allocation2 + $0x74] sm:$0xf0] }
   0xc   :  { %v275_v2 = vld [vmem:[#allocation2 + $0x74] sm:$0xf]  ;;  %v255_v3 = vor.u32 %v276_v1, %v254_v0  ;;  %v256_v4 = vld [vmem:[#allocation2 + $0x78] sm:$0xf0]  ;;  %v246_v5 = vld [vmem:[#allocation2 + $0x60] sm:$0xf] }
   0xd   :  { %v274_v6 = vld [vmem:[#allocation2 + $0x64] sm:$0xf0]  ;;  %v259_v7 = vor.u32 %v275_v2, %v256_v4  ;;  %v273_v8 = vld [vmem:[#allocation2 + $0x64] sm:$0xf]  ;;  %v248_v9 = vld [vmem:[#allocation2 + $0x68] sm:$0xf0] }
   0xe   :  { %154 = vmatpush.bf16.msra.mxu0 %v255_v3  ;;  %v247_v10 = vor.u32 %v274_v6, %v246_v5  ;;  %v251_v11 = vor.u32 %v273_v8, %v248_v9  ;;  %v238_v12 = vld [vmem:[#allocation2 + $0x50] sm:$0xf]  ;;  %v272_v13 = vld [vmem:[#allocation2 + $0x54] sm:$0xf0]  ;;  %v271_v14 = vld [vmem:[#allocation2 + $0x54] sm:$0xf] }
   0xf   :  { %168 = vmatpush.bf16.msra.mxu1 %v259_v7  ;;  %v240_v15 = vld [vmem:[#allocation2 + $0x58] sm:$0xf0]  ;;  %v239_v16 = vor.u32 %v272_v13, %v238_v12  ;;  %v230_v18 = vld [vmem:[#allocation2 + $0x40] sm:$0xf]  ;;  %v270_v19 = vld [vmem:[#allocation2 + $0x44] sm:$0xf0] }
  0x10   :  { %v243_v17 = vor.u32 %v271_v14, %v240_v15  ;;  %v269_v20 = vld [vmem:[#allocation2 + $0x44] sm:$0xf]  ;;  %v232_v21 = vld [vmem:[#allocation2 + $0x48] sm:$0xf0]  ;;  %v231_v22 = vor.u32 %v270_v19, %v230_v18  ;;  %v222_v24 = vld [vmem:[#allocation2 + $0x30] sm:$0xf] }
  0x11   :  { %v235_v23 = vor.u32 %v269_v20, %v232_v21  ;;  %v268_v25 = vld [vmem:[#allocation2 + $0x34] sm:$0xf0]  ;;  %v267_v26 = vld [vmem:[#allocation2 + $0x34] sm:$0xf]  ;;  %v224_v27 = vld [vmem:[#allocation2 + $0x38] sm:$0xf0] }
  0x12   :  { %155 = vmatpush.bf16.msra.mxu0 %v247_v10  ;;  %v223_v28 = vor.u32 %v268_v25, %v222_v24  ;;  %v227_v29 = vor.u32 %v267_v26, %v224_v27  ;;  %v214_v30 = vld [vmem:[#allocation2 + $0x20] sm:$0xf]  ;;  %v266_v31 = vld [vmem:[#allocation2 + $0x24] sm:$0xf0]  ;;  %v265_v32 = vld [vmem:[#allocation2 + $0x24] sm:$0xf] }
  0x13   :  { %169 = vmatpush.bf16.msra.mxu1 %v251_v11  ;;  %v216_v33 = vld [vmem:[#allocation2 + $0x28] sm:$0xf0]  ;;  %v215_v34 = vor.u32 %v266_v31, %v214_v30  ;;  %v206_v36 = vld [vmem:[#allocation2 + $0x10] sm:$0xf]  ;;  %v264_v37 = vld [vmem:[#allocation2 + $0x14] sm:$0xf0] }
  0x14   :  { %v219_v35 = vor.u32 %v265_v32, %v216_v33  ;;  %v263_v38 = vld [vmem:[#allocation2 + $0x14] sm:$0xf]  ;;  %v208_v39 = vld [vmem:[#allocation2 + $0x18] sm:$0xf0]  ;;  %v207_v40 = vor.u32 %v264_v37, %v206_v36  ;;  %v198_v42 = vld [vmem:[#allocation2] sm:$0xf] }
  0x15   :  { %v211_v41 = vor.u32 %v263_v38, %v208_v39  ;;  %v262_v43 = vld [vmem:[#allocation2 + $0x4] sm:$0xf0]  ;;  %v261_v44 = vld [vmem:[#allocation2 + $0x4] sm:$0xf]  ;;  %v200_v45 = vld [vmem:[#allocation2 + $0x8] sm:$0xf0] }
  0x16   :  { %156 = vmatpush.bf16.msra.mxu0 %v239_v16  ;;  %v199_v46 = vor.u32 %v262_v43, %v198_v42  ;;  %v203_v47 = vor.u32 %v261_v44, %v200_v45  ;;  %v260_v48 = vld [vmem:[%s372_s0] sm:$0xff] }
  0x17   :  { %170 = vmatpush.bf16.msra.mxu1 %v243_v17  ;;  %v62_v49 = vld [vmem:[#allocation4] sm:$0x3] }
  0x18   :  { %v64_v50 = vperm.slane %v62_v49, 0  ;;  %v65_v51 = vperm.slane %v62_v49, 1 }
  0x1a   :  { %157 = vmatpush.bf16.msra.mxu0 %v231_v22 }
  0x1b   :  { %171 = vmatpush.bf16.msra.mxu1 %v235_v23 }
  0x1e   :  { %158 = vmatpush.bf16.msra.mxu0 %v223_v28 }
  0x1f   :  { %172 = vmatpush.bf16.msra.mxu1 %v227_v29 }
  0x22   :  { %159 = vmatpush.bf16.msra.mxu0 %v215_v34 }
  0x23   :  { %173 = vmatpush.bf16.msra.mxu1 %v219_v35 }
  0x26   :  { %160 = vmatpush.bf16.msra.mxu0 %v207_v40 }
  0x27   :  { %174 = vmatpush.bf16.msra.mxu1 %v211_v41 }
  0x2a   :  { %161 = vmatpush.bf16.msra.mxu0 %v199_v46 }
  0x2b   :  { %175 = vmatpush.bf16.msra.mxu1 %v203_v47 }
  0x2d   :  { %162 = vmatmul.bf16.vlgmr.msra.gmra.mxu0 %v260_v48 }
  0x2e   :  { %176 = vmatmul.bf16.vlgmr.msra.gmra.mxu1 %v260_v48 }
  0xaa   :  { %v163_v52 = vpop.f32.mrf.mxu0 }
  0xab   :  { %v164_v53 = vadd.f32 %v163_v52, %v64_v50  ;;  %v177_v54 = vpop.f32.mrf.mxu1 }
  0xac   :  { %v178_v55 = vadd.f32 %v177_v54, %v65_v51 }
  0xae   :  { %v182_v56 = vpack.c.bf16 %v178_v55, %v164_v53 }
  0xb0   :  { %184 = vst [vmem:[%s375_s3] sm:$0xff] %v182_v56 }
  0xb2   :  { %v165_v57 = vpop.f32.mrf.mxu0 }
  0xb3   :  { %v166_v58 = vadd.f32 %v165_v57, %v64_v50  ;;  %v179_v59 = vpop.f32.mrf.mxu1 }
  0xb4   :  { %v180_v60 = vadd.f32 %v179_v59, %v65_v51 }
  0xb6   :  { %v183_v61 = vpack.c.bf16 %v180_v60, %v166_v58 }
  0xb8   :  { %185 = vst [vmem:[%s375_s3 + $0x8] sm:$0xff] %v183_v61 }
  0xb9   :  { %190 = vsyncpa [#allocation3], 1 }
  0xba   :  { %191 = vsyncpa [#allocation5], 1 }

// kernel: unet_forward.15
= control target key start
LH: loop header
LB: loop body
LE: loop exit
PB: predicated region body
PF: predicated region fallthrough
CT: control target
= control target key end

     0   :  { %8 = vsyncpa [#allocation3], 0  ;;  %s231_s15 = smov [#allocation2]   ;;  %s232_s17 = smov 64   ;;  %s278_s0 = inlined_call_operand.vmem [shape: bf16[32,128], index: 0, kind: input, shape index: {}]   ;;  %s279_s1 = inlined_call_operand.hbm [shape: bf16[128,48], index: 1, kind: input, shape index: {}]   ;;  %s280_s2 = inlined_call_operand.vmem [shape: f32[1,48], index: 2, kind: input, shape index: {}]   ;;  %s281_s3 = inlined_call_operand.vmem [shape: f32[32,48], index: 3, kind: output, shape index: {}]  }
   0x1   :  { %s15_s14 = sshll.u32 %s279_s1, 4  ;;  %s17_s16 = sshll.u32 %s231_s15, 4  ;;  %s16_s14 = int_to_ptr.hbm [resolvable:$true] %s15_s14  ;;  %s18_s16 = int_to_ptr.vmem [resolvable:$true] %s17_s16 }
   0x2   :  { %s233_s18 = smov 4  }
   0x3   :  { %23 = dma.hbm_to_vmem [thread:$0]  %s16_s14, 1024, %s18_s16, [#allocation3], %s232_s17, %s232_s17, %s233_s18  }
   0x4   :  { %229 = dma.done.wait [#allocation3], 1024  }
   0x5   :  { %230 = vsyncadd [#allocation3], 4294966272  ;;  %v192_v0 = vld [vmem:[#allocation2 + $0x38] sm:$0xff]  ;;  %v191_v1 = vld [vmem:[#allocation2 + $0x30] sm:$0xff]  ;;  %vm133_vm0 = vcmask 392192  }
   0x6   :  { %114 = vmatpush.bf16.msra.mxu0 %v192_v0  ;;  %193 = vmatpush.bf16.msra.mxu1 %v192_v0  ;;  %v190_v2 = vld [vmem:[#allocation2 + $0x28] sm:$0xff]  ;;  %v189_v3 = vld [vmem:[#allocation2 + $0x20] sm:$0xff]  ;;  %v188_v4 = vld [vmem:[#allocation2 + $0x18] sm:$0xff] }
   0x7   :  { %v187_v5 = vld [vmem:[#allocation2 + $0x10] sm:$0xff]  ;;  %v186_v6 = vld [vmem:[#allocation2 + $0x8] sm:$0xff]  ;;  %v185_v7 = vld [vmem:[#allocation2] sm:$0xff] }
   0x8   :  { %v183_v8 = vld [vmem:[%s278_s0] sm:$0xff]  ;;  %v184_v9 = vld [vmem:[%s278_s0 + $0x8] sm:$0xff] }
   0x9   :  { %v204_v10 = vld [vmem:[%s280_s2] ss:$0 sm:$0xff] }
   0xa   :  { %115 = vmatpush.bf16.msra.mxu0 %v191_v1  ;;  %194 = vmatpush.bf16.msra.mxu1 %v191_v1 }
   0xe   :  { %116 = vmatpush.bf16.msra.mxu0 %v190_v2  ;;  %195 = vmatpush.bf16.msra.mxu1 %v190_v2 }
  0x12   :  { %117 = vmatpush.bf16.msra.mxu0 %v189_v3  ;;  %196 = vmatpush.bf16.msra.mxu1 %v189_v3 }
  0x16   :  { %118 = vmatpush.bf16.msra.mxu0 %v188_v4  ;;  %197 = vmatpush.bf16.msra.mxu1 %v188_v4 }
  0x1a   :  { %119 = vmatpush.bf16.msra.mxu0 %v187_v5  ;;  %198 = vmatpush.bf16.msra.mxu1 %v187_v5 }
  0x1e   :  { %120 = vmatpush.bf16.msra.mxu0 %v186_v6  ;;  %199 = vmatpush.bf16.msra.mxu1 %v186_v6 }
  0x22   :  { %121 = vmatpush.bf16.msra.mxu0 %v185_v7  ;;  %200 = vmatpush.bf16.msra.mxu1 %v185_v7 }
  0x25   :  { %122 = vmatmul.bf16.vlgmr.msra.gmra.mxu0 %v183_v8  ;;  %127 = vmatmul.bf16.vlgmr.msra.gmra.mxu1 %v184_v9 }
  0xa2   :  { %v123_v11 = vpop.f32.mrf.mxu0  ;;  %v128_v12 = vpop.f32.mrf.mxu1 }
  0xa3   :  { %v124_v13 = vadd.f32 %v204_v10, %v123_v11  ;;  %v129_v14 = vadd.f32 %v204_v10, %v128_v12 }
  0xa5   :  { %134 = vst.msk [vmem:[%s281_s3] sm:$0xff] %vm133_vm0, %v124_v13 }
  0xa6   :  { %136 = vst.msk [vmem:[%s281_s3 + $0x10] sm:$0xff] %vm133_vm0, %v129_v14 }
  0xaa   :  { %v125_v15 = vpop.f32.mrf.mxu0  ;;  %v130_v16 = vpop.f32.mrf.mxu1 }
  0xab   :  { %v126_v17 = vadd.f32 %v204_v10, %v125_v15  ;;  %v131_v18 = vadd.f32 %v204_v10, %v130_v16 }
  0xad   :  { %135 = vst.msk [vmem:[%s281_s3 + $0x8] sm:$0xff] %vm133_vm0, %v126_v17 }
  0xae   :  { %137 = vst.msk [vmem:[%s281_s3 + $0x18] sm:$0xff] %vm133_vm0, %v131_v18 }
  0xaf   :  { %142 = vsyncpa [#allocation3], 1 }

// kernel: unet_forward.12
= control target key start
LH: loop header
LB: loop body
LE: loop exit
PB: predicated region body
PF: predicated region fallthrough
CT: control target
= control target key end

     0   :  { %18 = vsyncpa [#allocation3], 0  ;;  %s2211_s0 = inlined_call_operand.vmem [shape: bf16[16,128], index: 0, kind: input, shape index: {}]   ;;  %s2212_s1 = inlined_call_operand.vmem [shape: bf16[16,128], index: 1, kind: input, shape index: {}]   ;;  %s2213_s2 = inlined_call_operand.hbm [shape: bf16[16,16], index: 2, kind: input, shape index: {}]   ;;  %s2214_s3 = inlined_call_operand.hbm [shape: bf16[16,16], index: 3, kind: input, shape index: {}]   ;;  %s2215_s4 = inlined_call_operand.hbm [shape: bf16[3,128,128], index: 4, kind: input, shape index: {}]   ;;  %s2216_s5 = inlined_call_operand.hbm [shape: bf16[3,128,128], index: 5, kind: input, shape index: {}]   ;;  %s2217_s6 = inlined_call_operand.hbm [shape: bf16[3,128,128], index: 6, kind: input, shape index: {}]   ;;  %s2218_s7 = inlined_call_operand.hbm [shape: f32[128,16], index: 7, kind: input, shape index: {}]   ;;  %s2219_s8 = inlined_call_operand.hbm [shape: f32[16,128], index: 8, kind: input, shape index: {}]   ;;  %s2220_s9 = inlined_call_operand.vmem [shape: f32[1,16], index: 9, kind: input, shape index: {}, may-alias: {9,11}]   ;;  %s2221_s10 = inlined_call_operand.vmem [shape: f32[1,16], index: 10, kind: input, shape index: {}, may-alias: {10,12}]   ;;  %s2222_s11 = inlined_call_operand.vmem [shape: f32[1,16], index: 11, kind: input, shape index: {}, may-alias: {9,11}]   ;;  %s2223_s12 = inlined_call_operand.vmem [shape: f32[1,16], index: 12, kind: input, shape index: {}, may-alias: {10,12}]   ;;  %s2224_s13 = inlined_call_operand.vmem [shape: bf16[16,128], index: 13, kind: output, shape index: {}]  }
   0x1   :  { %19 = vsyncpa [#allocation5], 0 }
   0x2   :  { %20 = vsyncpa [#allocation8], 0 }
   0x3   :  { %21 = vsyncpa [#allocation11], 0  ;;  %s43_s27 = sshll.u32 %s2214_s3, 4  ;;  %s1924_s28 = smov [#allocation4]   ;;  %s44_s27 = int_to_ptr.hbm [resolvable:$true] %s43_s27 }
   0x4   :  { %s45_s29 = sshll.u32 %s1924_s28, 4  ;;  %s69_s15 = sshll.u32 %s2216_s5, 4  ;;  %s46_s29 = int_to_ptr.vmem [resolvable:$true] %s45_s29  ;;  %s70_s15 = int_to_ptr.hbm [resolvable:$true] %s69_s15 }
   0x5   :  { %s1925_s16 = smov 64   ;;  %s1926_s17 = smov 4  }
   0x6   :  { %51 = dma.hbm_to_vmem [thread:$0]  %s44_s27, 128, %s46_s29, [#allocation5], %s1925_s16, %s1925_s16, %s1926_s17  }
   0x7   :  { %s1927_s18 = smov [#allocation7]   ;;  %s95_s3 = sshll.u32 %s2218_s7, 4  ;;  %s96_s3 = int_to_ptr.hbm [resolvable:$true] %s95_s3 }
   0x8   :  { %s71_s19 = sshll.u32 %s1927_s18, 4  ;;  %s1928_s5 = smov [#allocation10]   ;;  %s72_s19 = int_to_ptr.vmem [resolvable:$true] %s71_s19 }
   0x9   :  { %77 = dma.hbm_to_vmem [thread:$0]  %s70_s15, 3072, %s72_s19, [#allocation8], %s1925_s16, %s1925_s16, %s1926_s17  }
   0xa   :  { %s97_s22 = sshll.u32 %s1928_s5, 4  ;;  %s30_s25 = sshll.u32 %s2213_s2, 4  ;;  %s98_s22 = int_to_ptr.vmem [resolvable:$true] %s97_s22  ;;  %s31_s25 = int_to_ptr.hbm [resolvable:$true] %s30_s25 }
   0xb   :  { %s1929_s26 = smov 128   ;;  %s1930_s27 = smov 8  }
   0xc   :  { %103 = dma.hbm_to_vmem [thread:$0]  %s96_s3, 2048, %s98_s22, [#allocation11], %s1929_s26, %s1929_s26, %s1930_s27  }
   0xd   :  { %s1931_s28 = smov [#allocation2]   ;;  %s56_s14 = sshll.u32 %s2215_s4, 4  ;;  %s57_s14 = int_to_ptr.hbm [resolvable:$true] %s56_s14 }
   0xe   :  { %s32_s29 = sshll.u32 %s1931_s28, 4  ;;  %s82_s2 = sshll.u32 %s2217_s6, 4  ;;  %s33_s29 = int_to_ptr.vmem [resolvable:$true] %s32_s29  ;;  %s83_s2 = int_to_ptr.hbm [resolvable:$true] %s82_s2 }
   0xf   :  { %38 = dma.hbm_to_vmem [thread:$0]  %s31_s25, 128, %s33_s29, [#allocation3], %s1925_s16, %s1925_s16, %s1926_s17  }
  0x10   :  { %s1932_s19 = smov [#allocation6]   ;;  %s1933_s21 = smov [#allocation9]  }
  0x11   :  { %s58_s20 = sshll.u32 %s1932_s19, 4  ;;  %s84_s4 = sshll.u32 %s1933_s21, 4  ;;  %s59_s20 = int_to_ptr.vmem [resolvable:$true] %s58_s20  ;;  %s85_s4 = int_to_ptr.vmem [resolvable:$true] %s84_s4 }
  0x12   :  { %64 = dma.hbm_to_vmem [thread:$0]  %s57_s14, 3072, %s59_s20, [#allocation5], %s1925_s16, %s1925_s16, %s1926_s17  }
  0x13   :  { %s108_s22 = sshll.u32 %s2219_s8, 4  ;;  %s1934_s6 = smov [#allocation12]   ;;  %s109_s22 = int_to_ptr.hbm [resolvable:$true] %s108_s22 }
  0x14   :  { %90 = dma.hbm_to_vmem [thread:$0]  %s83_s2, 3072, %s85_s4, [#allocation8], %s1925_s16, %s1925_s16, %s1926_s17  }
  0x15   :  { %s110_s23 = sshll.u32 %s1934_s6, 4  ;;  %s111_s23 = int_to_ptr.vmem [resolvable:$true] %s110_s23 }
  0x16   :  { %116 = dma.hbm_to_vmem [thread:$0]  %s109_s22, 256, %s111_s23, [#allocation11], %s1929_s26, %s1929_s26, %s1930_s27  }
  0x17   :  { %1916 = dma.done.wait [#allocation3], 128  }
  0x18   :  { %1917 = vsyncadd [#allocation3], 4294967168 }
  0x19   :  { %1918 = dma.done.wait [#allocation5], 3200  }
  0x1a   :  { %1919 = vsyncadd [#allocation5], 4294964096 }
  0x1b   :  { %1920 = dma.done.wait [#allocation8], 6144  }
  0x1c   :  { %1921 = vsyncadd [#allocation8], 4294961152 }
  0x1d   :  { %1922 = dma.done.wait [#allocation11], 2304  }
  0x1e   :  { %1923 = vsyncadd [#allocation11], 4294964992  ;;  %v1654_v0 = vld [vmem:[%s2211_s0] sm:$0xff]  ;;  %v2046_v2 = vld [vmem:[#allocation4] sm:$0xff]  ;;  %vm173_vm0 = vcmask 130048  }
  0x1f   :  { %v2044_v1 = vld [vmem:[#allocation2] sm:$0xff]  ;;  %184 = vmatpush.bf16.msra.mxu0 %v1654_v0  ;;  %207 = vmatpush.bf16.msra.mxu1 %v1654_v0  ;;  %v1671_v4 = vld [vmem:[#allocation6 + $0x78] sm:$0xff]  ;;  %v1669_v10 = vld [vmem:[#allocation6 + $0x68] sm:$0xff] }
  0x20   :  { %v2051_v3 = vld [vmem:[%s2212_s1] sm:$0xff]  ;;  %v1663_v5 = vld [vmem:[#allocation6 + $0x38] sm:$0xff]  ;;  %296 = vmatpush.bf16.msra.mxu2 %v1671_v4  ;;  %v1661_v11 = vld [vmem:[#allocation6 + $0x28] sm:$0xff] }
  0x21   :  { %358 = vmatpush.bf16.msra.mxu3 %v1663_v5  ;;  %v1670_v6 = vld [vmem:[#allocation6 + $0x70] sm:$0xff]  ;;  %v1679_v8 = vld [vmem:[#allocation6 + $0xb8] sm:$0xff]  ;;  %v1677_v12 = vld [vmem:[#allocation6 + $0xa8] sm:$0xff] }
  0x22   :  { %1344 = vmatmul.msk.bf16.vlgmr.msra.gmra.mxu0 %vm173_vm0, %v2044_v1  ;;  %1349 = vmatmul.msk.bf16.vlgmr.msra.gmra.mxu1 %vm173_vm0, %v2046_v2  ;;  %v1662_v7 = vld [vmem:[#allocation6 + $0x30] sm:$0xff]  ;;  %v1668_v13 = vld [vmem:[#allocation6 + $0x60] sm:$0xff]  ;;  %v1667_v16 = vld [vmem:[#allocation6 + $0x58] sm:$0xff] }
  0x23   :  { %466 = vmatpush.bf16.msrb.mxu1 %v2051_v3  ;;  %437 = vmatpush.bf16.msrb.mxu0 %v1679_v8  ;;  %v1678_v9 = vld [vmem:[#allocation6 + $0xb0] sm:$0xff]  ;;  %v1660_v14 = vld [vmem:[#allocation6 + $0x20] sm:$0xff]  ;;  %v1659_v17 = vld [vmem:[#allocation6 + $0x18] sm:$0xff] }
  0x24   :  { %297 = vmatpush.bf16.msra.mxu2 %v1670_v6  ;;  %v1676_v15 = vld [vmem:[#allocation6 + $0xa0] sm:$0xff]  ;;  %v1675_v18 = vld [vmem:[#allocation6 + $0x98] sm:$0xff]  ;;  %v1666_v19 = vld [vmem:[#allocation6 + $0x50] sm:$0xff] }
  0x25   :  { %359 = vmatpush.bf16.msra.mxu3 %v1662_v7  ;;  %v1658_v20 = vld [vmem:[#allocation6 + $0x10] sm:$0xff]  ;;  %v1665_v21 = vld [vmem:[#allocation6 + $0x48] sm:$0xff]  ;;  %v1664_v23 = vld [vmem:[#allocation6 + $0x40] sm:$0xff] }
  0x26   :  { %v1657_v22 = vld [vmem:[#allocation6 + $0x8] sm:$0xff]  ;;  %v1656_v24 = vld [vmem:[#allocation6] sm:$0xff]  ;;  %v1695_v25 = vld [vmem:[#allocation7 + $0x78] sm:$0xff] }
  0x27   :  { %481 = vmatpush.bf16.msra.mxu1 %v2051_v3  ;;  %438 = vmatpush.bf16.msrb.mxu0 %v1678_v9  ;;  %v1687_v26 = vld [vmem:[#allocation7 + $0x38] sm:$0xff]  ;;  %v1674_v27 = vld [vmem:[#allocation6 + $0x90] sm:$0xff]  ;;  %v1673_v30 = vld [vmem:[#allocation6 + $0x88] sm:$0xff] }
  0x28   :  { %298 = vmatpush.bf16.msra.mxu2 %v1669_v10  ;;  %v1694_v28 = vld [vmem:[#allocation7 + $0x70] sm:$0xff]  ;;  %v1693_v31 = vld [vmem:[#allocation7 + $0x68] sm:$0xff]  ;;  %v1672_v33 = vld [vmem:[#allocation6 + $0x80] sm:$0xff] }
  0x29   :  { %360 = vmatpush.bf16.msra.mxu3 %v1661_v11  ;;  %v1686_v29 = vld [vmem:[#allocation7 + $0x30] sm:$0xff]  ;;  %v1685_v32 = vld [vmem:[#allocation7 + $0x28] sm:$0xff]  ;;  %v1692_v34 = vld [vmem:[#allocation7 + $0x60] sm:$0xff] }
  0x2a   :  { %v1684_v35 = vld [vmem:[#allocation7 + $0x20] sm:$0xff]  ;;  %v1691_v36 = vld [vmem:[#allocation7 + $0x58] sm:$0xff]  ;;  %v1690_v39 = vld [vmem:[#allocation7 + $0x50] sm:$0xff] }
  0x2b   :  { %439 = vmatpush.bf16.msrb.mxu0 %v1677_v12  ;;  %v1683_v37 = vld [vmem:[#allocation7 + $0x18] sm:$0xff]  ;;  %v1682_v40 = vld [vmem:[#allocation7 + $0x10] sm:$0xff]  ;;  %v1689_v42 = vld [vmem:[#allocation7 + $0x48] sm:$0xff] }
  0x2c   :  { %299 = vmatpush.bf16.msra.mxu2 %v1668_v13  ;;  %v1703_v38 = vld [vmem:[#allocation7 + $0xb8] sm:$0xff]  ;;  %v1702_v41 = vld [vmem:[#allocation7 + $0xb0] sm:$0xff]  ;;  %v1701_v43 = vld [vmem:[#allocation7 + $0xa8] sm:$0xff] }
  0x2d   :  { %361 = vmatpush.bf16.msra.mxu3 %v1660_v14  ;;  %v1681_v44 = vld [vmem:[#allocation7 + $0x8] sm:$0xff]  ;;  %v1688_v45 = vld [vmem:[#allocation7 + $0x40] sm:$0xff]  ;;  %v1699_v48 = vld [vmem:[#allocation7 + $0x98] sm:$0xff] }
  0x2e   :  { %v1680_v46 = vld [vmem:[#allocation7] sm:$0xff]  ;;  %v1698_v49 = vld [vmem:[#allocation7 + $0x90] sm:$0xff]  ;;  %v1697_v52 = vld [vmem:[#allocation7 + $0x88] sm:$0xff] }
  0x2f   :  { %440 = vmatpush.bf16.msrb.mxu0 %v1676_v15  ;;  %v1700_v47 = vld [vmem:[#allocation7 + $0xa0] sm:$0xff]  ;;  %v2072_v4 = vld [vmem:[#allocation10 + $0x68] sm:$0xff]  ;;  %v2080_v6 = vld [vmem:[#allocation10 + $0x58] sm:$0xff] }
  0x30   :  { %300 = vmatpush.bf16.msra.mxu2 %v1667_v16  ;;  %v1696_v53 = vld [vmem:[#allocation7 + $0x80] sm:$0xff]  ;;  %v2082_v7 = vld [vmem:[#allocation10 + $0x50] sm:$0xff]  ;;  %v2088_v10 = vld [vmem:[#allocation10 + $0x48] sm:$0xff] }
  0x31   :  { %362 = vmatpush.bf16.msra.mxu3 %v1659_v17  ;;  %v2076_v5 = vld [vmem:[#allocation10 + $0x60] sm:$0xff]  ;;  %v2096_v12 = vld [vmem:[#allocation10 + $0x38] sm:$0xff]  ;;  %v2100_v13 = vld [vmem:[#allocation10 + $0x30] sm:$0xff] }
  0x32   :  { %1450 = vmatmul.msk.bf16.vlgmr.msrb.gmra.mxu1 %vm173_vm0, %v2044_v1  ;;  %v2092_v11 = vld [vmem:[#allocation10 + $0x40] sm:$0xff]  ;;  %v2104_v15 = vld [vmem:[#allocation10 + $0x28] sm:$0xff] }
  0x33   :  { %441 = vmatpush.bf16.msrb.mxu0 %v1675_v18  ;;  %v2108_v18 = vld [vmem:[#allocation10 + $0x20] sm:$0xff] }
  0x34   :  { %301 = vmatpush.bf16.msra.mxu2 %v1666_v19  ;;  %v2112_v19 = vld [vmem:[#allocation10 + $0x18] sm:$0xff] }
  0x35   :  { %363 = vmatpush.bf16.msra.mxu3 %v1658_v20  ;;  %v2114_v20 = vld [vmem:[#allocation10 + $0x10] sm:$0xff] }
  0x37   :  { %442 = vmatpush.bf16.msrb.mxu0 %v1674_v27 }
  0x38   :  { %302 = vmatpush.bf16.msra.mxu2 %v1665_v21  ;;  %v2118_v21 = vld [vmem:[#allocation10 + $0x8] sm:$0xff] }
  0x39   :  { %364 = vmatpush.bf16.msra.mxu3 %v1657_v22  ;;  %v2122_v22 = vld [vmem:[#allocation10] sm:$0xff] }
  0x3b   :  { %443 = vmatpush.bf16.msrb.mxu0 %v1673_v30 }
  0x3c   :  { %303 = vmatpush.bf16.msra.mxu2 %v1664_v23 }
  0x3d   :  { %365 = vmatpush.bf16.msra.mxu3 %v1656_v24 }
  0x3f   :  { %304 = vmatmul.bf16.vlgmr.msra.gmra.mxu2 %v1654_v0  ;;  %444 = vmatpush.bf16.msrb.mxu0 %v1672_v33  ;;  %v2064_v0 = vld [vmem:[#allocation10 + $0x78] sm:$0xff] }
  0x40   :  { %570 = vmatpush.bf16.msrb.mxu2 %v1695_v25  ;;  %752 = vmatpush.msrb.mxu1 %v2064_v0 }
  0x41   :  { %632 = vmatpush.bf16.msrb.mxu3 %v1687_v26  ;;  %v2128_v26 = vld [vmem:[#allocation12 + $0x8] sm:$0xff] }
  0x42   :  { %1451 = vmatmul.msk.bf16.vlgmr.msra.gmra.mxu1 %vm173_vm0, %v2046_v2 }
  0x43   :  { %711 = vmatpush.bf16.msra.mxu0 %v1703_v38 }
  0x44   :  { %571 = vmatpush.bf16.msrb.mxu2 %v1694_v28 }
  0x45   :  { %633 = vmatpush.bf16.msrb.mxu3 %v1686_v29 }
  0x47   :  { %712 = vmatpush.bf16.msra.mxu0 %v1702_v41 }
  0x48   :  { %572 = vmatpush.bf16.msrb.mxu2 %v1693_v31 }
  0x49   :  { %634 = vmatpush.bf16.msrb.mxu3 %v1685_v32 }
  0x4b   :  { %713 = vmatpush.bf16.msra.mxu0 %v1701_v43 }
  0x4c   :  { %573 = vmatpush.bf16.msrb.mxu2 %v1692_v34 }
  0x4d   :  { %635 = vmatpush.bf16.msrb.mxu3 %v1684_v35 }
  0x4f   :  { %714 = vmatpush.bf16.msra.mxu0 %v1700_v47 }
  0x50   :  { %574 = vmatpush.bf16.msrb.mxu2 %v1691_v36 }
  0x51   :  { %636 = vmatpush.bf16.msrb.mxu3 %v1683_v37 }
  0x53   :  { %715 = vmatpush.bf16.msra.mxu0 %v1699_v48  ;;  %v2154_v48 = vld [vmem:[#allocation12] sm:$0xff] }
  0x54   :  { %575 = vmatpush.bf16.msrb.mxu2 %v1690_v39 }
  0x55   :  { %637 = vmatpush.bf16.msrb.mxu3 %v1682_v40 }
  0x57   :  { %716 = vmatpush.bf16.msra.mxu0 %v1698_v49 }
  0x58   :  { %576 = vmatpush.bf16.msrb.mxu2 %v1689_v42 }
  0x59   :  { %638 = vmatpush.bf16.msrb.mxu3 %v1681_v44 }
  0x5b   :  { %717 = vmatpush.bf16.msra.mxu0 %v1697_v52 }
  0x5c   :  { %577 = vmatpush.bf16.msrb.mxu2 %v1688_v45 }
  0x5d   :  { %639 = vmatpush.bf16.msrb.mxu3 %v1680_v46 }
  0x5f   :  { %578 = vmatmul.bf16.vlgmr.msrb.gmra.mxu2 %v2051_v3  ;;  %718 = vmatpush.bf16.msra.mxu0 %v1696_v53  ;;  %v2068_v3 = vld [vmem:[#allocation10 + $0x70] sm:$0xff] }
  0x60   :  { %810 = vmatpush.msra.mxu2 %v2064_v0  ;;  %753 = vmatpush.msrb.mxu1 %v2068_v3 }
  0x62   :  { %811 = vmatpush.msra.mxu2 %v2068_v3  ;;  %754 = vmatpush.msrb.mxu1 %v2072_v4 }
  0x64   :  { %812 = vmatpush.msra.mxu2 %v2072_v4  ;;  %755 = vmatpush.msrb.mxu1 %v2076_v5 }
  0x66   :  { %813 = vmatpush.msra.mxu2 %v2076_v5  ;;  %756 = vmatpush.msrb.mxu1 %v2080_v6 }
  0x68   :  { %814 = vmatpush.msra.mxu2 %v2080_v6  ;;  %757 = vmatpush.msrb.mxu1 %v2082_v7 }
  0x6a   :  { %815 = vmatpush.msra.mxu2 %v2082_v7  ;;  %758 = vmatpush.msrb.mxu1 %v2088_v10 }
  0x6c   :  { %816 = vmatpush.msra.mxu2 %v2088_v10  ;;  %759 = vmatpush.msrb.mxu1 %v2092_v11 }
  0x6e   :  { %817 = vmatpush.msra.mxu2 %v2092_v11  ;;  %760 = vmatpush.msrb.mxu1 %v2096_v12 }
  0x70   :  { %818 = vmatpush.msra.mxu2 %v2096_v12  ;;  %761 = vmatpush.msrb.mxu1 %v2100_v13 }
  0x72   :  { %819 = vmatpush.msra.mxu2 %v2100_v13  ;;  %762 = vmatpush.msrb.mxu1 %v2104_v15 }
  0x74   :  { %820 = vmatpush.msra.mxu2 %v2104_v15  ;;  %763 = vmatpush.msrb.mxu1 %v2108_v18 }
  0x76   :  { %821 = vmatpush.msra.mxu2 %v2108_v18  ;;  %764 = vmatpush.msrb.mxu1 %v2112_v19 }
  0x78   :  { %822 = vmatpush.msra.mxu2 %v2112_v19  ;;  %765 = vmatpush.msrb.mxu1 %v2114_v20 }
  0x7a   :  { %823 = vmatpush.msra.mxu2 %v2114_v20  ;;  %766 = vmatpush.msrb.mxu1 %v2118_v21 }
  0x7c   :  { %824 = vmatpush.msra.mxu2 %v2118_v21  ;;  %767 = vmatpush.msrb.mxu1 %v2122_v22 }
  0x7e   :  { %825 = vmatpush.msra.mxu2 %v2122_v22 }
  0x80   :  { %1177 = vmatpush.msrb.mxu2 %v2064_v0 }
  0x82   :  { %1178 = vmatpush.msrb.mxu2 %v2068_v3 }
  0x84   :  { %1179 = vmatpush.msrb.mxu2 %v2072_v4 }
  0x86   :  { %1180 = vmatpush.msrb.mxu2 %v2076_v5 }
  0x88   :  { %1181 = vmatpush.msrb.mxu2 %v2080_v6 }
  0x8a   :  { %1182 = vmatpush.msrb.mxu2 %v2082_v7 }
  0x8c   :  { %1183 = vmatpush.msrb.mxu2 %v2088_v10 }
  0x8e   :  { %1184 = vmatpush.msrb.mxu2 %v2092_v11 }
  0x90   :  { %1185 = vmatpush.msrb.mxu2 %v2096_v12 }
  0x92   :  { %1186 = vmatpush.msrb.mxu2 %v2100_v13 }
  0x94   :  { %1187 = vmatpush.msrb.mxu2 %v2104_v15 }
  0x96   :  { %1188 = vmatpush.msrb.mxu2 %v2108_v18 }
  0x98   :  { %1189 = vmatpush.msrb.mxu2 %v2112_v19 }
  0x9a   :  { %1190 = vmatpush.msrb.mxu2 %v2114_v20 }
  0x9c   :  { %1191 = vmatpush.msrb.mxu2 %v2118_v21 }
  0x9e   :  { %1192 = vmatpush.msrb.mxu2 %v2122_v22 }
  0x9f   :  { %v186_v50 = vpop.f32.mrf.mxu0  ;;  %v209_v51 = vpop.f32.mrf.mxu1 }
  0xa7   :  { %v188_v54 = vpop.f32.mrf.mxu0  ;;  %v211_v55 = vpop.f32.mrf.mxu1 }
  0xa8   :  { %v191_v56 = vpack.c.bf16 %v188_v54, %v186_v50  ;;  %v214_v57 = vpack.c.bf16 %v211_v55, %v209_v51 }
  0xaa   :  { %366 = vmatmul.bf16.vlgmr.msra.gmra.mxu3 %v191_v56  ;;  %445 = vmatmul.bf16.vlgmr.msrb.gmra.mxu0 %v214_v57 }
  0xab   :  { %792 = vmatpush.msrb.mxu0 %v2128_v26  ;;  %864 = vmatpush.msra.mxu3 %v2128_v26 }
  0xad   :  { %793 = vmatpush.msrb.mxu0 %v2154_v48  ;;  %865 = vmatpush.msra.mxu3 %v2154_v48 }
  0xaf   :  { %v468_v58 = vpop.f32.mrf.mxu1 }
  0xb7   :  { %v470_v59 = vpop.f32.mrf.mxu1 }
  0xb8   :  { %v473_v60 = vpack.c.bf16 %v470_v59, %v468_v58 }
  0xba   :  { %640 = vmatmul.bf16.vlgmr.msrb.gmra.mxu3 %v473_v60 }
  0xbf   :  { %v483_v61 = vpop.f32.mrf.mxu1 }
  0xc2   :  { %v305_v8 = vpop.f32.mrf.mxu2 }
  0xc7   :  { %v485_v62 = vpop.f32.mrf.mxu1 }
  0xc8   :  { %v488_v63 = vpack.c.bf16 %v485_v62, %v483_v61 }
  0xca   :  { %719 = vmatmul.bf16.vlgmr.msra.gmra.mxu0 %v488_v63  ;;  %v307_v16 = vpop.f32.mrf.mxu2 }
  0xcb   :  { %887 = vmatpush.msra.mxu0 %v2128_v26 }
  0xcd   :  { %888 = vmatpush.msra.mxu0 %v2154_v48 }
  0xe2   :  { %v579_v24 = vpop.f32.mrf.mxu2 }
  0xea   :  { %v581_v28 = vpop.f32.mrf.mxu2 }
 0x127   :  { %v446_v14 = vpop.f32.mrf.mxu0 }
 0x12d   :  { %v367_v9 = vpop.f32.mrf.mxu3 }
 0x12e   :  { %v368_v30 = vadd.f32 %v367_v9, %v305_v8  ;;  %v1719_v8 = vld [vmem:[#allocation9 + $0x78] sm:$0xff]  ;;  %v1718_v9 = vld [vmem:[#allocation9 + $0x70] sm:$0xff] }
 0x12f   :  { %v448_v23 = vpop.f32.mrf.mxu0 }
 0x130   :  { %v451_v36 = vadd.f32 %v446_v14, %v368_v30 }
 0x135   :  { %v369_v17 = vpop.f32.mrf.mxu3 }
 0x136   :  { %v370_v31 = vadd.f32 %v369_v17, %v307_v16 }
 0x138   :  { %v452_v37 = vadd.f32 %v448_v23, %v370_v31  ;;  %v1717_v23 = vld [vmem:[#allocation9 + $0x68] sm:$0xff] }
 0x13d   :  { %v641_v25 = vpop.f32.mrf.mxu3 }
 0x13e   :  { %v642_v32 = vadd.f32 %v641_v25, %v579_v24  ;;  %v1716_v24 = vld [vmem:[#allocation9 + $0x60] sm:$0xff] }
 0x145   :  { %v643_v29 = vpop.f32.mrf.mxu3 }
 0x146   :  { %v644_v33 = vadd.f32 %v643_v29, %v581_v28 }
 0x147   :  { %v720_v27 = vpop.f32.mrf.mxu0 }
 0x148   :  { %v725_v34 = vadd.f32 %v720_v27, %v642_v32  ;;  %v1715_v27 = vld [vmem:[#allocation9 + $0x58] sm:$0xff]  ;;  %v831_v32 = vld [vmem:[%s2220_s9] sm:$0x1] }
 0x14a   :  { %v2140_v39 = vadd.f32 %v725_v34, %v451_v36  ;;  %v844_v36 = vld [vmem:[%s2221_s10] sm:$0x1] }
 0x14f   :  { %v722_v35 = vpop.f32.mrf.mxu0 }
 0x150   :  { %v726_v38 = vadd.f32 %v722_v35, %v644_v33 }
 0x152   :  { %v2142_v40 = vadd.f32 %v726_v38, %v452_v37 }
 0x154   :  { %v729_v41 = vadd.f32 %v2142_v40, %v2140_v39 }
 0x156   :  { %v730_v42 = vrot.slane %v729_v41, 4 }
 0x158   :  { %v731_v43 = vadd.f32 %v730_v42, %v729_v41  ;;  %v1714_v41 = vld [vmem:[#allocation9 + $0x50] sm:$0xff]  ;;  %v1713_v42 = vld [vmem:[#allocation9 + $0x48] sm:$0xff] }
 0x15a   :  { %v732_v44 = vrot.slane %v731_v43, 2 }
 0x15c   :  { %v733_v45 = vadd.f32 %v732_v44, %v731_v43  ;;  %v1712_v43 = vld [vmem:[#allocation9 + $0x40] sm:$0xff] }
 0x15e   :  { %v734_v46 = vrot.slane %v733_v45, 1 }
 0x160   :  { %v735_v47 = vadd.f32 %v734_v46, %v733_v45 }
 0x162   :  { %768 = vmatmul.f32.vlgmr.msrb.gmra.mxu1 %v735_v47 }
 0x1df   :  { %v769_v49 = vpop.f32.mrf.mxu1 }
 0x1e0   :  { %v772_v50 = vmul.f32 0.0078125, %v769_v49 }
 0x1e2   :  { %1548 = vmatmul.msk.f32.vlgmr.msrb.gmra.mxu0 %vm173_vm0, %v772_v50 }
 0x1e3   :  { %1013 = vmatpush.bf16.msrb.mxu0 %v1719_v8  ;;  %v1723_v8 = vld [vmem:[#allocation9 + $0x98] sm:$0xff] }
 0x1e7   :  { %1014 = vmatpush.bf16.msrb.mxu0 %v1718_v9  ;;  %v1705_v9 = vld [vmem:[#allocation9 + $0x8] sm:$0xff] }
 0x1eb   :  { %1015 = vmatpush.bf16.msrb.mxu0 %v1717_v23 }
 0x1ef   :  { %1016 = vmatpush.bf16.msrb.mxu0 %v1716_v24 }
 0x1f3   :  { %1017 = vmatpush.bf16.msrb.mxu0 %v1715_v27 }
 0x1f7   :  { %1018 = vmatpush.bf16.msrb.mxu0 %v1714_v41 }
 0x1fb   :  { %1019 = vmatpush.bf16.msrb.mxu0 %v1713_v42 }
 0x1ff   :  { %1020 = vmatpush.bf16.msrb.mxu0 %v1712_v43 }
 0x25f   :  { %v795_v51 = vpop.f32.mrf.mxu0 }
 0x260   :  { %v798_v52 = vperm.slane %v795_v51, 0 }
 0x262   :  { %v799_v53 = vsub.f32 %v2140_v39, %v798_v52  ;;  %v800_v54 = vsub.f32 %v2142_v40, %v798_v52 }
 0x264   :  { %v801_v55 = vmul.f32 %v799_v53, %v799_v53  ;;  %v802_v56 = vmul.f32 %v800_v54, %v800_v54 }
 0x266   :  { %v803_v57 = vadd.f32 %v802_v56, %v801_v55  ;;  %v1711_v55 = vld [vmem:[#allocation9 + $0x38] sm:$0xff] }
 0x268   :  { %v804_v58 = vrot.slane %v803_v57, 4 }
 0x26a   :  { %v805_v59 = vadd.f32 %v804_v58, %v803_v57  ;;  %v1727_v57 = vld [vmem:[#allocation9 + $0xb8] sm:$0xff]  ;;  %v1710_v58 = vld [vmem:[#allocation9 + $0x30] sm:$0xff] }
 0x26c   :  { %v806_v60 = vrot.slane %v805_v59, 2 }
 0x26e   :  { %v807_v61 = vadd.f32 %v806_v60, %v805_v59  ;;  %v1726_v59 = vld [vmem:[#allocation9 + $0xb0] sm:$0xff]  ;;  %v1708_v60 = vld [vmem:[#allocation9 + $0x20] sm:$0xff] }
 0x270   :  { %v808_v62 = vrot.slane %v807_v61, 1 }
 0x272   :  { %v809_v63 = vadd.f32 %v808_v62, %v807_v61  ;;  %v1707_v61 = vld [vmem:[#allocation9 + $0x18] sm:$0xff]  ;;  %v1724_v62 = vld [vmem:[#allocation9 + $0xa0] sm:$0xff] }
 0x274   :  { %826 = vmatmul.f32.vlgmr.msra.gmra.mxu2 %v809_v63  ;;  %v1706_v63 = vld [vmem:[#allocation9 + $0x10] sm:$0xff] }
 0x275   :  { %1287 = vmatpush.msra.mxu2 %v2128_v26 }
 0x277   :  { %1288 = vmatpush.msra.mxu2 %v2154_v48 }
 0x2f7   :  { %v827_v14 = vpop.f32.mrf.mxu2 }
 0x2f8   :  { %v830_v16 = vmul.f32 0.0078125, %v827_v14  ;;  %v1721_v14 = vld [vmem:[#allocation9 + $0x88] sm:$0xff] }
 0x2fa   :  { %v832_v17 = vadd.f32 1e-05, %v830_v16  ;;  %v1720_v16 = vld [vmem:[#allocation9 + $0x80] sm:$0xff] }
 0x2fc   :  { %1744 = vrsqrt.f32 %v832_v17  ;;  %vm839_vm2 = vweird.f32 %v832_v17 }
 0x302   :  { %v1745_v25 = vpop.eup %1744 }
 0x303   :  { %v834_v28 = vmul.f32 %v1745_v25, %v832_v17  ;;  %vm840_vm1 = vweird.f32 %v1745_v25 }
 0x304   :  { %vm841_vm3 = vmor %vm839_vm2, %vm840_vm1 }
 0x305   :  { %v835_v29 = vmul.f32 %v1745_v25, %v834_v28 }
 0x307   :  { %v836_v30 = vmul.f32 0.5, %v835_v29 }
 0x309   :  { %v837_v31 = vsub.f32 1.5, %v836_v30 }
 0x30b   :  { %v838_v33 = vmul.f32 %v1745_v25, %v837_v31 }
 0x30d   :  { %v842_v34 = vsel %vm841_vm3, %v1745_v25, %v838_v33 }
 0x30e   :  { %v843_v35 = vmul.f32 %v842_v34, %v831_v32 }
 0x310   :  { %v845_v37 = vmul.f32 %v843_v35, %v772_v50  ;;  %1549 = vmatmul.msk.f32.vlgmr.msra.gmra.mxu3 %vm173_vm0, %v843_v35 }
 0x312   :  { %v846_v38 = vsub.f32 %v844_v36, %v845_v37 }
 0x314   :  { %1550 = vmatmul.msk.f32.vlgmr.msra.gmra.mxu0 %vm173_vm0, %v846_v38 }
 0x315   :  { %1215 = vmatpush.msra.mxu0 %v2128_v26 }
 0x317   :  { %1216 = vmatpush.msra.mxu0 %v2154_v48 }
 0x391   :  { %v890_v44 = vpop.f32.mrf.mxu0 }
 0x392   :  { %v896_v47 = vperm.slane %v890_v44, 0 }
 0x393   :  { %v867_v45 = vpop.f32.mrf.mxu3 }
 0x394   :  { %v893_v46 = vperm.slane %v867_v45, 0 }
 0x396   :  { %v894_v49 = vmul.f32 %v893_v46, %v2140_v39  ;;  %v895_v50 = vmul.f32 %v893_v46, %v2142_v40  ;;  %v1709_v39 = vld [vmem:[#allocation9 + $0x28] sm:$0xff] }
 0x397   :  { %v1725_v40 = vld [vmem:[#allocation9 + $0xa8] sm:$0xff] }
 0x398   :  { %v897_v51 = vadd.f32 %v896_v47, %v894_v49  ;;  %v898_v52 = vadd.f32 %v896_v47, %v895_v50 }
 0x39a   :  { %v899_v53 = vmax.f32 %v897_v51, 0.0  ;;  %v900_v54 = vmax.f32 %v898_v52, 0.0 }
 0x39c   :  { %v901_v56 = vpack.c.bf16 %v900_v54, %v899_v53  ;;  %v1254_v54 = vld [vmem:[%s2222_s11] sm:$0x1] }
 0x39e   :  { %909 = vmatpush.bf16.msra.mxu1 %v901_v56  ;;  %924 = vmatpush.bf16.msrb.mxu3 %v901_v56 }
 0x39f   :  { %1021 = vmatmul.bf16.vlgmr.msrb.gmra.mxu0 %v901_v56 }
 0x3a1   :  { %1551 = vmatmul.msk.bf16.vlgmr.msra.gmra.mxu1 %vm173_vm0, %v2044_v1  ;;  %1552 = vmatmul.msk.bf16.vlgmr.msrb.gmra.mxu3 %vm173_vm0, %v2046_v2  ;;  %v1722_v1 = vld [vmem:[#allocation9 + $0x90] sm:$0xff]  ;;  %v1704_v2 = vld [vmem:[#allocation9] sm:$0xff] }
 0x3a2   :  { %1075 = vmatpush.bf16.msrb.mxu1 %v1711_v55  ;;  %1154 = vmatpush.bf16.msra.mxu3 %v1727_v57 }
 0x3a6   :  { %1076 = vmatpush.bf16.msrb.mxu1 %v1710_v58  ;;  %1155 = vmatpush.bf16.msra.mxu3 %v1726_v59  ;;  %v1267_v58 = vld [vmem:[%s2223_s12] sm:$0x1] }
 0x3aa   :  { %1077 = vmatpush.bf16.msrb.mxu1 %v1709_v39  ;;  %1156 = vmatpush.bf16.msra.mxu3 %v1725_v40 }
 0x3ae   :  { %1078 = vmatpush.bf16.msrb.mxu1 %v1708_v60  ;;  %1157 = vmatpush.bf16.msra.mxu3 %v1724_v62 }
 0x3b2   :  { %1079 = vmatpush.bf16.msrb.mxu1 %v1707_v61  ;;  %1158 = vmatpush.bf16.msra.mxu3 %v1723_v8 }
 0x3b6   :  { %1080 = vmatpush.bf16.msrb.mxu1 %v1706_v63  ;;  %1159 = vmatpush.bf16.msra.mxu3 %v1722_v1 }
 0x3ba   :  { %1081 = vmatpush.bf16.msrb.mxu1 %v1705_v9  ;;  %1160 = vmatpush.bf16.msra.mxu3 %v1721_v14 }
 0x3be   :  { %1082 = vmatpush.bf16.msrb.mxu1 %v1704_v2  ;;  %1161 = vmatpush.bf16.msra.mxu3 %v1720_v16 }
 0x3c2   :  { %1233 = vmatpush.msra.mxu1 %v2064_v0  ;;  %1310 = vmatpush.msrb.mxu3 %v2128_v26 }
 0x3c4   :  { %1234 = vmatpush.msra.mxu1 %v2068_v3  ;;  %1311 = vmatpush.msrb.mxu3 %v2154_v48 }
 0x3c6   :  { %1235 = vmatpush.msra.mxu1 %v2072_v4 }
 0x3c8   :  { %1236 = vmatpush.msra.mxu1 %v2076_v5 }
 0x3ca   :  { %1237 = vmatpush.msra.mxu1 %v2080_v6 }
 0x3cc   :  { %1238 = vmatpush.msra.mxu1 %v2082_v7 }
 0x3ce   :  { %1239 = vmatpush.msra.mxu1 %v2088_v10 }
 0x3d0   :  { %1240 = vmatpush.msra.mxu1 %v2092_v11 }
 0x3d2   :  { %1241 = vmatpush.msra.mxu1 %v2096_v12 }
 0x3d4   :  { %1242 = vmatpush.msra.mxu1 %v2100_v13 }
 0x3d6   :  { %1243 = vmatpush.msra.mxu1 %v2104_v15 }
 0x3d8   :  { %1244 = vmatpush.msra.mxu1 %v2108_v18 }
 0x3da   :  { %1245 = vmatpush.msra.mxu1 %v2112_v19 }
 0x3dc   :  { %1246 = vmatpush.msra.mxu1 %v2114_v20 }
 0x3de   :  { %1247 = vmatpush.msra.mxu1 %v2118_v21 }
 0x3e0   :  { %1248 = vmatpush.msra.mxu1 %v2122_v22 }
 0x41c   :  { %v1022_v11 = vpop.f32.mrf.mxu0 }
 0x41e   :  { %v911_v0 = vpop.f32.mrf.mxu1 }
 0x424   :  { %v926_v3 = vpop.f32.mrf.mxu3  ;;  %v1024_v15 = vpop.f32.mrf.mxu0 }
 0x426   :  { %v913_v4 = vpop.f32.mrf.mxu1 }
 0x427   :  { %v916_v5 = vpack.c.bf16 %v913_v4, %v911_v0 }
 0x429   :  { %1083 = vmatmul.bf16.vlgmr.msrb.gmra.mxu1 %v916_v5 }
 0x42c   :  { %v928_v6 = vpop.f32.mrf.mxu3 }
 0x42d   :  { %v931_v7 = vpack.c.bf16 %v928_v6, %v926_v3 }
 0x42f   :  { %1162 = vmatmul.bf16.vlgmr.msra.gmra.mxu3 %v931_v7 }
 0x4a6   :  { %v1084_v10 = vpop.f32.mrf.mxu1 }
 0x4a7   :  { %v1085_v18 = vadd.f32 %v1084_v10, %v1022_v11 }
 0x4ae   :  { %v1086_v13 = vpop.f32.mrf.mxu1 }
 0x4af   :  { %v1087_v19 = vadd.f32 %v1086_v13, %v1024_v15 }
 0x4b2   :  { %v1163_v12 = vpop.f32.mrf.mxu3 }
 0x4b3   :  { %v1168_v20 = vadd.f32 %v1163_v12, %v1085_v18 }
 0x4ba   :  { %v1165_v26 = vpop.f32.mrf.mxu3 }
 0x4bb   :  { %v1169_v48 = vadd.f32 %v1165_v26, %v1087_v19 }
 0x4bd   :  { %v1170_v17 = vadd.f32 %v1169_v48, %v1168_v20 }
 0x4bf   :  { %v1171_v21 = vrot.slane %v1170_v17, 4 }
 0x4c1   :  { %v1172_v23 = vadd.f32 %v1171_v21, %v1170_v17 }
 0x4c3   :  { %v1173_v24 = vrot.slane %v1172_v23, 2 }
 0x4c5   :  { %v1174_v22 = vadd.f32 %v1173_v24, %v1172_v23 }
 0x4c7   :  { %v1175_v25 = vrot.slane %v1174_v22, 1 }
 0x4c9   :  { %v1176_v27 = vadd.f32 %v1175_v25, %v1174_v22 }
 0x4cb   :  { %1193 = vmatmul.f32.vlgmr.msrb.gmra.mxu2 %v1176_v27 }
 0x54e   :  { %v1194_v28 = vpop.f32.mrf.mxu2 }
 0x54f   :  { %v1197_v29 = vmul.f32 0.0078125, %v1194_v28 }
 0x551   :  { %1649 = vmatmul.msk.f32.vlgmr.msra.gmra.mxu0 %vm173_vm0, %v1197_v29 }
 0x5ce   :  { %v1218_v30 = vpop.f32.mrf.mxu0 }
 0x5cf   :  { %v1221_v31 = vperm.slane %v1218_v30, 0 }
 0x5d1   :  { %v1222_v32 = vsub.f32 %v1168_v20, %v1221_v31  ;;  %v1223_v33 = vsub.f32 %v1169_v48, %v1221_v31 }
 0x5d3   :  { %v1224_v34 = vmul.f32 %v1222_v32, %v1222_v32  ;;  %v1225_v35 = vmul.f32 %v1223_v33, %v1223_v33 }
 0x5d5   :  { %v1226_v36 = vadd.f32 %v1225_v35, %v1224_v34 }
 0x5d7   :  { %v1227_v37 = vrot.slane %v1226_v36, 4 }
 0x5d9   :  { %v1228_v38 = vadd.f32 %v1227_v37, %v1226_v36 }
 0x5db   :  { %v1229_v41 = vrot.slane %v1228_v38, 2 }
 0x5dd   :  { %v1230_v42 = vadd.f32 %v1229_v41, %v1228_v38 }
 0x5df   :  { %v1231_v43 = vrot.slane %v1230_v42, 1 }
 0x5e1   :  { %v1232_v44 = vadd.f32 %v1231_v43, %v1230_v42 }
 0x5e3   :  { %1249 = vmatmul.f32.vlgmr.msra.gmra.mxu1 %v1232_v44 }
 0x660   :  { %v1250_v45 = vpop.f32.mrf.mxu1 }
 0x661   :  { %v1253_v46 = vmul.f32 0.0078125, %v1250_v45 }
 0x663   :  { %v1255_v47 = vadd.f32 1e-05, %v1253_v46 }
 0x665   :  { %1746 = vrsqrt.f32 %v1255_v47  ;;  %vm1262_vm5 = vweird.f32 %v1255_v47 }
 0x66b   :  { %v1747_v49 = vpop.eup %1746 }
 0x66c   :  { %v1257_v50 = vmul.f32 %v1747_v49, %v1255_v47  ;;  %vm1263_vm4 = vweird.f32 %v1747_v49 }
 0x66d   :  { %vm1264_vm6 = vmor %vm1262_vm5, %vm1263_vm4 }
 0x66e   :  { %v1258_v51 = vmul.f32 %v1747_v49, %v1257_v50 }
 0x670   :  { %v1259_v52 = vmul.f32 0.5, %v1258_v51 }
 0x672   :  { %v1260_v53 = vsub.f32 1.5, %v1259_v52 }
 0x674   :  { %v1261_v55 = vmul.f32 %v1747_v49, %v1260_v53 }
 0x676   :  { %v1265_v56 = vsel %vm1264_vm6, %v1747_v49, %v1261_v55 }
 0x677   :  { %v1266_v57 = vmul.f32 %v1265_v56, %v1254_v54 }
 0x679   :  { %v1268_v59 = vmul.f32 %v1266_v57, %v1197_v29  ;;  %1650 = vmatmul.msk.f32.vlgmr.msra.gmra.mxu2 %vm173_vm0, %v1266_v57 }
 0x67b   :  { %v1269_v39 = vsub.f32 %v1267_v58, %v1268_v59 }
 0x67d   :  { %1651 = vmatmul.msk.f32.vlgmr.msrb.gmra.mxu3 %vm173_vm0, %v1269_v39 }
 0x6fc   :  { %v1290_v40 = vpop.f32.mrf.mxu2 }
 0x6fd   :  { %v1316_v60 = vperm.slane %v1290_v40, 0 }
 0x6ff   :  { %v1317_v62 = vmul.f32 %v1316_v60, %v1168_v20  ;;  %v1318_v63 = vmul.f32 %v1316_v60, %v1169_v48 }
 0x700   :  { %v1313_v61 = vpop.f32.mrf.mxu3 }
 0x701   :  { %v1319_v8 = vperm.slane %v1313_v61, 0 }
 0x703   :  { %v1320_v9 = vadd.f32 %v1319_v8, %v1317_v62  ;;  %v1321_v1 = vadd.f32 %v1319_v8, %v1318_v63 }
 0x705   :  { %v1322_v2 = vmax.f32 %v1320_v9, 0.0  ;;  %v1323_v14 = vmax.f32 %v1321_v1, 0.0 }
 0x707   :  { %v1731_v16 = vpack.c.bf16 %v1323_v14, %v1322_v2 }
 0x709   :  { %1732 = vst [vmem:[%s2224_s13] sm:$0xff] %v1731_v16  }
 0x70a   :  { %1332 = vsyncpa [#allocation3], 1 }
 0x70b   :  { %1333 = vsyncpa [#allocation5], 1 }
 0x70c   :  { %1334 = vsyncpa [#allocation8], 1 }
 0x70d   :  { %1335 = vsyncpa [#allocation11], 1 }

// kernel: unet_forward.14
= control target key start
LH: loop header
LB: loop body
LE: loop exit
PB: predicated region body
PF: predicated region fallthrough
CT: control target
= control target key end

     0   :  { %18 = vsyncpa [#allocation3], 0  ;;  %s2386_s0 = inlined_call_operand.vmem [shape: bf16[32,128], index: 0, kind: input, shape index: {}]   ;;  %s2387_s1 = inlined_call_operand.vmem [shape: bf16[32,128], index: 1, kind: input, shape index: {}]   ;;  %s2388_s2 = inlined_call_operand.hbm [shape: bf16[32,32], index: 2, kind: input, shape index: {}]   ;;  %s2389_s3 = inlined_call_operand.vmem [shape: bf16[32,32], index: 3, kind: input, shape index: {}]   ;;  %s2390_s4 = inlined_call_operand.hbm [shape: bf16[3,128,128], index: 4, kind: input, shape index: {}]   ;;  %s2391_s5 = inlined_call_operand.hbm [shape: bf16[3,128,128], index: 5, kind: input, shape index: {}]   ;;  %s2392_s6 = inlined_call_operand.hbm [shape: bf16[3,128,128], index: 6, kind: input, shape index: {}]   ;;  %s2393_s7 = inlined_call_operand.vmem [shape: f32[128,8], index: 7, kind: input, shape index: {}]   ;;  %s2394_s8 = inlined_call_operand.vmem [shape: f32[8,128], index: 8, kind: input, shape index: {}]   ;;  %s2395_s9 = inlined_call_operand.vmem [shape: f32[1,8], index: 9, kind: input, shape index: {}, may-alias: {9,11}]   ;;  %s2396_s10 = inlined_call_operand.vmem [shape: f32[1,8], index: 10, kind: input, shape index: {}, may-alias: {10,12}]   ;;  %s2397_s11 = inlined_call_operand.vmem [shape: f32[1,8], index: 11, kind: input, shape index: {}, may-alias: {9,11}]   ;;  %s2398_s12 = inlined_call_operand.vmem [shape: f32[1,8], index: 12, kind: input, shape index: {}, may-alias: {10,12}]   ;;  %s2399_s13 = inlined_call_operand.vmem [shape: bf16[32,128], index: 13, kind: output, shape index: {}]  }
   0x1   :  { %19 = vsyncpa [#allocation5], 0 }
   0x2   :  { %20 = vsyncpa [#allocation8], 0  ;;  %s44_s27 = sshll.u32 %s2390_s4, 4  ;;  %s1988_s28 = smov [#allocation4]   ;;  %s45_s27 = int_to_ptr.hbm [resolvable:$true] %s44_s27 }
   0x3   :  { %s46_s29 = sshll.u32 %s1988_s28, 4  ;;  %s29_s15 = sshll.u32 %s2388_s2, 4  ;;  %s47_s29 = int_to_ptr.vmem [resolvable:$true] %s46_s29  ;;  %s30_s15 = int_to_ptr.hbm [resolvable:$true] %s29_s15 }
   0x4   :  { %s1989_s16 = smov 64   ;;  %s1990_s17 = smov 4  }
   0x5   :  { %52 = dma.hbm_to_vmem [thread:$0]  %s45_s27, 3072, %s47_s29, [#allocation5], %s1989_s16, %s1989_s16, %s1990_s17  }
   0x6   :  { %s1991_s18 = smov [#allocation2]   ;;  %s57_s22 = sshll.u32 %s2391_s5, 4  ;;  %s58_s22 = int_to_ptr.hbm [resolvable:$true] %s57_s22 }
   0x7   :  { %s31_s19 = sshll.u32 %s1991_s18, 4  ;;  %s70_s24 = sshll.u32 %s2392_s6, 4  ;;  %s32_s19 = int_to_ptr.vmem [resolvable:$true] %s31_s19  ;;  %s71_s24 = int_to_ptr.hbm [resolvable:$true] %s70_s24 }
   0x8   :  { %37 = dma.hbm_to_vmem [thread:$0]  %s30_s15, 256, %s32_s19, [#allocation3], %s1989_s16, %s1989_s16, %s1990_s17  }
   0x9   :  { %s1992_s25 = smov [#allocation6]   ;;  %s1993_s2 = smov [#allocation7]  }
   0xa   :  { %s59_s26 = sshll.u32 %s1992_s25, 4  ;;  %s72_s27 = sshll.u32 %s1993_s2, 4  ;;  %s60_s26 = int_to_ptr.vmem [resolvable:$true] %s59_s26  ;;  %s73_s27 = int_to_ptr.vmem [resolvable:$true] %s72_s27 }
   0xb   :  { %65 = dma.hbm_to_vmem [thread:$0]  %s58_s22, 3072, %s60_s26, [#allocation5], %s1989_s16, %s1989_s16, %s1990_s17  }
   0xc   :  { %78 = dma.hbm_to_vmem [thread:$0]  %s71_s24, 3072, %s73_s27, [#allocation8], %s1989_s16, %s1989_s16, %s1990_s17  }
   0xd   :  { %1982 = dma.done.wait [#allocation3], 256  }
   0xe   :  { %1983 = vsyncadd [#allocation3], 4294967040 }
   0xf   :  { %1984 = dma.done.wait [#allocation5], 6144  }
  0x10   :  { %1985 = vsyncadd [#allocation5], 4294961152 }
  0x11   :  { %1986 = dma.done.wait [#allocation8], 3072  }
  0x12   :  { %1987 = vsyncadd [#allocation8], 4294964224  ;;  %v1790_v0 = vld [vmem:[%s2386_s0 + $0x8] sm:$0xff]  ;;  %v1789_v2 = vld [vmem:[%s2386_s0] sm:$0xff]  ;;  %vm146_vm0 = vcmask 261120   ;;  %vm826_vm1 = vcmask 64512  }
  0x13   :  { %v1808_v1 = vld [vmem:[#allocation4 + $0x78] sm:$0xff]  ;;  %159 = vmatpush.bf16.msra.mxu0 %v1790_v0  ;;  %v1807_v3 = vld [vmem:[#allocation4 + $0x70] sm:$0xff]  ;;  %196 = vmatpush.bf16.msra.mxu1 %v1790_v0  ;;  %v1806_v6 = vld [vmem:[#allocation4 + $0x68] sm:$0xff] }
  0x14   :  { %292 = vmatpush.bf16.msra.mxu2 %v1808_v1  ;;  %v2085_v4 = vld [vmem:[%s2387_s1 + $0x8] sm:$0xff]  ;;  %v2087_v5 = vld [vmem:[#allocation2] sm:$0xff]  ;;  %v1805_v8 = vld [vmem:[#allocation4 + $0x60] sm:$0xff] }
  0x15   :  { %v2092_v7 = vld [vmem:[%s2389_s3] sm:$0xff]  ;;  %v1804_v9 = vld [vmem:[#allocation4 + $0x58] sm:$0xff]  ;;  %v1802_v13 = vld [vmem:[#allocation4 + $0x48] sm:$0xff] }
  0x16   :  { %v2102_v10 = vld [vmem:[%s2387_s1] sm:$0xff]  ;;  %v2105_v12 = vld [vmem:[#allocation2 + $0x8] sm:$0xff]  ;;  %v1801_v15 = vld [vmem:[#allocation4 + $0x40] sm:$0xff] }
  0x17   :  { %160 = vmatpush.bf16.msra.mxu0 %v1789_v2  ;;  %197 = vmatpush.bf16.msra.mxu1 %v1789_v2  ;;  %v1803_v11 = vld [vmem:[#allocation4 + $0x50] sm:$0xff]  ;;  %v2110_v14 = vld [vmem:[%s2389_s3 + $0x8] sm:$0xff]  ;;  %v1798_v20 = vld [vmem:[#allocation4 + $0x28] sm:$0xff] }
  0x18   :  { %293 = vmatpush.bf16.msra.mxu2 %v1807_v3  ;;  %v1800_v16 = vld [vmem:[#allocation4 + $0x38] sm:$0xff]  ;;  %v1799_v18 = vld [vmem:[#allocation4 + $0x30] sm:$0xff]  ;;  %v1814_v21 = vld [vmem:[#allocation4 + $0xa8] sm:$0xff] }
  0x19   :  { %v1816_v17 = vld [vmem:[#allocation4 + $0xb8] sm:$0xff]  ;;  %359 = vmatpush.bf16.msra.mxu3 %v1800_v16  ;;  %v1815_v19 = vld [vmem:[#allocation4 + $0xb0] sm:$0xff]  ;;  %v1797_v22 = vld [vmem:[#allocation4 + $0x20] sm:$0xff] }
  0x1a   :  { %1463 = vmatmul.msk.bf16.vlgmr.msra.gmra.mxu0 %vm146_vm0, %v2087_v5  ;;  %1473 = vmatmul.msk.bf16.vlgmr.msra.gmra.mxu1 %vm146_vm0, %v2092_v7  ;;  %v1796_v23 = vld [vmem:[#allocation4 + $0x18] sm:$0xff]  ;;  %v1795_v24 = vld [vmem:[#allocation4 + $0x10] sm:$0xff]  ;;  %v1813_v25 = vld [vmem:[#allocation4 + $0xa0] sm:$0xff] }
  0x1b   :  { %484 = vmatpush.bf16.msrb.mxu1 %v2085_v4  ;;  %443 = vmatpush.bf16.msrb.mxu0 %v1816_v17  ;;  %v1794_v26 = vld [vmem:[#allocation4 + $0x8] sm:$0xff]  ;;  %v1812_v27 = vld [vmem:[#allocation4 + $0x98] sm:$0xff]  ;;  %v1793_v28 = vld [vmem:[#allocation4] sm:$0xff] }
  0x1c   :  { %294 = vmatpush.bf16.msra.mxu2 %v1806_v6  ;;  %v1811_v29 = vld [vmem:[#allocation4 + $0x90] sm:$0xff]  ;;  %v1810_v30 = vld [vmem:[#allocation4 + $0x88] sm:$0xff]  ;;  %v1809_v31 = vld [vmem:[#allocation4 + $0x80] sm:$0xff] }
  0x1d   :  { %360 = vmatpush.bf16.msra.mxu3 %v1799_v18  ;;  %v1832_v32 = vld [vmem:[#allocation6 + $0x78] sm:$0xff]  ;;  %v1831_v33 = vld [vmem:[#allocation6 + $0x70] sm:$0xff]  ;;  %v1830_v35 = vld [vmem:[#allocation6 + $0x68] sm:$0xff] }
  0x1e   :  { %v1824_v34 = vld [vmem:[#allocation6 + $0x38] sm:$0xff]  ;;  %v1823_v36 = vld [vmem:[#allocation6 + $0x30] sm:$0xff]  ;;  %v1829_v37 = vld [vmem:[#allocation6 + $0x60] sm:$0xff] }
  0x1f   :  { %485 = vmatpush.bf16.msrb.mxu1 %v2102_v10  ;;  %444 = vmatpush.bf16.msrb.mxu0 %v1815_v19  ;;  %v1822_v38 = vld [vmem:[#allocation6 + $0x28] sm:$0xff]  ;;  %v1828_v39 = vld [vmem:[#allocation6 + $0x58] sm:$0xff]  ;;  %v1821_v41 = vld [vmem:[#allocation6 + $0x20] sm:$0xff] }
  0x20   :  { %295 = vmatpush.bf16.msra.mxu2 %v1805_v8  ;;  %v1827_v43 = vld [vmem:[#allocation6 + $0x50] sm:$0xff]  ;;  %v1820_v44 = vld [vmem:[#allocation6 + $0x18] sm:$0xff]  ;;  %v1826_v45 = vld [vmem:[#allocation6 + $0x48] sm:$0xff] }
  0x21   :  { %361 = vmatpush.bf16.msra.mxu3 %v1798_v20  ;;  %v1840_v46 = vld [vmem:[#allocation6 + $0xb8] sm:$0xff]  ;;  %v1819_v50 = vld [vmem:[#allocation6 + $0x10] sm:$0xff]  ;;  %v1825_v52 = vld [vmem:[#allocation6 + $0x40] sm:$0xff] }
  0x22   :  { %v1839_v53 = vld [vmem:[#allocation6 + $0xb0] sm:$0xff]  ;;  %v1818_v54 = vld [vmem:[#allocation6 + $0x8] sm:$0xff]  ;;  %v1817_v58 = vld [vmem:[#allocation6] sm:$0xff] }
  0x23   :  { %445 = vmatpush.bf16.msrb.mxu0 %v1814_v21  ;;  %752 = vmatpush.bf16.msra.mxu1 %v1840_v46  ;;  %v1838_v55 = vld [vmem:[#allocation6 + $0xa8] sm:$0xff]  ;;  %v1837_v59 = vld [vmem:[#allocation6 + $0xa0] sm:$0xff]  ;;  %v1836_v60 = vld [vmem:[#allocation6 + $0x98] sm:$0xff] }
  0x24   :  { %296 = vmatpush.bf16.msra.mxu2 %v1804_v9  ;;  %v1835_v1 = vld [vmem:[#allocation6 + $0x90] sm:$0xff]  ;;  %v1834_v3 = vld [vmem:[#allocation6 + $0x88] sm:$0xff]  ;;  %v1833_v8 = vld [vmem:[#allocation6 + $0x80] sm:$0xff] }
  0x25   :  { %362 = vmatpush.bf16.msra.mxu3 %v1797_v22 }
  0x27   :  { %446 = vmatpush.bf16.msrb.mxu0 %v1813_v25  ;;  %753 = vmatpush.bf16.msra.mxu1 %v1839_v53 }
  0x28   :  { %297 = vmatpush.bf16.msra.mxu2 %v1803_v11 }
  0x29   :  { %363 = vmatpush.bf16.msra.mxu3 %v1796_v23 }
  0x2a   :  { %1464 = vmatmul.msk.bf16.gmra.mxu0 %vm146_vm0, %v2105_v12  ;;  %1474 = vmatmul.msk.bf16.gmra.mxu1 %vm146_vm0, %v2110_v14 }
  0x2b   :  { %447 = vmatpush.bf16.msrb.mxu0 %v1812_v27  ;;  %754 = vmatpush.bf16.msra.mxu1 %v1838_v55 }
  0x2c   :  { %298 = vmatpush.bf16.msra.mxu2 %v1802_v13 }
  0x2d   :  { %364 = vmatpush.bf16.msra.mxu3 %v1795_v24 }
  0x2f   :  { %448 = vmatpush.bf16.msrb.mxu0 %v1811_v29  ;;  %755 = vmatpush.bf16.msra.mxu1 %v1837_v59 }
  0x30   :  { %299 = vmatpush.bf16.msra.mxu2 %v1801_v15 }
  0x31   :  { %365 = vmatpush.bf16.msra.mxu3 %v1794_v26 }
  0x33   :  { %300 = vmatmul.bf16.vlgmr.msra.gmra.mxu2 %v1789_v2  ;;  %449 = vmatpush.bf16.msrb.mxu0 %v1810_v30  ;;  %v2151_v30 = vld [vmem:[%s2393_s7 + $0x78] sm:$0xff] }
  0x34   :  { %505 = vmatpush.bf16.msrb.mxu2 %v2085_v4  ;;  %756 = vmatpush.bf16.msra.mxu1 %v1836_v60 }
  0x35   :  { %366 = vmatpush.bf16.msra.mxu3 %v1793_v28 }
  0x37   :  { %450 = vmatpush.bf16.msrb.mxu0 %v1809_v31 }
  0x38   :  { %506 = vmatpush.bf16.msrb.mxu2 %v2102_v10  ;;  %757 = vmatpush.bf16.msra.mxu1 %v1835_v1 }
  0x39   :  { %601 = vmatpush.bf16.msrb.mxu3 %v1832_v32  ;;  %v2160_v32 = vld [vmem:[%s2393_s7 + $0x70] sm:$0xff] }
  0x3a   :  { %1579 = vmatmul.msk.bf16.vlgmr.msrb.gmra.mxu1 %vm146_vm0, %v2087_v5 }
  0x3b   :  { %668 = vmatpush.bf16.msra.mxu0 %v1824_v34  ;;  %v2169_v34 = vld [vmem:[%s2393_s7 + $0x68] sm:$0xff] }
  0x3c   :  { %758 = vmatpush.bf16.msra.mxu1 %v1834_v3  ;;  %804 = vmatpush.msra.mxu2 %v2151_v30 }
  0x3d   :  { %602 = vmatpush.bf16.msrb.mxu3 %v1831_v33 }
  0x3e   :  { %805 = vmatpush.msra.mxu2 %v2160_v32 }
  0x3f   :  { %669 = vmatpush.bf16.msra.mxu0 %v1823_v36  ;;  %v2183_v36 = vld [vmem:[%s2393_s7 + $0x58] sm:$0xff] }
  0x40   :  { %759 = vmatpush.bf16.msra.mxu1 %v1833_v8  ;;  %806 = vmatpush.msra.mxu2 %v2169_v34 }
  0x41   :  { %603 = vmatpush.bf16.msrb.mxu3 %v1830_v35  ;;  %v2176_v35 = vld [vmem:[%s2393_s7 + $0x60] sm:$0xff] }
  0x42   :  { %807 = vmatpush.msra.mxu2 %v2176_v35 }
  0x43   :  { %305 = vmatmul.bf16.gmra.mxu2 %v1790_v0  ;;  %670 = vmatpush.bf16.msra.mxu0 %v1822_v38  ;;  %v2190_v38 = vld [vmem:[%s2393_s7 + $0x50] sm:$0xff] }
  0x44   :  { %808 = vmatpush.msra.mxu2 %v2183_v36 }
  0x45   :  { %604 = vmatpush.bf16.msrb.mxu3 %v1829_v37 }
  0x46   :  { %809 = vmatpush.msra.mxu2 %v2190_v38 }
  0x47   :  { %671 = vmatpush.bf16.msra.mxu0 %v1821_v41  ;;  %v2204_v41 = vld [vmem:[%s2393_s7 + $0x40] sm:$0xff] }
  0x49   :  { %605 = vmatpush.bf16.msrb.mxu3 %v1828_v39 }
  0x4a   :  { %1580 = vmatmul.msk.bf16.gmra.mxu1 %vm146_vm0, %v2105_v12 }
  0x4b   :  { %672 = vmatpush.bf16.msra.mxu0 %v1820_v44 }
  0x4d   :  { %606 = vmatpush.bf16.msrb.mxu3 %v1827_v43  ;;  %v2218_v43 = vld [vmem:[%s2393_s7 + $0x30] sm:$0xff] }
  0x4f   :  { %673 = vmatpush.bf16.msra.mxu0 %v1819_v50  ;;  %v2244_v50 = vld [vmem:[%s2393_s7 + $0x10] sm:$0xff] }
  0x51   :  { %607 = vmatpush.bf16.msrb.mxu3 %v1826_v45  ;;  %v2225_v45 = vld [vmem:[%s2393_s7 + $0x28] sm:$0xff] }
  0x53   :  { %1581 = vmatmul.msk.bf16.vlgmr.msrb.gmra.mxu2 %vm146_vm0, %v2092_v7  ;;  %674 = vmatpush.bf16.msra.mxu0 %v1818_v54 }
  0x55   :  { %608 = vmatpush.bf16.msrb.mxu3 %v1825_v52  ;;  %v2258_v52 = vld [vmem:[%s2393_s7] sm:$0xff] }
  0x57   :  { %675 = vmatpush.bf16.msra.mxu0 %v1817_v58 }
  0x63   :  { %1582 = vmatmul.msk.bf16.gmra.mxu2 %vm146_vm0, %v2110_v14 }
  0x97   :  { %v162_v40 = vpop.f32.mrf.mxu0  ;;  %v199_v42 = vpop.f32.mrf.mxu1 }
  0x9f   :  { %v164_v47 = vpop.f32.mrf.mxu0  ;;  %v201_v49 = vpop.f32.mrf.mxu1 }
  0xa0   :  { %v172_v48 = vpack.c.bf16 %v164_v47, %v162_v40  ;;  %v209_v51 = vpack.c.bf16 %v201_v49, %v199_v42  ;;  %v2197_v40 = vld [vmem:[%s2393_s7 + $0x48] sm:$0xff]  ;;  %v2211_v42 = vld [vmem:[%s2393_s7 + $0x38] sm:$0xff] }
  0xa1   :  { %810 = vmatpush.msra.mxu2 %v2197_v40  ;;  %v2239_v49 = vld [vmem:[%s2393_s7 + $0x18] sm:$0xff] }
  0xa2   :  { %367 = vmatmul.bf16.vlgmr.msra.gmra.mxu3 %v172_v48  ;;  %451 = vmatmul.bf16.vlgmr.msrb.gmra.mxu0 %v209_v51  ;;  %v2232_v48 = vld [vmem:[%s2393_s7 + $0x20] sm:$0xff]  ;;  %v2251_v51 = vld [vmem:[%s2393_s7 + $0x8] sm:$0xff] }
  0xa3   :  { %868 = vmatpush.msrb.mxu0 %v2151_v30  ;;  %811 = vmatpush.msra.mxu2 %v2204_v41 }
  0xa5   :  { %869 = vmatpush.msrb.mxu0 %v2160_v32  ;;  %812 = vmatpush.msra.mxu2 %v2211_v42 }
  0xa7   :  { %v167_v56 = vpop.f32.mrf.mxu0  ;;  %v204_v57 = vpop.f32.mrf.mxu1  ;;  %870 = vmatpush.msrb.mxu0 %v2169_v34  ;;  %813 = vmatpush.msra.mxu2 %v2218_v43 }
  0xa9   :  { %871 = vmatpush.msrb.mxu0 %v2176_v35  ;;  %814 = vmatpush.msra.mxu2 %v2225_v45 }
  0xab   :  { %872 = vmatpush.msrb.mxu0 %v2183_v36  ;;  %815 = vmatpush.msra.mxu2 %v2232_v48 }
  0xad   :  { %873 = vmatpush.msrb.mxu0 %v2190_v38  ;;  %816 = vmatpush.msra.mxu2 %v2239_v49 }
  0xaf   :  { %v169_v61 = vpop.f32.mrf.mxu0  ;;  %v206_v63 = vpop.f32.mrf.mxu1  ;;  %874 = vmatpush.msrb.mxu0 %v2197_v40  ;;  %817 = vmatpush.msra.mxu2 %v2244_v50 }
  0xb0   :  { %v173_v62 = vpack.c.bf16 %v169_v61, %v167_v56  ;;  %v210_v0 = vpack.c.bf16 %v206_v63, %v204_v57  ;;  %v2267_v56 = vld [vmem:[%s2394_s8] sm:$0xff] }
  0xb1   :  { %875 = vmatpush.msrb.mxu0 %v2204_v41  ;;  %818 = vmatpush.msra.mxu2 %v2251_v51 }
  0xb2   :  { %372 = vmatmul.bf16.gmra.mxu3 %v173_v62  ;;  %456 = vmatmul.bf16.gmra.mxu0 %v210_v0 }
  0xb3   :  { %876 = vmatpush.msrb.mxu0 %v2211_v42  ;;  %819 = vmatpush.msra.mxu2 %v2258_v52 }
  0xb4   :  { %845 = vmatpush.msra.mxu3 %v2267_v56  ;;  %923 = vmatpush.msrb.mxu1 %v2267_v56 }
  0xb5   :  { %877 = vmatpush.msrb.mxu0 %v2218_v43  ;;  %946 = vmatpush.msrb.mxu2 %v2267_v56 }
  0xb6   :  { %v2126_v2 = vpop.f32.mrf.mxu2 }
  0xb7   :  { %v487_v6 = vpop.f32.mrf.mxu1  ;;  %878 = vmatpush.msrb.mxu0 %v2225_v45 }
  0xb9   :  { %879 = vmatpush.msrb.mxu0 %v2232_v48 }
  0xbb   :  { %880 = vmatpush.msrb.mxu0 %v2239_v49 }
  0xbd   :  { %881 = vmatpush.msrb.mxu0 %v2244_v50 }
  0xbe   :  { %v2128_v9 = vpop.f32.mrf.mxu2 }
  0xbf   :  { %v489_v11 = vpop.f32.mrf.mxu1  ;;  %882 = vmatpush.msrb.mxu0 %v2251_v51 }
  0xc0   :  { %v497_v13 = vpack.c.bf16 %v489_v11, %v487_v6 }
  0xc1   :  { %883 = vmatpush.msrb.mxu0 %v2258_v52 }
  0xc2   :  { %609 = vmatmul.bf16.vlgmr.msrb.gmra.mxu3 %v2102_v10  ;;  %676 = vmatmul.bf16.vlgmr.msra.gmra.mxu0 %v497_v13 }
  0xc6   :  { %v2131_v15 = vpop.f32.mrf.mxu2 }
  0xc7   :  { %v492_v16 = vpop.f32.mrf.mxu1 }
  0xce   :  { %v2133_v17 = vpop.f32.mrf.mxu2 }
  0xcf   :  { %v494_v18 = vpop.f32.mrf.mxu1 }
  0xd0   :  { %v498_v19 = vpack.c.bf16 %v494_v18, %v492_v16 }
  0xd2   :  { %614 = vmatmul.bf16.gmra.mxu3 %v2085_v4  ;;  %681 = vmatmul.bf16.gmra.mxu0 %v498_v19 }
  0xd6   :  { %v508_v20 = vpop.f32.mrf.mxu2 }
  0xde   :  { %v510_v21 = vpop.f32.mrf.mxu2 }
  0xdf   :  { %v518_v22 = vpack.c.bf16 %v510_v21, %v508_v20 }
  0xe1   :  { %760 = vmatmul.bf16.vlgmr.msra.gmra.mxu1 %v518_v22 }
  0xe6   :  { %v513_v23 = vpop.f32.mrf.mxu2 }
  0xee   :  { %v515_v24 = vpop.f32.mrf.mxu2 }
  0xef   :  { %v519_v25 = vpack.c.bf16 %v515_v24, %v513_v23 }
  0xf1   :  { %765 = vmatmul.bf16.gmra.mxu1 %v519_v25 }
 0x11f   :  { %v2136_v10 = vpop.f32.mrf.mxu0 }
 0x125   :  { %v2138_v26 = vpop.f32.mrf.mxu3 }
 0x126   :  { %v369_v59 = vadd.f32 %v2138_v26, %v2126_v2 }
 0x127   :  { %v2140_v27 = vpop.f32.mrf.mxu0 }
 0x128   :  { %v462_v13 = vadd.f32 %v2136_v10, %v369_v59 }
 0x12d   :  { %v2142_v28 = vpop.f32.mrf.mxu3 }
 0x12e   :  { %v371_v57 = vadd.f32 %v2142_v28, %v2128_v9 }
 0x12f   :  { %v2144_v29 = vpop.f32.mrf.mxu0 }
 0x130   :  { %v463_v1 = vadd.f32 %v2140_v27, %v371_v57 }
 0x135   :  { %v2146_v4 = vpop.f32.mrf.mxu3 }
 0x136   :  { %v374_v61 = vadd.f32 %v2146_v4, %v2131_v15 }
 0x137   :  { %v2155_v31 = vpop.f32.mrf.mxu0 }
 0x138   :  { %v464_v9 = vadd.f32 %v2144_v29, %v374_v61 }
 0x13d   :  { %v2162_v33 = vpop.f32.mrf.mxu3 }
 0x13e   :  { %v376_v2 = vadd.f32 %v2162_v33, %v2133_v17 }
 0x13f   :  { %v677_v37 = vpop.f32.mrf.mxu0 }
 0x140   :  { %v465_v21 = vadd.f32 %v2155_v31, %v376_v2 }
 0x145   :  { %v610_v39 = vpop.f32.mrf.mxu3 }
 0x146   :  { %v678_v62 = vadd.f32 %v677_v37, %v610_v39 }
 0x147   :  { %v679_v44 = vpop.f32.mrf.mxu0 }
 0x14d   :  { %v612_v46 = vpop.f32.mrf.mxu3 }
 0x14e   :  { %v680_v58 = vadd.f32 %v679_v44, %v612_v46 }
 0x14f   :  { %v682_v55 = vpop.f32.mrf.mxu0 }
 0x155   :  { %v615_v54 = vpop.f32.mrf.mxu3 }
 0x156   :  { %v683_v63 = vadd.f32 %v682_v55, %v615_v54 }
 0x157   :  { %v684_v11 = vpop.f32.mrf.mxu0 }
 0x15d   :  { %v617_v8 = vpop.f32.mrf.mxu3 }
 0x15e   :  { %v761_v47 = vpop.f32.mrf.mxu1  ;;  %v685_v15 = vadd.f32 %v684_v11, %v617_v8  ;;  %v1856_v8 = vld [vmem:[#allocation7 + $0x78] sm:$0xff]  ;;  %v1855_v11 = vld [vmem:[#allocation7 + $0x70] sm:$0xff] }
 0x15f   :  { %v771_v3 = vadd.f32 %v761_v47, %v678_v62  ;;  %1090 = vmatpush.bf16.msra.mxu1 %v1856_v8 }
 0x161   :  { %v2285_v18 = vadd.f32 %v771_v3, %v462_v13 }
 0x163   :  { %1091 = vmatpush.bf16.msra.mxu1 %v1855_v11  ;;  %v1863_v11 = vld [vmem:[#allocation7 + $0xb0] sm:$0xff] }
 0x166   :  { %v763_v53 = vpop.f32.mrf.mxu1 }
 0x167   :  { %v772_v0 = vadd.f32 %v763_v53, %v680_v58 }
 0x169   :  { %v2283_v16 = vadd.f32 %v772_v0, %v463_v1 }
 0x16b   :  { %v779_v22 = vadd.f32 %v2283_v16, %v2285_v18 }
 0x16e   :  { %v766_v60 = vpop.f32.mrf.mxu1 }
 0x16f   :  { %v773_v6 = vadd.f32 %v766_v60, %v683_v63 }
 0x171   :  { %v2287_v19 = vadd.f32 %v773_v6, %v464_v9 }
 0x173   :  { %v780_v24 = vadd.f32 %v779_v22, %v2287_v19 }
 0x176   :  { %v768_v20 = vpop.f32.mrf.mxu1 }
 0x177   :  { %v774_v23 = vadd.f32 %v768_v20, %v685_v15  ;;  %v1854_v15 = vld [vmem:[#allocation7 + $0x68] sm:$0xff] }
 0x178   :  { %1092 = vmatpush.bf16.msra.mxu1 %v1854_v15 }
 0x179   :  { %v2293_v25 = vadd.f32 %v774_v23, %v465_v21 }
 0x17b   :  { %v781_v17 = vadd.f32 %v780_v24, %v2293_v25 }
 0x17d   :  { %v782_v10 = vrot.slane %v781_v17, 4 }
 0x17f   :  { %v783_v26 = vadd.f32 %v782_v10, %v781_v17  ;;  %v889_v17 = vld [vmem:[%s2395_s9] sm:$0x1] }
 0x181   :  { %v784_v27 = vrot.slane %v783_v26, 2 }
 0x183   :  { %v785_v28 = vadd.f32 %v784_v27, %v783_v26 }
 0x185   :  { %v786_v29 = vrot.slane %v785_v28, 1 }
 0x187   :  { %v787_v4 = vadd.f32 %v786_v29, %v785_v28  ;;  %v902_v28 = vld [vmem:[%s2396_s10] sm:$0x1] }
 0x189   :  { %820 = vmatmul.f32.vlgmr.msra.gmra.mxu2 %v787_v4 }
 0x20c   :  { %v821_v33 = vpop.f32.mrf.mxu2 }
 0x20d   :  { %v824_v31 = vmul.f32 0.001953125, %v821_v33  ;;  %v1853_v33 = vld [vmem:[#allocation7 + $0x60] sm:$0xff] }
 0x20e   :  { %1093 = vmatpush.bf16.msra.mxu1 %v1853_v33 }
 0x20f   :  { %1679 = vmatmul.msk.f32.vlgmr.msra.gmra.mxu3 %vm826_vm1, %v824_v31 }
 0x292   :  { %v847_v37 = vpop.f32.mrf.mxu3 }
 0x293   :  { %v850_v39 = vperm.slane %v847_v37, 0  ;;  %v1852_v37 = vld [vmem:[#allocation7 + $0x58] sm:$0xff] }
 0x294   :  { %1094 = vmatpush.bf16.msra.mxu1 %v1852_v37 }
 0x295   :  { %v851_v44 = vsub.f32 %v2285_v18, %v850_v39  ;;  %v852_v46 = vsub.f32 %v2283_v16, %v850_v39  ;;  %v853_v47 = vsub.f32 %v2287_v19, %v850_v39  ;;  %v854_v53 = vsub.f32 %v2293_v25, %v850_v39  ;;  %v1851_v39 = vld [vmem:[#allocation7 + $0x50] sm:$0xff] }
 0x297   :  { %v855_v54 = vmul.f32 %v851_v44, %v851_v44  ;;  %v856_v55 = vmul.f32 %v852_v46, %v852_v46  ;;  %v857_v57 = vmul.f32 %v853_v47, %v853_v47  ;;  %v858_v59 = vmul.f32 %v854_v53, %v854_v53  ;;  %v1850_v44 = vld [vmem:[#allocation7 + $0x48] sm:$0xff]  ;;  %v1849_v46 = vld [vmem:[#allocation7 + $0x40] sm:$0xff] }
 0x298   :  { %1095 = vmatpush.bf16.msra.mxu1 %v1851_v39 }
 0x299   :  { %v859_v58 = vadd.f32 %v856_v55, %v855_v54  ;;  %v1848_v55 = vld [vmem:[#allocation7 + $0x38] sm:$0xff] }
 0x29a   :  { %1157 = vmatpush.bf16.msra.mxu2 %v1848_v55 }
 0x29b   :  { %v860_v60 = vadd.f32 %v859_v58, %v857_v57 }
 0x29c   :  { %1096 = vmatpush.bf16.msra.mxu1 %v1850_v44 }
 0x29d   :  { %v861_v61 = vadd.f32 %v860_v60, %v858_v59 }
 0x29f   :  { %v862_v62 = vrot.slane %v861_v61, 4 }
 0x2a0   :  { %1097 = vmatpush.bf16.msra.mxu1 %v1849_v46 }
 0x2a1   :  { %v863_v63 = vadd.f32 %v862_v62, %v861_v61  ;;  %v1847_v61 = vld [vmem:[#allocation7 + $0x30] sm:$0xff] }
 0x2a2   :  { %1158 = vmatpush.bf16.msra.mxu2 %v1847_v61 }
 0x2a3   :  { %v864_v0 = vrot.slane %v863_v63, 2 }
 0x2a5   :  { %v865_v1 = vadd.f32 %v864_v0, %v863_v63 }
 0x2a7   :  { %v866_v3 = vrot.slane %v865_v1, 1 }
 0x2a9   :  { %v867_v6 = vadd.f32 %v866_v3, %v865_v1 }
 0x2ab   :  { %884 = vmatmul.f32.vlgmr.msrb.gmra.mxu0 %v867_v6 }
 0x328   :  { %v885_v13 = vpop.f32.mrf.mxu0 }
 0x329   :  { %v888_v9 = vmul.f32 0.001953125, %v885_v13  ;;  %v1862_v13 = vld [vmem:[#allocation7 + $0xa8] sm:$0xff] }
 0x32b   :  { %v890_v2 = vadd.f32 1e-05, %v888_v9  ;;  %v1861_v9 = vld [vmem:[#allocation7 + $0xa0] sm:$0xff] }
 0x32d   :  { %1882 = vrsqrt.f32 %v890_v2  ;;  %vm897_vm3 = vweird.f32 %v890_v2 }
 0x333   :  { %v1883_v20 = vpop.eup %1882 }
 0x334   :  { %v892_v21 = vmul.f32 %v1883_v20, %v890_v2  ;;  %vm898_vm2 = vweird.f32 %v1883_v20 }
 0x335   :  { %vm899_vm4 = vmor %vm897_vm3, %vm898_vm2 }
 0x336   :  { %v893_v22 = vmul.f32 %v1883_v20, %v892_v21 }
 0x338   :  { %v894_v23 = vmul.f32 0.5, %v893_v22 }
 0x33a   :  { %v895_v24 = vsub.f32 1.5, %v894_v23 }
 0x33c   :  { %v896_v10 = vmul.f32 %v1883_v20, %v895_v24 }
 0x33e   :  { %v900_v26 = vsel %vm899_vm4, %v1883_v20, %v896_v10 }
 0x33f   :  { %v901_v27 = vmul.f32 %v900_v26, %v889_v17 }
 0x341   :  { %v903_v29 = vmul.f32 %v901_v27, %v824_v31  ;;  %1680 = vmatmul.msk.f32.vlgmr.msrb.gmra.mxu1 %vm826_vm1, %v901_v27 }
 0x342   :  { %1335 = vmatpush.msrb.mxu1 %v2151_v30 }
 0x343   :  { %v904_v4 = vsub.f32 %v902_v28, %v903_v29 }
 0x344   :  { %1336 = vmatpush.msrb.mxu1 %v2160_v32 }
 0x345   :  { %1681 = vmatmul.msk.f32.vlgmr.msrb.gmra.mxu2 %vm826_vm1, %v904_v4 }
 0x346   :  { %1337 = vmatpush.msrb.mxu1 %v2169_v34 }
 0x348   :  { %1338 = vmatpush.msrb.mxu1 %v2176_v35 }
 0x34a   :  { %1339 = vmatpush.msrb.mxu1 %v2183_v36 }
 0x34c   :  { %1340 = vmatpush.msrb.mxu1 %v2190_v38 }
 0x34e   :  { %1341 = vmatpush.msrb.mxu1 %v2197_v40 }
 0x350   :  { %1342 = vmatpush.msrb.mxu1 %v2204_v41 }
 0x352   :  { %1343 = vmatpush.msrb.mxu1 %v2211_v42 }
 0x354   :  { %1344 = vmatpush.msrb.mxu1 %v2218_v43 }
 0x356   :  { %1345 = vmatpush.msrb.mxu1 %v2225_v45 }
 0x358   :  { %1346 = vmatpush.msrb.mxu1 %v2232_v48 }
 0x35a   :  { %1347 = vmatpush.msrb.mxu1 %v2239_v49 }
 0x35c   :  { %1348 = vmatpush.msrb.mxu1 %v2244_v50 }
 0x35e   :  { %1349 = vmatpush.msrb.mxu1 %v2251_v51 }
 0x360   :  { %1350 = vmatpush.msrb.mxu1 %v2258_v52 }
 0x3be   :  { %v925_v31 = vpop.f32.mrf.mxu1 }
 0x3bf   :  { %v951_v47 = vperm.slane %v925_v31, 0 }
 0x3c1   :  { %v952_v53 = vmul.f32 %v951_v47, %v2285_v18  ;;  %v953_v57 = vmul.f32 %v951_v47, %v2283_v16  ;;  %v954_v58 = vmul.f32 %v951_v47, %v2287_v19  ;;  %v955_v59 = vmul.f32 %v951_v47, %v2293_v25  ;;  %v1864_v25 = vld [vmem:[#allocation7 + $0xb8] sm:$0xff] }
 0x3c8   :  { %v948_v54 = vpop.f32.mrf.mxu2 }
 0x3c9   :  { %v956_v60 = vperm.slane %v948_v54, 0 }
 0x3cb   :  { %v957_v62 = vadd.f32 %v956_v60, %v952_v53  ;;  %v958_v63 = vadd.f32 %v956_v60, %v953_v57  ;;  %v959_v0 = vadd.f32 %v956_v60, %v954_v58  ;;  %v960_v1 = vadd.f32 %v956_v60, %v955_v59 }
 0x3cd   :  { %v961_v18 = vmax.f32 %v957_v62, 0.0  ;;  %v962_v3 = vmax.f32 %v958_v63, 0.0  ;;  %v963_v6 = vmax.f32 %v959_v0, 0.0  ;;  %v964_v8 = vmax.f32 %v960_v1, 0.0 }
 0x3cf   :  { %v966_v16 = vpack.c.bf16 %v964_v8, %v963_v6  ;;  %v965_v19 = vpack.c.bf16 %v962_v3, %v961_v18 }
 0x3d1   :  { %973 = vmatpush.bf16.msrb.mxu3 %v966_v16  ;;  %994 = vmatpush.bf16.msra.mxu0 %v966_v16 }
 0x3d2   :  { %1098 = vmatmul.bf16.vlgmr.msra.gmra.mxu1 %v965_v19 }
 0x3d5   :  { %974 = vmatpush.bf16.msrb.mxu3 %v965_v19  ;;  %995 = vmatpush.bf16.msra.mxu0 %v965_v19 }
 0x3d8   :  { %1682 = vmatmul.msk.bf16.vlgmr.msrb.gmra.mxu3 %vm146_vm0, %v2087_v5  ;;  %1684 = vmatmul.msk.bf16.vlgmr.msra.gmra.mxu0 %vm146_vm0, %v2092_v7  ;;  %v1846_v5 = vld [vmem:[#allocation7 + $0x28] sm:$0xff]  ;;  %v1860_v7 = vld [vmem:[#allocation7 + $0x98] sm:$0xff] }
 0x3d9   :  { %1241 = vmatpush.bf16.msra.mxu3 %v1864_v25  ;;  %1273 = vmatpush.msrb.mxu0 %v2151_v30  ;;  %v1844_v30 = vld [vmem:[#allocation7 + $0x18] sm:$0xff] }
 0x3da   :  { %1159 = vmatpush.bf16.msra.mxu2 %v1846_v5 }
 0x3db   :  { %1274 = vmatpush.msrb.mxu0 %v2160_v32  ;;  %v1858_v32 = vld [vmem:[#allocation7 + $0x88] sm:$0xff] }
 0x3dd   :  { %1242 = vmatpush.bf16.msra.mxu3 %v1863_v11  ;;  %1275 = vmatpush.msrb.mxu0 %v2169_v34  ;;  %v1843_v34 = vld [vmem:[#allocation7 + $0x10] sm:$0xff] }
 0x3df   :  { %1276 = vmatpush.msrb.mxu0 %v2176_v35  ;;  %v1857_v35 = vld [vmem:[#allocation7 + $0x80] sm:$0xff] }
 0x3e1   :  { %1243 = vmatpush.bf16.msra.mxu3 %v1862_v13  ;;  %1277 = vmatpush.msrb.mxu0 %v2183_v36  ;;  %v1842_v36 = vld [vmem:[#allocation7 + $0x8] sm:$0xff] }
 0x3e2   :  { %1103 = vmatmul.bf16.gmra.mxu1 %v966_v16 }
 0x3e3   :  { %1278 = vmatpush.msrb.mxu0 %v2190_v38  ;;  %v1841_v38 = vld [vmem:[#allocation7] sm:$0xff] }
 0x3e5   :  { %1244 = vmatpush.bf16.msra.mxu3 %v1861_v9  ;;  %1279 = vmatpush.msrb.mxu0 %v2197_v40 }
 0x3e7   :  { %1280 = vmatpush.msrb.mxu0 %v2204_v41 }
 0x3e8   :  { %1683 = vmatmul.msk.bf16.gmra.mxu3 %vm146_vm0, %v2105_v12  ;;  %1685 = vmatmul.msk.bf16.gmra.mxu0 %vm146_vm0, %v2110_v14  ;;  %v1845_v12 = vld [vmem:[#allocation7 + $0x20] sm:$0xff]  ;;  %v1859_v14 = vld [vmem:[#allocation7 + $0x90] sm:$0xff] }
 0x3e9   :  { %1281 = vmatpush.msrb.mxu0 %v2211_v42  ;;  %1245 = vmatpush.bf16.msra.mxu3 %v1860_v7 }
 0x3ea   :  { %1160 = vmatpush.bf16.msra.mxu2 %v1845_v12 }
 0x3eb   :  { %1282 = vmatpush.msrb.mxu0 %v2218_v43 }
 0x3ed   :  { %1283 = vmatpush.msrb.mxu0 %v2225_v45  ;;  %1246 = vmatpush.bf16.msra.mxu3 %v1859_v14 }
 0x3ee   :  { %1161 = vmatpush.bf16.msra.mxu2 %v1844_v30 }
 0x3ef   :  { %1284 = vmatpush.msrb.mxu0 %v2232_v48 }
 0x3f1   :  { %1285 = vmatpush.msrb.mxu0 %v2239_v49  ;;  %1247 = vmatpush.bf16.msra.mxu3 %v1858_v32 }
 0x3f2   :  { %1162 = vmatpush.bf16.msra.mxu2 %v1843_v34 }
 0x3f3   :  { %1286 = vmatpush.msrb.mxu0 %v2244_v50 }
 0x3f5   :  { %1287 = vmatpush.msrb.mxu0 %v2251_v51  ;;  %1248 = vmatpush.bf16.msra.mxu3 %v1857_v35 }
 0x3f6   :  { %1163 = vmatpush.bf16.msra.mxu2 %v1842_v36 }
 0x3f7   :  { %1288 = vmatpush.msrb.mxu0 %v2258_v52 }
 0x3f9   :  { %1312 = vmatpush.msra.mxu0 %v2267_v56 }
 0x3fa   :  { %1164 = vmatpush.bf16.msra.mxu2 %v1841_v38 }
 0x44f   :  { %v1099_v20 = vpop.f32.mrf.mxu1 }
 0x455   :  { %v997_v40 = vpop.f32.mrf.mxu0 }
 0x457   :  { %v1101_v23 = vpop.f32.mrf.mxu1 }
 0x45b   :  { %v976_v41 = vpop.f32.mrf.mxu3 }
 0x45d   :  { %v999_v42 = vpop.f32.mrf.mxu0 }
 0x45e   :  { %v1007_v43 = vpack.c.bf16 %v999_v42, %v997_v40 }
 0x45f   :  { %v1104_v10 = vpop.f32.mrf.mxu1 }
 0x460   :  { %1249 = vmatmul.bf16.vlgmr.msra.gmra.mxu3 %v1007_v43 }
 0x463   :  { %v978_v45 = vpop.f32.mrf.mxu3 }
 0x464   :  { %v986_v48 = vpack.c.bf16 %v978_v45, %v976_v41 }
 0x465   :  { %v1002_v49 = vpop.f32.mrf.mxu0 }
 0x466   :  { %1165 = vmatmul.bf16.vlgmr.msra.gmra.mxu2 %v986_v48 }
 0x467   :  { %v1106_v44 = vpop.f32.mrf.mxu1 }
 0x46b   :  { %v981_v50 = vpop.f32.mrf.mxu3 }
 0x46d   :  { %v1004_v51 = vpop.f32.mrf.mxu0 }
 0x46e   :  { %v1008_v52 = vpack.c.bf16 %v1004_v51, %v1002_v49  ;;  %v1356_v49 = vld [vmem:[%s2397_s11] sm:$0x1] }
 0x470   :  { %1254 = vmatmul.bf16.gmra.mxu3 %v1008_v52 }
 0x473   :  { %v983_v2 = vpop.f32.mrf.mxu3 }
 0x474   :  { %v987_v15 = vpack.c.bf16 %v983_v2, %v981_v50 }
 0x476   :  { %1170 = vmatmul.bf16.gmra.mxu2 %v987_v15  ;;  %v1369_v15 = vld [vmem:[%s2398_s12] sm:$0x1] }
 0x4e3   :  { %v1250_v21 = vpop.f32.mrf.mxu3 }
 0x4e9   :  { %v1166_v22 = vpop.f32.mrf.mxu2 }
 0x4ea   :  { %v1167_v29 = vadd.f32 %v1166_v22, %v1099_v20 }
 0x4eb   :  { %v1252_v24 = vpop.f32.mrf.mxu3 }
 0x4ec   :  { %v2356_v37 = vadd.f32 %v1250_v21, %v1167_v29 }
 0x4f1   :  { %v1168_v17 = vpop.f32.mrf.mxu2 }
 0x4f2   :  { %v1169_v28 = vadd.f32 %v1168_v17, %v1101_v23 }
 0x4f3   :  { %v1255_v26 = vpop.f32.mrf.mxu3 }
 0x4f4   :  { %v2354_v33 = vadd.f32 %v1252_v24, %v1169_v28 }
 0x4f6   :  { %v1264_v31 = vadd.f32 %v2354_v33, %v2356_v37 }
 0x4f9   :  { %v1171_v27 = vpop.f32.mrf.mxu2 }
 0x4fa   :  { %v1172_v4 = vadd.f32 %v1171_v27, %v1104_v10 }
 0x4fb   :  { %v1257_v53 = vpop.f32.mrf.mxu3 }
 0x4fc   :  { %v2358_v39 = vadd.f32 %v1255_v26, %v1172_v4 }
 0x4fe   :  { %v1265_v54 = vadd.f32 %v1264_v31, %v2358_v39 }
 0x501   :  { %v1173_v46 = vpop.f32.mrf.mxu2 }
 0x502   :  { %v1174_v47 = vadd.f32 %v1173_v46, %v1106_v44 }
 0x504   :  { %v1263_v55 = vadd.f32 %v1257_v53, %v1174_v47 }
 0x506   :  { %v1266_v57 = vadd.f32 %v1265_v54, %v1263_v55 }
 0x508   :  { %v1267_v58 = vrot.slane %v1266_v57, 4 }
 0x50a   :  { %v1268_v59 = vadd.f32 %v1267_v58, %v1266_v57 }
 0x50c   :  { %v1269_v60 = vrot.slane %v1268_v59, 2 }
 0x50e   :  { %v1270_v61 = vadd.f32 %v1269_v60, %v1268_v59 }
 0x510   :  { %v1271_v62 = vrot.slane %v1270_v61, 1 }
 0x512   :  { %v1272_v63 = vadd.f32 %v1271_v62, %v1270_v61 }
 0x514   :  { %1289 = vmatmul.f32.vlgmr.msrb.gmra.mxu0 %v1272_v63 }
 0x515   :  { %1390 = vmatpush.msrb.mxu0 %v2267_v56 }
 0x591   :  { %v1290_v0 = vpop.f32.mrf.mxu0 }
 0x592   :  { %v1293_v1 = vmul.f32 0.001953125, %v1290_v0 }
 0x594   :  { %1782 = vmatmul.msk.f32.vlgmr.msra.gmra.mxu0 %vm826_vm1, %v1293_v1 }
 0x595   :  { %1413 = vmatpush.msra.mxu0 %v2267_v56 }
 0x611   :  { %v1314_v18 = vpop.f32.mrf.mxu0 }
 0x612   :  { %v1317_v3 = vperm.slane %v1314_v18, 0 }
 0x614   :  { %v1318_v6 = vsub.f32 %v2356_v37, %v1317_v3  ;;  %v1319_v8 = vsub.f32 %v2354_v33, %v1317_v3  ;;  %v1320_v16 = vsub.f32 %v2358_v39, %v1317_v3  ;;  %v1321_v19 = vsub.f32 %v1263_v55, %v1317_v3 }
 0x616   :  { %v1322_v25 = vmul.f32 %v1318_v6, %v1318_v6  ;;  %v1323_v11 = vmul.f32 %v1319_v8, %v1319_v8  ;;  %v1324_v13 = vmul.f32 %v1320_v16, %v1320_v16  ;;  %v1325_v5 = vmul.f32 %v1321_v19, %v1321_v19 }
 0x618   :  { %v1326_v9 = vadd.f32 %v1323_v11, %v1322_v25 }
 0x61a   :  { %v1327_v7 = vadd.f32 %v1326_v9, %v1324_v13 }
 0x61c   :  { %v1328_v12 = vadd.f32 %v1327_v7, %v1325_v5 }
 0x61e   :  { %v1329_v14 = vrot.slane %v1328_v12, 4 }
 0x620   :  { %v1330_v30 = vadd.f32 %v1329_v14, %v1328_v12 }
 0x622   :  { %v1331_v32 = vrot.slane %v1330_v30, 2 }
 0x624   :  { %v1332_v56 = vadd.f32 %v1331_v32, %v1330_v30 }
 0x626   :  { %v1333_v34 = vrot.slane %v1332_v56, 1 }
 0x628   :  { %v1334_v35 = vadd.f32 %v1333_v34, %v1332_v56 }
 0x62a   :  { %1351 = vmatmul.f32.vlgmr.msrb.gmra.mxu1 %v1334_v35 }
 0x6a7   :  { %v1352_v36 = vpop.f32.mrf.mxu1 }
 0x6a8   :  { %v1355_v38 = vmul.f32 0.001953125, %v1352_v36 }
 0x6aa   :  { %v1357_v40 = vadd.f32 1e-05, %v1355_v38 }
 0x6ac   :  { %1884 = vrsqrt.f32 %v1357_v40  ;;  %vm1364_vm6 = vweird.f32 %v1357_v40 }
 0x6b2   :  { %v1885_v41 = vpop.eup %1884 }
 0x6b3   :  { %v1359_v42 = vmul.f32 %v1885_v41, %v1357_v40  ;;  %vm1365_vm5 = vweird.f32 %v1885_v41 }
 0x6b4   :  { %vm1366_vm7 = vmor %vm1364_vm6, %vm1365_vm5 }
 0x6b5   :  { %v1360_v43 = vmul.f32 %v1885_v41, %v1359_v42 }
 0x6b7   :  { %v1361_v45 = vmul.f32 0.5, %v1360_v43 }
 0x6b9   :  { %v1362_v48 = vsub.f32 1.5, %v1361_v45 }
 0x6bb   :  { %v1363_v50 = vmul.f32 %v1885_v41, %v1362_v48 }
 0x6bd   :  { %v1367_v51 = vsel %vm1366_vm7, %v1885_v41, %v1363_v50 }
 0x6be   :  { %v1368_v52 = vmul.f32 %v1367_v51, %v1356_v49 }
 0x6c0   :  { %1783 = vmatmul.msk.f32.vlgmr.msrb.gmra.mxu0 %vm826_vm1, %v1368_v52  ;;  %v1370_v2 = vmul.f32 %v1368_v52, %v1293_v1 }
 0x6c2   :  { %v1371_v20 = vsub.f32 %v1369_v15, %v1370_v2 }
 0x6c8   :  { %1784 = vmatmul.msk.f32.vlgmr.msra.gmra.mxu0 %vm826_vm1, %v1371_v20 }
 0x73d   :  { %v1392_v21 = vpop.f32.mrf.mxu0 }
 0x73e   :  { %v1418_v22 = vperm.slane %v1392_v21, 0 }
 0x740   :  { %v1419_v23 = vmul.f32 %v1418_v22, %v2356_v37  ;;  %v1420_v17 = vmul.f32 %v1418_v22, %v2354_v33  ;;  %v1421_v10 = vmul.f32 %v1418_v22, %v2358_v39  ;;  %v1422_v26 = vmul.f32 %v1418_v22, %v1263_v55 }
 0x745   :  { %v1415_v24 = vpop.f32.mrf.mxu0 }
 0x746   :  { %v1423_v27 = vperm.slane %v1415_v24, 0 }
 0x748   :  { %v1424_v28 = vadd.f32 %v1423_v27, %v1419_v23  ;;  %v1425_v29 = vadd.f32 %v1423_v27, %v1420_v17  ;;  %v1426_v4 = vadd.f32 %v1423_v27, %v1421_v10  ;;  %v1427_v44 = vadd.f32 %v1423_v27, %v1422_v26 }
 0x74a   :  { %v1428_v46 = vmax.f32 %v1424_v28, 0.0  ;;  %v1429_v31 = vmax.f32 %v1425_v29, 0.0  ;;  %v1430_v47 = vmax.f32 %v1426_v4, 0.0  ;;  %v1431_v53 = vmax.f32 %v1427_v44, 0.0 }
 0x74c   :  { %v1868_v54 = vpack.c.bf16 %v1429_v31, %v1428_v46  ;;  %v1873_v57 = vpack.c.bf16 %v1431_v53, %v1430_v47 }
 0x74e   :  { %1869 = vst [vmem:[%s2399_s13] sm:$0xff] %v1868_v54  }
 0x74f   :  { %1875 = vst [vmem:[%s2399_s13 + $0x8] sm:$0xff] %v1873_v57  }
 0x750   :  { %1444 = vsyncpa [#allocation3], 1 }
 0x751   :  { %1445 = vsyncpa [#allocation5], 1 }
 0x752   :  { %1446 = vsyncpa [#allocation8], 1 }

</bundles_post_ra>
